<compile_context>
chip_gen: v6e
topology: v6e:2x2x1
jax: 0.10.0
libtpu: 0.0.40
codegen_flags: <defaults>
</compile_context>

<pallas_src>
import jax
import jax.numpy as jnp
from jax.experimental import pallas as pl
from jax.experimental.pallas import tpu as pltpu

_SMEM_SPEC = pl.BlockSpec(memory_space=pltpu.MemorySpace.SMEM)


def _round_up(v, m):
    return ((v + m - 1) // m) * m


# ----------------------------- Pallas kernels -----------------------------

def _mm_bn_prelu_kernel(x_ref, w_ref, scale_ref, shift_ref, alpha_ref, o_ref):
    """o = prelu(x @ w * scale + shift, alpha); weight fully resident, f32 MXU accumulate."""
    acc = jnp.dot(x_ref[...], w_ref[...], preferred_element_type=jnp.float32)
    y = acc * scale_ref[...] + shift_ref[...]
    a = alpha_ref[0]
    o_ref[...] = jnp.where(y >= 0.0, y, a * y).astype(o_ref.dtype)


def _mm_bn_prelu_res_kernel(x_ref, w_ref, scale_ref, shift_ref, res_ref, alpha_ref, o_ref):
    """o = prelu(prelu(x @ w * scale + shift, a1) + residual, a2); residual streams in bf16."""
    acc = jnp.dot(x_ref[...], w_ref[...], preferred_element_type=jnp.float32)
    y = acc * scale_ref[...] + shift_ref[...]
    a1 = alpha_ref[0]
    y = jnp.where(y >= 0.0, y, a1 * y)
    y = y + res_ref[...].astype(jnp.float32)
    a2 = alpha_ref[1]
    o_ref[...] = jnp.where(y >= 0.0, y, a2 * y).astype(o_ref.dtype)


def matmul_bn_act(x, w, scale, shift, alpha, residual=None, alpha2=None):
    """Single-pass matmul with fused BN-affine / PReLU / (residual + PReLU) epilogue.

    x: (M, K) activations (bf16 on the MXU), w: (K, N) weights (held fully resident in
    VMEM), scale/shift: (N,) folded BN, residual: optional (M, N) bf16.
    Streams only the M axis; output is bf16 (M, N).
    """
    M, K = x.shape
    N = w.shape[1]

    # Full-extent K / N blocks (block == array dim) -> no channel padding / slicing passes.
    # tm rounded to the bf16 sublane quantum; the cap keeps the working set ~2 MB
    # (double-buffered x/res/out + resident weight) and gives >=2 grid blocks for large
    # layers so the v7x megacore can shard the "parallel" M axis.
    tm = min(_round_up(M, 16), 1024)
    Mp = _round_up(M, tm)

    xp = x.astype(jnp.bfloat16)
    if Mp != M:
        xp = jnp.pad(xp, ((0, Mp - M), (0, 0)))
    wp = w.astype(jnp.bfloat16)
    sp = scale.reshape(1, N).astype(jnp.float32)
    hp = shift.reshape(1, N).astype(jnp.float32)

    grid = (Mp // tm,)
    x_spec = pl.BlockSpec((tm, K), lambda i: (i, 0))
    w_spec = pl.BlockSpec((K, N), lambda i: (0, 0))     # constant index -> resident
    v_spec = pl.BlockSpec((1, N), lambda i: (0, 0))
    o_spec = pl.BlockSpec((tm, N), lambda i: (i, 0))
    cp = pltpu.CompilerParams(dimension_semantics=("parallel",))

    if residual is None:
        alphas = jnp.asarray(alpha, jnp.float32).reshape(1)
        out = pl.pallas_call(
            _mm_bn_prelu_kernel,
            out_shape=jax.ShapeDtypeStruct((Mp, N), jnp.bfloat16),
            grid=grid,
            in_specs=[x_spec, w_spec, v_spec, v_spec, _SMEM_SPEC],
            out_specs=o_spec,
            compiler_params=cp,
        )(xp, wp, sp, hp, alphas)
    else:
        rp = residual.astype(jnp.bfloat16)
        if Mp != M:
            rp = jnp.pad(rp, ((0, Mp - M), (0, 0)))
        alphas = jnp.stack([jnp.asarray(alpha, jnp.float32),
                            jnp.asarray(alpha2, jnp.float32)])
        out = pl.pallas_call(
            _mm_bn_prelu_res_kernel,
            out_shape=jax.ShapeDtypeStruct((Mp, N), jnp.bfloat16),
            grid=grid,
            in_specs=[x_spec, w_spec, v_spec, v_spec, o_spec, _SMEM_SPEC],
            out_specs=o_spec,
            compiler_params=cp,
        )(xp, wp, sp, hp, rp, alphas)
    return out[:M] if Mp != M else out


# ----------------------------- conv glue (im2col) -----------------------------

def _im2col(x, kh, kw, stride, padding, dilation):
    # TODO(synk): implicit GEMM (halo'd window DMA + per-tap accumulation inside the kernel)
    # would avoid materializing the kh*kw-replicated patches in HBM; kept as bf16 XLA glue.
    n, h, w, c = x.shape
    sh, sw = stride
    ph, pw = padding
    dh, dw = dilation
    xp = jnp.pad(x, ((0, 0), (ph, ph), (pw, pw), (0, 0)))
    hp, wp = h + 2 * ph, w + 2 * pw
    oh = (hp - dh * (kh - 1) - 1) // sh + 1
    ow = (wp - dw * (kw - 1) - 1) // sw + 1
    cols = []
    for i in range(kh):
        h0 = i * dh
        for j in range(kw):
            w0 = j * dw
            cols.append(xp[:, h0:h0 + sh * (oh - 1) + 1:sh,
                              w0:w0 + sw * (ow - 1) + 1:sw, :])
    patches = jnp.concatenate(cols, axis=-1)
    return patches.reshape(n * oh * ow, kh * kw * c), oh, ow


def conv2d(x, w_oihw, scale, shift, alpha,
           stride=(1, 1), padding=(0, 0), dilation=(1, 1),
           residual=None, alpha2=None):
    """Conv2d (bias=False) + folded BN + PReLU, optionally fused with residual-add + PReLU."""
    n = x.shape[0]
    o, i, kh, kw = w_oihw.shape
    if kh == 1 and kw == 1 and stride == (1, 1) and padding == (0, 0):
        oh, ow = x.shape[1], x.shape[2]
        patches = x.reshape(n * oh * ow, i)
    else:
        patches, oh, ow = _im2col(x, kh, kw, stride, padding, dilation)
    wm = jnp.transpose(w_oihw, (2, 3, 1, 0)).reshape(kh * kw * i, o)
    res2 = residual.reshape(n * oh * ow, o) if residual is not None else None
    y = matmul_bn_act(patches, wm, scale, shift, alpha, residual=res2, alpha2=alpha2)
    return y.reshape(n, oh, ow, o)


def conv_bn_prelu(x, p, stride=(1, 1), padding=(0, 0), dilation=(1, 1)):
    return conv2d(x, p['w'], p['scale'], p['shift'], p['alpha'],
                  stride=stride, padding=padding, dilation=dilation)


def conv_transpose2d_subpixel(x, w_t, scale, shift, alpha):
    """ConvTranspose2d(k=3, s=2, p=1, op=1, bias=False) via sub-pixel decomposition.

    out[n, 2i+dy, 2j+dx, o] is a small matmul over the 2x2 input neighborhood, so the 4x
    zero-inserted rows (wasted MXU FLOPs / HBM traffic) never exist.  One matmul produces
    all 4 sub-pixel phases as column blocks; the epilogue applies folded BN + PReLU (or
    the final relu / leaky-relu when alpha = 0.0 / 0.01).
    """
    n, h, w, c = x.shape
    i_c, o_c = w_t.shape[0], w_t.shape[1]

    def Wab(a, b):                       # flipped-kernel tap as (C_in, C_out)
        return w_t[:, :, 2 - a, 2 - b]

    Z = jnp.zeros((i_c, o_c), w_t.dtype)
    # rows: [x(i,j), x(i,j+1), x(i+1,j), x(i+1,j+1)]  cols: sub-pixel s = 2*dy + dx
    big_w = jnp.concatenate([
        jnp.concatenate([Wab(1, 1), Wab(1, 0), Wab(0, 1), Wab(0, 0)], axis=1),
        jnp.concatenate([Z,         Wab(1, 2), Z,         Wab(0, 2)], axis=1),
        jnp.concatenate([Z,         Z,         Wab(2, 1), Wab(2, 0)], axis=1),
        jnp.concatenate([Z,         Z,         Z,         Wab(2, 2)], axis=1),
    ], axis=0)                                               # (4*C_in, 4*C_out)

    xp = jnp.pad(x, ((0, 0), (0, 1), (0, 1), (0, 0)))
    patches = jnp.concatenate([
        xp[:, 0:h,     0:w,     :],
        xp[:, 0:h,     1:w + 1, :],
        xp[:, 1:h + 1, 0:w,     :],
        xp[:, 1:h + 1, 1:w + 1, :],
    ], axis=-1).reshape(n * h * w, 4 * c)

    scale4 = jnp.tile(scale.astype(jnp.float32), 4)
    shift4 = jnp.tile(shift.astype(jnp.float32), 4)
    y = matmul_bn_act(patches, big_w, scale4, shift4, alpha)
    y = y.reshape(n, h, w, 2, 2, o_c)                         # (.., dy, dx, o)
    # TODO(synk): place the 4 phases via an out BlockSpec so this relayout transpose disappears.
    y = jnp.transpose(y, (0, 1, 3, 2, 4, 5)).reshape(n, 2 * h, 2 * w, o_c)
    return y


# ----------------------------- pooling glue -----------------------------

def maxpool3x3_s2_p1(x):
    """MaxPool2d(kernel=3, stride=2, padding=1) with flat indices into input H*W (per n, c)."""
    n, h, w, c = x.shape
    oh = (h + 2 - 3) // 2 + 1
    ow = (w + 2 - 3) // 2 + 1
    neg = jnp.finfo(x.dtype).min
    xp = jnp.pad(x, ((0, 0), (1, 1), (1, 1), (0, 0)), constant_values=neg)
    rr = jnp.arange(-1, h + 1)
    cc = jnp.arange(-1, w + 1)
    flat = rr[:, None] * w + cc[None, :]
    vals, idxs = [], []
    for i in range(3):
        for j in range(3):
            v = xp[:, i:i + 2 * (oh - 1) + 1:2, j:j + 2 * (ow - 1) + 1:2, :]
            f = flat[i:i + 2 * (oh - 1) + 1:2, j:j + 2 * (ow - 1) + 1:2]
            vals.append(v)
            idxs.append(jnp.broadcast_to(f[None, :, :, None], v.shape).astype(jnp.int32))
    vals = jnp.stack(vals, axis=0)
    idxs = jnp.stack(idxs, axis=0)
    am = jnp.argmax(vals, axis=0)
    pooled = jnp.max(vals, axis=0)
    indices = jnp.take_along_axis(idxs, am[None], axis=0)[0]
    # Padded taps hold finfo.min so they never strictly win; clip guards the degenerate
    # all-equal case so unpool never scatters out of range (matches PyTorch in-range indices).
    indices = jnp.clip(indices, 0, h * w - 1)
    return pooled, indices


def max_unpool2x(x, indices, out_h, out_w):
    # TODO(synk): generic XLA scatter; a Pallas index-driven VMEM scatter would avoid the round trip.
    n, h, w, c = x.shape
    xf = x.reshape(n, h * w, c)
    idxf = indices.reshape(n, h * w, c)
    out = jnp.zeros((n, out_h * out_w, c), x.dtype)
    n_idx = jnp.arange(n)[:, None, None]
    c_idx = jnp.arange(c)[None, None, :]
    out = out.at[n_idx, idxf, c_idx].set(xf)
    return out.reshape(n, out_h, out_w, c)


# ----------------------------- parameter init -----------------------------

class KeyGen:
    def __init__(self, seed):
        self.key = jax.random.PRNGKey(seed)

    def __call__(self):
        self.key, sub = jax.random.split(self.key)
        return sub


_BN_EPS = 1e-5


def init_cbp(kg, out_c, in_c, kh, kw):
    fan_in = in_c * kh * kw
    w = jax.random.normal(kg(), (out_c, in_c, kh, kw), jnp.float32) / jnp.sqrt(fan_in)
    gamma = 1.0 + 0.1 * jax.random.normal(kg(), (out_c,), jnp.float32)
    beta = 0.05 * jax.random.normal(kg(), (out_c,), jnp.float32)
    scale = gamma / jnp.sqrt(1.0 + _BN_EPS)   # eval-mode BN fold (mean=0, var=1)
    shift = beta
    return {'w': w, 'scale': scale, 'shift': shift, 'alpha': jnp.float32(0.25)}


def init_initial_block(kg, in_c=3, out_c=16):
    fan_in = in_c * 9
    w = jax.random.normal(kg(), (out_c - 3, in_c, 3, 3), jnp.float32) / jnp.sqrt(fan_in)
    gamma = 1.0 + 0.1 * jax.random.normal(kg(), (out_c,), jnp.float32)
    beta = 0.05 * jax.random.normal(kg(), (out_c,), jnp.float32)
    return {'w': w,
            'bn_scale': gamma / jnp.sqrt(1.0 + _BN_EPS),
            'bn_shift': beta,
            'alpha': jnp.float32(0.25)}


def init_downsample(kg, in_c, out_c):
    internal = in_c // 4
    return {'c1': init_cbp(kg, internal, in_c, 2, 2),
            'c2': init_cbp(kg, internal, internal, 3, 3),
            'c3': init_cbp(kg, out_c, internal, 1, 1),
            'out_alpha': jnp.float32(0.25)}


def init_regular(kg, channels, kernel_size=3, asymmetric=False):
    internal = channels // 4
    p = {'c1': init_cbp(kg, internal, channels, 1, 1),
         'c3': init_cbp(kg, channels, internal, 1, 1),
         'out_alpha': jnp.float32(0.25)}
    if asymmetric:
        p['c2a'] = init_cbp(kg, internal, internal, kernel_size, 1)
        p['c2b'] = init_cbp(kg, internal, internal, 1, kernel_size)
    else:
        p['c2'] = init_cbp(kg, internal, internal, kernel_size, kernel_size)
    return p


def init_upsample(kg, in_c, out_c):
    internal = in_c // 4
    gamma = 1.0 + 0.1 * jax.random.normal(kg(), (internal,), jnp.float32)
    beta = 0.05 * jax.random.normal(kg(), (internal,), jnp.float32)
    return {'main_c1': init_cbp(kg, out_c, in_c, 1, 1),
            'e1': init_cbp(kg, internal, in_c, 1, 1),
            'e2_w': jax.random.normal(kg(), (internal, internal, 3, 3), jnp.float32)
                    / jnp.sqrt(internal * 9.0),
            'e2_scale': gamma / jnp.sqrt(1.0 + _BN_EPS),
            'e2_shift': beta,
            'e2_alpha': jnp.float32(0.25),
            'e3': init_cbp(kg, out_c, internal, 1, 1),
            'out_alpha': jnp.float32(0.25)}


def init_lanenet(seed=0):
    kg = KeyGen(seed)
    P = {'initial': init_initial_block(kg, 3, 16),
         'down1_0': init_downsample(kg, 16, 64)}
    for name in ['reg1_1', 'reg1_2', 'reg1_3', 'reg1_4']:
        P[name] = init_regular(kg, 64)
    P['down2_0'] = init_downsample(kg, 64, 128)
    P['reg2_1'] = init_regular(kg, 128)
    P['dil2_2'] = init_regular(kg, 128)
    P['asym2_3'] = init_regular(kg, 128, kernel_size=5, asymmetric=True)
    P['dil2_4'] = init_regular(kg, 128)
    P['reg2_5'] = init_regular(kg, 128)
    P['dil2_6'] = init_regular(kg, 128)
    P['asym2_7'] = init_regular(kg, 128, kernel_size=5, asymmetric=True)
    P['dil2_8'] = init_regular(kg, 128)
    for head in ['seg', 'clu']:
        P[f'{head}3_0'] = init_regular(kg, 128)
        P[f'{head}3_1'] = init_regular(kg, 128)
        P[f'{head}3_2'] = init_regular(kg, 128, kernel_size=5, asymmetric=True)
        P[f'{head}3_3'] = init_regular(kg, 128)
        P[f'{head}3_4'] = init_regular(kg, 128)
        P[f'{head}3_5'] = init_regular(kg, 128)
        P[f'{head}3_6'] = init_regular(kg, 128, kernel_size=5, asymmetric=True)
        P[f'{head}3_7'] = init_regular(kg, 128)
        P[f'{head}_up4_0'] = init_upsample(kg, 128, 64)
        P[f'{head}4_1'] = init_regular(kg, 64)
        P[f'{head}4_2'] = init_regular(kg, 64)
        P[f'{head}_up5_0'] = init_upsample(kg, 64, 16)
        P[f'{head}5_1'] = init_regular(kg, 16)
    P['seg_tconv'] = jax.random.normal(kg(), (16, 2, 3, 3), jnp.float32) / jnp.sqrt(16 * 9.0)
    P['clu_tconv'] = jax.random.normal(kg(), (16, 3, 3, 3), jnp.float32) / jnp.sqrt(16 * 9.0)
    return P


# ----------------------------- blocks -----------------------------

def initial_block(p, x):
    o_conv = p['w'].shape[0]                                  # 13 conv channels
    # BN + PReLU for the conv channels are fused into the matmul epilogue.
    main = conv2d(x, p['w'], p['bn_scale'][:o_conv], p['bn_shift'][:o_conv], p['alpha'],
                  stride=(2, 2), padding=(1, 1))
    ext, _ = maxpool3x3_s2_p1(x)
    # 3-channel pooled branch: BN affine + PReLU in plain jnp (XLA fuses it into the
    # concat); a dedicated Pallas kernel at c=3 would be <3%-lane-utilization masked stores.
    y = ext.astype(jnp.float32) * p['bn_scale'][o_conv:] + p['bn_shift'][o_conv:]
    y = jnp.where(y >= 0.0, y, p['alpha'] * y)
    return jnp.concatenate([main, y.astype(jnp.bfloat16)], axis=-1)


def downsample_bottleneck(p, x, out_c):
    main, indices = maxpool3x3_s2_p1(x)
    in_c = main.shape[-1]
    main = jnp.pad(main, ((0, 0), (0, 0), (0, 0), (0, out_c - in_c)))
    ext = conv_bn_prelu(x, p['c1'], stride=(2, 2))
    ext = conv_bn_prelu(ext, p['c2'], padding=(1, 1))
    out = conv2d(ext, p['c3']['w'], p['c3']['scale'], p['c3']['shift'], p['c3']['alpha'],
                 residual=main, alpha2=p['out_alpha'])
    return out, indices


def regular_bottleneck(p, x, kernel_size=3, padding=0, dilation=1, asymmetric=False):
    ext = conv_bn_prelu(x, p['c1'])
    if asymmetric:
        ext = conv_bn_prelu(ext, p['c2a'], padding=(padding, 0), dilation=(dilation, dilation))
        ext = conv_bn_prelu(ext, p['c2b'], padding=(0, padding), dilation=(dilation, dilation))
    else:
        ext = conv_bn_prelu(ext, p['c2'], padding=(padding, padding),
                            dilation=(dilation, dilation))
    # c3 conv + BN + PReLU + residual add + out PReLU all fused in one matmul epilogue.
    return conv2d(ext, p['c3']['w'], p['c3']['scale'], p['c3']['shift'], p['c3']['alpha'],
                  residual=x, alpha2=p['out_alpha'])


def upsample_bottleneck(p, x, indices):
    n, h, w, _ = x.shape
    main = conv_bn_prelu(x, p['main_c1'])
    main = max_unpool2x(main, indices, 2 * h, 2 * w)
    ext = conv_bn_prelu(x, p['e1'])
    ext = conv_transpose2d_subpixel(ext, p['e2_w'], p['e2_scale'], p['e2_shift'],
                                    p['e2_alpha'])
    return conv2d(ext, p['e3']['w'], p['e3']['scale'], p['e3']['shift'], p['e3']['alpha'],
                  residual=main, alpha2=p['out_alpha'])


def conv_transpose_final(x, w_t, act_slope):
    """Final ConvTranspose2d (bias=False) with the trailing relu / leaky_relu fused as the
    PReLU epilogue of the matmul (slope 0.0 == relu, 0.01 == default leaky_relu)."""
    o = w_t.shape[1]
    return conv_transpose2d_subpixel(x, w_t, jnp.ones((o,), jnp.float32),
                                     jnp.zeros((o,), jnp.float32), act_slope)


# ----------------------------- LaneNet forward -----------------------------

def lanenet_forward(P, x_nchw):
    # NHWC + bf16 activations throughout; f32 only inside the MXU accumulate and epilogue.
    x = jnp.transpose(x_nchw, (0, 2, 3, 1)).astype(jnp.bfloat16)
    x = initial_block(P['initial'], x)
    x, idx1_0 = downsample_bottleneck(P['down1_0'], x, 64)
    x = regular_bottleneck(P['reg1_1'], x, padding=1)
    x = regular_bottleneck(P['reg1_2'], x, padding=1)
    x = regular_bottleneck(P['reg1_3'], x, padding=1)
    x = regular_bottleneck(P['reg1_4'], x, padding=1)
    x, idx2_0 = downsample_bottleneck(P['down2_0'], x, 128)
    x = regular_bottleneck(P['reg2_1'], x, padding=1)
    x = regular_bottleneck(P['dil2_2'], x, dilation=2, padding=2)
    x = regular_bottleneck(P['asym2_3'], x, kernel_size=5, padding=2, asymmetric=True)
    x = regular_bottleneck(P['dil2_4'], x, dilation=4, padding=4)
    x = regular_bottleneck(P['reg2_5'], x, padding=1)
    x = regular_bottleneck(P['dil2_6'], x, dilation=8, padding=8)
    x = regular_bottleneck(P['asym2_7'], x, kernel_size=5, padding=2, asymmetric=True)
    x = regular_bottleneck(P['dil2_8'], x, dilation=16, padding=16)

    # TODO(synk): seg3_0/clu3_0 share the same input; packing their weights along N would
    # reach 256-wide MXU tiles on v6e/v7x.
    def stage3(head, h):
        h = regular_bottleneck(P[f'{head}3_0'], h, padding=1)
        h = regular_bottleneck(P[f'{head}3_1'], h, dilation=2, padding=2)
        h = regular_bottleneck(P[f'{head}3_2'], h, kernel_size=5, padding=2, asymmetric=True)
        h = regular_bottleneck(P[f'{head}3_3'], h, dilation=4, padding=4)
        h = regular_bottleneck(P[f'{head}3_4'], h, padding=1)
        h = regular_bottleneck(P[f'{head}3_5'], h, dilation=8, padding=8)
        h = regular_bottleneck(P[f'{head}3_6'], h, kernel_size=5, padding=2, asymmetric=True)
        h = regular_bottleneck(P[f'{head}3_7'], h, dilation=16, padding=16)
        return h

    seg = stage3('seg', x)
    clu = stage3('clu', x)

    seg = upsample_bottleneck(P['seg_up4_0'], seg, idx2_0)
    seg = regular_bottleneck(P['seg4_1'], seg, padding=1)
    seg = regular_bottleneck(P['seg4_2'], seg, padding=1)
    clu = upsample_bottleneck(P['clu_up4_0'], clu, idx2_0)
    clu = regular_bottleneck(P['clu4_1'], clu, padding=1)
    clu = regular_bottleneck(P['clu4_2'], clu, padding=1)

    seg = upsample_bottleneck(P['seg_up5_0'], seg, idx1_0)
    seg = regular_bottleneck(P['seg5_1'], seg, padding=1)
    binary_seg = conv_transpose_final(seg, P['seg_tconv'], 0.01)   # F.leaky_relu fused
    clu = upsample_bottleneck(P['clu_up5_0'], clu, idx1_0)
    clu = regular_bottleneck(P['clu5_1'], clu, padding=1)
    pix_embedding = conv_transpose_final(clu, P['clu_tconv'], 0.0)  # F.relu fused

    zero = jnp.float32(0.0)
    cluster_loss = zero * 1.0 + zero * 1.0 + zero * 0.001
    seg_loss = zero
    total_loss = cluster_loss + seg_loss
    return {
        'pix_embedding': jnp.transpose(pix_embedding, (0, 3, 1, 2)).astype(jnp.float32),
        'binary_seg': jnp.transpose(binary_seg, (0, 3, 1, 2)).astype(jnp.float32),
        'cluster_loss': cluster_loss,
        'seg_loss': seg_loss,
        'total_loss': total_loss,
    }


# ----------------------------- main -----------------------------

if __name__ == "__main__":
    params = init_lanenet(seed=0)
    key = jax.random.PRNGKey(0)
    x = jax.random.normal(key, (2, 3, 16, 16), jnp.float32)  # NCHW, like PyTorch

    fwd = jax.jit(lanenet_forward)
    out = fwd(params, x)
    out = jax.block_until_ready(out)

    assert out['pix_embedding'].shape == (2, 3, 16, 16)
    assert out['binary_seg'].shape == (2, 2, 16, 16)
    assert bool(jnp.isfinite(out['pix_embedding']).all())
    assert bool(jnp.isfinite(out['binary_seg']).all())
    print("KERNEL_OK")
</pallas_src>

<mosaic_0001>
module attributes {stable_mosaic.version = 11 : i64} {
  func.func @_mm_bn_prelu_kernel(%arg0: i32, %arg1: memref<128x27xbf16, #tpu.memory_space<vmem>>, %arg2: memref<27x13xbf16, #tpu.memory_space<vmem>>, %arg3: memref<1x13xf32, #tpu.memory_space<vmem>>, %arg4: memref<1x13xf32, #tpu.memory_space<vmem>>, %arg5: memref<1xf32, #tpu.memory_space<smem>>, %arg6: memref<128x13xbf16, #tpu.memory_space<vmem>>) attributes {dimension_semantics = [#tpu.dimension_semantics<parallel>], iteration_bounds = array<i64: 1>, scalar_prefetch = 0 : i64, scratch_operands = 0 : i64, tpu.core_type = #tpu.core_type<tc>, window_params = [{transform_indices = @transform_0, window_bounds = array<i64: 128, 27>}, {pipeline_mode = #tpu.pipeline_mode<synchronous>, transform_indices = @transform_1, window_bounds = array<i64: 27, 13>}, {pipeline_mode = #tpu.pipeline_mode<synchronous>, transform_indices = @transform_2, window_bounds = array<i64: 1, 13>}, {pipeline_mode = #tpu.pipeline_mode<synchronous>, transform_indices = @transform_3, window_bounds = array<i64: 1, 13>}, {transform_indices = @transform_4, window_bounds = array<i64: 1>}, {transform_indices = @transform_5, window_bounds = array<i64: 128, 13>}]} {
    %c0 = arith.constant 0 : index
    %c0_0 = arith.constant 0 : index
    %0 = vector.load %arg1[%c0, %c0_0] : memref<128x27xbf16, #tpu.memory_space<vmem>>, vector<128x27xbf16>
    %c0_1 = arith.constant 0 : index
    %c0_2 = arith.constant 0 : index
    %1 = vector.load %arg2[%c0_1, %c0_2] : memref<27x13xbf16, #tpu.memory_space<vmem>>, vector<27x13xbf16>
    %cst = arith.constant dense<0.000000e+00> : vector<128x13xf32>
    %2 = tpu.matmul %0, %1, %cst {dimension_numbers = #tpu.dot_dimension_numbers<[1], [0], [0], [1], [0, 0, 1, 1], [], []>} : vector<128x27xbf16>, vector<27x13xbf16>, vector<128x13xf32> -> vector<128x13xf32>
    %c0_3 = arith.constant 0 : index
    %c0_4 = arith.constant 0 : index
    %3 = vector.load %arg3[%c0_3, %c0_4] : memref<1x13xf32, #tpu.memory_space<vmem>>, vector<1x13xf32>
    %4 = vector.broadcast %3 : vector<1x13xf32> to vector<128x13xf32>
    %5 = arith.mulf %2, %4 : vector<128x13xf32>
    %c0_5 = arith.constant 0 : index
    %c0_6 = arith.constant 0 : index
    %6 = vector.load %arg4[%c0_5, %c0_6] : memref<1x13xf32, #tpu.memory_space<vmem>>, vector<1x13xf32>
    %7 = vector.broadcast %6 : vector<1x13xf32> to vector<128x13xf32>
    %8 = arith.addf %5, %7 : vector<128x13xf32>
    %c0_7 = arith.constant 0 : index
    %9 = memref.load %arg5[%c0_7] : memref<1xf32, #tpu.memory_space<smem>>
    %cst_8 = arith.constant 0.000000e+00 : f32
    %10 = vector.broadcast %cst_8 : f32 to vector<128x13xf32>
    %11 = arith.cmpf oge, %8, %10 : vector<128x13xf32>
    %12 = vector.broadcast %9 : f32 to vector<128x13xf32>
    %13 = arith.mulf %12, %8 : vector<128x13xf32>
    %14 = arith.select %11, %8, %13 : vector<128x13xi1>, vector<128x13xf32>
    %15 = arith.truncf %14 : vector<128x13xf32> to vector<128x13xbf16>
    %c0_9 = arith.constant 0 : index
    %c0_10 = arith.constant 0 : index
    %16 = vector.load %arg6[%c0_9, %c0_10] : memref<128x13xbf16, #tpu.memory_space<vmem>>, vector<128x13xbf16>
    tpu.vector_store %arg6[%c0_9, %c0_10], %15 {strides = array<i32>} : memref<128x13xbf16, #tpu.memory_space<vmem>>, vector<128x13xbf16>,
    return
  }
  func.func @transform_0(%arg0: i32) -> (i32, i32) {
    %c0_i32 = arith.constant 0 : i32
    %c0_i32_0 = arith.constant 0 : i32
    return %arg0, %c0_i32 : i32, i32
  }
  func.func @transform_1(%arg0: i32) -> (i32, i32) {
    %c0_i32 = arith.constant 0 : i32
    %c0_i32_0 = arith.constant 0 : i32
    %c0_i32_1 = arith.constant 0 : i32
    return %c0_i32, %c0_i32_0 : i32, i32
  }
  func.func @transform_2(%arg0: i32) -> (i32, i32) {
    %c0_i32 = arith.constant 0 : i32
    %c0_i32_0 = arith.constant 0 : i32
    %c0_i32_1 = arith.constant 0 : i32
    return %c0_i32, %c0_i32_0 : i32, i32
  }
  func.func @transform_3(%arg0: i32) -> (i32, i32) {
    %c0_i32 = arith.constant 0 : i32
    %c0_i32_0 = arith.constant 0 : i32
    %c0_i32_1 = arith.constant 0 : i32
    return %c0_i32, %c0_i32_0 : i32, i32
  }
  func.func @transform_4(%arg0: i32) -> i32 {
    %c0_i32 = arith.constant 0 : i32
    %c0_i32_0 = arith.constant 0 : i32
    return %c0_i32 : i32
  }
  func.func @transform_5(%arg0: i32) -> (i32, i32) {
    %c0_i32 = arith.constant 0 : i32
    %c0_i32_0 = arith.constant 0 : i32
    return %arg0, %c0_i32 : i32, i32
  }
}

module attributes {stable_mosaic.version = 11 : i64} {
  func.func @_mm_bn_prelu_kernel(%arg0: i32, %arg1: memref<32x64xbf16, #tpu.memory_space<vmem>>, %arg2: memref<64x4xbf16, #tpu.memory_space<vmem>>, %arg3: memref<1x4xf32, #tpu.memory_space<vmem>>, %arg4: memref<1x4xf32, #tpu.memory_space<vmem>>, %arg5: memref<1xf32, #tpu.memory_space<smem>>, %arg6: memref<32x4xbf16, #tpu.memory_space<vmem>>) attributes {dimension_semantics = [#tpu.dimension_semantics<parallel>], iteration_bounds = array<i64: 1>, scalar_prefetch = 0 : i64, scratch_operands = 0 : i64, tpu.core_type = #tpu.core_type<tc>, window_params = [{transform_indices = @transform_0, window_bounds = array<i64: 32, 64>}, {pipeline_mode = #tpu.pipeline_mode<synchronous>, transform_indices = @transform_1, window_bounds = array<i64: 64, 4>}, {pipeline_mode = #tpu.pipeline_mode<synchronous>, transform_indices = @transform_2, window_bounds = array<i64: 1, 4>}, {pipeline_mode = #tpu.pipeline_mode<synchronous>, transform_indices = @transform_3, window_bounds = array<i64: 1, 4>}, {transform_indices = @transform_4, window_bounds = array<i64: 1>}, {transform_indices = @transform_5, window_bounds = array<i64: 32, 4>}]} {
    %c0 = arith.constant 0 : index
    %c0_0 = arith.constant 0 : index
    %0 = vector.load %arg1[%c0, %c0_0] : memref<32x64xbf16, #tpu.memory_space<vmem>>, vector<32x64xbf16>
    %c0_1 = arith.constant 0 : index
    %c0_2 = arith.constant 0 : index
    %1 = vector.load %arg2[%c0_1, %c0_2] : memref<64x4xbf16, #tpu.memory_space<vmem>>, vector<64x4xbf16>
    %cst = arith.constant dense<0.000000e+00> : vector<32x4xf32>
    %2 = tpu.matmul %0, %1, %cst {dimension_numbers = #tpu.dot_dimension_numbers<[1], [0], [0], [1], [0, 0, 1, 1], [], []>} : vector<32x64xbf16>, vector<64x4xbf16>, vector<32x4xf32> -> vector<32x4xf32>
    %c0_3 = arith.constant 0 : index
    %c0_4 = arith.constant 0 : index
    %3 = vector.load %arg3[%c0_3, %c0_4] : memref<1x4xf32, #tpu.memory_space<vmem>>, vector<1x4xf32>
    %4 = vector.broadcast %3 : vector<1x4xf32> to vector<32x4xf32>
    %5 = arith.mulf %2, %4 : vector<32x4xf32>
    %c0_5 = arith.constant 0 : index
    %c0_6 = arith.constant 0 : index
    %6 = vector.load %arg4[%c0_5, %c0_6] : memref<1x4xf32, #tpu.memory_space<vmem>>, vector<1x4xf32>
    %7 = vector.broadcast %6 : vector<1x4xf32> to vector<32x4xf32>
    %8 = arith.addf %5, %7 : vector<32x4xf32>
    %c0_7 = arith.constant 0 : index
    %9 = memref.load %arg5[%c0_7] : memref<1xf32, #tpu.memory_space<smem>>
    %cst_8 = arith.constant 0.000000e+00 : f32
    %10 = vector.broadcast %cst_8 : f32 to vector<32x4xf32>
    %11 = arith.cmpf oge, %8, %10 : vector<32x4xf32>
    %12 = vector.broadcast %9 : f32 to vector<32x4xf32>
    %13 = arith.mulf %12, %8 : vector<32x4xf32>
    %14 = arith.select %11, %8, %13 : vector<32x4xi1>, vector<32x4xf32>
    %15 = arith.truncf %14 : vector<32x4xf32> to vector<32x4xbf16>
    %c0_9 = arith.constant 0 : index
    %c0_10 = arith.constant 0 : index
    %16 = vector.load %arg6[%c0_9, %c0_10] : memref<32x4xbf16, #tpu.memory_space<vmem>>, vector<32x4xbf16>
    tpu.vector_store %arg6[%c0_9, %c0_10], %15 {strides = array<i32>} : memref<32x4xbf16, #tpu.memory_space<vmem>>, vector<32x4xbf16>,
    return
  }
  func.func @transform_0(%arg0: i32) -> (i32, i32) {
    %c0_i32 = arith.constant 0 : i32
    %c0_i32_0 = arith.constant 0 : i32
    return %arg0, %c0_i32 : i32, i32
  }
  func.func @transform_1(%arg0: i32) -> (i32, i32) {
    %c0_i32 = arith.constant 0 : i32
    %c0_i32_0 = arith.constant 0 : i32
    %c0_i32_1 = arith.constant 0 : i32
    return %c0_i32, %c0_i32_0 : i32, i32
  }
  func.func @transform_2(%arg0: i32) -> (i32, i32) {
    %c0_i32 = arith.constant 0 : i32
    %c0_i32_0 = arith.constant 0 : i32
    %c0_i32_1 = arith.constant 0 : i32
    return %c0_i32, %c0_i32_0 : i32, i32
  }
  func.func @transform_3(%arg0: i32) -> (i32, i32) {
    %c0_i32 = arith.constant 0 : i32
    %c0_i32_0 = arith.constant 0 : i32
    %c0_i32_1 = arith.constant 0 : i32
    return %c0_i32, %c0_i32_0 : i32, i32
  }
  func.func @transform_4(%arg0: i32) -> i32 {
    %c0_i32 = arith.constant 0 : i32
    %c0_i32_0 = arith.constant 0 : i32
    return %c0_i32 : i32
  }
  func.func @transform_5(%arg0: i32) -> (i32, i32) {
    %c0_i32 = arith.constant 0 : i32
    %c0_i32_0 = arith.constant 0 : i32
    return %arg0, %c0_i32 : i32, i32
  }
}

module attributes {stable_mosaic.version = 11 : i64} {
  func.func @_mm_bn_prelu_kernel(%arg0: i32, %arg1: memref<32x36xbf16, #tpu.memory_space<vmem>>, %arg2: memref<36x4xbf16, #tpu.memory_space<vmem>>, %arg3: memref<1x4xf32, #tpu.memory_space<vmem>>, %arg4: memref<1x4xf32, #tpu.memory_space<vmem>>, %arg5: memref<1xf32, #tpu.memory_space<smem>>, %arg6: memref<32x4xbf16, #tpu.memory_space<vmem>>) attributes {dimension_semantics = [#tpu.dimension_semantics<parallel>], iteration_bounds = array<i64: 1>, scalar_prefetch = 0 : i64, scratch_operands = 0 : i64, tpu.core_type = #tpu.core_type<tc>, window_params = [{transform_indices = @transform_0, window_bounds = array<i64: 32, 36>}, {pipeline_mode = #tpu.pipeline_mode<synchronous>, transform_indices = @transform_1, window_bounds = array<i64: 36, 4>}, {pipeline_mode = #tpu.pipeline_mode<synchronous>, transform_indices = @transform_2, window_bounds = array<i64: 1, 4>}, {pipeline_mode = #tpu.pipeline_mode<synchronous>, transform_indices = @transform_3, window_bounds = array<i64: 1, 4>}, {transform_indices = @transform_4, window_bounds = array<i64: 1>}, {transform_indices = @transform_5, window_bounds = array<i64: 32, 4>}]} {
    %c0 = arith.constant 0 : index
    %c0_0 = arith.constant 0 : index
    %0 = vector.load %arg1[%c0, %c0_0] : memref<32x36xbf16, #tpu.memory_space<vmem>>, vector<32x36xbf16>
    %c0_1 = arith.constant 0 : index
    %c0_2 = arith.constant 0 : index
    %1 = vector.load %arg2[%c0_1, %c0_2] : memref<36x4xbf16, #tpu.memory_space<vmem>>, vector<36x4xbf16>
    %cst = arith.constant dense<0.000000e+00> : vector<32x4xf32>
    %2 = tpu.matmul %0, %1, %cst {dimension_numbers = #tpu.dot_dimension_numbers<[1], [0], [0], [1], [0, 0, 1, 1], [], []>} : vector<32x36xbf16>, vector<36x4xbf16>, vector<32x4xf32> -> vector<32x4xf32>
    %c0_3 = arith.constant 0 : index
    %c0_4 = arith.constant 0 : index
    %3 = vector.load %arg3[%c0_3, %c0_4] : memref<1x4xf32, #tpu.memory_space<vmem>>, vector<1x4xf32>
    %4 = vector.broadcast %3 : vector<1x4xf32> to vector<32x4xf32>
    %5 = arith.mulf %2, %4 : vector<32x4xf32>
    %c0_5 = arith.constant 0 : index
    %c0_6 = arith.constant 0 : index
    %6 = vector.load %arg4[%c0_5, %c0_6] : memref<1x4xf32, #tpu.memory_space<vmem>>, vector<1x4xf32>
    %7 = vector.broadcast %6 : vector<1x4xf32> to vector<32x4xf32>
    %8 = arith.addf %5, %7 : vector<32x4xf32>
    %c0_7 = arith.constant 0 : index
    %9 = memref.load %arg5[%c0_7] : memref<1xf32, #tpu.memory_space<smem>>
    %cst_8 = arith.constant 0.000000e+00 : f32
    %10 = vector.broadcast %cst_8 : f32 to vector<32x4xf32>
    %11 = arith.cmpf oge, %8, %10 : vector<32x4xf32>
    %12 = vector.broadcast %9 : f32 to vector<32x4xf32>
    %13 = arith.mulf %12, %8 : vector<32x4xf32>
    %14 = arith.select %11, %8, %13 : vector<32x4xi1>, vector<32x4xf32>
    %15 = arith.truncf %14 : vector<32x4xf32> to vector<32x4xbf16>
    %c0_9 = arith.constant 0 : index
    %c0_10 = arith.constant 0 : index
    %16 = vector.load %arg6[%c0_9, %c0_10] : memref<32x4xbf16, #tpu.memory_space<vmem>>, vector<32x4xbf16>
    tpu.vector_store %arg6[%c0_9, %c0_10], %15 {strides = array<i32>} : memref<32x4xbf16, #tpu.memory_space<vmem>>, vector<32x4xbf16>,
    return
  }
  func.func @transform_0(%arg0: i32) -> (i32, i32) {
    %c0_i32 = arith.constant 0 : i32
    %c0_i32_0 = arith.constant 0 : i32
    return %arg0, %c0_i32 : i32, i32
  }
  func.func @transform_1(%arg0: i32) -> (i32, i32) {
    %c0_i32 = arith.constant 0 : i32
    %c0_i32_0 = arith.constant 0 : i32
    %c0_i32_1 = arith.constant 0 : i32
    return %c0_i32, %c0_i32_0 : i32, i32
  }
  func.func @transform_2(%arg0: i32) -> (i32, i32) {
    %c0_i32 = arith.constant 0 : i32
    %c0_i32_0 = arith.constant 0 : i32
    %c0_i32_1 = arith.constant 0 : i32
    return %c0_i32, %c0_i32_0 : i32, i32
  }
  func.func @transform_3(%arg0: i32) -> (i32, i32) {
    %c0_i32 = arith.constant 0 : i32
    %c0_i32_0 = arith.constant 0 : i32
    %c0_i32_1 = arith.constant 0 : i32
    return %c0_i32, %c0_i32_0 : i32, i32
  }
  func.func @transform_4(%arg0: i32) -> i32 {
    %c0_i32 = arith.constant 0 : i32
    %c0_i32_0 = arith.constant 0 : i32
    return %c0_i32 : i32
  }
  func.func @transform_5(%arg0: i32) -> (i32, i32) {
    %c0_i32 = arith.constant 0 : i32
    %c0_i32_0 = arith.constant 0 : i32
    return %arg0, %c0_i32 : i32, i32
  }
}

module attributes {stable_mosaic.version = 11 : i64} {
  func.func @_mm_bn_prelu_res_kernel(%arg0: i32, %arg1: memref<32x4xbf16, #tpu.memory_space<vmem>>, %arg2: memref<4x64xbf16, #tpu.memory_space<vmem>>, %arg3: memref<1x64xf32, #tpu.memory_space<vmem>>, %arg4: memref<1x64xf32, #tpu.memory_space<vmem>>, %arg5: memref<32x64xbf16, #tpu.memory_space<vmem>>, %arg6: memref<2xf32, #tpu.memory_space<smem>>, %arg7: memref<32x64xbf16, #tpu.memory_space<vmem>>) attributes {dimension_semantics = [#tpu.dimension_semantics<parallel>], iteration_bounds = array<i64: 1>, scalar_prefetch = 0 : i64, scratch_operands = 0 : i64, tpu.core_type = #tpu.core_type<tc>, window_params = [{transform_indices = @transform_0, window_bounds = array<i64: 32, 4>}, {pipeline_mode = #tpu.pipeline_mode<synchronous>, transform_indices = @transform_1, window_bounds = array<i64: 4, 64>}, {pipeline_mode = #tpu.pipeline_mode<synchronous>, transform_indices = @transform_2, window_bounds = array<i64: 1, 64>}, {pipeline_mode = #tpu.pipeline_mode<synchronous>, transform_indices = @transform_3, window_bounds = array<i64: 1, 64>}, {transform_indices = @transform_4, window_bounds = array<i64: 32, 64>}, {transform_indices = @transform_5, window_bounds = array<i64: 2>}, {transform_indices = @transform_6, window_bounds = array<i64: 32, 64>}]} {
    %c0 = arith.constant 0 : index
    %c0_0 = arith.constant 0 : index
    %0 = vector.load %arg1[%c0, %c0_0] : memref<32x4xbf16, #tpu.memory_space<vmem>>, vector<32x4xbf16>
    %c0_1 = arith.constant 0 : index
    %c0_2 = arith.constant 0 : index
    %1 = vector.load %arg2[%c0_1, %c0_2] : memref<4x64xbf16, #tpu.memory_space<vmem>>, vector<4x64xbf16>
    %cst = arith.constant dense<0.000000e+00> : vector<32x64xf32>
    %2 = tpu.matmul %0, %1, %cst {dimension_numbers = #tpu.dot_dimension_numbers<[1], [0], [0], [1], [0, 0, 1, 1], [], []>} : vector<32x4xbf16>, vector<4x64xbf16>, vector<32x64xf32> -> vector<32x64xf32>
    %c0_3 = arith.constant 0 : index
    %c0_4 = arith.constant 0 : index
    %3 = vector.load %arg3[%c0_3, %c0_4] : memref<1x64xf32, #tpu.memory_space<vmem>>, vector<1x64xf32>
    %4 = vector.broadcast %3 : vector<1x64xf32> to vector<32x64xf32>
    %5 = arith.mulf %2, %4 : vector<32x64xf32>
    %c0_5 = arith.constant 0 : index
    %c0_6 = arith.constant 0 : index
    %6 = vector.load %arg4[%c0_5, %c0_6] : memref<1x64xf32, #tpu.memory_space<vmem>>, vector<1x64xf32>
    %7 = vector.broadcast %6 : vector<1x64xf32> to vector<32x64xf32>
    %8 = arith.addf %5, %7 : vector<32x64xf32>
    %c0_7 = arith.constant 0 : index
    %9 = memref.load %arg6[%c0_7] : memref<2xf32, #tpu.memory_space<smem>>
    %cst_8 = arith.constant 0.000000e+00 : f32
    %10 = vector.broadcast %cst_8 : f32 to vector<32x64xf32>
    %11 = arith.cmpf oge, %8, %10 : vector<32x64xf32>
    %12 = vector.broadcast %9 : f32 to vector<32x64xf32>
    %13 = arith.mulf %12, %8 : vector<32x64xf32>
    %14 = arith.select %11, %8, %13 : vector<32x64xi1>, vector<32x64xf32>
    %c0_9 = arith.constant 0 : index
    %c0_10 = arith.constant 0 : index
    %15 = vector.load %arg5[%c0_9, %c0_10] : memref<32x64xbf16, #tpu.memory_space<vmem>>, vector<32x64xbf16>
    %16 = arith.extf %15 : vector<32x64xbf16> to vector<32x64xf32>
    %17 = arith.addf %14, %16 : vector<32x64xf32>
    %c1 = arith.constant 1 : index
    %18 = memref.load %arg6[%c1] : memref<2xf32, #tpu.memory_space<smem>>
    %cst_11 = arith.constant 0.000000e+00 : f32
    %19 = vector.broadcast %cst_11 : f32 to vector<32x64xf32>
    %20 = arith.cmpf oge, %17, %19 : vector<32x64xf32>
    %21 = vector.broadcast %18 : f32 to vector<32x64xf32>
    %22 = arith.mulf %21, %17 : vector<32x64xf32>
    %23 = arith.select %20, %17, %22 : vector<32x64xi1>, vector<32x64xf32>
    %24 = arith.truncf %23 : vector<32x64xf32> to vector<32x64xbf16>
    %c0_12 = arith.constant 0 : index
    %c0_13 = arith.constant 0 : index
    %25 = vector.load %arg7[%c0_12, %c0_13] : memref<32x64xbf16, #tpu.memory_space<vmem>>, vector<32x64xbf16>
    tpu.vector_store %arg7[%c0_12, %c0_13], %24 {strides = array<i32>} : memref<32x64xbf16, #tpu.memory_space<vmem>>, vector<32x64xbf16>,
    return
  }
  func.func @transform_0(%arg0: i32) -> (i32, i32) {
    %c0_i32 = arith.constant 0 : i32
    %c0_i32_0 = arith.constant 0 : i32
    return %arg0, %c0_i32 : i32, i32
  }
  func.func @transform_1(%arg0: i32) -> (i32, i32) {
    %c0_i32 = arith.constant 0 : i32
    %c0_i32_0 = arith.constant 0 : i32
    %c0_i32_1 = arith.constant 0 : i32
    return %c0_i32, %c0_i32_0 : i32, i32
  }
  func.func @transform_2(%arg0: i32) -> (i32, i32) {
    %c0_i32 = arith.constant 0 : i32
    %c0_i32_0 = arith.constant 0 : i32
    %c0_i32_1 = arith.constant 0 : i32
    return %c0_i32, %c0_i32_0 : i32, i32
  }
  func.func @transform_3(%arg0: i32) -> (i32, i32) {
    %c0_i32 = arith.constant 0 : i32
    %c0_i32_0 = arith.constant 0 : i32
    %c0_i32_1 = arith.constant 0 : i32
    return %c0_i32, %c0_i32_0 : i32, i32
  }
  func.func @transform_4(%arg0: i32) -> (i32, i32) {
    %c0_i32 = arith.constant 0 : i32
    %c0_i32_0 = arith.constant 0 : i32
    return %arg0, %c0_i32 : i32, i32
  }
  func.func @transform_5(%arg0: i32) -> i32 {
    %c0_i32 = arith.constant 0 : i32
    %c0_i32_0 = arith.constant 0 : i32
    return %c0_i32 : i32
  }
  func.func @transform_6(%arg0: i32) -> (i32, i32) {
    %c0_i32 = arith.constant 0 : i32
    %c0_i32_0 = arith.constant 0 : i32
    return %arg0, %c0_i32 : i32, i32
  }
}

module attributes {stable_mosaic.version = 11 : i64} {
  func.func @_mm_bn_prelu_kernel(%arg0: i32, %arg1: memref<32x64xbf16, #tpu.memory_space<vmem>>, %arg2: memref<64x16xbf16, #tpu.memory_space<vmem>>, %arg3: memref<1x16xf32, #tpu.memory_space<vmem>>, %arg4: memref<1x16xf32, #tpu.memory_space<vmem>>, %arg5: memref<1xf32, #tpu.memory_space<smem>>, %arg6: memref<32x16xbf16, #tpu.memory_space<vmem>>) attributes {dimension_semantics = [#tpu.dimension_semantics<parallel>], iteration_bounds = array<i64: 1>, scalar_prefetch = 0 : i64, scratch_operands = 0 : i64, tpu.core_type = #tpu.core_type<tc>, window_params = [{transform_indices = @transform_0, window_bounds = array<i64: 32, 64>}, {pipeline_mode = #tpu.pipeline_mode<synchronous>, transform_indices = @transform_1, window_bounds = array<i64: 64, 16>}, {pipeline_mode = #tpu.pipeline_mode<synchronous>, transform_indices = @transform_2, window_bounds = array<i64: 1, 16>}, {pipeline_mode = #tpu.pipeline_mode<synchronous>, transform_indices = @transform_3, window_bounds = array<i64: 1, 16>}, {transform_indices = @transform_4, window_bounds = array<i64: 1>}, {transform_indices = @transform_5, window_bounds = array<i64: 32, 16>}]} {
    %c0 = arith.constant 0 : index
    %c0_0 = arith.constant 0 : index
    %0 = vector.load %arg1[%c0, %c0_0] : memref<32x64xbf16, #tpu.memory_space<vmem>>, vector<32x64xbf16>
    %c0_1 = arith.constant 0 : index
    %c0_2 = arith.constant 0 : index
    %1 = vector.load %arg2[%c0_1, %c0_2] : memref<64x16xbf16, #tpu.memory_space<vmem>>, vector<64x16xbf16>
    %cst = arith.constant dense<0.000000e+00> : vector<32x16xf32>
    %2 = tpu.matmul %0, %1, %cst {dimension_numbers = #tpu.dot_dimension_numbers<[1], [0], [0], [1], [0, 0, 1, 1], [], []>} : vector<32x64xbf16>, vector<64x16xbf16>, vector<32x16xf32> -> vector<32x16xf32>
    %c0_3 = arith.constant 0 : index
    %c0_4 = arith.constant 0 : index
    %3 = vector.load %arg3[%c0_3, %c0_4] : memref<1x16xf32, #tpu.memory_space<vmem>>, vector<1x16xf32>
    %4 = vector.broadcast %3 : vector<1x16xf32> to vector<32x16xf32>
    %5 = arith.mulf %2, %4 : vector<32x16xf32>
    %c0_5 = arith.constant 0 : index
    %c0_6 = arith.constant 0 : index
    %6 = vector.load %arg4[%c0_5, %c0_6] : memref<1x16xf32, #tpu.memory_space<vmem>>, vector<1x16xf32>
    %7 = vector.broadcast %6 : vector<1x16xf32> to vector<32x16xf32>
    %8 = arith.addf %5, %7 : vector<32x16xf32>
    %c0_7 = arith.constant 0 : index
    %9 = memref.load %arg5[%c0_7] : memref<1xf32, #tpu.memory_space<smem>>
    %cst_8 = arith.constant 0.000000e+00 : f32
    %10 = vector.broadcast %cst_8 : f32 to vector<32x16xf32>
    %11 = arith.cmpf oge, %8, %10 : vector<32x16xf32>
    %12 = vector.broadcast %9 : f32 to vector<32x16xf32>
    %13 = arith.mulf %12, %8 : vector<32x16xf32>
    %14 = arith.select %11, %8, %13 : vector<32x16xi1>, vector<32x16xf32>
    %15 = arith.truncf %14 : vector<32x16xf32> to vector<32x16xbf16>
    %c0_9 = arith.constant 0 : index
    %c0_10 = arith.constant 0 : index
    %16 = vector.load %arg6[%c0_9, %c0_10] : memref<32x16xbf16, #tpu.memory_space<vmem>>, vector<32x16xbf16>
    tpu.vector_store %arg6[%c0_9, %c0_10], %15 {strides = array<i32>} : memref<32x16xbf16, #tpu.memory_space<vmem>>, vector<32x16xbf16>,
    return
  }
  func.func @transform_0(%arg0: i32) -> (i32, i32) {
    %c0_i32 = arith.constant 0 : i32
    %c0_i32_0 = arith.constant 0 : i32
    return %arg0, %c0_i32 : i32, i32
  }
  func.func @transform_1(%arg0: i32) -> (i32, i32) {
    %c0_i32 = arith.constant 0 : i32
    %c0_i32_0 = arith.constant 0 : i32
    %c0_i32_1 = arith.constant 0 : i32
    return %c0_i32, %c0_i32_0 : i32, i32
  }
  func.func @transform_2(%arg0: i32) -> (i32, i32) {
    %c0_i32 = arith.constant 0 : i32
    %c0_i32_0 = arith.constant 0 : i32
    %c0_i32_1 = arith.constant 0 : i32
    return %c0_i32, %c0_i32_0 : i32, i32
  }
  func.func @transform_3(%arg0: i32) -> (i32, i32) {
    %c0_i32 = arith.constant 0 : i32
    %c0_i32_0 = arith.constant 0 : i32
    %c0_i32_1 = arith.constant 0 : i32
    return %c0_i32, %c0_i32_0 : i32, i32
  }
  func.func @transform_4(%arg0: i32) -> i32 {
    %c0_i32 = arith.constant 0 : i32
    %c0_i32_0 = arith.constant 0 : i32
    return %c0_i32 : i32
  }
  func.func @transform_5(%arg0: i32) -> (i32, i32) {
    %c0_i32 = arith.constant 0 : i32
    %c0_i32_0 = arith.constant 0 : i32
    return %arg0, %c0_i32 : i32, i32
  }
}

module attributes {stable_mosaic.version = 11 : i64} {
  func.func @_mm_bn_prelu_kernel(%arg0: i32, %arg1: memref<32x144xbf16, #tpu.memory_space<vmem>>, %arg2: memref<144x16xbf16, #tpu.memory_space<vmem>>, %arg3: memref<1x16xf32, #tpu.memory_space<vmem>>, %arg4: memref<1x16xf32, #tpu.memory_space<vmem>>, %arg5: memref<1xf32, #tpu.memory_space<smem>>, %arg6: memref<32x16xbf16, #tpu.memory_space<vmem>>) attributes {dimension_semantics = [#tpu.dimension_semantics<parallel>], iteration_bounds = array<i64: 1>, scalar_prefetch = 0 : i64, scratch_operands = 0 : i64, tpu.core_type = #tpu.core_type<tc>, window_params = [{transform_indices = @transform_0, window_bounds = array<i64: 32, 144>}, {pipeline_mode = #tpu.pipeline_mode<synchronous>, transform_indices = @transform_1, window_bounds = array<i64: 144, 16>}, {pipeline_mode = #tpu.pipeline_mode<synchronous>, transform_indices = @transform_2, window_bounds = array<i64: 1, 16>}, {pipeline_mode = #tpu.pipeline_mode<synchronous>, transform_indices = @transform_3, window_bounds = array<i64: 1, 16>}, {transform_indices = @transform_4, window_bounds = array<i64: 1>}, {transform_indices = @transform_5, window_bounds = array<i64: 32, 16>}]} {
    %c0 = arith.constant 0 : index
    %c0_0 = arith.constant 0 : index
    %0 = vector.load %arg1[%c0, %c0_0] : memref<32x144xbf16, #tpu.memory_space<vmem>>, vector<32x144xbf16>
    %c0_1 = arith.constant 0 : index
    %c0_2 = arith.constant 0 : index
    %1 = vector.load %arg2[%c0_1, %c0_2] : memref<144x16xbf16, #tpu.memory_space<vmem>>, vector<144x16xbf16>
    %cst = arith.constant dense<0.000000e+00> : vector<32x16xf32>
    %2 = tpu.matmul %0, %1, %cst {dimension_numbers = #tpu.dot_dimension_numbers<[1], [0], [0], [1], [0, 0, 1, 1], [], []>} : vector<32x144xbf16>, vector<144x16xbf16>, vector<32x16xf32> -> vector<32x16xf32>
    %c0_3 = arith.constant 0 : index
    %c0_4 = arith.constant 0 : index
    %3 = vector.load %arg3[%c0_3, %c0_4] : memref<1x16xf32, #tpu.memory_space<vmem>>, vector<1x16xf32>
    %4 = vector.broadcast %3 : vector<1x16xf32> to vector<32x16xf32>
    %5 = arith.mulf %2, %4 : vector<32x16xf32>
    %c0_5 = arith.constant 0 : index
    %c0_6 = arith.constant 0 : index
    %6 = vector.load %arg4[%c0_5, %c0_6] : memref<1x16xf32, #tpu.memory_space<vmem>>, vector<1x16xf32>
    %7 = vector.broadcast %6 : vector<1x16xf32> to vector<32x16xf32>
    %8 = arith.addf %5, %7 : vector<32x16xf32>
    %c0_7 = arith.constant 0 : index
    %9 = memref.load %arg5[%c0_7] : memref<1xf32, #tpu.memory_space<smem>>
    %cst_8 = arith.constant 0.000000e+00 : f32
    %10 = vector.broadcast %cst_8 : f32 to vector<32x16xf32>
    %11 = arith.cmpf oge, %8, %10 : vector<32x16xf32>
    %12 = vector.broadcast %9 : f32 to vector<32x16xf32>
    %13 = arith.mulf %12, %8 : vector<32x16xf32>
    %14 = arith.select %11, %8, %13 : vector<32x16xi1>, vector<32x16xf32>
    %15 = arith.truncf %14 : vector<32x16xf32> to vector<32x16xbf16>
    %c0_9 = arith.constant 0 : index
    %c0_10 = arith.constant 0 : index
    %16 = vector.load %arg6[%c0_9, %c0_10] : memref<32x16xbf16, #tpu.memory_space<vmem>>, vector<32x16xbf16>
    tpu.vector_store %arg6[%c0_9, %c0_10], %15 {strides = array<i32>} : memref<32x16xbf16, #tpu.memory_space<vmem>>, vector<32x16xbf16>,
    return
  }
  func.func @transform_0(%arg0: i32) -> (i32, i32) {
    %c0_i32 = arith.constant 0 : i32
    %c0_i32_0 = arith.constant 0 : i32
    return %arg0, %c0_i32 : i32, i32
  }
  func.func @transform_1(%arg0: i32) -> (i32, i32) {
    %c0_i32 = arith.constant 0 : i32
    %c0_i32_0 = arith.constant 0 : i32
    %c0_i32_1 = arith.constant 0 : i32
    return %c0_i32, %c0_i32_0 : i32, i32
  }
  func.func @transform_2(%arg0: i32) -> (i32, i32) {
    %c0_i32 = arith.constant 0 : i32
    %c0_i32_0 = arith.constant 0 : i32
    %c0_i32_1 = arith.constant 0 : i32
    return %c0_i32, %c0_i32_0 : i32, i32
  }
  func.func @transform_3(%arg0: i32) -> (i32, i32) {
    %c0_i32 = arith.constant 0 : i32
    %c0_i32_0 = arith.constant 0 : i32
    %c0_i32_1 = arith.constant 0 : i32
    return %c0_i32, %c0_i32_0 : i32, i32
  }
  func.func @transform_4(%arg0: i32) -> i32 {
    %c0_i32 = arith.constant 0 : i32
    %c0_i32_0 = arith.constant 0 : i32
    return %c0_i32 : i32
  }
  func.func @transform_5(%arg0: i32) -> (i32, i32) {
    %c0_i32 = arith.constant 0 : i32
    %c0_i32_0 = arith.constant 0 : i32
    return %arg0, %c0_i32 : i32, i32
  }
}

module attributes {stable_mosaic.version = 11 : i64} {
  func.func @_mm_bn_prelu_res_kernel(%arg0: i32, %arg1: memref<32x16xbf16, #tpu.memory_space<vmem>>, %arg2: memref<16x64xbf16, #tpu.memory_space<vmem>>, %arg3: memref<1x64xf32, #tpu.memory_space<vmem>>, %arg4: memref<1x64xf32, #tpu.memory_space<vmem>>, %arg5: memref<32x64xbf16, #tpu.memory_space<vmem>>, %arg6: memref<2xf32, #tpu.memory_space<smem>>, %arg7: memref<32x64xbf16, #tpu.memory_space<vmem>>) attributes {dimension_semantics = [#tpu.dimension_semantics<parallel>], iteration_bounds = array<i64: 1>, scalar_prefetch = 0 : i64, scratch_operands = 0 : i64, tpu.core_type = #tpu.core_type<tc>, window_params = [{transform_indices = @transform_0, window_bounds = array<i64: 32, 16>}, {pipeline_mode = #tpu.pipeline_mode<synchronous>, transform_indices = @transform_1, window_bounds = array<i64: 16, 64>}, {pipeline_mode = #tpu.pipeline_mode<synchronous>, transform_indices = @transform_2, window_bounds = array<i64: 1, 64>}, {pipeline_mode = #tpu.pipeline_mode<synchronous>, transform_indices = @transform_3, window_bounds = array<i64: 1, 64>}, {transform_indices = @transform_4, window_bounds = array<i64: 32, 64>}, {transform_indices = @transform_5, window_bounds = array<i64: 2>}, {transform_indices = @transform_6, window_bounds = array<i64: 32, 64>}]} {
    %c0 = arith.constant 0 : index
    %c0_0 = arith.constant 0 : index
    %0 = vector.load %arg1[%c0, %c0_0] : memref<32x16xbf16, #tpu.memory_space<vmem>>, vector<32x16xbf16>
    %c0_1 = arith.constant 0 : index
    %c0_2 = arith.constant 0 : index
    %1 = vector.load %arg2[%c0_1, %c0_2] : memref<16x64xbf16, #tpu.memory_space<vmem>>, vector<16x64xbf16>
    %cst = arith.constant dense<0.000000e+00> : vector<32x64xf32>
    %2 = tpu.matmul %0, %1, %cst {dimension_numbers = #tpu.dot_dimension_numbers<[1], [0], [0], [1], [0, 0, 1, 1], [], []>} : vector<32x16xbf16>, vector<16x64xbf16>, vector<32x64xf32> -> vector<32x64xf32>
    %c0_3 = arith.constant 0 : index
    %c0_4 = arith.constant 0 : index
    %3 = vector.load %arg3[%c0_3, %c0_4] : memref<1x64xf32, #tpu.memory_space<vmem>>, vector<1x64xf32>
    %4 = vector.broadcast %3 : vector<1x64xf32> to vector<32x64xf32>
    %5 = arith.mulf %2, %4 : vector<32x64xf32>
    %c0_5 = arith.constant 0 : index
    %c0_6 = arith.constant 0 : index
    %6 = vector.load %arg4[%c0_5, %c0_6] : memref<1x64xf32, #tpu.memory_space<vmem>>, vector<1x64xf32>
    %7 = vector.broadcast %6 : vector<1x64xf32> to vector<32x64xf32>
    %8 = arith.addf %5, %7 : vector<32x64xf32>
    %c0_7 = arith.constant 0 : index
    %9 = memref.load %arg6[%c0_7] : memref<2xf32, #tpu.memory_space<smem>>
    %cst_8 = arith.constant 0.000000e+00 : f32
    %10 = vector.broadcast %cst_8 : f32 to vector<32x64xf32>
    %11 = arith.cmpf oge, %8, %10 : vector<32x64xf32>
    %12 = vector.broadcast %9 : f32 to vector<32x64xf32>
    %13 = arith.mulf %12, %8 : vector<32x64xf32>
    %14 = arith.select %11, %8, %13 : vector<32x64xi1>, vector<32x64xf32>
    %c0_9 = arith.constant 0 : index
    %c0_10 = arith.constant 0 : index
    %15 = vector.load %arg5[%c0_9, %c0_10] : memref<32x64xbf16, #tpu.memory_space<vmem>>, vector<32x64xbf16>
    %16 = arith.extf %15 : vector<32x64xbf16> to vector<32x64xf32>
    %17 = arith.addf %14, %16 : vector<32x64xf32>
    %c1 = arith.constant 1 : index
    %18 = memref.load %arg6[%c1] : memref<2xf32, #tpu.memory_space<smem>>
    %cst_11 = arith.constant 0.000000e+00 : f32
    %19 = vector.broadcast %cst_11 : f32 to vector<32x64xf32>
    %20 = arith.cmpf oge, %17, %19 : vector<32x64xf32>
    %21 = vector.broadcast %18 : f32 to vector<32x64xf32>
    %22 = arith.mulf %21, %17 : vector<32x64xf32>
    %23 = arith.select %20, %17, %22 : vector<32x64xi1>, vector<32x64xf32>
    %24 = arith.truncf %23 : vector<32x64xf32> to vector<32x64xbf16>
    %c0_12 = arith.constant 0 : index
    %c0_13 = arith.constant 0 : index
    %25 = vector.load %arg7[%c0_12, %c0_13] : memref<32x64xbf16, #tpu.memory_space<vmem>>, vector<32x64xbf16>
    tpu.vector_store %arg7[%c0_12, %c0_13], %24 {strides = array<i32>} : memref<32x64xbf16, #tpu.memory_space<vmem>>, vector<32x64xbf16>,
    return
  }
  func.func @transform_0(%arg0: i32) -> (i32, i32) {
    %c0_i32 = arith.constant 0 : i32
    %c0_i32_0 = arith.constant 0 : i32
    return %arg0, %c0_i32 : i32, i32
  }
  func.func @transform_1(%arg0: i32) -> (i32, i32) {
    %c0_i32 = arith.constant 0 : i32
    %c0_i32_0 = arith.constant 0 : i32
    %c0_i32_1 = arith.constant 0 : i32
    return %c0_i32, %c0_i32_0 : i32, i32
  }
  func.func @transform_2(%arg0: i32) -> (i32, i32) {
    %c0_i32 = arith.constant 0 : i32
    %c0_i32_0 = arith.constant 0 : i32
    %c0_i32_1 = arith.constant 0 : i32
    return %c0_i32, %c0_i32_0 : i32, i32
  }
  func.func @transform_3(%arg0: i32) -> (i32, i32) {
    %c0_i32 = arith.constant 0 : i32
    %c0_i32_0 = arith.constant 0 : i32
    %c0_i32_1 = arith.constant 0 : i32
    return %c0_i32, %c0_i32_0 : i32, i32
  }
  func.func @transform_4(%arg0: i32) -> (i32, i32) {
    %c0_i32 = arith.constant 0 : i32
    %c0_i32_0 = arith.constant 0 : i32
    return %arg0, %c0_i32 : i32, i32
  }
  func.func @transform_5(%arg0: i32) -> i32 {
    %c0_i32 = arith.constant 0 : i32
    %c0_i32_0 = arith.constant 0 : i32
    return %c0_i32 : i32
  }
  func.func @transform_6(%arg0: i32) -> (i32, i32) {
    %c0_i32 = arith.constant 0 : i32
    %c0_i32_0 = arith.constant 0 : i32
    return %arg0, %c0_i32 : i32, i32
  }
}

module attributes {stable_mosaic.version = 11 : i64} {
  func.func @_mm_bn_prelu_kernel(%arg0: i32, %arg1: memref<16x256xbf16, #tpu.memory_space<vmem>>, %arg2: memref<256x16xbf16, #tpu.memory_space<vmem>>, %arg3: memref<1x16xf32, #tpu.memory_space<vmem>>, %arg4: memref<1x16xf32, #tpu.memory_space<vmem>>, %arg5: memref<1xf32, #tpu.memory_space<smem>>, %arg6: memref<16x16xbf16, #tpu.memory_space<vmem>>) attributes {dimension_semantics = [#tpu.dimension_semantics<parallel>], iteration_bounds = array<i64: 1>, scalar_prefetch = 0 : i64, scratch_operands = 0 : i64, tpu.core_type = #tpu.core_type<tc>, window_params = [{transform_indices = @transform_0, window_bounds = array<i64: 16, 256>}, {pipeline_mode = #tpu.pipeline_mode<synchronous>, transform_indices = @transform_1, window_bounds = array<i64: 256, 16>}, {pipeline_mode = #tpu.pipeline_mode<synchronous>, transform_indices = @transform_2, window_bounds = array<i64: 1, 16>}, {pipeline_mode = #tpu.pipeline_mode<synchronous>, transform_indices = @transform_3, window_bounds = array<i64: 1, 16>}, {transform_indices = @transform_4, window_bounds = array<i64: 1>}, {transform_indices = @transform_5, window_bounds = array<i64: 16, 16>}]} {
    %c0 = arith.constant 0 : index
    %c0_0 = arith.constant 0 : index
    %0 = vector.load %arg1[%c0, %c0_0] : memref<16x256xbf16, #tpu.memory_space<vmem>>, vector<16x256xbf16>
    %c0_1 = arith.constant 0 : index
    %c0_2 = arith.constant 0 : index
    %1 = vector.load %arg2[%c0_1, %c0_2] : memref<256x16xbf16, #tpu.memory_space<vmem>>, vector<256x16xbf16>
    %cst = arith.constant dense<0.000000e+00> : vector<16x16xf32>
    %2 = tpu.matmul %0, %1, %cst {dimension_numbers = #tpu.dot_dimension_numbers<[1], [0], [0], [1], [0, 0, 1, 1], [], []>} : vector<16x256xbf16>, vector<256x16xbf16>, vector<16x16xf32> -> vector<16x16xf32>
    %c0_3 = arith.constant 0 : index
    %c0_4 = arith.constant 0 : index
    %3 = vector.load %arg3[%c0_3, %c0_4] : memref<1x16xf32, #tpu.memory_space<vmem>>, vector<1x16xf32>
    %4 = vector.broadcast %3 : vector<1x16xf32> to vector<16x16xf32>
    %5 = arith.mulf %2, %4 : vector<16x16xf32>
    %c0_5 = arith.constant 0 : index
    %c0_6 = arith.constant 0 : index
    %6 = vector.load %arg4[%c0_5, %c0_6] : memref<1x16xf32, #tpu.memory_space<vmem>>, vector<1x16xf32>
    %7 = vector.broadcast %6 : vector<1x16xf32> to vector<16x16xf32>
    %8 = arith.addf %5, %7 : vector<16x16xf32>
    %c0_7 = arith.constant 0 : index
    %9 = memref.load %arg5[%c0_7] : memref<1xf32, #tpu.memory_space<smem>>
    %cst_8 = arith.constant 0.000000e+00 : f32
    %10 = vector.broadcast %cst_8 : f32 to vector<16x16xf32>
    %11 = arith.cmpf oge, %8, %10 : vector<16x16xf32>
    %12 = vector.broadcast %9 : f32 to vector<16x16xf32>
    %13 = arith.mulf %12, %8 : vector<16x16xf32>
    %14 = arith.select %11, %8, %13 : vector<16x16xi1>, vector<16x16xf32>
    %15 = arith.truncf %14 : vector<16x16xf32> to vector<16x16xbf16>
    %c0_9 = arith.constant 0 : index
    %c0_10 = arith.constant 0 : index
    %16 = vector.load %arg6[%c0_9, %c0_10] : memref<16x16xbf16, #tpu.memory_space<vmem>>, vector<16x16xbf16>
    tpu.vector_store %arg6[%c0_9, %c0_10], %15 {strides = array<i32>} : memref<16x16xbf16, #tpu.memory_space<vmem>>, vector<16x16xbf16>,
    return
  }
  func.func @transform_0(%arg0: i32) -> (i32, i32) {
    %c0_i32 = arith.constant 0 : i32
    %c0_i32_0 = arith.constant 0 : i32
    return %arg0, %c0_i32 : i32, i32
  }
  func.func @transform_1(%arg0: i32) -> (i32, i32) {
    %c0_i32 = arith.constant 0 : i32
    %c0_i32_0 = arith.constant 0 : i32
    %c0_i32_1 = arith.constant 0 : i32
    return %c0_i32, %c0_i32_0 : i32, i32
  }
  func.func @transform_2(%arg0: i32) -> (i32, i32) {
    %c0_i32 = arith.constant 0 : i32
    %c0_i32_0 = arith.constant 0 : i32
    %c0_i32_1 = arith.constant 0 : i32
    return %c0_i32, %c0_i32_0 : i32, i32
  }
  func.func @transform_3(%arg0: i32) -> (i32, i32) {
    %c0_i32 = arith.constant 0 : i32
    %c0_i32_0 = arith.constant 0 : i32
    %c0_i32_1 = arith.constant 0 : i32
    return %c0_i32, %c0_i32_0 : i32, i32
  }
  func.func @transform_4(%arg0: i32) -> i32 {
    %c0_i32 = arith.constant 0 : i32
    %c0_i32_0 = arith.constant 0 : i32
    return %c0_i32 : i32
  }
  func.func @transform_5(%arg0: i32) -> (i32, i32) {
    %c0_i32 = arith.constant 0 : i32
    %c0_i32_0 = arith.constant 0 : i32
    return %arg0, %c0_i32 : i32, i32
  }
}

module attributes {stable_mosaic.version = 11 : i64} {
  func.func @_mm_bn_prelu_kernel(%arg0: i32, %arg1: memref<16x144xbf16, #tpu.memory_space<vmem>>, %arg2: memref<144x16xbf16, #tpu.memory_space<vmem>>, %arg3: memref<1x16xf32, #tpu.memory_space<vmem>>, %arg4: memref<1x16xf32, #tpu.memory_space<vmem>>, %arg5: memref<1xf32, #tpu.memory_space<smem>>, %arg6: memref<16x16xbf16, #tpu.memory_space<vmem>>) attributes {dimension_semantics = [#tpu.dimension_semantics<parallel>], iteration_bounds = array<i64: 1>, scalar_prefetch = 0 : i64, scratch_operands = 0 : i64, tpu.core_type = #tpu.core_type<tc>, window_params = [{transform_indices = @transform_0, window_bounds = array<i64: 16, 144>}, {pipeline_mode = #tpu.pipeline_mode<synchronous>, transform_indices = @transform_1, window_bounds = array<i64: 144, 16>}, {pipeline_mode = #tpu.pipeline_mode<synchronous>, transform_indices = @transform_2, window_bounds = array<i64: 1, 16>}, {pipeline_mode = #tpu.pipeline_mode<synchronous>, transform_indices = @transform_3, window_bounds = array<i64: 1, 16>}, {transform_indices = @transform_4, window_bounds = array<i64: 1>}, {transform_indices = @transform_5, window_bounds = array<i64: 16, 16>}]} {
    %c0 = arith.constant 0 : index
    %c0_0 = arith.constant 0 : index
    %0 = vector.load %arg1[%c0, %c0_0] : memref<16x144xbf16, #tpu.memory_space<vmem>>, vector<16x144xbf16>
    %c0_1 = arith.constant 0 : index
    %c0_2 = arith.constant 0 : index
    %1 = vector.load %arg2[%c0_1, %c0_2] : memref<144x16xbf16, #tpu.memory_space<vmem>>, vector<144x16xbf16>
    %cst = arith.constant dense<0.000000e+00> : vector<16x16xf32>
    %2 = tpu.matmul %0, %1, %cst {dimension_numbers = #tpu.dot_dimension_numbers<[1], [0], [0], [1], [0, 0, 1, 1], [], []>} : vector<16x144xbf16>, vector<144x16xbf16>, vector<16x16xf32> -> vector<16x16xf32>
    %c0_3 = arith.constant 0 : index
    %c0_4 = arith.constant 0 : index
    %3 = vector.load %arg3[%c0_3, %c0_4] : memref<1x16xf32, #tpu.memory_space<vmem>>, vector<1x16xf32>
    %4 = vector.broadcast %3 : vector<1x16xf32> to vector<16x16xf32>
    %5 = arith.mulf %2, %4 : vector<16x16xf32>
    %c0_5 = arith.constant 0 : index
    %c0_6 = arith.constant 0 : index
    %6 = vector.load %arg4[%c0_5, %c0_6] : memref<1x16xf32, #tpu.memory_space<vmem>>, vector<1x16xf32>
    %7 = vector.broadcast %6 : vector<1x16xf32> to vector<16x16xf32>
    %8 = arith.addf %5, %7 : vector<16x16xf32>
    %c0_7 = arith.constant 0 : index
    %9 = memref.load %arg5[%c0_7] : memref<1xf32, #tpu.memory_space<smem>>
    %cst_8 = arith.constant 0.000000e+00 : f32
    %10 = vector.broadcast %cst_8 : f32 to vector<16x16xf32>
    %11 = arith.cmpf oge, %8, %10 : vector<16x16xf32>
    %12 = vector.broadcast %9 : f32 to vector<16x16xf32>
    %13 = arith.mulf %12, %8 : vector<16x16xf32>
    %14 = arith.select %11, %8, %13 : vector<16x16xi1>, vector<16x16xf32>
    %15 = arith.truncf %14 : vector<16x16xf32> to vector<16x16xbf16>
    %c0_9 = arith.constant 0 : index
    %c0_10 = arith.constant 0 : index
    %16 = vector.load %arg6[%c0_9, %c0_10] : memref<16x16xbf16, #tpu.memory_space<vmem>>, vector<16x16xbf16>
    tpu.vector_store %arg6[%c0_9, %c0_10], %15 {strides = array<i32>} : memref<16x16xbf16, #tpu.memory_space<vmem>>, vector<16x16xbf16>,
    return
  }
  func.func @transform_0(%arg0: i32) -> (i32, i32) {
    %c0_i32 = arith.constant 0 : i32
    %c0_i32_0 = arith.constant 0 : i32
    return %arg0, %c0_i32 : i32, i32
  }
  func.func @transform_1(%arg0: i32) -> (i32, i32) {
    %c0_i32 = arith.constant 0 : i32
    %c0_i32_0 = arith.constant 0 : i32
    %c0_i32_1 = arith.constant 0 : i32
    return %c0_i32, %c0_i32_0 : i32, i32
  }
  func.func @transform_2(%arg0: i32) -> (i32, i32) {
    %c0_i32 = arith.constant 0 : i32
    %c0_i32_0 = arith.constant 0 : i32
    %c0_i32_1 = arith.constant 0 : i32
    return %c0_i32, %c0_i32_0 : i32, i32
  }
  func.func @transform_3(%arg0: i32) -> (i32, i32) {
    %c0_i32 = arith.constant 0 : i32
    %c0_i32_0 = arith.constant 0 : i32
    %c0_i32_1 = arith.constant 0 : i32
    return %c0_i32, %c0_i32_0 : i32, i32
  }
  func.func @transform_4(%arg0: i32) -> i32 {
    %c0_i32 = arith.constant 0 : i32
    %c0_i32_0 = arith.constant 0 : i32
    return %c0_i32 : i32
  }
  func.func @transform_5(%arg0: i32) -> (i32, i32) {
    %c0_i32 = arith.constant 0 : i32
    %c0_i32_0 = arith.constant 0 : i32
    return %arg0, %c0_i32 : i32, i32
  }
}

module attributes {stable_mosaic.version = 11 : i64} {
  func.func @_mm_bn_prelu_res_kernel(%arg0: i32, %arg1: memref<16x16xbf16, #tpu.memory_space<vmem>>, %arg2: memref<16x128xbf16, #tpu.memory_space<vmem>>, %arg3: memref<1x128xf32, #tpu.memory_space<vmem>>, %arg4: memref<1x128xf32, #tpu.memory_space<vmem>>, %arg5: memref<16x128xbf16, #tpu.memory_space<vmem>>, %arg6: memref<2xf32, #tpu.memory_space<smem>>, %arg7: memref<16x128xbf16, #tpu.memory_space<vmem>>) attributes {dimension_semantics = [#tpu.dimension_semantics<parallel>], iteration_bounds = array<i64: 1>, scalar_prefetch = 0 : i64, scratch_operands = 0 : i64, tpu.core_type = #tpu.core_type<tc>, window_params = [{transform_indices = @transform_0, window_bounds = array<i64: 16, 16>}, {pipeline_mode = #tpu.pipeline_mode<synchronous>, transform_indices = @transform_1, window_bounds = array<i64: 16, 128>}, {pipeline_mode = #tpu.pipeline_mode<synchronous>, transform_indices = @transform_2, window_bounds = array<i64: 1, 128>}, {pipeline_mode = #tpu.pipeline_mode<synchronous>, transform_indices = @transform_3, window_bounds = array<i64: 1, 128>}, {transform_indices = @transform_4, window_bounds = array<i64: 16, 128>}, {transform_indices = @transform_5, window_bounds = array<i64: 2>}, {transform_indices = @transform_6, window_bounds = array<i64: 16, 128>}]} {
    %c0 = arith.constant 0 : index
    %c0_0 = arith.constant 0 : index
    %0 = vector.load %arg1[%c0, %c0_0] : memref<16x16xbf16, #tpu.memory_space<vmem>>, vector<16x16xbf16>
    %c0_1 = arith.constant 0 : index
    %c0_2 = arith.constant 0 : index
    %1 = vector.load %arg2[%c0_1, %c0_2] : memref<16x128xbf16, #tpu.memory_space<vmem>>, vector<16x128xbf16>
    %cst = arith.constant dense<0.000000e+00> : vector<16x128xf32>
    %2 = tpu.matmul %0, %1, %cst {dimension_numbers = #tpu.dot_dimension_numbers<[1], [0], [0], [1], [0, 0, 1, 1], [], []>} : vector<16x16xbf16>, vector<16x128xbf16>, vector<16x128xf32> -> vector<16x128xf32>
    %c0_3 = arith.constant 0 : index
    %c0_4 = arith.constant 0 : index
    %3 = vector.load %arg3[%c0_3, %c0_4] : memref<1x128xf32, #tpu.memory_space<vmem>>, vector<1x128xf32>
    %4 = vector.broadcast %3 : vector<1x128xf32> to vector<16x128xf32>
    %5 = arith.mulf %2, %4 : vector<16x128xf32>
    %c0_5 = arith.constant 0 : index
    %c0_6 = arith.constant 0 : index
    %6 = vector.load %arg4[%c0_5, %c0_6] : memref<1x128xf32, #tpu.memory_space<vmem>>, vector<1x128xf32>
    %7 = vector.broadcast %6 : vector<1x128xf32> to vector<16x128xf32>
    %8 = arith.addf %5, %7 : vector<16x128xf32>
    %c0_7 = arith.constant 0 : index
    %9 = memref.load %arg6[%c0_7] : memref<2xf32, #tpu.memory_space<smem>>
    %cst_8 = arith.constant 0.000000e+00 : f32
    %10 = vector.broadcast %cst_8 : f32 to vector<16x128xf32>
    %11 = arith.cmpf oge, %8, %10 : vector<16x128xf32>
    %12 = vector.broadcast %9 : f32 to vector<16x128xf32>
    %13 = arith.mulf %12, %8 : vector<16x128xf32>
    %14 = arith.select %11, %8, %13 : vector<16x128xi1>, vector<16x128xf32>
    %c0_9 = arith.constant 0 : index
    %c0_10 = arith.constant 0 : index
    %15 = vector.load %arg5[%c0_9, %c0_10] : memref<16x128xbf16, #tpu.memory_space<vmem>>, vector<16x128xbf16>
    %16 = arith.extf %15 : vector<16x128xbf16> to vector<16x128xf32>
    %17 = arith.addf %14, %16 : vector<16x128xf32>
    %c1 = arith.constant 1 : index
    %18 = memref.load %arg6[%c1] : memref<2xf32, #tpu.memory_space<smem>>
    %cst_11 = arith.constant 0.000000e+00 : f32
    %19 = vector.broadcast %cst_11 : f32 to vector<16x128xf32>
    %20 = arith.cmpf oge, %17, %19 : vector<16x128xf32>
    %21 = vector.broadcast %18 : f32 to vector<16x128xf32>
    %22 = arith.mulf %21, %17 : vector<16x128xf32>
    %23 = arith.select %20, %17, %22 : vector<16x128xi1>, vector<16x128xf32>
    %24 = arith.truncf %23 : vector<16x128xf32> to vector<16x128xbf16>
    %c0_12 = arith.constant 0 : index
    %c0_13 = arith.constant 0 : index
    %25 = vector.load %arg7[%c0_12, %c0_13] : memref<16x128xbf16, #tpu.memory_space<vmem>>, vector<16x128xbf16>
    tpu.vector_store %arg7[%c0_12, %c0_13], %24 {strides = array<i32>} : memref<16x128xbf16, #tpu.memory_space<vmem>>, vector<16x128xbf16>,
    return
  }
  func.func @transform_0(%arg0: i32) -> (i32, i32) {
    %c0_i32 = arith.constant 0 : i32
    %c0_i32_0 = arith.constant 0 : i32
    return %arg0, %c0_i32 : i32, i32
  }
  func.func @transform_1(%arg0: i32) -> (i32, i32) {
    %c0_i32 = arith.constant 0 : i32
    %c0_i32_0 = arith.constant 0 : i32
    %c0_i32_1 = arith.constant 0 : i32
    return %c0_i32, %c0_i32_0 : i32, i32
  }
  func.func @transform_2(%arg0: i32) -> (i32, i32) {
    %c0_i32 = arith.constant 0 : i32
    %c0_i32_0 = arith.constant 0 : i32
    %c0_i32_1 = arith.constant 0 : i32
    return %c0_i32, %c0_i32_0 : i32, i32
  }
  func.func @transform_3(%arg0: i32) -> (i32, i32) {
    %c0_i32 = arith.constant 0 : i32
    %c0_i32_0 = arith.constant 0 : i32
    %c0_i32_1 = arith.constant 0 : i32
    return %c0_i32, %c0_i32_0 : i32, i32
  }
  func.func @transform_4(%arg0: i32) -> (i32, i32) {
    %c0_i32 = arith.constant 0 : i32
    %c0_i32_0 = arith.constant 0 : i32
    return %arg0, %c0_i32 : i32, i32
  }
  func.func @transform_5(%arg0: i32) -> i32 {
    %c0_i32 = arith.constant 0 : i32
    %c0_i32_0 = arith.constant 0 : i32
    return %c0_i32 : i32
  }
  func.func @transform_6(%arg0: i32) -> (i32, i32) {
    %c0_i32 = arith.constant 0 : i32
    %c0_i32_0 = arith.constant 0 : i32
    return %arg0, %c0_i32 : i32, i32
  }
}

module attributes {stable_mosaic.version = 11 : i64} {
  func.func @_mm_bn_prelu_kernel(%arg0: i32, %arg1: memref<16x128xbf16, #tpu.memory_space<vmem>>, %arg2: memref<128x32xbf16, #tpu.memory_space<vmem>>, %arg3: memref<1x32xf32, #tpu.memory_space<vmem>>, %arg4: memref<1x32xf32, #tpu.memory_space<vmem>>, %arg5: memref<1xf32, #tpu.memory_space<smem>>, %arg6: memref<16x32xbf16, #tpu.memory_space<vmem>>) attributes {dimension_semantics = [#tpu.dimension_semantics<parallel>], iteration_bounds = array<i64: 1>, scalar_prefetch = 0 : i64, scratch_operands = 0 : i64, tpu.core_type = #tpu.core_type<tc>, window_params = [{transform_indices = @transform_0, window_bounds = array<i64: 16, 128>}, {pipeline_mode = #tpu.pipeline_mode<synchronous>, transform_indices = @transform_1, window_bounds = array<i64: 128, 32>}, {pipeline_mode = #tpu.pipeline_mode<synchronous>, transform_indices = @transform_2, window_bounds = array<i64: 1, 32>}, {pipeline_mode = #tpu.pipeline_mode<synchronous>, transform_indices = @transform_3, window_bounds = array<i64: 1, 32>}, {transform_indices = @transform_4, window_bounds = array<i64: 1>}, {transform_indices = @transform_5, window_bounds = array<i64: 16, 32>}]} {
    %c0 = arith.constant 0 : index
    %c0_0 = arith.constant 0 : index
    %0 = vector.load %arg1[%c0, %c0_0] : memref<16x128xbf16, #tpu.memory_space<vmem>>, vector<16x128xbf16>
    %c0_1 = arith.constant 0 : index
    %c0_2 = arith.constant 0 : index
    %1 = vector.load %arg2[%c0_1, %c0_2] : memref<128x32xbf16, #tpu.memory_space<vmem>>, vector<128x32xbf16>
    %cst = arith.constant dense<0.000000e+00> : vector<16x32xf32>
    %2 = tpu.matmul %0, %1, %cst {dimension_numbers = #tpu.dot_dimension_numbers<[1], [0], [0], [1], [0, 0, 1, 1], [], []>} : vector<16x128xbf16>, vector<128x32xbf16>, vector<16x32xf32> -> vector<16x32xf32>
    %c0_3 = arith.constant 0 : index
    %c0_4 = arith.constant 0 : index
    %3 = vector.load %arg3[%c0_3, %c0_4] : memref<1x32xf32, #tpu.memory_space<vmem>>, vector<1x32xf32>
    %4 = vector.broadcast %3 : vector<1x32xf32> to vector<16x32xf32>
    %5 = arith.mulf %2, %4 : vector<16x32xf32>
    %c0_5 = arith.constant 0 : index
    %c0_6 = arith.constant 0 : index
    %6 = vector.load %arg4[%c0_5, %c0_6] : memref<1x32xf32, #tpu.memory_space<vmem>>, vector<1x32xf32>
    %7 = vector.broadcast %6 : vector<1x32xf32> to vector<16x32xf32>
    %8 = arith.addf %5, %7 : vector<16x32xf32>
    %c0_7 = arith.constant 0 : index
    %9 = memref.load %arg5[%c0_7] : memref<1xf32, #tpu.memory_space<smem>>
    %cst_8 = arith.constant 0.000000e+00 : f32
    %10 = vector.broadcast %cst_8 : f32 to vector<16x32xf32>
    %11 = arith.cmpf oge, %8, %10 : vector<16x32xf32>
    %12 = vector.broadcast %9 : f32 to vector<16x32xf32>
    %13 = arith.mulf %12, %8 : vector<16x32xf32>
    %14 = arith.select %11, %8, %13 : vector<16x32xi1>, vector<16x32xf32>
    %15 = arith.truncf %14 : vector<16x32xf32> to vector<16x32xbf16>
    %c0_9 = arith.constant 0 : index
    %c0_10 = arith.constant 0 : index
    %16 = vector.load %arg6[%c0_9, %c0_10] : memref<16x32xbf16, #tpu.memory_space<vmem>>, vector<16x32xbf16>
    tpu.vector_store %arg6[%c0_9, %c0_10], %15 {strides = array<i32>} : memref<16x32xbf16, #tpu.memory_space<vmem>>, vector<16x32xbf16>,
    return
  }
  func.func @transform_0(%arg0: i32) -> (i32, i32) {
    %c0_i32 = arith.constant 0 : i32
    %c0_i32_0 = arith.constant 0 : i32
    return %arg0, %c0_i32 : i32, i32
  }
  func.func @transform_1(%arg0: i32) -> (i32, i32) {
    %c0_i32 = arith.constant 0 : i32
    %c0_i32_0 = arith.constant 0 : i32
    %c0_i32_1 = arith.constant 0 : i32
    return %c0_i32, %c0_i32_0 : i32, i32
  }
  func.func @transform_2(%arg0: i32) -> (i32, i32) {
    %c0_i32 = arith.constant 0 : i32
    %c0_i32_0 = arith.constant 0 : i32
    %c0_i32_1 = arith.constant 0 : i32
    return %c0_i32, %c0_i32_0 : i32, i32
  }
  func.func @transform_3(%arg0: i32) -> (i32, i32) {
    %c0_i32 = arith.constant 0 : i32
    %c0_i32_0 = arith.constant 0 : i32
    %c0_i32_1 = arith.constant 0 : i32
    return %c0_i32, %c0_i32_0 : i32, i32
  }
  func.func @transform_4(%arg0: i32) -> i32 {
    %c0_i32 = arith.constant 0 : i32
    %c0_i32_0 = arith.constant 0 : i32
    return %c0_i32 : i32
  }
  func.func @transform_5(%arg0: i32) -> (i32, i32) {
    %c0_i32 = arith.constant 0 : i32
    %c0_i32_0 = arith.constant 0 : i32
    return %arg0, %c0_i32 : i32, i32
  }
}

module attributes {stable_mosaic.version = 11 : i64} {
  func.func @_mm_bn_prelu_kernel(%arg0: i32, %arg1: memref<16x288xbf16, #tpu.memory_space<vmem>>, %arg2: memref<288x32xbf16, #tpu.memory_space<vmem>>, %arg3: memref<1x32xf32, #tpu.memory_space<vmem>>, %arg4: memref<1x32xf32, #tpu.memory_space<vmem>>, %arg5: memref<1xf32, #tpu.memory_space<smem>>, %arg6: memref<16x32xbf16, #tpu.memory_space<vmem>>) attributes {dimension_semantics = [#tpu.dimension_semantics<parallel>], iteration_bounds = array<i64: 1>, scalar_prefetch = 0 : i64, scratch_operands = 0 : i64, tpu.core_type = #tpu.core_type<tc>, window_params = [{transform_indices = @transform_0, window_bounds = array<i64: 16, 288>}, {pipeline_mode = #tpu.pipeline_mode<synchronous>, transform_indices = @transform_1, window_bounds = array<i64: 288, 32>}, {pipeline_mode = #tpu.pipeline_mode<synchronous>, transform_indices = @transform_2, window_bounds = array<i64: 1, 32>}, {pipeline_mode = #tpu.pipeline_mode<synchronous>, transform_indices = @transform_3, window_bounds = array<i64: 1, 32>}, {transform_indices = @transform_4, window_bounds = array<i64: 1>}, {transform_indices = @transform_5, window_bounds = array<i64: 16, 32>}]} {
    %c0 = arith.constant 0 : index
    %c0_0 = arith.constant 0 : index
    %0 = vector.load %arg1[%c0, %c0_0] : memref<16x288xbf16, #tpu.memory_space<vmem>>, vector<16x288xbf16>
    %c0_1 = arith.constant 0 : index
    %c0_2 = arith.constant 0 : index
    %1 = vector.load %arg2[%c0_1, %c0_2] : memref<288x32xbf16, #tpu.memory_space<vmem>>, vector<288x32xbf16>
    %cst = arith.constant dense<0.000000e+00> : vector<16x32xf32>
    %2 = tpu.matmul %0, %1, %cst {dimension_numbers = #tpu.dot_dimension_numbers<[1], [0], [0], [1], [0, 0, 1, 1], [], []>} : vector<16x288xbf16>, vector<288x32xbf16>, vector<16x32xf32> -> vector<16x32xf32>
    %c0_3 = arith.constant 0 : index
    %c0_4 = arith.constant 0 : index
    %3 = vector.load %arg3[%c0_3, %c0_4] : memref<1x32xf32, #tpu.memory_space<vmem>>, vector<1x32xf32>
    %4 = vector.broadcast %3 : vector<1x32xf32> to vector<16x32xf32>
    %5 = arith.mulf %2, %4 : vector<16x32xf32>
    %c0_5 = arith.constant 0 : index
    %c0_6 = arith.constant 0 : index
    %6 = vector.load %arg4[%c0_5, %c0_6] : memref<1x32xf32, #tpu.memory_space<vmem>>, vector<1x32xf32>
    %7 = vector.broadcast %6 : vector<1x32xf32> to vector<16x32xf32>
    %8 = arith.addf %5, %7 : vector<16x32xf32>
    %c0_7 = arith.constant 0 : index
    %9 = memref.load %arg5[%c0_7] : memref<1xf32, #tpu.memory_space<smem>>
    %cst_8 = arith.constant 0.000000e+00 : f32
    %10 = vector.broadcast %cst_8 : f32 to vector<16x32xf32>
    %11 = arith.cmpf oge, %8, %10 : vector<16x32xf32>
    %12 = vector.broadcast %9 : f32 to vector<16x32xf32>
    %13 = arith.mulf %12, %8 : vector<16x32xf32>
    %14 = arith.select %11, %8, %13 : vector<16x32xi1>, vector<16x32xf32>
    %15 = arith.truncf %14 : vector<16x32xf32> to vector<16x32xbf16>
    %c0_9 = arith.constant 0 : index
    %c0_10 = arith.constant 0 : index
    %16 = vector.load %arg6[%c0_9, %c0_10] : memref<16x32xbf16, #tpu.memory_space<vmem>>, vector<16x32xbf16>
    tpu.vector_store %arg6[%c0_9, %c0_10], %15 {strides = array<i32>} : memref<16x32xbf16, #tpu.memory_space<vmem>>, vector<16x32xbf16>,
    return
  }
  func.func @transform_0(%arg0: i32) -> (i32, i32) {
    %c0_i32 = arith.constant 0 : i32
    %c0_i32_0 = arith.constant 0 : i32
    return %arg0, %c0_i32 : i32, i32
  }
  func.func @transform_1(%arg0: i32) -> (i32, i32) {
    %c0_i32 = arith.constant 0 : i32
    %c0_i32_0 = arith.constant 0 : i32
    %c0_i32_1 = arith.constant 0 : i32
    return %c0_i32, %c0_i32_0 : i32, i32
  }
  func.func @transform_2(%arg0: i32) -> (i32, i32) {
    %c0_i32 = arith.constant 0 : i32
    %c0_i32_0 = arith.constant 0 : i32
    %c0_i32_1 = arith.constant 0 : i32
    return %c0_i32, %c0_i32_0 : i32, i32
  }
  func.func @transform_3(%arg0: i32) -> (i32, i32) {
    %c0_i32 = arith.constant 0 : i32
    %c0_i32_0 = arith.constant 0 : i32
    %c0_i32_1 = arith.constant 0 : i32
    return %c0_i32, %c0_i32_0 : i32, i32
  }
  func.func @transform_4(%arg0: i32) -> i32 {
    %c0_i32 = arith.constant 0 : i32
    %c0_i32_0 = arith.constant 0 : i32
    return %c0_i32 : i32
  }
  func.func @transform_5(%arg0: i32) -> (i32, i32) {
    %c0_i32 = arith.constant 0 : i32
    %c0_i32_0 = arith.constant 0 : i32
    return %arg0, %c0_i32 : i32, i32
  }
}

module attributes {stable_mosaic.version = 11 : i64} {
  func.func @_mm_bn_prelu_res_kernel(%arg0: i32, %arg1: memref<16x32xbf16, #tpu.memory_space<vmem>>, %arg2: memref<32x128xbf16, #tpu.memory_space<vmem>>, %arg3: memref<1x128xf32, #tpu.memory_space<vmem>>, %arg4: memref<1x128xf32, #tpu.memory_space<vmem>>, %arg5: memref<16x128xbf16, #tpu.memory_space<vmem>>, %arg6: memref<2xf32, #tpu.memory_space<smem>>, %arg7: memref<16x128xbf16, #tpu.memory_space<vmem>>) attributes {dimension_semantics = [#tpu.dimension_semantics<parallel>], iteration_bounds = array<i64: 1>, scalar_prefetch = 0 : i64, scratch_operands = 0 : i64, tpu.core_type = #tpu.core_type<tc>, window_params = [{transform_indices = @transform_0, window_bounds = array<i64: 16, 32>}, {pipeline_mode = #tpu.pipeline_mode<synchronous>, transform_indices = @transform_1, window_bounds = array<i64: 32, 128>}, {pipeline_mode = #tpu.pipeline_mode<synchronous>, transform_indices = @transform_2, window_bounds = array<i64: 1, 128>}, {pipeline_mode = #tpu.pipeline_mode<synchronous>, transform_indices = @transform_3, window_bounds = array<i64: 1, 128>}, {transform_indices = @transform_4, window_bounds = array<i64: 16, 128>}, {transform_indices = @transform_5, window_bounds = array<i64: 2>}, {transform_indices = @transform_6, window_bounds = array<i64: 16, 128>}]} {
    %c0 = arith.constant 0 : index
    %c0_0 = arith.constant 0 : index
    %0 = vector.load %arg1[%c0, %c0_0] : memref<16x32xbf16, #tpu.memory_space<vmem>>, vector<16x32xbf16>
    %c0_1 = arith.constant 0 : index
    %c0_2 = arith.constant 0 : index
    %1 = vector.load %arg2[%c0_1, %c0_2] : memref<32x128xbf16, #tpu.memory_space<vmem>>, vector<32x128xbf16>
    %cst = arith.constant dense<0.000000e+00> : vector<16x128xf32>
    %2 = tpu.matmul %0, %1, %cst {dimension_numbers = #tpu.dot_dimension_numbers<[1], [0], [0], [1], [0, 0, 1, 1], [], []>} : vector<16x32xbf16>, vector<32x128xbf16>, vector<16x128xf32> -> vector<16x128xf32>
    %c0_3 = arith.constant 0 : index
    %c0_4 = arith.constant 0 : index
    %3 = vector.load %arg3[%c0_3, %c0_4] : memref<1x128xf32, #tpu.memory_space<vmem>>, vector<1x128xf32>
    %4 = vector.broadcast %3 : vector<1x128xf32> to vector<16x128xf32>
    %5 = arith.mulf %2, %4 : vector<16x128xf32>
    %c0_5 = arith.constant 0 : index
    %c0_6 = arith.constant 0 : index
    %6 = vector.load %arg4[%c0_5, %c0_6] : memref<1x128xf32, #tpu.memory_space<vmem>>, vector<1x128xf32>
    %7 = vector.broadcast %6 : vector<1x128xf32> to vector<16x128xf32>
    %8 = arith.addf %5, %7 : vector<16x128xf32>
    %c0_7 = arith.constant 0 : index
    %9 = memref.load %arg6[%c0_7] : memref<2xf32, #tpu.memory_space<smem>>
    %cst_8 = arith.constant 0.000000e+00 : f32
    %10 = vector.broadcast %cst_8 : f32 to vector<16x128xf32>
    %11 = arith.cmpf oge, %8, %10 : vector<16x128xf32>
    %12 = vector.broadcast %9 : f32 to vector<16x128xf32>
    %13 = arith.mulf %12, %8 : vector<16x128xf32>
    %14 = arith.select %11, %8, %13 : vector<16x128xi1>, vector<16x128xf32>
    %c0_9 = arith.constant 0 : index
    %c0_10 = arith.constant 0 : index
    %15 = vector.load %arg5[%c0_9, %c0_10] : memref<16x128xbf16, #tpu.memory_space<vmem>>, vector<16x128xbf16>
    %16 = arith.extf %15 : vector<16x128xbf16> to vector<16x128xf32>
    %17 = arith.addf %14, %16 : vector<16x128xf32>
    %c1 = arith.constant 1 : index
    %18 = memref.load %arg6[%c1] : memref<2xf32, #tpu.memory_space<smem>>
    %cst_11 = arith.constant 0.000000e+00 : f32
    %19 = vector.broadcast %cst_11 : f32 to vector<16x128xf32>
    %20 = arith.cmpf oge, %17, %19 : vector<16x128xf32>
    %21 = vector.broadcast %18 : f32 to vector<16x128xf32>
    %22 = arith.mulf %21, %17 : vector<16x128xf32>
    %23 = arith.select %20, %17, %22 : vector<16x128xi1>, vector<16x128xf32>
    %24 = arith.truncf %23 : vector<16x128xf32> to vector<16x128xbf16>
    %c0_12 = arith.constant 0 : index
    %c0_13 = arith.constant 0 : index
    %25 = vector.load %arg7[%c0_12, %c0_13] : memref<16x128xbf16, #tpu.memory_space<vmem>>, vector<16x128xbf16>
    tpu.vector_store %arg7[%c0_12, %c0_13], %24 {strides = array<i32>} : memref<16x128xbf16, #tpu.memory_space<vmem>>, vector<16x128xbf16>,
    return
  }
  func.func @transform_0(%arg0: i32) -> (i32, i32) {
    %c0_i32 = arith.constant 0 : i32
    %c0_i32_0 = arith.constant 0 : i32
    return %arg0, %c0_i32 : i32, i32
  }
  func.func @transform_1(%arg0: i32) -> (i32, i32) {
    %c0_i32 = arith.constant 0 : i32
    %c0_i32_0 = arith.constant 0 : i32
    %c0_i32_1 = arith.constant 0 : i32
    return %c0_i32, %c0_i32_0 : i32, i32
  }
  func.func @transform_2(%arg0: i32) -> (i32, i32) {
    %c0_i32 = arith.constant 0 : i32
    %c0_i32_0 = arith.constant 0 : i32
    %c0_i32_1 = arith.constant 0 : i32
    return %c0_i32, %c0_i32_0 : i32, i32
  }
  func.func @transform_3(%arg0: i32) -> (i32, i32) {
    %c0_i32 = arith.constant 0 : i32
    %c0_i32_0 = arith.constant 0 : i32
    %c0_i32_1 = arith.constant 0 : i32
    return %c0_i32, %c0_i32_0 : i32, i32
  }
  func.func @transform_4(%arg0: i32) -> (i32, i32) {
    %c0_i32 = arith.constant 0 : i32
    %c0_i32_0 = arith.constant 0 : i32
    return %arg0, %c0_i32 : i32, i32
  }
  func.func @transform_5(%arg0: i32) -> i32 {
    %c0_i32 = arith.constant 0 : i32
    %c0_i32_0 = arith.constant 0 : i32
    return %c0_i32 : i32
  }
  func.func @transform_6(%arg0: i32) -> (i32, i32) {
    %c0_i32 = arith.constant 0 : i32
    %c0_i32_0 = arith.constant 0 : i32
    return %arg0, %c0_i32 : i32, i32
  }
}

module attributes {stable_mosaic.version = 11 : i64} {
  func.func @_mm_bn_prelu_kernel(%arg0: i32, %arg1: memref<16x160xbf16, #tpu.memory_space<vmem>>, %arg2: memref<160x32xbf16, #tpu.memory_space<vmem>>, %arg3: memref<1x32xf32, #tpu.memory_space<vmem>>, %arg4: memref<1x32xf32, #tpu.memory_space<vmem>>, %arg5: memref<1xf32, #tpu.memory_space<smem>>, %arg6: memref<16x32xbf16, #tpu.memory_space<vmem>>) attributes {dimension_semantics = [#tpu.dimension_semantics<parallel>], iteration_bounds = array<i64: 1>, scalar_prefetch = 0 : i64, scratch_operands = 0 : i64, tpu.core_type = #tpu.core_type<tc>, window_params = [{transform_indices = @transform_0, window_bounds = array<i64: 16, 160>}, {pipeline_mode = #tpu.pipeline_mode<synchronous>, transform_indices = @transform_1, window_bounds = array<i64: 160, 32>}, {pipeline_mode = #tpu.pipeline_mode<synchronous>, transform_indices = @transform_2, window_bounds = array<i64: 1, 32>}, {pipeline_mode = #tpu.pipeline_mode<synchronous>, transform_indices = @transform_3, window_bounds = array<i64: 1, 32>}, {transform_indices = @transform_4, window_bounds = array<i64: 1>}, {transform_indices = @transform_5, window_bounds = array<i64: 16, 32>}]} {
    %c0 = arith.constant 0 : index
    %c0_0 = arith.constant 0 : index
    %0 = vector.load %arg1[%c0, %c0_0] : memref<16x160xbf16, #tpu.memory_space<vmem>>, vector<16x160xbf16>
    %c0_1 = arith.constant 0 : index
    %c0_2 = arith.constant 0 : index
    %1 = vector.load %arg2[%c0_1, %c0_2] : memref<160x32xbf16, #tpu.memory_space<vmem>>, vector<160x32xbf16>
    %cst = arith.constant dense<0.000000e+00> : vector<16x32xf32>
    %2 = tpu.matmul %0, %1, %cst {dimension_numbers = #tpu.dot_dimension_numbers<[1], [0], [0], [1], [0, 0, 1, 1], [], []>} : vector<16x160xbf16>, vector<160x32xbf16>, vector<16x32xf32> -> vector<16x32xf32>
    %c0_3 = arith.constant 0 : index
    %c0_4 = arith.constant 0 : index
    %3 = vector.load %arg3[%c0_3, %c0_4] : memref<1x32xf32, #tpu.memory_space<vmem>>, vector<1x32xf32>
    %4 = vector.broadcast %3 : vector<1x32xf32> to vector<16x32xf32>
    %5 = arith.mulf %2, %4 : vector<16x32xf32>
    %c0_5 = arith.constant 0 : index
    %c0_6 = arith.constant 0 : index
    %6 = vector.load %arg4[%c0_5, %c0_6] : memref<1x32xf32, #tpu.memory_space<vmem>>, vector<1x32xf32>
    %7 = vector.broadcast %6 : vector<1x32xf32> to vector<16x32xf32>
    %8 = arith.addf %5, %7 : vector<16x32xf32>
    %c0_7 = arith.constant 0 : index
    %9 = memref.load %arg5[%c0_7] : memref<1xf32, #tpu.memory_space<smem>>
    %cst_8 = arith.constant 0.000000e+00 : f32
    %10 = vector.broadcast %cst_8 : f32 to vector<16x32xf32>
    %11 = arith.cmpf oge, %8, %10 : vector<16x32xf32>
    %12 = vector.broadcast %9 : f32 to vector<16x32xf32>
    %13 = arith.mulf %12, %8 : vector<16x32xf32>
    %14 = arith.select %11, %8, %13 : vector<16x32xi1>, vector<16x32xf32>
    %15 = arith.truncf %14 : vector<16x32xf32> to vector<16x32xbf16>
    %c0_9 = arith.constant 0 : index
    %c0_10 = arith.constant 0 : index
    %16 = vector.load %arg6[%c0_9, %c0_10] : memref<16x32xbf16, #tpu.memory_space<vmem>>, vector<16x32xbf16>
    tpu.vector_store %arg6[%c0_9, %c0_10], %15 {strides = array<i32>} : memref<16x32xbf16, #tpu.memory_space<vmem>>, vector<16x32xbf16>,
    return
  }
  func.func @transform_0(%arg0: i32) -> (i32, i32) {
    %c0_i32 = arith.constant 0 : i32
    %c0_i32_0 = arith.constant 0 : i32
    return %arg0, %c0_i32 : i32, i32
  }
  func.func @transform_1(%arg0: i32) -> (i32, i32) {
    %c0_i32 = arith.constant 0 : i32
    %c0_i32_0 = arith.constant 0 : i32
    %c0_i32_1 = arith.constant 0 : i32
    return %c0_i32, %c0_i32_0 : i32, i32
  }
  func.func @transform_2(%arg0: i32) -> (i32, i32) {
    %c0_i32 = arith.constant 0 : i32
    %c0_i32_0 = arith.constant 0 : i32
    %c0_i32_1 = arith.constant 0 : i32
    return %c0_i32, %c0_i32_0 : i32, i32
  }
  func.func @transform_3(%arg0: i32) -> (i32, i32) {
    %c0_i32 = arith.constant 0 : i32
    %c0_i32_0 = arith.constant 0 : i32
    %c0_i32_1 = arith.constant 0 : i32
    return %c0_i32, %c0_i32_0 : i32, i32
  }
  func.func @transform_4(%arg0: i32) -> i32 {
    %c0_i32 = arith.constant 0 : i32
    %c0_i32_0 = arith.constant 0 : i32
    return %c0_i32 : i32
  }
  func.func @transform_5(%arg0: i32) -> (i32, i32) {
    %c0_i32 = arith.constant 0 : i32
    %c0_i32_0 = arith.constant 0 : i32
    return %arg0, %c0_i32 : i32, i32
  }
}

module attributes {stable_mosaic.version = 11 : i64} {
  func.func @_mm_bn_prelu_kernel(%arg0: i32, %arg1: memref<16x128xbf16, #tpu.memory_space<vmem>>, %arg2: memref<128x64xbf16, #tpu.memory_space<vmem>>, %arg3: memref<1x64xf32, #tpu.memory_space<vmem>>, %arg4: memref<1x64xf32, #tpu.memory_space<vmem>>, %arg5: memref<1xf32, #tpu.memory_space<smem>>, %arg6: memref<16x64xbf16, #tpu.memory_space<vmem>>) attributes {dimension_semantics = [#tpu.dimension_semantics<parallel>], iteration_bounds = array<i64: 1>, scalar_prefetch = 0 : i64, scratch_operands = 0 : i64, tpu.core_type = #tpu.core_type<tc>, window_params = [{transform_indices = @transform_0, window_bounds = array<i64: 16, 128>}, {pipeline_mode = #tpu.pipeline_mode<synchronous>, transform_indices = @transform_1, window_bounds = array<i64: 128, 64>}, {pipeline_mode = #tpu.pipeline_mode<synchronous>, transform_indices = @transform_2, window_bounds = array<i64: 1, 64>}, {pipeline_mode = #tpu.pipeline_mode<synchronous>, transform_indices = @transform_3, window_bounds = array<i64: 1, 64>}, {transform_indices = @transform_4, window_bounds = array<i64: 1>}, {transform_indices = @transform_5, window_bounds = array<i64: 16, 64>}]} {
    %c0 = arith.constant 0 : index
    %c0_0 = arith.constant 0 : index
    %0 = vector.load %arg1[%c0, %c0_0] : memref<16x128xbf16, #tpu.memory_space<vmem>>, vector<16x128xbf16>
    %c0_1 = arith.constant 0 : index
    %c0_2 = arith.constant 0 : index
    %1 = vector.load %arg2[%c0_1, %c0_2] : memref<128x64xbf16, #tpu.memory_space<vmem>>, vector<128x64xbf16>
    %cst = arith.constant dense<0.000000e+00> : vector<16x64xf32>
    %2 = tpu.matmul %0, %1, %cst {dimension_numbers = #tpu.dot_dimension_numbers<[1], [0], [0], [1], [0, 0, 1, 1], [], []>} : vector<16x128xbf16>, vector<128x64xbf16>, vector<16x64xf32> -> vector<16x64xf32>
    %c0_3 = arith.constant 0 : index
    %c0_4 = arith.constant 0 : index
    %3 = vector.load %arg3[%c0_3, %c0_4] : memref<1x64xf32, #tpu.memory_space<vmem>>, vector<1x64xf32>
    %4 = vector.broadcast %3 : vector<1x64xf32> to vector<16x64xf32>
    %5 = arith.mulf %2, %4 : vector<16x64xf32>
    %c0_5 = arith.constant 0 : index
    %c0_6 = arith.constant 0 : index
    %6 = vector.load %arg4[%c0_5, %c0_6] : memref<1x64xf32, #tpu.memory_space<vmem>>, vector<1x64xf32>
    %7 = vector.broadcast %6 : vector<1x64xf32> to vector<16x64xf32>
    %8 = arith.addf %5, %7 : vector<16x64xf32>
    %c0_7 = arith.constant 0 : index
    %9 = memref.load %arg5[%c0_7] : memref<1xf32, #tpu.memory_space<smem>>
    %cst_8 = arith.constant 0.000000e+00 : f32
    %10 = vector.broadcast %cst_8 : f32 to vector<16x64xf32>
    %11 = arith.cmpf oge, %8, %10 : vector<16x64xf32>
    %12 = vector.broadcast %9 : f32 to vector<16x64xf32>
    %13 = arith.mulf %12, %8 : vector<16x64xf32>
    %14 = arith.select %11, %8, %13 : vector<16x64xi1>, vector<16x64xf32>
    %15 = arith.truncf %14 : vector<16x64xf32> to vector<16x64xbf16>
    %c0_9 = arith.constant 0 : index
    %c0_10 = arith.constant 0 : index
    %16 = vector.load %arg6[%c0_9, %c0_10] : memref<16x64xbf16, #tpu.memory_space<vmem>>, vector<16x64xbf16>
    tpu.vector_store %arg6[%c0_9, %c0_10], %15 {strides = array<i32>} : memref<16x64xbf16, #tpu.memory_space<vmem>>, vector<16x64xbf16>,
    return
  }
  func.func @transform_0(%arg0: i32) -> (i32, i32) {
    %c0_i32 = arith.constant 0 : i32
    %c0_i32_0 = arith.constant 0 : i32
    return %arg0, %c0_i32 : i32, i32
  }
  func.func @transform_1(%arg0: i32) -> (i32, i32) {
    %c0_i32 = arith.constant 0 : i32
    %c0_i32_0 = arith.constant 0 : i32
    %c0_i32_1 = arith.constant 0 : i32
    return %c0_i32, %c0_i32_0 : i32, i32
  }
  func.func @transform_2(%arg0: i32) -> (i32, i32) {
    %c0_i32 = arith.constant 0 : i32
    %c0_i32_0 = arith.constant 0 : i32
    %c0_i32_1 = arith.constant 0 : i32
    return %c0_i32, %c0_i32_0 : i32, i32
  }
  func.func @transform_3(%arg0: i32) -> (i32, i32) {
    %c0_i32 = arith.constant 0 : i32
    %c0_i32_0 = arith.constant 0 : i32
    %c0_i32_1 = arith.constant 0 : i32
    return %c0_i32, %c0_i32_0 : i32, i32
  }
  func.func @transform_4(%arg0: i32) -> i32 {
    %c0_i32 = arith.constant 0 : i32
    %c0_i32_0 = arith.constant 0 : i32
    return %c0_i32 : i32
  }
  func.func @transform_5(%arg0: i32) -> (i32, i32) {
    %c0_i32 = arith.constant 0 : i32
    %c0_i32_0 = arith.constant 0 : i32
    return %arg0, %c0_i32 : i32, i32
  }
}

module attributes {stable_mosaic.version = 11 : i64} {
  func.func @_mm_bn_prelu_kernel(%arg0: i32, %arg1: memref<16x128xbf16, #tpu.memory_space<vmem>>, %arg2: memref<128x128xbf16, #tpu.memory_space<vmem>>, %arg3: memref<1x128xf32, #tpu.memory_space<vmem>>, %arg4: memref<1x128xf32, #tpu.memory_space<vmem>>, %arg5: memref<1xf32, #tpu.memory_space<smem>>, %arg6: memref<16x128xbf16, #tpu.memory_space<vmem>>) attributes {dimension_semantics = [#tpu.dimension_semantics<parallel>], iteration_bounds = array<i64: 1>, scalar_prefetch = 0 : i64, scratch_operands = 0 : i64, tpu.core_type = #tpu.core_type<tc>, window_params = [{transform_indices = @transform_0, window_bounds = array<i64: 16, 128>}, {pipeline_mode = #tpu.pipeline_mode<synchronous>, transform_indices = @transform_1, window_bounds = array<i64: 128, 128>}, {pipeline_mode = #tpu.pipeline_mode<synchronous>, transform_indices = @transform_2, window_bounds = array<i64: 1, 128>}, {pipeline_mode = #tpu.pipeline_mode<synchronous>, transform_indices = @transform_3, window_bounds = array<i64: 1, 128>}, {transform_indices = @transform_4, window_bounds = array<i64: 1>}, {transform_indices = @transform_5, window_bounds = array<i64: 16, 128>}]} {
    %c0 = arith.constant 0 : index
    %c0_0 = arith.constant 0 : index
    %0 = vector.load %arg1[%c0, %c0_0] : memref<16x128xbf16, #tpu.memory_space<vmem>>, vector<16x128xbf16>
    %c0_1 = arith.constant 0 : index
    %c0_2 = arith.constant 0 : index
    %1 = vector.load %arg2[%c0_1, %c0_2] : memref<128x128xbf16, #tpu.memory_space<vmem>>, vector<128x128xbf16>
    %cst = arith.constant dense<0.000000e+00> : vector<16x128xf32>
    %2 = tpu.matmul %0, %1, %cst {dimension_numbers = #tpu.dot_dimension_numbers<[1], [0], [0], [1], [0, 0, 1, 1], [], []>} : vector<16x128xbf16>, vector<128x128xbf16>, vector<16x128xf32> -> vector<16x128xf32>
    %c0_3 = arith.constant 0 : index
    %c0_4 = arith.constant 0 : index
    %3 = vector.load %arg3[%c0_3, %c0_4] : memref<1x128xf32, #tpu.memory_space<vmem>>, vector<1x128xf32>
    %4 = vector.broadcast %3 : vector<1x128xf32> to vector<16x128xf32>
    %5 = arith.mulf %2, %4 : vector<16x128xf32>
    %c0_5 = arith.constant 0 : index
    %c0_6 = arith.constant 0 : index
    %6 = vector.load %arg4[%c0_5, %c0_6] : memref<1x128xf32, #tpu.memory_space<vmem>>, vector<1x128xf32>
    %7 = vector.broadcast %6 : vector<1x128xf32> to vector<16x128xf32>
    %8 = arith.addf %5, %7 : vector<16x128xf32>
    %c0_7 = arith.constant 0 : index
    %9 = memref.load %arg5[%c0_7] : memref<1xf32, #tpu.memory_space<smem>>
    %cst_8 = arith.constant 0.000000e+00 : f32
    %10 = vector.broadcast %cst_8 : f32 to vector<16x128xf32>
    %11 = arith.cmpf oge, %8, %10 : vector<16x128xf32>
    %12 = vector.broadcast %9 : f32 to vector<16x128xf32>
    %13 = arith.mulf %12, %8 : vector<16x128xf32>
    %14 = arith.select %11, %8, %13 : vector<16x128xi1>, vector<16x128xf32>
    %15 = arith.truncf %14 : vector<16x128xf32> to vector<16x128xbf16>
    %c0_9 = arith.constant 0 : index
    %c0_10 = arith.constant 0 : index
    %16 = vector.load %arg6[%c0_9, %c0_10] : memref<16x128xbf16, #tpu.memory_space<vmem>>, vector<16x128xbf16>
    tpu.vector_store %arg6[%c0_9, %c0_10], %15 {strides = array<i32>} : memref<16x128xbf16, #tpu.memory_space<vmem>>, vector<16x128xbf16>,
    return
  }
  func.func @transform_0(%arg0: i32) -> (i32, i32) {
    %c0_i32 = arith.constant 0 : i32
    %c0_i32_0 = arith.constant 0 : i32
    return %arg0, %c0_i32 : i32, i32
  }
  func.func @transform_1(%arg0: i32) -> (i32, i32) {
    %c0_i32 = arith.constant 0 : i32
    %c0_i32_0 = arith.constant 0 : i32
    %c0_i32_1 = arith.constant 0 : i32
    return %c0_i32, %c0_i32_0 : i32, i32
  }
  func.func @transform_2(%arg0: i32) -> (i32, i32) {
    %c0_i32 = arith.constant 0 : i32
    %c0_i32_0 = arith.constant 0 : i32
    %c0_i32_1 = arith.constant 0 : i32
    return %c0_i32, %c0_i32_0 : i32, i32
  }
  func.func @transform_3(%arg0: i32) -> (i32, i32) {
    %c0_i32 = arith.constant 0 : i32
    %c0_i32_0 = arith.constant 0 : i32
    %c0_i32_1 = arith.constant 0 : i32
    return %c0_i32, %c0_i32_0 : i32, i32
  }
  func.func @transform_4(%arg0: i32) -> i32 {
    %c0_i32 = arith.constant 0 : i32
    %c0_i32_0 = arith.constant 0 : i32
    return %c0_i32 : i32
  }
  func.func @transform_5(%arg0: i32) -> (i32, i32) {
    %c0_i32 = arith.constant 0 : i32
    %c0_i32_0 = arith.constant 0 : i32
    return %arg0, %c0_i32 : i32, i32
  }
}

module attributes {stable_mosaic.version = 11 : i64} {
  func.func @_mm_bn_prelu_res_kernel(%arg0: i32, %arg1: memref<32x32xbf16, #tpu.memory_space<vmem>>, %arg2: memref<32x64xbf16, #tpu.memory_space<vmem>>, %arg3: memref<1x64xf32, #tpu.memory_space<vmem>>, %arg4: memref<1x64xf32, #tpu.memory_space<vmem>>, %arg5: memref<32x64xbf16, #tpu.memory_space<vmem>>, %arg6: memref<2xf32, #tpu.memory_space<smem>>, %arg7: memref<32x64xbf16, #tpu.memory_space<vmem>>) attributes {dimension_semantics = [#tpu.dimension_semantics<parallel>], iteration_bounds = array<i64: 1>, scalar_prefetch = 0 : i64, scratch_operands = 0 : i64, tpu.core_type = #tpu.core_type<tc>, window_params = [{transform_indices = @transform_0, window_bounds = array<i64: 32, 32>}, {pipeline_mode = #tpu.pipeline_mode<synchronous>, transform_indices = @transform_1, window_bounds = array<i64: 32, 64>}, {pipeline_mode = #tpu.pipeline_mode<synchronous>, transform_indices = @transform_2, window_bounds = array<i64: 1, 64>}, {pipeline_mode = #tpu.pipeline_mode<synchronous>, transform_indices = @transform_3, window_bounds = array<i64: 1, 64>}, {transform_indices = @transform_4, window_bounds = array<i64: 32, 64>}, {transform_indices = @transform_5, window_bounds = array<i64: 2>}, {transform_indices = @transform_6, window_bounds = array<i64: 32, 64>}]} {
    %c0 = arith.constant 0 : index
    %c0_0 = arith.constant 0 : index
    %0 = vector.load %arg1[%c0, %c0_0] : memref<32x32xbf16, #tpu.memory_space<vmem>>, vector<32x32xbf16>
    %c0_1 = arith.constant 0 : index
    %c0_2 = arith.constant 0 : index
    %1 = vector.load %arg2[%c0_1, %c0_2] : memref<32x64xbf16, #tpu.memory_space<vmem>>, vector<32x64xbf16>
    %cst = arith.constant dense<0.000000e+00> : vector<32x64xf32>
    %2 = tpu.matmul %0, %1, %cst {dimension_numbers = #tpu.dot_dimension_numbers<[1], [0], [0], [1], [0, 0, 1, 1], [], []>} : vector<32x32xbf16>, vector<32x64xbf16>, vector<32x64xf32> -> vector<32x64xf32>
    %c0_3 = arith.constant 0 : index
    %c0_4 = arith.constant 0 : index
    %3 = vector.load %arg3[%c0_3, %c0_4] : memref<1x64xf32, #tpu.memory_space<vmem>>, vector<1x64xf32>
    %4 = vector.broadcast %3 : vector<1x64xf32> to vector<32x64xf32>
    %5 = arith.mulf %2, %4 : vector<32x64xf32>
    %c0_5 = arith.constant 0 : index
    %c0_6 = arith.constant 0 : index
    %6 = vector.load %arg4[%c0_5, %c0_6] : memref<1x64xf32, #tpu.memory_space<vmem>>, vector<1x64xf32>
    %7 = vector.broadcast %6 : vector<1x64xf32> to vector<32x64xf32>
    %8 = arith.addf %5, %7 : vector<32x64xf32>
    %c0_7 = arith.constant 0 : index
    %9 = memref.load %arg6[%c0_7] : memref<2xf32, #tpu.memory_space<smem>>
    %cst_8 = arith.constant 0.000000e+00 : f32
    %10 = vector.broadcast %cst_8 : f32 to vector<32x64xf32>
    %11 = arith.cmpf oge, %8, %10 : vector<32x64xf32>
    %12 = vector.broadcast %9 : f32 to vector<32x64xf32>
    %13 = arith.mulf %12, %8 : vector<32x64xf32>
    %14 = arith.select %11, %8, %13 : vector<32x64xi1>, vector<32x64xf32>
    %c0_9 = arith.constant 0 : index
    %c0_10 = arith.constant 0 : index
    %15 = vector.load %arg5[%c0_9, %c0_10] : memref<32x64xbf16, #tpu.memory_space<vmem>>, vector<32x64xbf16>
    %16 = arith.extf %15 : vector<32x64xbf16> to vector<32x64xf32>
    %17 = arith.addf %14, %16 : vector<32x64xf32>
    %c1 = arith.constant 1 : index
    %18 = memref.load %arg6[%c1] : memref<2xf32, #tpu.memory_space<smem>>
    %cst_11 = arith.constant 0.000000e+00 : f32
    %19 = vector.broadcast %cst_11 : f32 to vector<32x64xf32>
    %20 = arith.cmpf oge, %17, %19 : vector<32x64xf32>
    %21 = vector.broadcast %18 : f32 to vector<32x64xf32>
    %22 = arith.mulf %21, %17 : vector<32x64xf32>
    %23 = arith.select %20, %17, %22 : vector<32x64xi1>, vector<32x64xf32>
    %24 = arith.truncf %23 : vector<32x64xf32> to vector<32x64xbf16>
    %c0_12 = arith.constant 0 : index
    %c0_13 = arith.constant 0 : index
    %25 = vector.load %arg7[%c0_12, %c0_13] : memref<32x64xbf16, #tpu.memory_space<vmem>>, vector<32x64xbf16>
    tpu.vector_store %arg7[%c0_12, %c0_13], %24 {strides = array<i32>} : memref<32x64xbf16, #tpu.memory_space<vmem>>, vector<32x64xbf16>,
    return
  }
  func.func @transform_0(%arg0: i32) -> (i32, i32) {
    %c0_i32 = arith.constant 0 : i32
    %c0_i32_0 = arith.constant 0 : i32
    return %arg0, %c0_i32 : i32, i32
  }
  func.func @transform_1(%arg0: i32) -> (i32, i32) {
    %c0_i32 = arith.constant 0 : i32
    %c0_i32_0 = arith.constant 0 : i32
    %c0_i32_1 = arith.constant 0 : i32
    return %c0_i32, %c0_i32_0 : i32, i32
  }
  func.func @transform_2(%arg0: i32) -> (i32, i32) {
    %c0_i32 = arith.constant 0 : i32
    %c0_i32_0 = arith.constant 0 : i32
    %c0_i32_1 = arith.constant 0 : i32
    return %c0_i32, %c0_i32_0 : i32, i32
  }
  func.func @transform_3(%arg0: i32) -> (i32, i32) {
    %c0_i32 = arith.constant 0 : i32
    %c0_i32_0 = arith.constant 0 : i32
    %c0_i32_1 = arith.constant 0 : i32
    return %c0_i32, %c0_i32_0 : i32, i32
  }
  func.func @transform_4(%arg0: i32) -> (i32, i32) {
    %c0_i32 = arith.constant 0 : i32
    %c0_i32_0 = arith.constant 0 : i32
    return %arg0, %c0_i32 : i32, i32
  }
  func.func @transform_5(%arg0: i32) -> i32 {
    %c0_i32 = arith.constant 0 : i32
    %c0_i32_0 = arith.constant 0 : i32
    return %c0_i32 : i32
  }
  func.func @transform_6(%arg0: i32) -> (i32, i32) {
    %c0_i32 = arith.constant 0 : i32
    %c0_i32_0 = arith.constant 0 : i32
    return %arg0, %c0_i32 : i32, i32
  }
}

module attributes {stable_mosaic.version = 11 : i64} {
  func.func @_mm_bn_prelu_kernel(%arg0: i32, %arg1: memref<32x64xbf16, #tpu.memory_space<vmem>>, %arg2: memref<64x64xbf16, #tpu.memory_space<vmem>>, %arg3: memref<1x64xf32, #tpu.memory_space<vmem>>, %arg4: memref<1x64xf32, #tpu.memory_space<vmem>>, %arg5: memref<1xf32, #tpu.memory_space<smem>>, %arg6: memref<32x64xbf16, #tpu.memory_space<vmem>>) attributes {dimension_semantics = [#tpu.dimension_semantics<parallel>], iteration_bounds = array<i64: 1>, scalar_prefetch = 0 : i64, scratch_operands = 0 : i64, tpu.core_type = #tpu.core_type<tc>, window_params = [{transform_indices = @transform_0, window_bounds = array<i64: 32, 64>}, {pipeline_mode = #tpu.pipeline_mode<synchronous>, transform_indices = @transform_1, window_bounds = array<i64: 64, 64>}, {pipeline_mode = #tpu.pipeline_mode<synchronous>, transform_indices = @transform_2, window_bounds = array<i64: 1, 64>}, {pipeline_mode = #tpu.pipeline_mode<synchronous>, transform_indices = @transform_3, window_bounds = array<i64: 1, 64>}, {transform_indices = @transform_4, window_bounds = array<i64: 1>}, {transform_indices = @transform_5, window_bounds = array<i64: 32, 64>}]} {
    %c0 = arith.constant 0 : index
    %c0_0 = arith.constant 0 : index
    %0 = vector.load %arg1[%c0, %c0_0] : memref<32x64xbf16, #tpu.memory_space<vmem>>, vector<32x64xbf16>
    %c0_1 = arith.constant 0 : index
    %c0_2 = arith.constant 0 : index
    %1 = vector.load %arg2[%c0_1, %c0_2] : memref<64x64xbf16, #tpu.memory_space<vmem>>, vector<64x64xbf16>
    %cst = arith.constant dense<0.000000e+00> : vector<32x64xf32>
    %2 = tpu.matmul %0, %1, %cst {dimension_numbers = #tpu.dot_dimension_numbers<[1], [0], [0], [1], [0, 0, 1, 1], [], []>} : vector<32x64xbf16>, vector<64x64xbf16>, vector<32x64xf32> -> vector<32x64xf32>
    %c0_3 = arith.constant 0 : index
    %c0_4 = arith.constant 0 : index
    %3 = vector.load %arg3[%c0_3, %c0_4] : memref<1x64xf32, #tpu.memory_space<vmem>>, vector<1x64xf32>
    %4 = vector.broadcast %3 : vector<1x64xf32> to vector<32x64xf32>
    %5 = arith.mulf %2, %4 : vector<32x64xf32>
    %c0_5 = arith.constant 0 : index
    %c0_6 = arith.constant 0 : index
    %6 = vector.load %arg4[%c0_5, %c0_6] : memref<1x64xf32, #tpu.memory_space<vmem>>, vector<1x64xf32>
    %7 = vector.broadcast %6 : vector<1x64xf32> to vector<32x64xf32>
    %8 = arith.addf %5, %7 : vector<32x64xf32>
    %c0_7 = arith.constant 0 : index
    %9 = memref.load %arg5[%c0_7] : memref<1xf32, #tpu.memory_space<smem>>
    %cst_8 = arith.constant 0.000000e+00 : f32
    %10 = vector.broadcast %cst_8 : f32 to vector<32x64xf32>
    %11 = arith.cmpf oge, %8, %10 : vector<32x64xf32>
    %12 = vector.broadcast %9 : f32 to vector<32x64xf32>
    %13 = arith.mulf %12, %8 : vector<32x64xf32>
    %14 = arith.select %11, %8, %13 : vector<32x64xi1>, vector<32x64xf32>
    %15 = arith.truncf %14 : vector<32x64xf32> to vector<32x64xbf16>
    %c0_9 = arith.constant 0 : index
    %c0_10 = arith.constant 0 : index
    %16 = vector.load %arg6[%c0_9, %c0_10] : memref<32x64xbf16, #tpu.memory_space<vmem>>, vector<32x64xbf16>
    tpu.vector_store %arg6[%c0_9, %c0_10], %15 {strides = array<i32>} : memref<32x64xbf16, #tpu.memory_space<vmem>>, vector<32x64xbf16>,
    return
  }
  func.func @transform_0(%arg0: i32) -> (i32, i32) {
    %c0_i32 = arith.constant 0 : i32
    %c0_i32_0 = arith.constant 0 : i32
    return %arg0, %c0_i32 : i32, i32
  }
  func.func @transform_1(%arg0: i32) -> (i32, i32) {
    %c0_i32 = arith.constant 0 : i32
    %c0_i32_0 = arith.constant 0 : i32
    %c0_i32_1 = arith.constant 0 : i32
    return %c0_i32, %c0_i32_0 : i32, i32
  }
  func.func @transform_2(%arg0: i32) -> (i32, i32) {
    %c0_i32 = arith.constant 0 : i32
    %c0_i32_0 = arith.constant 0 : i32
    %c0_i32_1 = arith.constant 0 : i32
    return %c0_i32, %c0_i32_0 : i32, i32
  }
  func.func @transform_3(%arg0: i32) -> (i32, i32) {
    %c0_i32 = arith.constant 0 : i32
    %c0_i32_0 = arith.constant 0 : i32
    %c0_i32_1 = arith.constant 0 : i32
    return %c0_i32, %c0_i32_0 : i32, i32
  }
  func.func @transform_4(%arg0: i32) -> i32 {
    %c0_i32 = arith.constant 0 : i32
    %c0_i32_0 = arith.constant 0 : i32
    return %c0_i32 : i32
  }
  func.func @transform_5(%arg0: i32) -> (i32, i32) {
    %c0_i32 = arith.constant 0 : i32
    %c0_i32_0 = arith.constant 0 : i32
    return %arg0, %c0_i32 : i32, i32
  }
}

module attributes {stable_mosaic.version = 11 : i64} {
  func.func @_mm_bn_prelu_res_kernel(%arg0: i32, %arg1: memref<128x16xbf16, #tpu.memory_space<vmem>>, %arg2: memref<16x16xbf16, #tpu.memory_space<vmem>>, %arg3: memref<1x16xf32, #tpu.memory_space<vmem>>, %arg4: memref<1x16xf32, #tpu.memory_space<vmem>>, %arg5: memref<128x16xbf16, #tpu.memory_space<vmem>>, %arg6: memref<2xf32, #tpu.memory_space<smem>>, %arg7: memref<128x16xbf16, #tpu.memory_space<vmem>>) attributes {dimension_semantics = [#tpu.dimension_semantics<parallel>], iteration_bounds = array<i64: 1>, scalar_prefetch = 0 : i64, scratch_operands = 0 : i64, tpu.core_type = #tpu.core_type<tc>, window_params = [{transform_indices = @transform_0, window_bounds = array<i64: 128, 16>}, {pipeline_mode = #tpu.pipeline_mode<synchronous>, transform_indices = @transform_1, window_bounds = array<i64: 16, 16>}, {pipeline_mode = #tpu.pipeline_mode<synchronous>, transform_indices = @transform_2, window_bounds = array<i64: 1, 16>}, {pipeline_mode = #tpu.pipeline_mode<synchronous>, transform_indices = @transform_3, window_bounds = array<i64: 1, 16>}, {transform_indices = @transform_4, window_bounds = array<i64: 128, 16>}, {transform_indices = @transform_5, window_bounds = array<i64: 2>}, {transform_indices = @transform_6, window_bounds = array<i64: 128, 16>}]} {
    %c0 = arith.constant 0 : index
    %c0_0 = arith.constant 0 : index
    %0 = vector.load %arg1[%c0, %c0_0] : memref<128x16xbf16, #tpu.memory_space<vmem>>, vector<128x16xbf16>
    %c0_1 = arith.constant 0 : index
    %c0_2 = arith.constant 0 : index
    %1 = vector.load %arg2[%c0_1, %c0_2] : memref<16x16xbf16, #tpu.memory_space<vmem>>, vector<16x16xbf16>
    %cst = arith.constant dense<0.000000e+00> : vector<128x16xf32>
    %2 = tpu.matmul %0, %1, %cst {dimension_numbers = #tpu.dot_dimension_numbers<[1], [0], [0], [1], [0, 0, 1, 1], [], []>} : vector<128x16xbf16>, vector<16x16xbf16>, vector<128x16xf32> -> vector<128x16xf32>
    %c0_3 = arith.constant 0 : index
    %c0_4 = arith.constant 0 : index
    %3 = vector.load %arg3[%c0_3, %c0_4] : memref<1x16xf32, #tpu.memory_space<vmem>>, vector<1x16xf32>
    %4 = vector.broadcast %3 : vector<1x16xf32> to vector<128x16xf32>
    %5 = arith.mulf %2, %4 : vector<128x16xf32>
    %c0_5 = arith.constant 0 : index
    %c0_6 = arith.constant 0 : index
    %6 = vector.load %arg4[%c0_5, %c0_6] : memref<1x16xf32, #tpu.memory_space<vmem>>, vector<1x16xf32>
    %7 = vector.broadcast %6 : vector<1x16xf32> to vector<128x16xf32>
    %8 = arith.addf %5, %7 : vector<128x16xf32>
    %c0_7 = arith.constant 0 : index
    %9 = memref.load %arg6[%c0_7] : memref<2xf32, #tpu.memory_space<smem>>
    %cst_8 = arith.constant 0.000000e+00 : f32
    %10 = vector.broadcast %cst_8 : f32 to vector<128x16xf32>
    %11 = arith.cmpf oge, %8, %10 : vector<128x16xf32>
    %12 = vector.broadcast %9 : f32 to vector<128x16xf32>
    %13 = arith.mulf %12, %8 : vector<128x16xf32>
    %14 = arith.select %11, %8, %13 : vector<128x16xi1>, vector<128x16xf32>
    %c0_9 = arith.constant 0 : index
    %c0_10 = arith.constant 0 : index
    %15 = vector.load %arg5[%c0_9, %c0_10] : memref<128x16xbf16, #tpu.memory_space<vmem>>, vector<128x16xbf16>
    %16 = arith.extf %15 : vector<128x16xbf16> to vector<128x16xf32>
    %17 = arith.addf %14, %16 : vector<128x16xf32>
    %c1 = arith.constant 1 : index
    %18 = memref.load %arg6[%c1] : memref<2xf32, #tpu.memory_space<smem>>
    %cst_11 = arith.constant 0.000000e+00 : f32
    %19 = vector.broadcast %cst_11 : f32 to vector<128x16xf32>
    %20 = arith.cmpf oge, %17, %19 : vector<128x16xf32>
    %21 = vector.broadcast %18 : f32 to vector<128x16xf32>
    %22 = arith.mulf %21, %17 : vector<128x16xf32>
    %23 = arith.select %20, %17, %22 : vector<128x16xi1>, vector<128x16xf32>
    %24 = arith.truncf %23 : vector<128x16xf32> to vector<128x16xbf16>
    %c0_12 = arith.constant 0 : index
    %c0_13 = arith.constant 0 : index
    %25 = vector.load %arg7[%c0_12, %c0_13] : memref<128x16xbf16, #tpu.memory_space<vmem>>, vector<128x16xbf16>
    tpu.vector_store %arg7[%c0_12, %c0_13], %24 {strides = array<i32>} : memref<128x16xbf16, #tpu.memory_space<vmem>>, vector<128x16xbf16>,
    return
  }
  func.func @transform_0(%arg0: i32) -> (i32, i32) {
    %c0_i32 = arith.constant 0 : i32
    %c0_i32_0 = arith.constant 0 : i32
    return %arg0, %c0_i32 : i32, i32
  }
  func.func @transform_1(%arg0: i32) -> (i32, i32) {
    %c0_i32 = arith.constant 0 : i32
    %c0_i32_0 = arith.constant 0 : i32
    %c0_i32_1 = arith.constant 0 : i32
    return %c0_i32, %c0_i32_0 : i32, i32
  }
  func.func @transform_2(%arg0: i32) -> (i32, i32) {
    %c0_i32 = arith.constant 0 : i32
    %c0_i32_0 = arith.constant 0 : i32
    %c0_i32_1 = arith.constant 0 : i32
    return %c0_i32, %c0_i32_0 : i32, i32
  }
  func.func @transform_3(%arg0: i32) -> (i32, i32) {
    %c0_i32 = arith.constant 0 : i32
    %c0_i32_0 = arith.constant 0 : i32
    %c0_i32_1 = arith.constant 0 : i32
    return %c0_i32, %c0_i32_0 : i32, i32
  }
  func.func @transform_4(%arg0: i32) -> (i32, i32) {
    %c0_i32 = arith.constant 0 : i32
    %c0_i32_0 = arith.constant 0 : i32
    return %arg0, %c0_i32 : i32, i32
  }
  func.func @transform_5(%arg0: i32) -> i32 {
    %c0_i32 = arith.constant 0 : i32
    %c0_i32_0 = arith.constant 0 : i32
    return %c0_i32 : i32
  }
  func.func @transform_6(%arg0: i32) -> (i32, i32) {
    %c0_i32 = arith.constant 0 : i32
    %c0_i32_0 = arith.constant 0 : i32
    return %arg0, %c0_i32 : i32, i32
  }
}

module attributes {stable_mosaic.version = 11 : i64} {
  func.func @_mm_bn_prelu_kernel(%arg0: i32, %arg1: memref<128x16xbf16, #tpu.memory_space<vmem>>, %arg2: memref<16x4xbf16, #tpu.memory_space<vmem>>, %arg3: memref<1x4xf32, #tpu.memory_space<vmem>>, %arg4: memref<1x4xf32, #tpu.memory_space<vmem>>, %arg5: memref<1xf32, #tpu.memory_space<smem>>, %arg6: memref<128x4xbf16, #tpu.memory_space<vmem>>) attributes {dimension_semantics = [#tpu.dimension_semantics<parallel>], iteration_bounds = array<i64: 1>, scalar_prefetch = 0 : i64, scratch_operands = 0 : i64, tpu.core_type = #tpu.core_type<tc>, window_params = [{transform_indices = @transform_0, window_bounds = array<i64: 128, 16>}, {pipeline_mode = #tpu.pipeline_mode<synchronous>, transform_indices = @transform_1, window_bounds = array<i64: 16, 4>}, {pipeline_mode = #tpu.pipeline_mode<synchronous>, transform_indices = @transform_2, window_bounds = array<i64: 1, 4>}, {pipeline_mode = #tpu.pipeline_mode<synchronous>, transform_indices = @transform_3, window_bounds = array<i64: 1, 4>}, {transform_indices = @transform_4, window_bounds = array<i64: 1>}, {transform_indices = @transform_5, window_bounds = array<i64: 128, 4>}]} {
    %c0 = arith.constant 0 : index
    %c0_0 = arith.constant 0 : index
    %0 = vector.load %arg1[%c0, %c0_0] : memref<128x16xbf16, #tpu.memory_space<vmem>>, vector<128x16xbf16>
    %c0_1 = arith.constant 0 : index
    %c0_2 = arith.constant 0 : index
    %1 = vector.load %arg2[%c0_1, %c0_2] : memref<16x4xbf16, #tpu.memory_space<vmem>>, vector<16x4xbf16>
    %cst = arith.constant dense<0.000000e+00> : vector<128x4xf32>
    %2 = tpu.matmul %0, %1, %cst {dimension_numbers = #tpu.dot_dimension_numbers<[1], [0], [0], [1], [0, 0, 1, 1], [], []>} : vector<128x16xbf16>, vector<16x4xbf16>, vector<128x4xf32> -> vector<128x4xf32>
    %c0_3 = arith.constant 0 : index
    %c0_4 = arith.constant 0 : index
    %3 = vector.load %arg3[%c0_3, %c0_4] : memref<1x4xf32, #tpu.memory_space<vmem>>, vector<1x4xf32>
    %4 = vector.broadcast %3 : vector<1x4xf32> to vector<128x4xf32>
    %5 = arith.mulf %2, %4 : vector<128x4xf32>
    %c0_5 = arith.constant 0 : index
    %c0_6 = arith.constant 0 : index
    %6 = vector.load %arg4[%c0_5, %c0_6] : memref<1x4xf32, #tpu.memory_space<vmem>>, vector<1x4xf32>
    %7 = vector.broadcast %6 : vector<1x4xf32> to vector<128x4xf32>
    %8 = arith.addf %5, %7 : vector<128x4xf32>
    %c0_7 = arith.constant 0 : index
    %9 = memref.load %arg5[%c0_7] : memref<1xf32, #tpu.memory_space<smem>>
    %cst_8 = arith.constant 0.000000e+00 : f32
    %10 = vector.broadcast %cst_8 : f32 to vector<128x4xf32>
    %11 = arith.cmpf oge, %8, %10 : vector<128x4xf32>
    %12 = vector.broadcast %9 : f32 to vector<128x4xf32>
    %13 = arith.mulf %12, %8 : vector<128x4xf32>
    %14 = arith.select %11, %8, %13 : vector<128x4xi1>, vector<128x4xf32>
    %15 = arith.truncf %14 : vector<128x4xf32> to vector<128x4xbf16>
    %c0_9 = arith.constant 0 : index
    %c0_10 = arith.constant 0 : index
    %16 = vector.load %arg6[%c0_9, %c0_10] : memref<128x4xbf16, #tpu.memory_space<vmem>>, vector<128x4xbf16>
    tpu.vector_store %arg6[%c0_9, %c0_10], %15 {strides = array<i32>} : memref<128x4xbf16, #tpu.memory_space<vmem>>, vector<128x4xbf16>,
    return
  }
  func.func @transform_0(%arg0: i32) -> (i32, i32) {
    %c0_i32 = arith.constant 0 : i32
    %c0_i32_0 = arith.constant 0 : i32
    return %arg0, %c0_i32 : i32, i32
  }
  func.func @transform_1(%arg0: i32) -> (i32, i32) {
    %c0_i32 = arith.constant 0 : i32
    %c0_i32_0 = arith.constant 0 : i32
    %c0_i32_1 = arith.constant 0 : i32
    return %c0_i32, %c0_i32_0 : i32, i32
  }
  func.func @transform_2(%arg0: i32) -> (i32, i32) {
    %c0_i32 = arith.constant 0 : i32
    %c0_i32_0 = arith.constant 0 : i32
    %c0_i32_1 = arith.constant 0 : i32
    return %c0_i32, %c0_i32_0 : i32, i32
  }
  func.func @transform_3(%arg0: i32) -> (i32, i32) {
    %c0_i32 = arith.constant 0 : i32
    %c0_i32_0 = arith.constant 0 : i32
    %c0_i32_1 = arith.constant 0 : i32
    return %c0_i32, %c0_i32_0 : i32, i32
  }
  func.func @transform_4(%arg0: i32) -> i32 {
    %c0_i32 = arith.constant 0 : i32
    %c0_i32_0 = arith.constant 0 : i32
    return %c0_i32 : i32
  }
  func.func @transform_5(%arg0: i32) -> (i32, i32) {
    %c0_i32 = arith.constant 0 : i32
    %c0_i32_0 = arith.constant 0 : i32
    return %arg0, %c0_i32 : i32, i32
  }
}

module attributes {stable_mosaic.version = 11 : i64} {
  func.func @_mm_bn_prelu_kernel(%arg0: i32, %arg1: memref<128x36xbf16, #tpu.memory_space<vmem>>, %arg2: memref<36x4xbf16, #tpu.memory_space<vmem>>, %arg3: memref<1x4xf32, #tpu.memory_space<vmem>>, %arg4: memref<1x4xf32, #tpu.memory_space<vmem>>, %arg5: memref<1xf32, #tpu.memory_space<smem>>, %arg6: memref<128x4xbf16, #tpu.memory_space<vmem>>) attributes {dimension_semantics = [#tpu.dimension_semantics<parallel>], iteration_bounds = array<i64: 1>, scalar_prefetch = 0 : i64, scratch_operands = 0 : i64, tpu.core_type = #tpu.core_type<tc>, window_params = [{transform_indices = @transform_0, window_bounds = array<i64: 128, 36>}, {pipeline_mode = #tpu.pipeline_mode<synchronous>, transform_indices = @transform_1, window_bounds = array<i64: 36, 4>}, {pipeline_mode = #tpu.pipeline_mode<synchronous>, transform_indices = @transform_2, window_bounds = array<i64: 1, 4>}, {pipeline_mode = #tpu.pipeline_mode<synchronous>, transform_indices = @transform_3, window_bounds = array<i64: 1, 4>}, {transform_indices = @transform_4, window_bounds = array<i64: 1>}, {transform_indices = @transform_5, window_bounds = array<i64: 128, 4>}]} {
    %c0 = arith.constant 0 : index
    %c0_0 = arith.constant 0 : index
    %0 = vector.load %arg1[%c0, %c0_0] : memref<128x36xbf16, #tpu.memory_space<vmem>>, vector<128x36xbf16>
    %c0_1 = arith.constant 0 : index
    %c0_2 = arith.constant 0 : index
    %1 = vector.load %arg2[%c0_1, %c0_2] : memref<36x4xbf16, #tpu.memory_space<vmem>>, vector<36x4xbf16>
    %cst = arith.constant dense<0.000000e+00> : vector<128x4xf32>
    %2 = tpu.matmul %0, %1, %cst {dimension_numbers = #tpu.dot_dimension_numbers<[1], [0], [0], [1], [0, 0, 1, 1], [], []>} : vector<128x36xbf16>, vector<36x4xbf16>, vector<128x4xf32> -> vector<128x4xf32>
    %c0_3 = arith.constant 0 : index
    %c0_4 = arith.constant 0 : index
    %3 = vector.load %arg3[%c0_3, %c0_4] : memref<1x4xf32, #tpu.memory_space<vmem>>, vector<1x4xf32>
    %4 = vector.broadcast %3 : vector<1x4xf32> to vector<128x4xf32>
    %5 = arith.mulf %2, %4 : vector<128x4xf32>
    %c0_5 = arith.constant 0 : index
    %c0_6 = arith.constant 0 : index
    %6 = vector.load %arg4[%c0_5, %c0_6] : memref<1x4xf32, #tpu.memory_space<vmem>>, vector<1x4xf32>
    %7 = vector.broadcast %6 : vector<1x4xf32> to vector<128x4xf32>
    %8 = arith.addf %5, %7 : vector<128x4xf32>
    %c0_7 = arith.constant 0 : index
    %9 = memref.load %arg5[%c0_7] : memref<1xf32, #tpu.memory_space<smem>>
    %cst_8 = arith.constant 0.000000e+00 : f32
    %10 = vector.broadcast %cst_8 : f32 to vector<128x4xf32>
    %11 = arith.cmpf oge, %8, %10 : vector<128x4xf32>
    %12 = vector.broadcast %9 : f32 to vector<128x4xf32>
    %13 = arith.mulf %12, %8 : vector<128x4xf32>
    %14 = arith.select %11, %8, %13 : vector<128x4xi1>, vector<128x4xf32>
    %15 = arith.truncf %14 : vector<128x4xf32> to vector<128x4xbf16>
    %c0_9 = arith.constant 0 : index
    %c0_10 = arith.constant 0 : index
    %16 = vector.load %arg6[%c0_9, %c0_10] : memref<128x4xbf16, #tpu.memory_space<vmem>>, vector<128x4xbf16>
    tpu.vector_store %arg6[%c0_9, %c0_10], %15 {strides = array<i32>} : memref<128x4xbf16, #tpu.memory_space<vmem>>, vector<128x4xbf16>,
    return
  }
  func.func @transform_0(%arg0: i32) -> (i32, i32) {
    %c0_i32 = arith.constant 0 : i32
    %c0_i32_0 = arith.constant 0 : i32
    return %arg0, %c0_i32 : i32, i32
  }
  func.func @transform_1(%arg0: i32) -> (i32, i32) {
    %c0_i32 = arith.constant 0 : i32
    %c0_i32_0 = arith.constant 0 : i32
    %c0_i32_1 = arith.constant 0 : i32
    return %c0_i32, %c0_i32_0 : i32, i32
  }
  func.func @transform_2(%arg0: i32) -> (i32, i32) {
    %c0_i32 = arith.constant 0 : i32
    %c0_i32_0 = arith.constant 0 : i32
    %c0_i32_1 = arith.constant 0 : i32
    return %c0_i32, %c0_i32_0 : i32, i32
  }
  func.func @transform_3(%arg0: i32) -> (i32, i32) {
    %c0_i32 = arith.constant 0 : i32
    %c0_i32_0 = arith.constant 0 : i32
    %c0_i32_1 = arith.constant 0 : i32
    return %c0_i32, %c0_i32_0 : i32, i32
  }
  func.func @transform_4(%arg0: i32) -> i32 {
    %c0_i32 = arith.constant 0 : i32
    %c0_i32_0 = arith.constant 0 : i32
    return %c0_i32 : i32
  }
  func.func @transform_5(%arg0: i32) -> (i32, i32) {
    %c0_i32 = arith.constant 0 : i32
    %c0_i32_0 = arith.constant 0 : i32
    return %arg0, %c0_i32 : i32, i32
  }
}

module attributes {stable_mosaic.version = 11 : i64} {
  func.func @_mm_bn_prelu_res_kernel(%arg0: i32, %arg1: memref<128x4xbf16, #tpu.memory_space<vmem>>, %arg2: memref<4x16xbf16, #tpu.memory_space<vmem>>, %arg3: memref<1x16xf32, #tpu.memory_space<vmem>>, %arg4: memref<1x16xf32, #tpu.memory_space<vmem>>, %arg5: memref<128x16xbf16, #tpu.memory_space<vmem>>, %arg6: memref<2xf32, #tpu.memory_space<smem>>, %arg7: memref<128x16xbf16, #tpu.memory_space<vmem>>) attributes {dimension_semantics = [#tpu.dimension_semantics<parallel>], iteration_bounds = array<i64: 1>, scalar_prefetch = 0 : i64, scratch_operands = 0 : i64, tpu.core_type = #tpu.core_type<tc>, window_params = [{transform_indices = @transform_0, window_bounds = array<i64: 128, 4>}, {pipeline_mode = #tpu.pipeline_mode<synchronous>, transform_indices = @transform_1, window_bounds = array<i64: 4, 16>}, {pipeline_mode = #tpu.pipeline_mode<synchronous>, transform_indices = @transform_2, window_bounds = array<i64: 1, 16>}, {pipeline_mode = #tpu.pipeline_mode<synchronous>, transform_indices = @transform_3, window_bounds = array<i64: 1, 16>}, {transform_indices = @transform_4, window_bounds = array<i64: 128, 16>}, {transform_indices = @transform_5, window_bounds = array<i64: 2>}, {transform_indices = @transform_6, window_bounds = array<i64: 128, 16>}]} {
    %c0 = arith.constant 0 : index
    %c0_0 = arith.constant 0 : index
    %0 = vector.load %arg1[%c0, %c0_0] : memref<128x4xbf16, #tpu.memory_space<vmem>>, vector<128x4xbf16>
    %c0_1 = arith.constant 0 : index
    %c0_2 = arith.constant 0 : index
    %1 = vector.load %arg2[%c0_1, %c0_2] : memref<4x16xbf16, #tpu.memory_space<vmem>>, vector<4x16xbf16>
    %cst = arith.constant dense<0.000000e+00> : vector<128x16xf32>
    %2 = tpu.matmul %0, %1, %cst {dimension_numbers = #tpu.dot_dimension_numbers<[1], [0], [0], [1], [0, 0, 1, 1], [], []>} : vector<128x4xbf16>, vector<4x16xbf16>, vector<128x16xf32> -> vector<128x16xf32>
    %c0_3 = arith.constant 0 : index
    %c0_4 = arith.constant 0 : index
    %3 = vector.load %arg3[%c0_3, %c0_4] : memref<1x16xf32, #tpu.memory_space<vmem>>, vector<1x16xf32>
    %4 = vector.broadcast %3 : vector<1x16xf32> to vector<128x16xf32>
    %5 = arith.mulf %2, %4 : vector<128x16xf32>
    %c0_5 = arith.constant 0 : index
    %c0_6 = arith.constant 0 : index
    %6 = vector.load %arg4[%c0_5, %c0_6] : memref<1x16xf32, #tpu.memory_space<vmem>>, vector<1x16xf32>
    %7 = vector.broadcast %6 : vector<1x16xf32> to vector<128x16xf32>
    %8 = arith.addf %5, %7 : vector<128x16xf32>
    %c0_7 = arith.constant 0 : index
    %9 = memref.load %arg6[%c0_7] : memref<2xf32, #tpu.memory_space<smem>>
    %cst_8 = arith.constant 0.000000e+00 : f32
    %10 = vector.broadcast %cst_8 : f32 to vector<128x16xf32>
    %11 = arith.cmpf oge, %8, %10 : vector<128x16xf32>
    %12 = vector.broadcast %9 : f32 to vector<128x16xf32>
    %13 = arith.mulf %12, %8 : vector<128x16xf32>
    %14 = arith.select %11, %8, %13 : vector<128x16xi1>, vector<128x16xf32>
    %c0_9 = arith.constant 0 : index
    %c0_10 = arith.constant 0 : index
    %15 = vector.load %arg5[%c0_9, %c0_10] : memref<128x16xbf16, #tpu.memory_space<vmem>>, vector<128x16xbf16>
    %16 = arith.extf %15 : vector<128x16xbf16> to vector<128x16xf32>
    %17 = arith.addf %14, %16 : vector<128x16xf32>
    %c1 = arith.constant 1 : index
    %18 = memref.load %arg6[%c1] : memref<2xf32, #tpu.memory_space<smem>>
    %cst_11 = arith.constant 0.000000e+00 : f32
    %19 = vector.broadcast %cst_11 : f32 to vector<128x16xf32>
    %20 = arith.cmpf oge, %17, %19 : vector<128x16xf32>
    %21 = vector.broadcast %18 : f32 to vector<128x16xf32>
    %22 = arith.mulf %21, %17 : vector<128x16xf32>
    %23 = arith.select %20, %17, %22 : vector<128x16xi1>, vector<128x16xf32>
    %24 = arith.truncf %23 : vector<128x16xf32> to vector<128x16xbf16>
    %c0_12 = arith.constant 0 : index
    %c0_13 = arith.constant 0 : index
    %25 = vector.load %arg7[%c0_12, %c0_13] : memref<128x16xbf16, #tpu.memory_space<vmem>>, vector<128x16xbf16>
    tpu.vector_store %arg7[%c0_12, %c0_13], %24 {strides = array<i32>} : memref<128x16xbf16, #tpu.memory_space<vmem>>, vector<128x16xbf16>,
    return
  }
  func.func @transform_0(%arg0: i32) -> (i32, i32) {
    %c0_i32 = arith.constant 0 : i32
    %c0_i32_0 = arith.constant 0 : i32
    return %arg0, %c0_i32 : i32, i32
  }
  func.func @transform_1(%arg0: i32) -> (i32, i32) {
    %c0_i32 = arith.constant 0 : i32
    %c0_i32_0 = arith.constant 0 : i32
    %c0_i32_1 = arith.constant 0 : i32
    return %c0_i32, %c0_i32_0 : i32, i32
  }
  func.func @transform_2(%arg0: i32) -> (i32, i32) {
    %c0_i32 = arith.constant 0 : i32
    %c0_i32_0 = arith.constant 0 : i32
    %c0_i32_1 = arith.constant 0 : i32
    return %c0_i32, %c0_i32_0 : i32, i32
  }
  func.func @transform_3(%arg0: i32) -> (i32, i32) {
    %c0_i32 = arith.constant 0 : i32
    %c0_i32_0 = arith.constant 0 : i32
    %c0_i32_1 = arith.constant 0 : i32
    return %c0_i32, %c0_i32_0 : i32, i32
  }
  func.func @transform_4(%arg0: i32) -> (i32, i32) {
    %c0_i32 = arith.constant 0 : i32
    %c0_i32_0 = arith.constant 0 : i32
    return %arg0, %c0_i32 : i32, i32
  }
  func.func @transform_5(%arg0: i32) -> i32 {
    %c0_i32 = arith.constant 0 : i32
    %c0_i32_0 = arith.constant 0 : i32
    return %c0_i32 : i32
  }
  func.func @transform_6(%arg0: i32) -> (i32, i32) {
    %c0_i32 = arith.constant 0 : i32
    %c0_i32_0 = arith.constant 0 : i32
    return %arg0, %c0_i32 : i32, i32
  }
}

module attributes {stable_mosaic.version = 11 : i64} {
  func.func @_mm_bn_prelu_kernel(%arg0: i32, %arg1: memref<128x64xbf16, #tpu.memory_space<vmem>>, %arg2: memref<64x12xbf16, #tpu.memory_space<vmem>>, %arg3: memref<1x12xf32, #tpu.memory_space<vmem>>, %arg4: memref<1x12xf32, #tpu.memory_space<vmem>>, %arg5: memref<1xf32, #tpu.memory_space<smem>>, %arg6: memref<128x12xbf16, #tpu.memory_space<vmem>>) attributes {dimension_semantics = [#tpu.dimension_semantics<parallel>], iteration_bounds = array<i64: 1>, scalar_prefetch = 0 : i64, scratch_operands = 0 : i64, tpu.core_type = #tpu.core_type<tc>, window_params = [{transform_indices = @transform_0, window_bounds = array<i64: 128, 64>}, {pipeline_mode = #tpu.pipeline_mode<synchronous>, transform_indices = @transform_1, window_bounds = array<i64: 64, 12>}, {pipeline_mode = #tpu.pipeline_mode<synchronous>, transform_indices = @transform_2, window_bounds = array<i64: 1, 12>}, {pipeline_mode = #tpu.pipeline_mode<synchronous>, transform_indices = @transform_3, window_bounds = array<i64: 1, 12>}, {transform_indices = @transform_4, window_bounds = array<i64: 1>}, {transform_indices = @transform_5, window_bounds = array<i64: 128, 12>}]} {
    %c0 = arith.constant 0 : index
    %c0_0 = arith.constant 0 : index
    %0 = vector.load %arg1[%c0, %c0_0] : memref<128x64xbf16, #tpu.memory_space<vmem>>, vector<128x64xbf16>
    %c0_1 = arith.constant 0 : index
    %c0_2 = arith.constant 0 : index
    %1 = vector.load %arg2[%c0_1, %c0_2] : memref<64x12xbf16, #tpu.memory_space<vmem>>, vector<64x12xbf16>
    %cst = arith.constant dense<0.000000e+00> : vector<128x12xf32>
    %2 = tpu.matmul %0, %1, %cst {dimension_numbers = #tpu.dot_dimension_numbers<[1], [0], [0], [1], [0, 0, 1, 1], [], []>} : vector<128x64xbf16>, vector<64x12xbf16>, vector<128x12xf32> -> vector<128x12xf32>
    %c0_3 = arith.constant 0 : index
    %c0_4 = arith.constant 0 : index
    %3 = vector.load %arg3[%c0_3, %c0_4] : memref<1x12xf32, #tpu.memory_space<vmem>>, vector<1x12xf32>
    %4 = vector.broadcast %3 : vector<1x12xf32> to vector<128x12xf32>
    %5 = arith.mulf %2, %4 : vector<128x12xf32>
    %c0_5 = arith.constant 0 : index
    %c0_6 = arith.constant 0 : index
    %6 = vector.load %arg4[%c0_5, %c0_6] : memref<1x12xf32, #tpu.memory_space<vmem>>, vector<1x12xf32>
    %7 = vector.broadcast %6 : vector<1x12xf32> to vector<128x12xf32>
    %8 = arith.addf %5, %7 : vector<128x12xf32>
    %c0_7 = arith.constant 0 : index
    %9 = memref.load %arg5[%c0_7] : memref<1xf32, #tpu.memory_space<smem>>
    %cst_8 = arith.constant 0.000000e+00 : f32
    %10 = vector.broadcast %cst_8 : f32 to vector<128x12xf32>
    %11 = arith.cmpf oge, %8, %10 : vector<128x12xf32>
    %12 = vector.broadcast %9 : f32 to vector<128x12xf32>
    %13 = arith.mulf %12, %8 : vector<128x12xf32>
    %14 = arith.select %11, %8, %13 : vector<128x12xi1>, vector<128x12xf32>
    %15 = arith.truncf %14 : vector<128x12xf32> to vector<128x12xbf16>
    %c0_9 = arith.constant 0 : index
    %c0_10 = arith.constant 0 : index
    %16 = vector.load %arg6[%c0_9, %c0_10] : memref<128x12xbf16, #tpu.memory_space<vmem>>, vector<128x12xbf16>
    tpu.vector_store %arg6[%c0_9, %c0_10], %15 {strides = array<i32>} : memref<128x12xbf16, #tpu.memory_space<vmem>>, vector<128x12xbf16>,
    return
  }
  func.func @transform_0(%arg0: i32) -> (i32, i32) {
    %c0_i32 = arith.constant 0 : i32
    %c0_i32_0 = arith.constant 0 : i32
    return %arg0, %c0_i32 : i32, i32
  }
  func.func @transform_1(%arg0: i32) -> (i32, i32) {
    %c0_i32 = arith.constant 0 : i32
    %c0_i32_0 = arith.constant 0 : i32
    %c0_i32_1 = arith.constant 0 : i32
    return %c0_i32, %c0_i32_0 : i32, i32
  }
  func.func @transform_2(%arg0: i32) -> (i32, i32) {
    %c0_i32 = arith.constant 0 : i32
    %c0_i32_0 = arith.constant 0 : i32
    %c0_i32_1 = arith.constant 0 : i32
    return %c0_i32, %c0_i32_0 : i32, i32
  }
  func.func @transform_3(%arg0: i32) -> (i32, i32) {
    %c0_i32 = arith.constant 0 : i32
    %c0_i32_0 = arith.constant 0 : i32
    %c0_i32_1 = arith.constant 0 : i32
    return %c0_i32, %c0_i32_0 : i32, i32
  }
  func.func @transform_4(%arg0: i32) -> i32 {
    %c0_i32 = arith.constant 0 : i32
    %c0_i32_0 = arith.constant 0 : i32
    return %c0_i32 : i32
  }
  func.func @transform_5(%arg0: i32) -> (i32, i32) {
    %c0_i32 = arith.constant 0 : i32
    %c0_i32_0 = arith.constant 0 : i32
    return %arg0, %c0_i32 : i32, i32
  }
}

module attributes {stable_mosaic.version = 11 : i64} {
  func.func @_mm_bn_prelu_kernel(%arg0: i32, %arg1: memref<128x64xbf16, #tpu.memory_space<vmem>>, %arg2: memref<64x8xbf16, #tpu.memory_space<vmem>>, %arg3: memref<1x8xf32, #tpu.memory_space<vmem>>, %arg4: memref<1x8xf32, #tpu.memory_space<vmem>>, %arg5: memref<1xf32, #tpu.memory_space<smem>>, %arg6: memref<128x8xbf16, #tpu.memory_space<vmem>>) attributes {dimension_semantics = [#tpu.dimension_semantics<parallel>], iteration_bounds = array<i64: 1>, scalar_prefetch = 0 : i64, scratch_operands = 0 : i64, tpu.core_type = #tpu.core_type<tc>, window_params = [{transform_indices = @transform_0, window_bounds = array<i64: 128, 64>}, {pipeline_mode = #tpu.pipeline_mode<synchronous>, transform_indices = @transform_1, window_bounds = array<i64: 64, 8>}, {pipeline_mode = #tpu.pipeline_mode<synchronous>, transform_indices = @transform_2, window_bounds = array<i64: 1, 8>}, {pipeline_mode = #tpu.pipeline_mode<synchronous>, transform_indices = @transform_3, window_bounds = array<i64: 1, 8>}, {transform_indices = @transform_4, window_bounds = array<i64: 1>}, {transform_indices = @transform_5, window_bounds = array<i64: 128, 8>}]} {
    %c0 = arith.constant 0 : index
    %c0_0 = arith.constant 0 : index
    %0 = vector.load %arg1[%c0, %c0_0] : memref<128x64xbf16, #tpu.memory_space<vmem>>, vector<128x64xbf16>
    %c0_1 = arith.constant 0 : index
    %c0_2 = arith.constant 0 : index
    %1 = vector.load %arg2[%c0_1, %c0_2] : memref<64x8xbf16, #tpu.memory_space<vmem>>, vector<64x8xbf16>
    %cst = arith.constant dense<0.000000e+00> : vector<128x8xf32>
    %2 = tpu.matmul %0, %1, %cst {dimension_numbers = #tpu.dot_dimension_numbers<[1], [0], [0], [1], [0, 0, 1, 1], [], []>} : vector<128x64xbf16>, vector<64x8xbf16>, vector<128x8xf32> -> vector<128x8xf32>
    %c0_3 = arith.constant 0 : index
    %c0_4 = arith.constant 0 : index
    %3 = vector.load %arg3[%c0_3, %c0_4] : memref<1x8xf32, #tpu.memory_space<vmem>>, vector<1x8xf32>
    %4 = vector.broadcast %3 : vector<1x8xf32> to vector<128x8xf32>
    %5 = arith.mulf %2, %4 : vector<128x8xf32>
    %c0_5 = arith.constant 0 : index
    %c0_6 = arith.constant 0 : index
    %6 = vector.load %arg4[%c0_5, %c0_6] : memref<1x8xf32, #tpu.memory_space<vmem>>, vector<1x8xf32>
    %7 = vector.broadcast %6 : vector<1x8xf32> to vector<128x8xf32>
    %8 = arith.addf %5, %7 : vector<128x8xf32>
    %c0_7 = arith.constant 0 : index
    %9 = memref.load %arg5[%c0_7] : memref<1xf32, #tpu.memory_space<smem>>
    %cst_8 = arith.constant 0.000000e+00 : f32
    %10 = vector.broadcast %cst_8 : f32 to vector<128x8xf32>
    %11 = arith.cmpf oge, %8, %10 : vector<128x8xf32>
    %12 = vector.broadcast %9 : f32 to vector<128x8xf32>
    %13 = arith.mulf %12, %8 : vector<128x8xf32>
    %14 = arith.select %11, %8, %13 : vector<128x8xi1>, vector<128x8xf32>
    %15 = arith.truncf %14 : vector<128x8xf32> to vector<128x8xbf16>
    %c0_9 = arith.constant 0 : index
    %c0_10 = arith.constant 0 : index
    %16 = vector.load %arg6[%c0_9, %c0_10] : memref<128x8xbf16, #tpu.memory_space<vmem>>, vector<128x8xbf16>
    tpu.vector_store %arg6[%c0_9, %c0_10], %15 {strides = array<i32>} : memref<128x8xbf16, #tpu.memory_space<vmem>>, vector<128x8xbf16>,
    return
  }
  func.func @transform_0(%arg0: i32) -> (i32, i32) {
    %c0_i32 = arith.constant 0 : i32
    %c0_i32_0 = arith.constant 0 : i32
    return %arg0, %c0_i32 : i32, i32
  }
  func.func @transform_1(%arg0: i32) -> (i32, i32) {
    %c0_i32 = arith.constant 0 : i32
    %c0_i32_0 = arith.constant 0 : i32
    %c0_i32_1 = arith.constant 0 : i32
    return %c0_i32, %c0_i32_0 : i32, i32
  }
  func.func @transform_2(%arg0: i32) -> (i32, i32) {
    %c0_i32 = arith.constant 0 : i32
    %c0_i32_0 = arith.constant 0 : i32
    %c0_i32_1 = arith.constant 0 : i32
    return %c0_i32, %c0_i32_0 : i32, i32
  }
  func.func @transform_3(%arg0: i32) -> (i32, i32) {
    %c0_i32 = arith.constant 0 : i32
    %c0_i32_0 = arith.constant 0 : i32
    %c0_i32_1 = arith.constant 0 : i32
    return %c0_i32, %c0_i32_0 : i32, i32
  }
  func.func @transform_4(%arg0: i32) -> i32 {
    %c0_i32 = arith.constant 0 : i32
    %c0_i32_0 = arith.constant 0 : i32
    return %c0_i32 : i32
  }
  func.func @transform_5(%arg0: i32) -> (i32, i32) {
    %c0_i32 = arith.constant 0 : i32
    %c0_i32_0 = arith.constant 0 : i32
    return %arg0, %c0_i32 : i32, i32
  }
}

</mosaic_0001>

<bundles_post_ra>
// kernel: lanenet_forward.133
= control target key start
LH: loop header
LB: loop body
LE: loop exit
PB: predicated region body
PF: predicated region fallthrough
CT: control target
= control target key end

     0   :  { %vm118_vm0 = vcmask 1044480   ;;  %vm119_vm1 = vcmask 1045504   ;;  %v500_v1 = vmov 65535   ;;  %vm93_vm2 = vcmask 220160   ;;  %s696_s1 = inlined_call_operand.vmem [shape: bf16[27,13], index: 1, kind: input, shape index: {}]   ;;  %s697_s0 = inlined_call_operand.vmem [shape: bf16[128,27], index: 0, kind: input, shape index: {}]   ;;  %s698_s2 = inlined_call_operand.vmem [shape: f32[1,13], index: 2, kind: input, shape index: {}]   ;;  %s699_s3 = inlined_call_operand.vmem [shape: f32[1,13], index: 3, kind: input, shape index: {}]   ;;  %s700_s4 = inlined_call_operand.<no memory space> [shape: f32[1], index: 4, kind: input, shape index: {}]   ;;  %s701_s5 = inlined_call_operand.vmem [shape: bf16[128,13], index: 5, kind: output, shape index: {}]  }
   0x1   :  { %v490_v0 = vld [vmem:[%s696_s1 + $0x8] sm:$0x3f]   ;;  %v120_v2 = vsel %vm118_vm0, 4294967295, %v500_v1  ;;  %v492_v4 = vld [vmem:[%s697_s0] sm:$0xff]   ;;  %v496_v10 = vld [vmem:[%s697_s0 + $0x10] sm:$0xff]   ;;  %v584_v20 = vstv %s700_s4  ;;  %vm382_vm3 = vcmask 101376  }
   0x2   :  { %v121_v3 = vsel %vm119_vm1, %v120_v2, 0  ;;  %v491_v6 = vld [vmem:[%s696_s1] sm:$0xff]   ;;  %469 = vmatprep.mubr.msk.bf16.mxu0 %vm93_vm2, %v492_v4  ;;  %v494_v8 = vld [vmem:[%s697_s0 + $0x8] sm:$0xff]   ;;  %v497_v11 = vld [vmem:[%s697_s0 + $0x30] sm:$0xff]  }
   0x3   :  { %v123_v5 = vand.u32 %v490_v0, %v121_v3  ;;  %v493_v7 = vld [vmem:[%s697_s0 + $0x20] sm:$0xff]   ;;  %v495_v9 = vld [vmem:[%s697_s0 + $0x28] sm:$0xff]   ;;  %v498_v12 = vld [vmem:[%s697_s0 + $0x18] sm:$0xff]  }
   0x4   :  { %477 = vmatprep.mubr.msk.bf16.mxu1 %vm93_vm2, %v493_v7  ;;  %v499_v13 = vld [vmem:[%s697_s0 + $0x38] sm:$0xff]   ;;  %v572_v14 = vld [vmem:[%s698_s2] ss:$0 sm:$0xff] }
   0x5   :  { %465 = vmatprep.subr.bf16.mxu0 %v123_v5  ;;  %485 = vmatprep.subr.bf16.mxu1 %v123_v5  ;;  %v577_v16 = vld [vmem:[%s699_s3] ss:$0 sm:$0xff] }
   0x6   :  { %466 = vmatpush3.bf16.msra.mxu0 %v123_v5  ;;  %487 = vmatpush3.bf16.msra.mxu1 %v123_v5 }
   0x7   :  { %467 = vmatprep.subr.bf16.mxu0 %v491_v6  ;;  %486 = vmatprep.subr.bf16.mxu1 %v491_v6 }
   0xa   :  { %468 = vmatpush3.bf16.msra.mxu0 %v491_v6  ;;  %488 = vmatpush3.bf16.msra.mxu1 %v491_v6 }
   0xd   :  { %470 = vmatmul.mubr.msk.bf16.vlgmr.msra.gmra.mxu0 %vm93_vm2, %v494_v8  ;;  %478 = vmatmul.mubr.msk.bf16.vlgmr.msra.gmra.mxu1 %vm93_vm2, %v495_v9 }
   0xe   :  { %473 = vmatprep.mubr.msk.bf16.mxu0 %vm93_vm2, %v496_v10  ;;  %481 = vmatprep.mubr.msk.bf16.mxu1 %vm93_vm2, %v497_v11 }
  0x15   :  { %474 = vmatmul.mubr.msk.bf16.gmra.mxu0 %vm93_vm2, %v498_v12  ;;  %482 = vmatmul.mubr.msk.bf16.gmra.mxu1 %vm93_vm2, %v499_v13 }
  0xcd   :  { %v471_v15 = vpop.f32.mrf.mxu0  ;;  %v479_v17 = vpop.f32.mrf.mxu1 }
  0xce   :  { %v231_v18 = vmul.f32 %v471_v15, %v572_v14  ;;  %v239_v19 = vmul.f32 %v479_v17, %v572_v14 }
  0xcf   :  { %v159_v21 = vpop.f32.mrf.mxu0  ;;  %v191_v22 = vpop.f32.mrf.mxu1 }
  0xd0   :  { %v254_v23 = vadd.f32 %v577_v16, %v231_v18  ;;  %v262_v24 = vadd.f32 %v577_v16, %v239_v19  ;;  %v229_v25 = vmul.f32 %v572_v14, %v159_v21  ;;  %v237_v26 = vmul.f32 %v572_v14, %v191_v22 }
  0xd1   :  { %v472_v27 = vpop.f32.mrf.mxu0  ;;  %v480_v28 = vpop.f32.mrf.mxu1 }
  0xd2   :  { %vm271_vm4 = vcmp.ge.f32.partialorder %v254_v23, 0.0  ;;  %v288_v29 = vmul.f32 %v584_v20, %v254_v23  ;;  %vm279_vm5 = vcmp.ge.f32.partialorder %v262_v24, 0.0  ;;  %v296_v30 = vmul.f32 %v584_v20, %v262_v24 }
  0xd3   :  { %v252_v31 = vadd.f32 %v577_v16, %v229_v25  ;;  %v260_v32 = vadd.f32 %v577_v16, %v237_v26  ;;  %v232_v33 = vmul.f32 %v472_v27, %v572_v14  ;;  %v240_v34 = vmul.f32 %v480_v28, %v572_v14  ;;  %v162_v35 = vpop.f32.mrf.mxu0  ;;  %v194_v36 = vpop.f32.mrf.mxu1 }
  0xd4   :  { %v304_v37 = vsel %vm271_vm4, %v254_v23, %v288_v29  ;;  %v312_v38 = vsel %vm279_vm5, %v262_v24, %v296_v30  ;;  %v230_v39 = vmul.f32 %v572_v14, %v162_v35  ;;  %v238_v40 = vmul.f32 %v572_v14, %v194_v36 }
  0xd5   :  { %v441_v41 = vpack.c.bf16 %v304_v37, %v304_v37  ;;  %v449_v42 = vpack.c.bf16 %v312_v38, %v312_v38  ;;  %vm269_vm6 = vcmp.ge.f32.partialorder %v252_v31, 0.0  ;;  %v286_v43 = vmul.f32 %v584_v20, %v252_v31  ;;  %v475_v44 = vpop.f32.mrf.mxu0  ;;  %v483_v45 = vpop.f32.mrf.mxu1 }
  0xd6   :  { %vm277_vm7 = vcmp.ge.f32.partialorder %v260_v32, 0.0  ;;  %v294_v46 = vmul.f32 %v584_v20, %v260_v32  ;;  %v255_v47 = vadd.f32 %v577_v16, %v232_v33  ;;  %v263_v48 = vadd.f32 %v577_v16, %v240_v34 }
  0xd7   :  { %385 = vst.msk [vmem:[%s701_s5 + $0x8] sm:$0xf] %vm382_vm3, %v441_v41  ;;  %393 = vst.msk [vmem:[%s701_s5 + $0x28] sm:$0xf] %vm382_vm3, %v449_v42  ;;  %v302_v49 = vsel %vm269_vm6, %v252_v31, %v286_v43  ;;  %v253_v50 = vadd.f32 %v577_v16, %v230_v39  ;;  %v261_v51 = vadd.f32 %v577_v16, %v238_v40  ;;  %v175_v53 = vpop.f32.mrf.mxu0  ;;  %v207_v54 = vpop.f32.mrf.mxu1 }
  0xd8   :  { %v235_v52 = vmul.f32 %v475_v44, %v572_v14  ;;  %v439_v55 = vpack.c.bf16 %v302_v49, %v302_v49  ;;  %v310_v56 = vsel %vm277_vm7, %v260_v32, %v294_v46  ;;  %vm272_vm8 = vcmp.ge.f32.partialorder %v255_v47, 0.0 }
  0xd9   :  { %v289_v57 = vmul.f32 %v584_v20, %v255_v47  ;;  %v447_v58 = vpack.c.bf16 %v310_v56, %v310_v56  ;;  %vm280_vm9 = vcmp.ge.f32.partialorder %v263_v48, 0.0  ;;  %v297_v59 = vmul.f32 %v584_v20, %v263_v48  ;;  %v476_v60 = vpop.f32.mrf.mxu0  ;;  %v484_v61 = vpop.f32.mrf.mxu1 }
  0xda   :  { %vm270_vm10 = vcmp.ge.f32.partialorder %v253_v50, 0.0  ;;  %383 = vst.msk [vmem:[%s701_s5] sm:$0xf] %vm382_vm3, %v439_v55  ;;  %v287_v63 = vmul.f32 %v584_v20, %v253_v50  ;;  %vm278_vm11 = vcmp.ge.f32.partialorder %v261_v51, 0.0  ;;  %v295_v0 = vmul.f32 %v584_v20, %v261_v51 }
  0xdb   :  { %v305_v62 = vsel %vm272_vm8, %v255_v47, %v289_v57  ;;  %391 = vst.msk [vmem:[%s701_s5 + $0x20] sm:$0xf] %vm382_vm3, %v447_v58  ;;  %v313_v2 = vsel %vm280_vm9, %v263_v48, %v297_v59  ;;  %v258_v3 = vadd.f32 %v577_v16, %v235_v52  ;;  %v243_v4 = vmul.f32 %v483_v45, %v572_v14  ;;  %v178_v9 = vpop.f32.mrf.mxu0  ;;  %v210_v10 = vpop.f32.mrf.mxu1 }
  0xdc   :  { %v442_v1 = vpack.c.bf16 %v305_v62, %v305_v62  ;;  %v450_v5 = vpack.c.bf16 %v313_v2, %v313_v2  ;;  %v303_v6 = vsel %vm270_vm10, %v253_v50, %v287_v63  ;;  %v311_v7 = vsel %vm278_vm11, %v261_v51, %v295_v0 }
  0xdd   :  { %v233_v8 = vmul.f32 %v572_v14, %v175_v53  ;;  %v440_v11 = vpack.c.bf16 %v303_v6, %v303_v6  ;;  %v448_v12 = vpack.c.bf16 %v311_v7, %v311_v7  ;;  %vm275_vm12 = vcmp.ge.f32.partialorder %v258_v3, 0.0 }
  0xde   :  { %386 = vst.msk [vmem:[%s701_s5 + $0xc] sm:$0xf] %vm382_vm3, %v442_v1  ;;  %v292_v13 = vmul.f32 %v584_v20, %v258_v3  ;;  %394 = vst.msk [vmem:[%s701_s5 + $0x2c] sm:$0xf] %vm382_vm3, %v450_v5  ;;  %v266_v15 = vadd.f32 %v577_v16, %v243_v4  ;;  %v241_v18 = vmul.f32 %v572_v14, %v207_v54 }
  0xdf   :  { %v256_v17 = vadd.f32 %v577_v16, %v233_v8  ;;  %v236_v19 = vmul.f32 %v476_v60, %v572_v14  ;;  %384 = vst.msk [vmem:[%s701_s5 + $0x4] sm:$0xf] %vm382_vm3, %v440_v11  ;;  %392 = vst.msk [vmem:[%s701_s5 + $0x24] sm:$0xf] %vm382_vm3, %v448_v12  ;;  %v244_v22 = vmul.f32 %v484_v61, %v572_v14 }
  0xe0   :  { %v308_v21 = vsel %vm275_vm12, %v258_v3, %v292_v13  ;;  %v234_v23 = vmul.f32 %v572_v14, %v178_v9  ;;  %v242_v24 = vmul.f32 %v572_v14, %v210_v10  ;;  %vm283_vm13 = vcmp.ge.f32.partialorder %v266_v15, 0.0 }
  0xe1   :  { %v445_v25 = vpack.c.bf16 %v308_v21, %v308_v21  ;;  %v300_v26 = vmul.f32 %v584_v20, %v266_v15  ;;  %vm273_vm14 = vcmp.ge.f32.partialorder %v256_v17, 0.0  ;;  %v290_v27 = vmul.f32 %v584_v20, %v256_v17 }
  0xe2   :  { %v264_v28 = vadd.f32 %v577_v16, %v241_v18  ;;  %v259_v29 = vadd.f32 %v577_v16, %v236_v19  ;;  %v267_v30 = vadd.f32 %v577_v16, %v244_v22  ;;  %v257_v14 = vadd.f32 %v577_v16, %v234_v23 }
  0xe3   :  { %389 = vst.msk [vmem:[%s701_s5 + $0x18] sm:$0xf] %vm382_vm3, %v445_v25  ;;  %v316_v31 = vsel %vm283_vm13, %v266_v15, %v300_v26  ;;  %v265_v32 = vadd.f32 %v577_v16, %v242_v24  ;;  %v306_v34 = vsel %vm273_vm14, %v256_v17, %v290_v27 }
  0xe4   :  { %v453_v33 = vpack.c.bf16 %v316_v31, %v316_v31  ;;  %vm281_vm15 = vcmp.ge.f32.partialorder %v264_v28, 0.0  ;;  %v298_v35 = vmul.f32 %v584_v20, %v264_v28  ;;  %v443_v36 = vpack.c.bf16 %v306_v34, %v306_v34 }
  0xe5   :  { %vm276_vm0 = vcmp.ge.f32.partialorder %v259_v29, 0.0  ;;  %v293_v37 = vmul.f32 %v584_v20, %v259_v29  ;;  %vm284_vm1 = vcmp.ge.f32.partialorder %v267_v30, 0.0  ;;  %v301_v39 = vmul.f32 %v584_v20, %v267_v30 }
  0xe6   :  { %397 = vst.msk [vmem:[%s701_s5 + $0x38] sm:$0xf] %vm382_vm3, %v453_v33  ;;  %v314_v38 = vsel %vm281_vm15, %v264_v28, %v298_v35  ;;  %vm274_vm2 = vcmp.ge.f32.partialorder %v257_v14, 0.0  ;;  %v291_v16 = vmul.f32 %v584_v20, %v257_v14  ;;  %387 = vst.msk [vmem:[%s701_s5 + $0x10] sm:$0xf] %vm382_vm3, %v443_v36  ;;  %vm282_vm4 = vcmp.ge.f32.partialorder %v265_v32, 0.0 }
  0xe7   :  { %v451_v40 = vpack.c.bf16 %v314_v38, %v314_v38  ;;  %v309_v41 = vsel %vm276_vm0, %v259_v29, %v293_v37  ;;  %v299_v42 = vmul.f32 %v584_v20, %v265_v32  ;;  %v317_v44 = vsel %vm284_vm1, %v267_v30, %v301_v39 }
  0xe8   :  { %v446_v43 = vpack.c.bf16 %v309_v41, %v309_v41  ;;  %v307_v45 = vsel %vm274_vm2, %v257_v14, %v291_v16  ;;  %v454_v46 = vpack.c.bf16 %v317_v44, %v317_v44 }
  0xe9   :  { %395 = vst.msk [vmem:[%s701_s5 + $0x30] sm:$0xf] %vm382_vm3, %v451_v40  ;;  %v444_v47 = vpack.c.bf16 %v307_v45, %v307_v45  ;;  %v315_v48 = vsel %vm282_vm4, %v265_v32, %v299_v42 }
  0xea   :  { %390 = vst.msk [vmem:[%s701_s5 + $0x1c] sm:$0xf] %vm382_vm3, %v446_v43  ;;  %v452_v49 = vpack.c.bf16 %v315_v48, %v315_v48  ;;  %398 = vst.msk [vmem:[%s701_s5 + $0x3c] sm:$0xf] %vm382_vm3, %v454_v46 }
  0xeb   :  { %388 = vst.msk [vmem:[%s701_s5 + $0x14] sm:$0xf] %vm382_vm3, %v444_v47 }
  0xec   :  { %396 = vst.msk [vmem:[%s701_s5 + $0x34] sm:$0xf] %vm382_vm3, %v452_v49 }

// kernel: lanenet_forward.134
= control target key start
LH: loop header
LB: loop body
LE: loop exit
PB: predicated region body
PF: predicated region fallthrough
CT: control target
= control target key end

     0   :  { %vm68_vm0 = vcmask 523264   ;;  %vm176_vm2 = vcmask 27648   ;;  %s300_s1 = inlined_call_operand.vmem [shape: bf16[64,4], index: 1, kind: input, shape index: {}]   ;;  %s301_s0 = inlined_call_operand.vmem [shape: bf16[32,64], index: 0, kind: input, shape index: {}]   ;;  %s302_s2 = inlined_call_operand.vmem [shape: f32[1,4], index: 2, kind: input, shape index: {}]   ;;  %s303_s3 = inlined_call_operand.vmem [shape: f32[1,4], index: 3, kind: input, shape index: {}]   ;;  %s304_s4 = inlined_call_operand.<no memory space> [shape: f32[1], index: 4, kind: input, shape index: {}]   ;;  %s305_s5 = inlined_call_operand.vmem [shape: bf16[32,4], index: 5, kind: output, shape index: {}]  }
   0x1   :  { %v221_v0 = vld [vmem:[%s300_s1 + $0x18] sm:$0xff]   ;;  %v222_v1 = vld [vmem:[%s300_s1 + $0x10] sm:$0xff]   ;;  %v223_v2 = vld [vmem:[%s300_s1 + $0x8] sm:$0xff]   ;;  %v151_v10 = vstv %s304_s4 }
   0x2   :  { %209 = vmatprep.subr.bf16.mxu0 %v221_v0  ;;  %v225_v3 = vld [vmem:[%s301_s0] sm:$0xff]   ;;  %v226_v5 = vld [vmem:[%s301_s0 + $0x8] sm:$0xff]  }
   0x3   :  { %210 = vmatpush3.bf16.msra.mxu0 %v221_v0  ;;  %217 = vmatprep.mubr.msk.bf16.mxu0 %vm68_vm0, %v225_v3  ;;  %v224_v4 = vld [vmem:[%s300_s1] sm:$0xff]  }
   0x4   :  { %211 = vmatprep.subr.bf16.mxu0 %v222_v1  ;;  %v193_v6 = vld [vmem:[%s302_s2] ss:$0 sm:$0xff] }
   0x5   :  { %v194_v8 = vld [vmem:[%s303_s3] ss:$0 sm:$0xff] }
   0x7   :  { %212 = vmatpush3.bf16.msra.mxu0 %v222_v1 }
   0x8   :  { %213 = vmatprep.subr.bf16.mxu0 %v223_v2 }
   0xb   :  { %214 = vmatpush3.bf16.msra.mxu0 %v223_v2 }
   0xc   :  { %215 = vmatprep.subr.bf16.mxu0 %v224_v4 }
   0xf   :  { %216 = vmatpush3.bf16.msra.mxu0 %v224_v4 }
  0x12   :  { %218 = vmatmul.mubr.msk.bf16.vlgmr.msra.gmra.mxu0 %vm68_vm0, %v226_v5 }
  0xd2   :  { %v219_v7 = vpop.f32.mrf.mxu0 }
  0xd3   :  { %v133_v9 = vmul.f32 %v219_v7, %v193_v6 }
  0xd4   :  { %v109_v11 = vpop.f32.mrf.mxu0 }
  0xd5   :  { %v144_v12 = vadd.f32 %v194_v8, %v133_v9  ;;  %v131_v13 = vmul.f32 %v193_v6, %v109_v11 }
  0xd6   :  { %v220_v14 = vpop.f32.mrf.mxu0 }
  0xd7   :  { %vm149_vm1 = vcmp.ge.f32.partialorder %v144_v12, 0.0  ;;  %v154_v15 = vmul.f32 %v151_v10, %v144_v12  ;;  %v142_v16 = vadd.f32 %v194_v8, %v131_v13  ;;  %v134_v17 = vmul.f32 %v220_v14, %v193_v6 }
  0xd8   :  { %v112_v18 = vpop.f32.mrf.mxu0 }
  0xd9   :  { %v158_v19 = vsel %vm149_vm1, %v144_v12, %v154_v15  ;;  %vm147_vm3 = vcmp.ge.f32.partialorder %v142_v16, 0.0  ;;  %v152_v20 = vmul.f32 %v151_v10, %v142_v16  ;;  %v145_v21 = vadd.f32 %v194_v8, %v134_v17 }
  0xda   :  { %v201_v22 = vpack.c.bf16 %v158_v19, %v158_v19  ;;  %v132_v23 = vmul.f32 %v193_v6, %v112_v18 }
  0xdb   :  { %v156_v24 = vsel %vm147_vm3, %v142_v16, %v152_v20  ;;  %vm150_vm4 = vcmp.ge.f32.partialorder %v145_v21, 0.0  ;;  %v155_v25 = vmul.f32 %v151_v10, %v145_v21 }
  0xdc   :  { %179 = vst.msk [vmem:[%s305_s5 + $0x8] sm:$0xf] %vm176_vm2, %v201_v22  ;;  %v199_v26 = vpack.c.bf16 %v156_v24, %v156_v24  ;;  %v143_v27 = vadd.f32 %v194_v8, %v132_v23 }
  0xdd   :  { %v159_v28 = vsel %vm150_vm4, %v145_v21, %v155_v25 }
  0xde   :  { %177 = vst.msk [vmem:[%s305_s5] sm:$0xf] %vm176_vm2, %v199_v26  ;;  %v202_v29 = vpack.c.bf16 %v159_v28, %v159_v28  ;;  %vm148_vm5 = vcmp.ge.f32.partialorder %v143_v27, 0.0  ;;  %v153_v30 = vmul.f32 %v151_v10, %v143_v27 }
  0xe0   :  { %180 = vst.msk [vmem:[%s305_s5 + $0xc] sm:$0xf] %vm176_vm2, %v202_v29  ;;  %v157_v31 = vsel %vm148_vm5, %v143_v27, %v153_v30 }
  0xe1   :  { %v200_v32 = vpack.c.bf16 %v157_v31, %v157_v31 }
  0xe3   :  { %178 = vst.msk [vmem:[%s305_s5 + $0x4] sm:$0xf] %vm176_vm2, %v200_v32 }

// kernel: lanenet_forward.135
= control target key start
LH: loop header
LB: loop body
LE: loop exit
PB: predicated region body
PF: predicated region fallthrough
CT: control target
= control target key end

     0   :  { %vm63_vm0 = vcmask 1041408   ;;  %vm56_vm1 = vcmask 293888   ;;  %vm168_vm3 = vcmask 27648   ;;  %s285_s1 = inlined_call_operand.vmem [shape: bf16[36,4], index: 1, kind: input, shape index: {}]   ;;  %s286_s0 = inlined_call_operand.vmem [shape: bf16[32,36], index: 0, kind: input, shape index: {}]   ;;  %s287_s2 = inlined_call_operand.vmem [shape: f32[1,4], index: 2, kind: input, shape index: {}]   ;;  %s288_s3 = inlined_call_operand.vmem [shape: f32[1,4], index: 3, kind: input, shape index: {}]   ;;  %s289_s4 = inlined_call_operand.<no memory space> [shape: f32[1], index: 4, kind: input, shape index: {}]   ;;  %s290_s5 = inlined_call_operand.vmem [shape: bf16[32,4], index: 5, kind: output, shape index: {}]  }
   0x1   :  { %v210_v0 = vld [vmem:[%s285_s1 + $0x10] ss:$0 sps:$4 sm:$0x33]   ;;  %v211_v1 = vld [vmem:[%s285_s1 + $0x8] sm:$0xff]   ;;  %v213_v3 = vld [vmem:[%s286_s0] sm:$0xff]   ;;  %v143_v10 = vstv %s289_s4 }
   0x2   :  { %209 = vmatprep.subr.msk.bf16.mxu0 %vm63_vm0, %v210_v0  ;;  %v65_v2 = vsel %vm63_vm0, %v210_v0, 0  ;;  %v212_v4 = vld [vmem:[%s285_s1] sm:$0xff]   ;;  %205 = vmatprep.mubr.msk.bf16.mxu0 %vm56_vm1, %v213_v3  ;;  %v214_v5 = vld [vmem:[%s286_s0 + $0x8] sm:$0xff]  }
   0x3   :  { %200 = vmatpush3.bf16.msra.mxu0 %v65_v2  ;;  %v184_v6 = vld [vmem:[%s287_s2] ss:$0 sm:$0xff] }
   0x4   :  { %201 = vmatprep.subr.bf16.mxu0 %v211_v1  ;;  %v185_v8 = vld [vmem:[%s288_s3] ss:$0 sm:$0xff] }
   0x7   :  { %202 = vmatpush3.bf16.msra.mxu0 %v211_v1 }
   0x8   :  { %203 = vmatprep.subr.bf16.mxu0 %v212_v4 }
   0xb   :  { %204 = vmatpush3.bf16.msra.mxu0 %v212_v4 }
   0xe   :  { %206 = vmatmul.mubr.msk.bf16.vlgmr.msra.gmra.mxu0 %vm56_vm1, %v214_v5 }
  0xce   :  { %v207_v7 = vpop.f32.mrf.mxu0 }
  0xcf   :  { %v125_v9 = vmul.f32 %v207_v7, %v184_v6 }
  0xd0   :  { %v101_v11 = vpop.f32.mrf.mxu0 }
  0xd1   :  { %v136_v12 = vadd.f32 %v185_v8, %v125_v9  ;;  %v123_v13 = vmul.f32 %v184_v6, %v101_v11 }
  0xd2   :  { %v208_v14 = vpop.f32.mrf.mxu0 }
  0xd3   :  { %vm141_vm2 = vcmp.ge.f32.partialorder %v136_v12, 0.0  ;;  %v146_v15 = vmul.f32 %v143_v10, %v136_v12  ;;  %v134_v16 = vadd.f32 %v185_v8, %v123_v13  ;;  %v126_v17 = vmul.f32 %v208_v14, %v184_v6 }
  0xd4   :  { %v104_v18 = vpop.f32.mrf.mxu0 }
  0xd5   :  { %v150_v19 = vsel %vm141_vm2, %v136_v12, %v146_v15  ;;  %vm139_vm4 = vcmp.ge.f32.partialorder %v134_v16, 0.0  ;;  %v144_v20 = vmul.f32 %v143_v10, %v134_v16  ;;  %v137_v21 = vadd.f32 %v185_v8, %v126_v17 }
  0xd6   :  { %v192_v22 = vpack.c.bf16 %v150_v19, %v150_v19  ;;  %v124_v23 = vmul.f32 %v184_v6, %v104_v18 }
  0xd7   :  { %v148_v24 = vsel %vm139_vm4, %v134_v16, %v144_v20  ;;  %vm142_vm5 = vcmp.ge.f32.partialorder %v137_v21, 0.0  ;;  %v147_v25 = vmul.f32 %v143_v10, %v137_v21 }
  0xd8   :  { %171 = vst.msk [vmem:[%s290_s5 + $0x8] sm:$0xf] %vm168_vm3, %v192_v22  ;;  %v190_v26 = vpack.c.bf16 %v148_v24, %v148_v24  ;;  %v135_v27 = vadd.f32 %v185_v8, %v124_v23 }
  0xd9   :  { %v151_v28 = vsel %vm142_vm5, %v137_v21, %v147_v25 }
  0xda   :  { %169 = vst.msk [vmem:[%s290_s5] sm:$0xf] %vm168_vm3, %v190_v26  ;;  %v193_v29 = vpack.c.bf16 %v151_v28, %v151_v28  ;;  %vm140_vm6 = vcmp.ge.f32.partialorder %v135_v27, 0.0  ;;  %v145_v30 = vmul.f32 %v143_v10, %v135_v27 }
  0xdc   :  { %172 = vst.msk [vmem:[%s290_s5 + $0xc] sm:$0xf] %vm168_vm3, %v193_v29  ;;  %v149_v31 = vsel %vm140_vm6, %v135_v27, %v145_v30 }
  0xdd   :  { %v191_v32 = vpack.c.bf16 %v149_v31, %v149_v31 }
  0xdf   :  { %170 = vst.msk [vmem:[%s290_s5 + $0x4] sm:$0xf] %vm168_vm3, %v191_v32 }

// kernel: lanenet_forward.137
= control target key start
LH: loop header
LB: loop body
LE: loop exit
PB: predicated region body
PF: predicated region fallthrough
CT: control target
= control target key end

     0   :  { %vm68_vm0 = vcmask 523264   ;;  %vm176_vm2 = vcmask 125952   ;;  %s300_s1 = inlined_call_operand.vmem [shape: bf16[64,16], index: 1, kind: input, shape index: {}]   ;;  %s301_s0 = inlined_call_operand.vmem [shape: bf16[32,64], index: 0, kind: input, shape index: {}]   ;;  %s302_s2 = inlined_call_operand.vmem [shape: f32[1,16], index: 2, kind: input, shape index: {}]   ;;  %s303_s3 = inlined_call_operand.vmem [shape: f32[1,16], index: 3, kind: input, shape index: {}]   ;;  %s304_s4 = inlined_call_operand.<no memory space> [shape: f32[1], index: 4, kind: input, shape index: {}]   ;;  %s305_s5 = inlined_call_operand.vmem [shape: bf16[32,16], index: 5, kind: output, shape index: {}]  }
   0x1   :  { %v221_v0 = vld [vmem:[%s300_s1 + $0x18] sm:$0xff]   ;;  %v222_v1 = vld [vmem:[%s300_s1 + $0x10] sm:$0xff]   ;;  %v223_v2 = vld [vmem:[%s300_s1 + $0x8] sm:$0xff]   ;;  %v151_v10 = vstv %s304_s4 }
   0x2   :  { %209 = vmatprep.subr.bf16.mxu0 %v221_v0  ;;  %v225_v3 = vld [vmem:[%s301_s0] sm:$0xff]   ;;  %v226_v5 = vld [vmem:[%s301_s0 + $0x8] sm:$0xff]  }
   0x3   :  { %210 = vmatpush3.bf16.msra.mxu0 %v221_v0  ;;  %217 = vmatprep.mubr.msk.bf16.mxu0 %vm68_vm0, %v225_v3  ;;  %v224_v4 = vld [vmem:[%s300_s1] sm:$0xff]  }
   0x4   :  { %211 = vmatprep.subr.bf16.mxu0 %v222_v1  ;;  %v193_v6 = vld [vmem:[%s302_s2] ss:$0 sm:$0xff] }
   0x5   :  { %v194_v8 = vld [vmem:[%s303_s3] ss:$0 sm:$0xff] }
   0x7   :  { %212 = vmatpush3.bf16.msra.mxu0 %v222_v1 }
   0x8   :  { %213 = vmatprep.subr.bf16.mxu0 %v223_v2 }
   0xb   :  { %214 = vmatpush3.bf16.msra.mxu0 %v223_v2 }
   0xc   :  { %215 = vmatprep.subr.bf16.mxu0 %v224_v4 }
   0xf   :  { %216 = vmatpush3.bf16.msra.mxu0 %v224_v4 }
  0x12   :  { %218 = vmatmul.mubr.msk.bf16.vlgmr.msra.gmra.mxu0 %vm68_vm0, %v226_v5 }
  0xd2   :  { %v219_v7 = vpop.f32.mrf.mxu0 }
  0xd3   :  { %v133_v9 = vmul.f32 %v219_v7, %v193_v6 }
  0xd4   :  { %v109_v11 = vpop.f32.mrf.mxu0 }
  0xd5   :  { %v144_v12 = vadd.f32 %v194_v8, %v133_v9  ;;  %v131_v13 = vmul.f32 %v193_v6, %v109_v11 }
  0xd6   :  { %v220_v14 = vpop.f32.mrf.mxu0 }
  0xd7   :  { %vm149_vm1 = vcmp.ge.f32.partialorder %v144_v12, 0.0  ;;  %v154_v15 = vmul.f32 %v151_v10, %v144_v12  ;;  %v142_v16 = vadd.f32 %v194_v8, %v131_v13  ;;  %v134_v17 = vmul.f32 %v220_v14, %v193_v6 }
  0xd8   :  { %v112_v18 = vpop.f32.mrf.mxu0 }
  0xd9   :  { %v158_v19 = vsel %vm149_vm1, %v144_v12, %v154_v15  ;;  %vm147_vm3 = vcmp.ge.f32.partialorder %v142_v16, 0.0  ;;  %v152_v20 = vmul.f32 %v151_v10, %v142_v16  ;;  %v145_v21 = vadd.f32 %v194_v8, %v134_v17 }
  0xda   :  { %v201_v22 = vpack.c.bf16 %v158_v19, %v158_v19  ;;  %v132_v23 = vmul.f32 %v193_v6, %v112_v18 }
  0xdb   :  { %v156_v24 = vsel %vm147_vm3, %v142_v16, %v152_v20  ;;  %vm150_vm4 = vcmp.ge.f32.partialorder %v145_v21, 0.0  ;;  %v155_v25 = vmul.f32 %v151_v10, %v145_v21 }
  0xdc   :  { %179 = vst.msk [vmem:[%s305_s5 + $0x8] sm:$0xf] %vm176_vm2, %v201_v22  ;;  %v199_v26 = vpack.c.bf16 %v156_v24, %v156_v24  ;;  %v143_v27 = vadd.f32 %v194_v8, %v132_v23 }
  0xdd   :  { %v159_v28 = vsel %vm150_vm4, %v145_v21, %v155_v25 }
  0xde   :  { %177 = vst.msk [vmem:[%s305_s5] sm:$0xf] %vm176_vm2, %v199_v26  ;;  %v202_v29 = vpack.c.bf16 %v159_v28, %v159_v28  ;;  %vm148_vm5 = vcmp.ge.f32.partialorder %v143_v27, 0.0  ;;  %v153_v30 = vmul.f32 %v151_v10, %v143_v27 }
  0xe0   :  { %180 = vst.msk [vmem:[%s305_s5 + $0xc] sm:$0xf] %vm176_vm2, %v202_v29  ;;  %v157_v31 = vsel %vm148_vm5, %v143_v27, %v153_v30 }
  0xe1   :  { %v200_v32 = vpack.c.bf16 %v157_v31, %v157_v31 }
  0xe3   :  { %178 = vst.msk [vmem:[%s305_s5 + $0x4] sm:$0xf] %vm176_vm2, %v200_v32 }

// kernel: lanenet_forward.136
= control target key start
LH: loop header
LB: loop body
LE: loop exit
PB: predicated region body
PF: predicated region fallthrough
CT: control target
= control target key end

     0   :  { %11 = vsyncpa [#allocation3], 0  ;;  %s327_s0 = inlined_call_operand.vmem [shape: bf16[32,4], index: 0, kind: input, shape index: {}]   ;;  %s328_s1 = inlined_call_operand.vmem [shape: bf16[4,64], index: 1, kind: input, shape index: {}]   ;;  %s329_s2 = inlined_call_operand.vmem [shape: f32[1,64], index: 2, kind: input, shape index: {}]   ;;  %s330_s3 = inlined_call_operand.vmem [shape: f32[1,64], index: 3, kind: input, shape index: {}]   ;;  %s331_s4 = inlined_call_operand.vmem [shape: bf16[32,64], index: 4, kind: input, shape index: {}]   ;;  %s332_s5 = inlined_call_operand.vmem [shape: f32[2], index: 5, kind: input, shape index: {}]   ;;  %s333_s6 = inlined_call_operand.vmem [shape: bf16[32,64], index: 6, kind: output, shape index: {}]  }
   0x1   :  { %s28_s23 = sshll.u32 %s332_s5, 4  ;;  %s29_s23 = int_to_ptr.vmem [resolvable:$true] %s28_s23 }
   0x2   :  { %s237_s24 = scalar_lea.vmem %s29_s23, 16  ;;  %p242_p1 = scmp.lt.s32.totalorder %s29_s23, %s29_s23 }
   0x3   :  { %p238_p0 = scmp.ne.s32.totalorder %s29_s23, %s237_s24  ;;  %p243_p2 = scmp.lt.s32.totalorder %s237_s24, %s237_s24 }
   0x5   :  { %p244_p3 = por %p243_p2, %p242_p1 }
   0x7   :  { %p245_p4 = pnand %p244_p3, %p238_p0 }
   0x9   :  { %248 = shalt.err (!%p245_p4)
}
   0xa   :  { %s251_s25 = smov [#allocation2]  }
   0xb   :  { %31 = dma.vmem_to_smem %s29_s23, 16, %s251_s25, [#allocation3]  }
   0xc   :  { %249 = dma.done.wait [#allocation3], 16  }
   0xd   :  { %250 = vsyncadd [#allocation3], 4294967280 }
   0xe   :  { %35 = sfence }
   0xf   :  { %v41_v0 = vld [vmem:[%s328_s1] sm:$0x3]  ;;  %vm59_vm0 = vcmask 1041408   ;;  %vm52_vm1 = vcmask 31744   ;;  %v236_v3 = vld [vmem:[%s327_s0 + $0x8] sm:$0xff]   ;;  %s134_s7 = sld [smem:[#allocation2]] }
  0x10   :  { %v235_v1 = vld [vmem:[%s327_s0] sm:$0xff]   ;;  %233 = vmatprep.subr.msk.bf16.mxu0 %vm59_vm0, %v41_v0  ;;  %v61_v2 = vsel %vm59_vm0, %v41_v0, 0  ;;  %s206_s1 = sld [smem:[#allocation2 + $0x1]]  ;;  %v223_v8 = vld [vmem:[%s331_s4 + $0x8] sm:$0xff]   ;;  %vm190_vm6 = vcmask 519168  }
  0x11   :  { %228 = vmatpush3.bf16.msra.mxu0 %v61_v2  ;;  %229 = vmatprep.mubr.msk.bf16.mxu0 %vm52_vm1, %v235_v1  ;;  %v204_v4 = vld [vmem:[%s329_s2] ss:$0 sm:$0xff]  ;;  %v221_v14 = vunpack.c.l.bf16 %v223_v8  ;;  %v222_v26 = vunpack.c.h.bf16 %v223_v8 }
  0x12   :  { %v205_v6 = vld [vmem:[%s330_s3] ss:$0 sm:$0xff] }
  0x13   :  { %v216_v13 = vld [vmem:[%s331_s4] sm:$0xff]  }
  0x14   :  { %230 = vmatmul.mubr.msk.bf16.vlgmr.msra.gmra.mxu0 %vm52_vm1, %v236_v3  ;;  %v217_v20 = vunpack.c.l.bf16 %v216_v13  ;;  %v218_v34 = vunpack.c.h.bf16 %v216_v13 }
  0x15   :  { %v139_v9 = vstv %s134_s7 }
  0x16   :  { %v165_v19 = vstv %s206_s1 }
  0xd4   :  { %v231_v5 = vpop.f32.mrf.mxu0 }
  0xd5   :  { %v121_v7 = vmul.f32 %v231_v5, %v204_v4 }
  0xd6   :  { %v97_v10 = vpop.f32.mrf.mxu0 }
  0xd7   :  { %v132_v11 = vadd.f32 %v205_v6, %v121_v7  ;;  %v119_v12 = vmul.f32 %v204_v4, %v97_v10 }
  0xd8   :  { %v232_v15 = vpop.f32.mrf.mxu0 }
  0xd9   :  { %vm137_vm2 = vcmp.ge.f32.partialorder %v132_v11, 0.0  ;;  %v142_v16 = vmul.f32 %v139_v9, %v132_v11  ;;  %v130_v17 = vadd.f32 %v205_v6, %v119_v12  ;;  %v122_v18 = vmul.f32 %v232_v15, %v204_v4 }
  0xda   :  { %v100_v21 = vpop.f32.mrf.mxu0 }
  0xdb   :  { %v146_v22 = vsel %vm137_vm2, %v132_v11, %v142_v16  ;;  %vm135_vm3 = vcmp.ge.f32.partialorder %v130_v17, 0.0  ;;  %v140_v23 = vmul.f32 %v139_v9, %v130_v17  ;;  %v133_v24 = vadd.f32 %v205_v6, %v122_v18 }
  0xdc   :  { %v158_v25 = vadd.f32 %v221_v14, %v146_v22  ;;  %v120_v27 = vmul.f32 %v204_v4, %v100_v21 }
  0xdd   :  { %v144_v28 = vsel %vm135_vm3, %v130_v17, %v140_v23  ;;  %vm138_vm4 = vcmp.ge.f32.partialorder %v133_v24, 0.0  ;;  %v143_v29 = vmul.f32 %v139_v9, %v133_v24 }
  0xde   :  { %vm163_vm5 = vcmp.ge.f32.partialorder %v158_v25, 0.0  ;;  %v168_v30 = vmul.f32 %v165_v19, %v158_v25  ;;  %v156_v31 = vadd.f32 %v217_v20, %v144_v28  ;;  %v131_v32 = vadd.f32 %v205_v6, %v120_v27 }
  0xdf   :  { %v147_v33 = vsel %vm138_vm4, %v133_v24, %v143_v29 }
  0xe0   :  { %v172_v35 = vsel %vm163_vm5, %v158_v25, %v168_v30  ;;  %vm161_vm7 = vcmp.ge.f32.partialorder %v156_v31, 0.0  ;;  %v166_v36 = vmul.f32 %v165_v19, %v156_v31  ;;  %v159_v37 = vadd.f32 %v222_v26, %v147_v33 }
  0xe1   :  { %v213_v38 = vpack.c.bf16 %v172_v35, %v172_v35  ;;  %vm136_vm8 = vcmp.ge.f32.partialorder %v131_v32, 0.0  ;;  %v141_v39 = vmul.f32 %v139_v9, %v131_v32 }
  0xe2   :  { %v170_v40 = vsel %vm161_vm7, %v156_v31, %v166_v36  ;;  %vm164_vm9 = vcmp.ge.f32.partialorder %v159_v37, 0.0  ;;  %v169_v41 = vmul.f32 %v165_v19, %v159_v37 }
  0xe3   :  { %193 = vst.msk [vmem:[%s333_s6 + $0x8] sm:$0xf] %vm190_vm6, %v213_v38  ;;  %v211_v42 = vpack.c.bf16 %v170_v40, %v170_v40  ;;  %v145_v43 = vsel %vm136_vm8, %v131_v32, %v141_v39 }
  0xe4   :  { %v173_v44 = vsel %vm164_vm9, %v159_v37, %v169_v41  ;;  %v157_v45 = vadd.f32 %v218_v34, %v145_v43 }
  0xe5   :  { %191 = vst.msk [vmem:[%s333_s6] sm:$0xf] %vm190_vm6, %v211_v42  ;;  %v214_v46 = vpack.c.bf16 %v173_v44, %v173_v44 }
  0xe6   :  { %vm162_vm10 = vcmp.ge.f32.partialorder %v157_v45, 0.0  ;;  %v167_v47 = vmul.f32 %v165_v19, %v157_v45 }
  0xe7   :  { %194 = vst.msk [vmem:[%s333_s6 + $0xc] sm:$0xf] %vm190_vm6, %v214_v46 }
  0xe8   :  { %v171_v48 = vsel %vm162_vm10, %v157_v45, %v167_v47 }
  0xe9   :  { %v212_v49 = vpack.c.bf16 %v171_v48, %v171_v48 }
  0xeb   :  { %192 = vst.msk [vmem:[%s333_s6 + $0x4] sm:$0xf] %vm190_vm6, %v212_v49 }
  0xec   :  { %199 = vsyncpa [#allocation3], 1 }

// kernel: lanenet_forward.138
= control target key start
LH: loop header
LB: loop body
LE: loop exit
PB: predicated region body
PF: predicated region fallthrough
CT: control target
= control target key end

     0   :  { %v292_v0 = vmov 0   ;;  %vm116_vm0 = vcmask 130048   ;;  %vm224_vm3 = vcmask 125952   ;;  %s387_s1 = inlined_call_operand.vmem [shape: bf16[144,16], index: 1, kind: input, shape index: {}]   ;;  %s388_s0 = inlined_call_operand.vmem [shape: bf16[32,144], index: 0, kind: input, shape index: {}]   ;;  %s389_s2 = inlined_call_operand.vmem [shape: f32[1,16], index: 2, kind: input, shape index: {}]   ;;  %s390_s3 = inlined_call_operand.vmem [shape: f32[1,16], index: 3, kind: input, shape index: {}]   ;;  %s391_s4 = inlined_call_operand.<no memory space> [shape: f32[1], index: 4, kind: input, shape index: {}]   ;;  %s392_s5 = inlined_call_operand.vmem [shape: bf16[32,16], index: 5, kind: output, shape index: {}]  }
   0x1   :  { %123 = vmatprep.subr.bf16.mxu0 %v292_v0  ;;  %258 = vmatprep.subr.bf16.mxu1 %v292_v0  ;;  %v277_v1 = vld [vmem:[%s387_s1 + $0x38] sm:$0xff]   ;;  %v278_v2 = vld [vmem:[%s387_s1 + $0x30] sm:$0xff]   ;;  %v279_v3 = vld [vmem:[%s387_s1 + $0x28] sm:$0xff]   ;;  %v199_v20 = vstv %s391_s4 }
   0x2   :  { %124 = vmatpush1.bf16.msra.mxu0 %v277_v1  ;;  %267 = vmatpush1.bf16.msra.mxu1 %v277_v1  ;;  %v280_v4 = vld [vmem:[%s387_s1 + $0x20] sm:$0xff]   ;;  %v291_v6 = vld [vmem:[%s388_s0 + $0x14] ss:$8 sps:$4 sm:$0xff]   ;;  %v283_v9 = vld [vmem:[%s387_s1 + $0x8] sm:$0xff]  }
   0x3   :  { %125 = vmatprep.subr.bf16.mxu0 %v292_v0  ;;  %259 = vmatprep.subr.bf16.mxu1 %v292_v0  ;;  %v288_v5 = vld [vmem:[%s388_s0 + $0x4] ss:$8 sps:$4 sm:$0xff]   ;;  %v281_v7 = vld [vmem:[%s387_s1 + $0x18] sm:$0xff]   ;;  %v282_v8 = vld [vmem:[%s387_s1 + $0x10] sm:$0xff]  }
   0x4   :  { %246 = vmatprep.mubr.msk.bf16.mxu0 %vm116_vm0, %v288_v5  ;;  %247 = vmatprep.mubr.msk.bf16.mxu1 %vm116_vm0, %v291_v6  ;;  %v284_v10 = vld [vmem:[%s387_s1] sm:$0xff]   ;;  %v289_v13 = vld [vmem:[%s388_s0 + $0x10] ss:$8 sps:$4 sm:$0xff]  }
   0x5   :  { %v285_v11 = vld [vmem:[%s387_s1 + $0x40] sm:$0xff]  }
   0x6   :  { %126 = vmatpush1.bf16.msra.mxu0 %v278_v2  ;;  %268 = vmatpush1.bf16.msra.mxu1 %v278_v2  ;;  %v286_v12 = vld [vmem:[%s388_s0] ss:$8 sps:$4 sm:$0xff]  }
   0x7   :  { %127 = vmatprep.subr.bf16.mxu0 %v292_v0  ;;  %260 = vmatprep.subr.bf16.mxu1 %v292_v0  ;;  %v248_v14 = vld [vmem:[%s389_s2] ss:$0 sm:$0xff] }
   0x8   :  { %v249_v16 = vld [vmem:[%s390_s3] ss:$0 sm:$0xff] }
   0xa   :  { %128 = vmatpush1.bf16.msra.mxu0 %v279_v3  ;;  %269 = vmatpush1.bf16.msra.mxu1 %v279_v3 }
   0xb   :  { %129 = vmatprep.subr.bf16.mxu0 %v292_v0  ;;  %261 = vmatprep.subr.bf16.mxu1 %v292_v0 }
   0xe   :  { %130 = vmatpush1.bf16.msra.mxu0 %v280_v4  ;;  %270 = vmatpush1.bf16.msra.mxu1 %v280_v4 }
   0xf   :  { %131 = vmatprep.subr.bf16.mxu0 %v292_v0  ;;  %262 = vmatprep.subr.bf16.mxu1 %v292_v0 }
  0x12   :  { %132 = vmatpush1.bf16.msra.mxu0 %v281_v7  ;;  %271 = vmatpush1.bf16.msra.mxu1 %v281_v7 }
  0x13   :  { %133 = vmatprep.subr.bf16.mxu0 %v292_v0  ;;  %263 = vmatprep.subr.bf16.mxu1 %v292_v0 }
  0x16   :  { %134 = vmatpush1.bf16.msra.mxu0 %v282_v8  ;;  %272 = vmatpush1.bf16.msra.mxu1 %v282_v8 }
  0x17   :  { %135 = vmatprep.subr.bf16.mxu0 %v292_v0  ;;  %264 = vmatprep.subr.bf16.mxu1 %v292_v0 }
  0x1a   :  { %136 = vmatpush1.bf16.msra.mxu0 %v283_v9  ;;  %273 = vmatpush1.bf16.msra.mxu1 %v283_v9 }
  0x1b   :  { %137 = vmatprep.subr.bf16.mxu0 %v292_v0  ;;  %265 = vmatprep.subr.bf16.mxu1 %v292_v0 }
  0x1e   :  { %138 = vmatpush1.bf16.msra.mxu0 %v284_v10  ;;  %274 = vmatpush1.bf16.msra.mxu1 %v284_v10 }
  0x1f   :  { %153 = vmatprep.subr.bf16.mxu0 %v292_v0  ;;  %266 = vmatprep.subr.bf16.mxu1 %v292_v0 }
  0x22   :  { %154 = vmatpush2.bf16.msra.mxu0 %v285_v11  ;;  %275 = vmatpush2.bf16.msra.mxu1 %v285_v11 }
  0x25   :  { %156 = vmatmul.mubr.bf16.vlgmr.msra.gmra.mxu0 %v286_v12  ;;  %164 = vmatmul.mubr.bf16.vlgmr.msra.gmra.mxu1 %v289_v13 }
  0xe5   :  { %v157_v15 = vpop.f32.mrf.mxu0  ;;  %v165_v17 = vpop.f32.mrf.mxu1 }
  0xe6   :  { %v179_v18 = vmul.f32 %v248_v14, %v157_v15  ;;  %v181_v19 = vmul.f32 %v248_v14, %v165_v17 }
  0xe7   :  { %v159_v21 = vpop.f32.mrf.mxu0  ;;  %v167_v22 = vpop.f32.mrf.mxu1 }
  0xe8   :  { %v190_v23 = vadd.f32 %v249_v16, %v179_v18  ;;  %v192_v24 = vadd.f32 %v249_v16, %v181_v19 }
  0xe9   :  { %v160_v25 = vpop.f32.mrf.mxu0  ;;  %v168_v26 = vpop.f32.mrf.mxu1 }
  0xea   :  { %vm195_vm1 = vcmp.ge.f32.partialorder %v190_v23, 0.0  ;;  %v200_v27 = vmul.f32 %v199_v20, %v190_v23  ;;  %vm197_vm2 = vcmp.ge.f32.partialorder %v192_v24, 0.0  ;;  %v202_v28 = vmul.f32 %v199_v20, %v192_v24 }
  0xeb   :  { %v180_v29 = vmul.f32 %v248_v14, %v160_v25  ;;  %v182_v30 = vmul.f32 %v248_v14, %v168_v26  ;;  %v162_v31 = vpop.f32.mrf.mxu0  ;;  %v170_v32 = vpop.f32.mrf.mxu1 }
  0xec   :  { %v204_v33 = vsel %vm195_vm1, %v190_v23, %v200_v27  ;;  %v206_v34 = vsel %vm197_vm2, %v192_v24, %v202_v28 }
  0xed   :  { %v254_v35 = vpack.c.bf16 %v204_v33, %v204_v33  ;;  %v256_v36 = vpack.c.bf16 %v206_v34, %v206_v34  ;;  %v191_v37 = vadd.f32 %v249_v16, %v180_v29  ;;  %v193_v38 = vadd.f32 %v249_v16, %v182_v30 }
  0xef   :  { %225 = vst.msk [vmem:[%s392_s5] sm:$0xf] %vm224_vm3, %v254_v35  ;;  %227 = vst.msk [vmem:[%s392_s5 + $0x8] sm:$0xf] %vm224_vm3, %v256_v36  ;;  %vm196_vm4 = vcmp.ge.f32.partialorder %v191_v37, 0.0  ;;  %v201_v39 = vmul.f32 %v199_v20, %v191_v37  ;;  %vm198_vm5 = vcmp.ge.f32.partialorder %v193_v38, 0.0  ;;  %v203_v40 = vmul.f32 %v199_v20, %v193_v38 }
  0xf1   :  { %v205_v41 = vsel %vm196_vm4, %v191_v37, %v201_v39  ;;  %v207_v42 = vsel %vm198_vm5, %v193_v38, %v203_v40 }
  0xf2   :  { %v255_v43 = vpack.c.bf16 %v205_v41, %v205_v41  ;;  %v257_v44 = vpack.c.bf16 %v207_v42, %v207_v42 }
  0xf4   :  { %226 = vst.msk [vmem:[%s392_s5 + $0x4] sm:$0xf] %vm224_vm3, %v255_v43  ;;  %228 = vst.msk [vmem:[%s392_s5 + $0xc] sm:$0xf] %vm224_vm3, %v257_v44 }

// kernel: lanenet_forward.139
= control target key start
LH: loop header
LB: loop body
LE: loop exit
PB: predicated region body
PF: predicated region fallthrough
CT: control target
= control target key end

     0   :  { %11 = vsyncpa [#allocation3], 0  ;;  %s331_s0 = inlined_call_operand.vmem [shape: bf16[32,16], index: 0, kind: input, shape index: {}]   ;;  %s332_s1 = inlined_call_operand.vmem [shape: bf16[16,64], index: 1, kind: input, shape index: {}]   ;;  %s333_s2 = inlined_call_operand.vmem [shape: f32[1,64], index: 2, kind: input, shape index: {}]   ;;  %s334_s3 = inlined_call_operand.vmem [shape: f32[1,64], index: 3, kind: input, shape index: {}]   ;;  %s335_s4 = inlined_call_operand.vmem [shape: bf16[32,64], index: 4, kind: input, shape index: {}]   ;;  %s336_s5 = inlined_call_operand.vmem [shape: f32[2], index: 5, kind: input, shape index: {}]   ;;  %s337_s6 = inlined_call_operand.vmem [shape: bf16[32,64], index: 6, kind: output, shape index: {}]  }
   0x1   :  { %s28_s23 = sshll.u32 %s336_s5, 4  ;;  %s29_s23 = int_to_ptr.vmem [resolvable:$true] %s28_s23 }
   0x2   :  { %s241_s24 = scalar_lea.vmem %s29_s23, 16  ;;  %p246_p1 = scmp.lt.s32.totalorder %s29_s23, %s29_s23 }
   0x3   :  { %p242_p0 = scmp.ne.s32.totalorder %s29_s23, %s241_s24  ;;  %p247_p2 = scmp.lt.s32.totalorder %s241_s24, %s241_s24 }
   0x5   :  { %p248_p3 = por %p247_p2, %p246_p1 }
   0x7   :  { %p249_p4 = pnand %p248_p3, %p242_p0 }
   0x9   :  { %252 = shalt.err (!%p249_p4)
}
   0xa   :  { %s255_s25 = smov [#allocation2]  }
   0xb   :  { %31 = dma.vmem_to_smem %s29_s23, 16, %s255_s25, [#allocation3]  }
   0xc   :  { %253 = dma.done.wait [#allocation3], 16  }
   0xd   :  { %254 = vsyncadd [#allocation3], 4294967280 }
   0xe   :  { %35 = sfence }
   0xf   :  { %v238_v0 = vld [vmem:[%s332_s1] sm:$0xff]   ;;  %vm59_vm0 = vcmask 130048   ;;  %v240_v2 = vld [vmem:[%s331_s0 + $0x8] sm:$0xff]   ;;  %s137_s7 = sld [smem:[#allocation2]]  ;;  %vm193_vm5 = vcmask 519168  }
  0x10   :  { %v239_v1 = vld [vmem:[%s331_s0] sm:$0xff]   ;;  %231 = vmatprep.subr.bf16.mxu0 %v238_v0  ;;  %s210_s10 = sld [smem:[#allocation2 + $0x1]]  ;;  %v227_v7 = vld [vmem:[%s335_s4 + $0x8] sm:$0xff]  }
  0x11   :  { %232 = vmatpush3.bf16.msra.mxu0 %v238_v0  ;;  %233 = vmatprep.mubr.msk.bf16.mxu0 %vm59_vm0, %v239_v1  ;;  %v208_v3 = vld [vmem:[%s333_s2] ss:$0 sm:$0xff]  ;;  %v225_v13 = vunpack.c.l.bf16 %v227_v7  ;;  %v226_v25 = vunpack.c.h.bf16 %v227_v7 }
  0x12   :  { %v209_v5 = vld [vmem:[%s334_s3] ss:$0 sm:$0xff] }
  0x13   :  { %v220_v12 = vld [vmem:[%s335_s4] sm:$0xff]  }
  0x14   :  { %234 = vmatmul.mubr.msk.bf16.vlgmr.msra.gmra.mxu0 %vm59_vm0, %v240_v2  ;;  %v221_v19 = vunpack.c.l.bf16 %v220_v12  ;;  %v222_v33 = vunpack.c.h.bf16 %v220_v12 }
  0x15   :  { %v142_v8 = vstv %s137_s7 }
  0x16   :  { %v168_v18 = vstv %s210_s10 }
  0xd4   :  { %v235_v4 = vpop.f32.mrf.mxu0 }
  0xd5   :  { %v124_v6 = vmul.f32 %v235_v4, %v208_v3 }
  0xd6   :  { %v100_v9 = vpop.f32.mrf.mxu0 }
  0xd7   :  { %v135_v10 = vadd.f32 %v209_v5, %v124_v6  ;;  %v122_v11 = vmul.f32 %v208_v3, %v100_v9 }
  0xd8   :  { %v236_v14 = vpop.f32.mrf.mxu0 }
  0xd9   :  { %vm140_vm1 = vcmp.ge.f32.partialorder %v135_v10, 0.0  ;;  %v145_v15 = vmul.f32 %v142_v8, %v135_v10  ;;  %v133_v16 = vadd.f32 %v209_v5, %v122_v11  ;;  %v125_v17 = vmul.f32 %v236_v14, %v208_v3 }
  0xda   :  { %v103_v20 = vpop.f32.mrf.mxu0 }
  0xdb   :  { %v149_v21 = vsel %vm140_vm1, %v135_v10, %v145_v15  ;;  %vm138_vm2 = vcmp.ge.f32.partialorder %v133_v16, 0.0  ;;  %v143_v22 = vmul.f32 %v142_v8, %v133_v16  ;;  %v136_v23 = vadd.f32 %v209_v5, %v125_v17 }
  0xdc   :  { %v161_v24 = vadd.f32 %v225_v13, %v149_v21  ;;  %v123_v26 = vmul.f32 %v208_v3, %v103_v20 }
  0xdd   :  { %v147_v27 = vsel %vm138_vm2, %v133_v16, %v143_v22  ;;  %vm141_vm3 = vcmp.ge.f32.partialorder %v136_v23, 0.0  ;;  %v146_v28 = vmul.f32 %v142_v8, %v136_v23 }
  0xde   :  { %vm166_vm4 = vcmp.ge.f32.partialorder %v161_v24, 0.0  ;;  %v171_v29 = vmul.f32 %v168_v18, %v161_v24  ;;  %v159_v30 = vadd.f32 %v221_v19, %v147_v27  ;;  %v134_v31 = vadd.f32 %v209_v5, %v123_v26 }
  0xdf   :  { %v150_v32 = vsel %vm141_vm3, %v136_v23, %v146_v28 }
  0xe0   :  { %v175_v34 = vsel %vm166_vm4, %v161_v24, %v171_v29  ;;  %vm164_vm6 = vcmp.ge.f32.partialorder %v159_v30, 0.0  ;;  %v169_v35 = vmul.f32 %v168_v18, %v159_v30  ;;  %v162_v36 = vadd.f32 %v226_v25, %v150_v32 }
  0xe1   :  { %v217_v37 = vpack.c.bf16 %v175_v34, %v175_v34  ;;  %vm139_vm7 = vcmp.ge.f32.partialorder %v134_v31, 0.0  ;;  %v144_v38 = vmul.f32 %v142_v8, %v134_v31 }
  0xe2   :  { %v173_v39 = vsel %vm164_vm6, %v159_v30, %v169_v35  ;;  %vm167_vm8 = vcmp.ge.f32.partialorder %v162_v36, 0.0  ;;  %v172_v40 = vmul.f32 %v168_v18, %v162_v36 }
  0xe3   :  { %196 = vst.msk [vmem:[%s337_s6 + $0x8] sm:$0xf] %vm193_vm5, %v217_v37  ;;  %v215_v41 = vpack.c.bf16 %v173_v39, %v173_v39  ;;  %v148_v42 = vsel %vm139_vm7, %v134_v31, %v144_v38 }
  0xe4   :  { %v176_v43 = vsel %vm167_vm8, %v162_v36, %v172_v40  ;;  %v160_v44 = vadd.f32 %v222_v33, %v148_v42 }
  0xe5   :  { %194 = vst.msk [vmem:[%s337_s6] sm:$0xf] %vm193_vm5, %v215_v41  ;;  %v218_v45 = vpack.c.bf16 %v176_v43, %v176_v43 }
  0xe6   :  { %vm165_vm9 = vcmp.ge.f32.partialorder %v160_v44, 0.0  ;;  %v170_v46 = vmul.f32 %v168_v18, %v160_v44 }
  0xe7   :  { %197 = vst.msk [vmem:[%s337_s6 + $0xc] sm:$0xf] %vm193_vm5, %v218_v45 }
  0xe8   :  { %v174_v47 = vsel %vm165_vm9, %v160_v44, %v170_v46 }
  0xe9   :  { %v216_v48 = vpack.c.bf16 %v174_v47, %v174_v47 }
  0xeb   :  { %195 = vst.msk [vmem:[%s337_s6 + $0x4] sm:$0xf] %vm193_vm5, %v216_v48 }
  0xec   :  { %202 = vsyncpa [#allocation3], 1 }

// kernel: lanenet_forward.149
= control target key start
LH: loop header
LB: loop body
LE: loop exit
PB: predicated region body
PF: predicated region fallthrough
CT: control target
= control target key end

     0   :  { %vm237_vm1 = vcmask 125952   ;;  %s408_s1 = inlined_call_operand.vmem [shape: bf16[256,16], index: 1, kind: input, shape index: {}]   ;;  %s409_s0 = inlined_call_operand.vmem [shape: bf16[16,256], index: 0, kind: input, shape index: {}]   ;;  %s410_s2 = inlined_call_operand.vmem [shape: f32[1,16], index: 2, kind: input, shape index: {}]   ;;  %s411_s3 = inlined_call_operand.vmem [shape: f32[1,16], index: 3, kind: input, shape index: {}]   ;;  %s412_s4 = inlined_call_operand.<no memory space> [shape: f32[1], index: 4, kind: input, shape index: {}]   ;;  %s413_s5 = inlined_call_operand.vmem [shape: bf16[16,16], index: 5, kind: output, shape index: {}]  }
   0x1   :  { %v290_v0 = vld [vmem:[%s408_s1 + $0x78] sm:$0xff]   ;;  %v292_v2 = vld [vmem:[%s408_s1 + $0x70] sm:$0xff]   ;;  %v294_v4 = vld [vmem:[%s408_s1 + $0x68] sm:$0xff]   ;;  %v224_v25 = vstv %s412_s4 }
   0x2   :  { %v291_v1 = vld [vmem:[%s408_s1 + $0x38] sm:$0xff]   ;;  %268 = vmatprep.subr.bf16.mxu0 %v290_v0  ;;  %v293_v3 = vld [vmem:[%s408_s1 + $0x30] sm:$0xff]   ;;  %v295_v5 = vld [vmem:[%s408_s1 + $0x28] sm:$0xff]  }
   0x3   :  { %269 = vmatpush3.bf16.msra.mxu0 %v291_v1  ;;  %v296_v6 = vld [vmem:[%s408_s1 + $0x60] sm:$0xff]   ;;  %v298_v8 = vld [vmem:[%s408_s1 + $0x58] sm:$0xff]   ;;  %v300_v10 = vld [vmem:[%s408_s1 + $0x50] sm:$0xff]  }
   0x4   :  { %270 = vmatprep.subr.bf16.mxu0 %v292_v2  ;;  %v297_v7 = vld [vmem:[%s408_s1 + $0x20] sm:$0xff]   ;;  %v299_v9 = vld [vmem:[%s408_s1 + $0x18] sm:$0xff]   ;;  %v301_v12 = vld [vmem:[%s408_s1 + $0x10] sm:$0xff]  }
   0x5   :  { %v308_v11 = vld [vmem:[%s409_s0 + $0x4] ss:$8 sps:$4 sm:$0xff]   ;;  %v306_v17 = vld [vmem:[%s409_s0] ss:$8 sps:$4 sm:$0xff]  }
   0x6   :  { %194 = vmatprep.mubr.bf16.mxu0 %v308_v11  ;;  %v302_v13 = vld [vmem:[%s408_s1 + $0x48] sm:$0xff]   ;;  %v304_v15 = vld [vmem:[%s408_s1 + $0x40] sm:$0xff]  }
   0x7   :  { %271 = vmatpush3.bf16.msra.mxu0 %v293_v3  ;;  %v303_v14 = vld [vmem:[%s408_s1 + $0x8] sm:$0xff]   ;;  %v305_v16 = vld [vmem:[%s408_s1] sm:$0xff]  }
   0x8   :  { %272 = vmatprep.subr.bf16.mxu0 %v294_v4  ;;  %v262_v20 = vld [vmem:[%s410_s2] ss:$0 sm:$0xff] }
   0x9   :  { %v263_v22 = vld [vmem:[%s411_s3] ss:$0 sm:$0xff] }
   0xb   :  { %273 = vmatpush3.bf16.msra.mxu0 %v295_v5 }
   0xc   :  { %274 = vmatprep.subr.bf16.mxu0 %v296_v6 }
   0xf   :  { %275 = vmatpush3.bf16.msra.mxu0 %v297_v7 }
  0x10   :  { %276 = vmatprep.subr.bf16.mxu0 %v298_v8 }
  0x13   :  { %277 = vmatpush3.bf16.msra.mxu0 %v299_v9 }
  0x14   :  { %278 = vmatprep.subr.bf16.mxu0 %v300_v10 }
  0x17   :  { %279 = vmatpush3.bf16.msra.mxu0 %v301_v12 }
  0x18   :  { %280 = vmatprep.subr.bf16.mxu0 %v302_v13 }
  0x1b   :  { %281 = vmatpush3.bf16.msra.mxu0 %v303_v14 }
  0x1c   :  { %282 = vmatprep.subr.bf16.mxu0 %v304_v15 }
  0x1f   :  { %283 = vmatpush3.bf16.msra.mxu0 %v305_v16 }
  0x22   :  { %195 = vmatmul.mubr.bf16.vlgmr.msra.gmra.mxu0 %v306_v17 }
  0xe2   :  { %v284_v18 = vpop.f32.mrf.mxu0 }
  0xe4   :  { %v285_v19 = vpop.f32.mrf.mxu0 }
  0xe5   :  { %v286_v21 = vadd.f32 %v285_v19, %v284_v18 }
  0xe6   :  { %v287_v23 = vpop.f32.mrf.mxu0 }
  0xe7   :  { %v210_v24 = vmul.f32 %v286_v21, %v262_v20 }
  0xe8   :  { %v288_v26 = vpop.f32.mrf.mxu0 }
  0xe9   :  { %v219_v27 = vadd.f32 %v263_v22, %v210_v24  ;;  %v289_v28 = vadd.f32 %v288_v26, %v287_v23 }
  0xeb   :  { %vm222_vm0 = vcmp.ge.f32.partialorder %v219_v27, 0.0  ;;  %v225_v29 = vmul.f32 %v224_v25, %v219_v27  ;;  %v211_v30 = vmul.f32 %v289_v28, %v262_v20 }
  0xed   :  { %v227_v31 = vsel %vm222_vm0, %v219_v27, %v225_v29  ;;  %v220_v32 = vadd.f32 %v263_v22, %v211_v30 }
  0xee   :  { %v266_v33 = vpack.c.bf16 %v227_v31, %v227_v31 }
  0xef   :  { %vm223_vm2 = vcmp.ge.f32.partialorder %v220_v32, 0.0  ;;  %v226_v34 = vmul.f32 %v224_v25, %v220_v32 }
  0xf0   :  { %238 = vst.msk [vmem:[%s413_s5] sm:$0xf] %vm237_vm1, %v266_v33 }
  0xf1   :  { %v228_v35 = vsel %vm223_vm2, %v220_v32, %v226_v34 }
  0xf2   :  { %v267_v36 = vpack.c.bf16 %v228_v35, %v228_v35 }
  0xf4   :  { %239 = vst.msk [vmem:[%s413_s5 + $0x4] sm:$0xf] %vm237_vm1, %v267_v36 }

// kernel: lanenet_forward.150
= control target key start
LH: loop header
LB: loop body
LE: loop exit
PB: predicated region body
PF: predicated region fallthrough
CT: control target
= control target key end

     0   :  { %v222_v0 = vmov 0   ;;  %vm105_vm0 = vcmask 130048   ;;  %vm184_vm2 = vcmask 125952   ;;  %s301_s1 = inlined_call_operand.vmem [shape: bf16[144,16], index: 1, kind: input, shape index: {}]   ;;  %s302_s0 = inlined_call_operand.vmem [shape: bf16[16,144], index: 0, kind: input, shape index: {}]   ;;  %s303_s2 = inlined_call_operand.vmem [shape: f32[1,16], index: 2, kind: input, shape index: {}]   ;;  %s304_s3 = inlined_call_operand.vmem [shape: f32[1,16], index: 3, kind: input, shape index: {}]   ;;  %s305_s4 = inlined_call_operand.<no memory space> [shape: f32[1], index: 4, kind: input, shape index: {}]   ;;  %s306_s5 = inlined_call_operand.vmem [shape: bf16[16,16], index: 5, kind: output, shape index: {}]  }
   0x1   :  { %109 = vmatprep.subr.bf16.mxu0 %v222_v0  ;;  %v210_v1 = vld [vmem:[%s301_s1 + $0x38] sm:$0xff]   ;;  %v211_v2 = vld [vmem:[%s301_s1 + $0x30] sm:$0xff]   ;;  %v212_v3 = vld [vmem:[%s301_s1 + $0x28] sm:$0xff]   ;;  %v171_v16 = vstv %s305_s4 }
   0x2   :  { %110 = vmatpush1.bf16.msra.mxu0 %v210_v1  ;;  %v213_v4 = vld [vmem:[%s301_s1 + $0x20] sm:$0xff]   ;;  %v214_v6 = vld [vmem:[%s301_s1 + $0x18] sm:$0xff]   ;;  %v215_v7 = vld [vmem:[%s301_s1 + $0x10] sm:$0xff]  }
   0x3   :  { %111 = vmatprep.subr.bf16.mxu0 %v222_v0  ;;  %v221_v5 = vld [vmem:[%s302_s0 + $0x4] ss:$8 sps:$4 sm:$0xff]   ;;  %v219_v11 = vld [vmem:[%s302_s0] ss:$8 sps:$4 sm:$0xff]  }
   0x4   :  { %202 = vmatprep.mubr.msk.bf16.mxu0 %vm105_vm0, %v221_v5  ;;  %v216_v8 = vld [vmem:[%s301_s1 + $0x8] sm:$0xff]   ;;  %v217_v9 = vld [vmem:[%s301_s1] sm:$0xff]  }
   0x5   :  { %v218_v10 = vld [vmem:[%s301_s1 + $0x40] sm:$0xff]  }
   0x6   :  { %112 = vmatpush1.bf16.msra.mxu0 %v211_v2  ;;  %v203_v12 = vld [vmem:[%s303_s2] ss:$0 sm:$0xff] }
   0x7   :  { %113 = vmatprep.subr.bf16.mxu0 %v222_v0  ;;  %v204_v14 = vld [vmem:[%s304_s3] ss:$0 sm:$0xff] }
   0xa   :  { %114 = vmatpush1.bf16.msra.mxu0 %v212_v3 }
   0xb   :  { %115 = vmatprep.subr.bf16.mxu0 %v222_v0 }
   0xe   :  { %116 = vmatpush1.bf16.msra.mxu0 %v213_v4 }
   0xf   :  { %117 = vmatprep.subr.bf16.mxu0 %v222_v0 }
  0x12   :  { %118 = vmatpush1.bf16.msra.mxu0 %v214_v6 }
  0x13   :  { %119 = vmatprep.subr.bf16.mxu0 %v222_v0 }
  0x16   :  { %120 = vmatpush1.bf16.msra.mxu0 %v215_v7 }
  0x17   :  { %121 = vmatprep.subr.bf16.mxu0 %v222_v0 }
  0x1a   :  { %122 = vmatpush1.bf16.msra.mxu0 %v216_v8 }
  0x1b   :  { %123 = vmatprep.subr.bf16.mxu0 %v222_v0 }
  0x1e   :  { %124 = vmatpush1.bf16.msra.mxu0 %v217_v9 }
  0x1f   :  { %139 = vmatprep.subr.bf16.mxu0 %v222_v0 }
  0x22   :  { %140 = vmatpush2.bf16.msra.mxu0 %v218_v10 }
  0x25   :  { %142 = vmatmul.mubr.bf16.vlgmr.msra.gmra.mxu0 %v219_v11 }
  0xe5   :  { %v143_v13 = vpop.f32.mrf.mxu0 }
  0xe6   :  { %v157_v15 = vmul.f32 %v203_v12, %v143_v13 }
  0xe7   :  { %v145_v17 = vpop.f32.mrf.mxu0 }
  0xe8   :  { %v166_v18 = vadd.f32 %v204_v14, %v157_v15 }
  0xe9   :  { %v146_v19 = vpop.f32.mrf.mxu0 }
  0xea   :  { %vm169_vm1 = vcmp.ge.f32.partialorder %v166_v18, 0.0  ;;  %v172_v20 = vmul.f32 %v171_v16, %v166_v18  ;;  %v158_v21 = vmul.f32 %v203_v12, %v146_v19 }
  0xeb   :  { %v148_v22 = vpop.f32.mrf.mxu0 }
  0xec   :  { %v174_v23 = vsel %vm169_vm1, %v166_v18, %v172_v20  ;;  %v167_v24 = vadd.f32 %v204_v14, %v158_v21 }
  0xed   :  { %v207_v25 = vpack.c.bf16 %v174_v23, %v174_v23 }
  0xee   :  { %vm170_vm3 = vcmp.ge.f32.partialorder %v167_v24, 0.0  ;;  %v173_v26 = vmul.f32 %v171_v16, %v167_v24 }
  0xef   :  { %185 = vst.msk [vmem:[%s306_s5] sm:$0xf] %vm184_vm2, %v207_v25 }
  0xf0   :  { %v175_v27 = vsel %vm170_vm3, %v167_v24, %v173_v26 }
  0xf1   :  { %v208_v28 = vpack.c.bf16 %v175_v27, %v175_v27 }
  0xf3   :  { %186 = vst.msk [vmem:[%s306_s5 + $0x4] sm:$0xf] %vm184_vm2, %v208_v28 }

// kernel: lanenet_forward.151
= control target key start
LH: loop header
LB: loop body
LE: loop exit
PB: predicated region body
PF: predicated region fallthrough
CT: control target
= control target key end

     0   :  { %11 = vsyncpa [#allocation3], 0  ;;  %s257_s0 = inlined_call_operand.vmem [shape: bf16[16,16], index: 0, kind: input, shape index: {}]   ;;  %s258_s1 = inlined_call_operand.vmem [shape: bf16[16,128], index: 1, kind: input, shape index: {}]   ;;  %s259_s2 = inlined_call_operand.vmem [shape: f32[1,128], index: 2, kind: input, shape index: {}]   ;;  %s260_s3 = inlined_call_operand.vmem [shape: f32[1,128], index: 3, kind: input, shape index: {}]   ;;  %s261_s4 = inlined_call_operand.vmem [shape: bf16[16,128], index: 4, kind: input, shape index: {}]   ;;  %s262_s5 = inlined_call_operand.vmem [shape: f32[2], index: 5, kind: input, shape index: {}]   ;;  %s263_s6 = inlined_call_operand.vmem [shape: bf16[16,128], index: 6, kind: output, shape index: {}]  }
   0x1   :  { %s28_s23 = sshll.u32 %s262_s5, 4  ;;  %s29_s23 = int_to_ptr.vmem [resolvable:$true] %s28_s23 }
   0x2   :  { %s184_s24 = scalar_lea.vmem %s29_s23, 16  ;;  %p189_p1 = scmp.lt.s32.totalorder %s29_s23, %s29_s23 }
   0x3   :  { %p185_p0 = scmp.ne.s32.totalorder %s29_s23, %s184_s24  ;;  %p190_p2 = scmp.lt.s32.totalorder %s184_s24, %s184_s24 }
   0x5   :  { %p191_p3 = por %p190_p2, %p189_p1 }
   0x7   :  { %p192_p4 = pnand %p191_p3, %p185_p0 }
   0x9   :  { %195 = shalt.err (!%p192_p4)
}
   0xa   :  { %s198_s25 = smov [#allocation2]  }
   0xb   :  { %31 = dma.vmem_to_smem %s29_s23, 16, %s198_s25, [#allocation3]  }
   0xc   :  { %196 = dma.done.wait [#allocation3], 16  }
   0xd   :  { %197 = vsyncadd [#allocation3], 4294967280 }
   0xe   :  { %35 = sfence }
   0xf   :  { %v182_v0 = vld [vmem:[%s258_s1] sm:$0xff]   ;;  %v199_v1 = vmov 0.0   ;;  %vm200_vm0 = vmmov 0   ;;  %vm52_vm1 = vcmask 130048   ;;  %s115_s29 = sld [smem:[#allocation2]] }
  0x10   :  { %173 = vmatprep.subr.bf16.mxu0 %v199_v1  ;;  %v183_v2 = vld [vmem:[%s257_s0] sm:$0xff]   ;;  %175 = vmatprep.mubr.msk.bf16.mxu0 %vm200_vm0, %v199_v1  ;;  %s157_s0 = sld [smem:[#allocation2 + $0x1]] }
  0x11   :  { %174 = vmatpush3.bf16.msra.mxu0 %v182_v0  ;;  %v155_v3 = vld [vmem:[%s259_s2] ss:$0 sm:$0xff] }
  0x12   :  { %v156_v5 = vld [vmem:[%s260_s3] ss:$0 sm:$0xff] }
  0x13   :  { %v163_v7 = vld [vmem:[%s261_s4] sm:$0xff]  }
  0x14   :  { %176 = vmatmul.mubr.msk.bf16.vlgmr.msra.gmra.mxu0 %vm52_vm1, %v183_v2  ;;  %v164_v11 = vunpack.c.l.bf16 %v163_v7  ;;  %v165_v19 = vunpack.c.h.bf16 %v163_v7 }
  0x15   :  { %v118_v8 = vstv %s115_s29 }
  0x16   :  { %v132_v20 = vstv %s157_s0 }
  0xd4   :  { %v90_v4 = vpop.f32.mrf.mxu0 }
  0xd5   :  { %v104_v6 = vmul.f32 %v155_v3, %v90_v4 }
  0xd6   :  { %v177_v9 = vpop.f32.mrf.mxu0 }
  0xd7   :  { %v113_v10 = vadd.f32 %v156_v5, %v104_v6 }
  0xd8   :  { %v93_v12 = vpop.f32.mrf.mxu0 }
  0xd9   :  { %vm116_vm2 = vcmp.ge.f32.partialorder %v113_v10, 0.0  ;;  %v119_v13 = vmul.f32 %v118_v8, %v113_v10  ;;  %v105_v14 = vmul.f32 %v155_v3, %v93_v12 }
  0xda   :  { %v178_v15 = vpop.f32.mrf.mxu0 }
  0xdb   :  { %v121_v16 = vsel %vm116_vm2, %v113_v10, %v119_v13  ;;  %v114_v17 = vadd.f32 %v156_v5, %v105_v14 }
  0xdc   :  { %v127_v18 = vadd.f32 %v164_v11, %v121_v16 }
  0xdd   :  { %vm117_vm3 = vcmp.ge.f32.partialorder %v114_v17, 0.0  ;;  %v120_v21 = vmul.f32 %v118_v8, %v114_v17 }
  0xde   :  { %v133_v23 = vmul.f32 %v132_v20, %v127_v18  ;;  %vm130_vm4 = vcmp.ge.f32.partialorder %v127_v18, 0.0 }
  0xdf   :  { %v122_v22 = vsel %vm117_vm3, %v114_v17, %v120_v21 }
  0xe0   :  { %v128_v24 = vadd.f32 %v165_v19, %v122_v22  ;;  %v135_v26 = vsel %vm130_vm4, %v127_v18, %v133_v23 }
  0xe2   :  { %vm131_vm5 = vcmp.ge.f32.partialorder %v128_v24, 0.0  ;;  %v134_v25 = vmul.f32 %v132_v20, %v128_v24 }
  0xe4   :  { %v136_v27 = vsel %vm131_vm5, %v128_v24, %v134_v25 }
  0xe5   :  { %v169_v28 = vpack.c.bf16 %v136_v27, %v135_v26 }
  0xe7   :  { %170 = vst [vmem:[%s263_s6] sm:$0xff] %v169_v28  }
  0xe8   :  { %151 = vsyncpa [#allocation3], 1 }

// kernel: lanenet_forward.152
= control target key start
LH: loop header
LB: loop body
LE: loop exit
PB: predicated region body
PF: predicated region fallthrough
CT: control target
= control target key end

     0   :  { %v231_v0 = vmov 0.0   ;;  %vm232_vm0 = vmmov 0   ;;  %vm169_vm2 = vcmask 257024   ;;  %s305_s1 = inlined_call_operand.vmem [shape: bf16[128,32], index: 1, kind: input, shape index: {}]   ;;  %s306_s0 = inlined_call_operand.vmem [shape: bf16[16,128], index: 0, kind: input, shape index: {}]   ;;  %s307_s2 = inlined_call_operand.vmem [shape: f32[1,32], index: 2, kind: input, shape index: {}]   ;;  %s308_s3 = inlined_call_operand.vmem [shape: f32[1,32], index: 3, kind: input, shape index: {}]   ;;  %s309_s4 = inlined_call_operand.<no memory space> [shape: f32[1], index: 4, kind: input, shape index: {}]   ;;  %s310_s5 = inlined_call_operand.vmem [shape: bf16[16,32], index: 5, kind: output, shape index: {}]  }
   0x1   :  { %200 = vmatprep.subr.bf16.mxu0 %v231_v0  ;;  %v222_v1 = vld [vmem:[%s305_s1 + $0x38] sm:$0xff]   ;;  %216 = vmatprep.mubr.msk.bf16.mxu0 %vm232_vm0, %v231_v0  ;;  %v223_v2 = vld [vmem:[%s305_s1 + $0x30] sm:$0xff]   ;;  %v224_v3 = vld [vmem:[%s305_s1 + $0x28] sm:$0xff]   ;;  %v156_v14 = vstv %s309_s4 }
   0x2   :  { %201 = vmatpush3.bf16.msra.mxu0 %v222_v1  ;;  %v225_v4 = vld [vmem:[%s305_s1 + $0x20] sm:$0xff]   ;;  %v226_v5 = vld [vmem:[%s305_s1 + $0x18] sm:$0xff]   ;;  %v227_v6 = vld [vmem:[%s305_s1 + $0x10] sm:$0xff]  }
   0x3   :  { %202 = vmatprep.subr.bf16.mxu0 %v231_v0  ;;  %v228_v7 = vld [vmem:[%s305_s1 + $0x8] sm:$0xff]   ;;  %v229_v8 = vld [vmem:[%s305_s1] sm:$0xff]  }
   0x4   :  { %v230_v9 = vld [vmem:[%s306_s0] sm:$0xff]  }
   0x5   :  { %v185_v10 = vld [vmem:[%s307_s2] ss:$0 sm:$0xff] }
   0x6   :  { %203 = vmatpush3.bf16.msra.mxu0 %v223_v2  ;;  %v186_v12 = vld [vmem:[%s308_s3] ss:$0 sm:$0xff] }
   0x7   :  { %204 = vmatprep.subr.bf16.mxu0 %v231_v0 }
   0xa   :  { %205 = vmatpush3.bf16.msra.mxu0 %v224_v3 }
   0xb   :  { %206 = vmatprep.subr.bf16.mxu0 %v231_v0 }
   0xe   :  { %207 = vmatpush3.bf16.msra.mxu0 %v225_v4 }
   0xf   :  { %208 = vmatprep.subr.bf16.mxu0 %v231_v0 }
  0x12   :  { %209 = vmatpush3.bf16.msra.mxu0 %v226_v5 }
  0x13   :  { %210 = vmatprep.subr.bf16.mxu0 %v231_v0 }
  0x16   :  { %211 = vmatpush3.bf16.msra.mxu0 %v227_v6 }
  0x17   :  { %212 = vmatprep.subr.bf16.mxu0 %v231_v0 }
  0x1a   :  { %213 = vmatpush3.bf16.msra.mxu0 %v228_v7 }
  0x1b   :  { %214 = vmatprep.subr.bf16.mxu0 %v231_v0 }
  0x1e   :  { %215 = vmatpush3.bf16.msra.mxu0 %v229_v8 }
  0x21   :  { %217 = vmatmul.mubr.bf16.vlgmr.msra.gmra.mxu0 %v230_v9 }
  0xe1   :  { %v128_v11 = vpop.f32.mrf.mxu0 }
  0xe2   :  { %v142_v13 = vmul.f32 %v185_v10, %v128_v11 }
  0xe3   :  { %v218_v15 = vpop.f32.mrf.mxu0 }
  0xe4   :  { %v151_v16 = vadd.f32 %v186_v12, %v142_v13 }
  0xe5   :  { %v131_v17 = vpop.f32.mrf.mxu0 }
  0xe6   :  { %vm154_vm1 = vcmp.ge.f32.partialorder %v151_v16, 0.0  ;;  %v157_v18 = vmul.f32 %v156_v14, %v151_v16  ;;  %v143_v19 = vmul.f32 %v185_v10, %v131_v17 }
  0xe7   :  { %v219_v20 = vpop.f32.mrf.mxu0 }
  0xe8   :  { %v159_v21 = vsel %vm154_vm1, %v151_v16, %v157_v18  ;;  %v152_v22 = vadd.f32 %v186_v12, %v143_v19 }
  0xe9   :  { %v189_v23 = vpack.c.bf16 %v159_v21, %v159_v21 }
  0xea   :  { %vm155_vm3 = vcmp.ge.f32.partialorder %v152_v22, 0.0  ;;  %v158_v24 = vmul.f32 %v156_v14, %v152_v22 }
  0xeb   :  { %170 = vst.msk [vmem:[%s310_s5] sm:$0xf] %vm169_vm2, %v189_v23 }
  0xec   :  { %v160_v25 = vsel %vm155_vm3, %v152_v22, %v158_v24 }
  0xed   :  { %v190_v26 = vpack.c.bf16 %v160_v25, %v160_v25 }
  0xef   :  { %171 = vst.msk [vmem:[%s310_s5 + $0x4] sm:$0xf] %vm169_vm2, %v190_v26 }

// kernel: lanenet_forward.153
= control target key start
LH: loop header
LB: loop body
LE: loop exit
PB: predicated region body
PF: predicated region fallthrough
CT: control target
= control target key end

     0   :  { %v397_v1 = vmov 0.0   ;;  %vm398_vm0 = vmmov 0   ;;  %vm185_vm1 = vcmask 261120   ;;  %vm305_vm3 = vcmask 257024   ;;  %s507_s1 = inlined_call_operand.vmem [shape: bf16[288,32], index: 1, kind: input, shape index: {}]   ;;  %s508_s0 = inlined_call_operand.vmem [shape: bf16[16,288], index: 0, kind: input, shape index: {}]   ;;  %s509_s2 = inlined_call_operand.vmem [shape: f32[1,32], index: 2, kind: input, shape index: {}]   ;;  %s510_s3 = inlined_call_operand.vmem [shape: f32[1,32], index: 3, kind: input, shape index: {}]   ;;  %s511_s4 = inlined_call_operand.<no memory space> [shape: f32[1], index: 4, kind: input, shape index: {}]   ;;  %s512_s5 = inlined_call_operand.vmem [shape: bf16[16,32], index: 5, kind: output, shape index: {}]  }
   0x1   :  { %v375_v0 = vld [vmem:[%s507_s1 + $0x78] sm:$0xff]   ;;  %365 = vmatprep.subr.bf16.mxu1 %v397_v1  ;;  %369 = vmatprep.mubr.msk.bf16.mxu1 %vm398_vm0, %v397_v1  ;;  %v377_v3 = vld [vmem:[%s507_s1 + $0x70] sm:$0xff]   ;;  %v379_v5 = vld [vmem:[%s507_s1 + $0x68] sm:$0xff]   ;;  %v292_v36 = vstv %s511_s4 }
   0x2   :  { %v376_v2 = vld [vmem:[%s507_s1 + $0x38] sm:$0xff]   ;;  %340 = vmatprep.subr.bf16.mxu0 %v375_v0  ;;  %v378_v4 = vld [vmem:[%s507_s1 + $0x30] sm:$0xff]   ;;  %v380_v6 = vld [vmem:[%s507_s1 + $0x28] sm:$0xff]  }
   0x3   :  { %341 = vmatpush3.bf16.msra.mxu0 %v376_v2  ;;  %v381_v7 = vld [vmem:[%s507_s1 + $0x60] sm:$0xff]   ;;  %v383_v9 = vld [vmem:[%s507_s1 + $0x58] sm:$0xff]   ;;  %v387_v10 = vld [vmem:[%s507_s1 + $0x88] sm:$0xff]  }
   0x4   :  { %342 = vmatprep.subr.bf16.mxu0 %v377_v3  ;;  %v382_v8 = vld [vmem:[%s507_s1 + $0x20] sm:$0xff]   ;;  %v384_v11 = vld [vmem:[%s507_s1 + $0x18] sm:$0xff]   ;;  %366 = vmatpush3.bf16.msra.mxu1 %v387_v10  ;;  %v385_v13 = vld [vmem:[%s507_s1 + $0x50] sm:$0xff]  }
   0x5   :  { %367 = vmatprep.subr.bf16.mxu1 %v397_v1  ;;  %v390_v12 = vld [vmem:[%s507_s1 + $0x80] sm:$0xff]   ;;  %v393_v14 = vld [vmem:[%s508_s0 + $0x8] ss:$12 sps:$4 sm:$0xff]  }
   0x6   :  { %v386_v15 = vld [vmem:[%s507_s1 + $0x10] sm:$0xff]   ;;  %v388_v16 = vld [vmem:[%s507_s1 + $0x48] sm:$0xff]   ;;  %v391_v19 = vld [vmem:[%s507_s1 + $0x40] sm:$0xff]  }
   0x7   :  { %343 = vmatpush3.bf16.msra.mxu0 %v378_v4  ;;  %v396_v17 = vld [vmem:[%s508_s0 + $0x4] ss:$12 sps:$4 sm:$0xff]   ;;  %v389_v18 = vld [vmem:[%s507_s1 + $0x8] sm:$0xff]   ;;  %v334_v29 = vld [vmem:[%s509_s2] ss:$0 sm:$0xff] }
   0x8   :  { %344 = vmatprep.subr.bf16.mxu0 %v379_v5  ;;  %368 = vmatpush3.bf16.msra.mxu1 %v390_v12  ;;  %v392_v20 = vld [vmem:[%s507_s1] sm:$0xff]  }
   0x9   :  { %221 = vmatprep.mubr.bf16.mxu0 %v396_v17  ;;  %v394_v21 = vld [vmem:[%s508_s0] ss:$12 sps:$4 sm:$0xff]  }
   0xa   :  { %v335_v32 = vld [vmem:[%s510_s3] ss:$0 sm:$0xff] }
   0xb   :  { %345 = vmatpush3.bf16.msra.mxu0 %v380_v6  ;;  %370 = vmatmul.mubr.msk.bf16.vlgmr.msra.gmra.mxu1 %vm185_vm1, %v393_v14 }
   0xc   :  { %346 = vmatprep.subr.bf16.mxu0 %v381_v7 }
   0xf   :  { %347 = vmatpush3.bf16.msra.mxu0 %v382_v8 }
  0x10   :  { %348 = vmatprep.subr.bf16.mxu0 %v383_v9 }
  0x13   :  { %349 = vmatpush3.bf16.msra.mxu0 %v384_v11 }
  0x14   :  { %350 = vmatprep.subr.bf16.mxu0 %v385_v13 }
  0x17   :  { %351 = vmatpush3.bf16.msra.mxu0 %v386_v15 }
  0x18   :  { %352 = vmatprep.subr.bf16.mxu0 %v388_v16 }
  0x1b   :  { %353 = vmatpush3.bf16.msra.mxu0 %v389_v18 }
  0x1c   :  { %354 = vmatprep.subr.bf16.mxu0 %v391_v19 }
  0x1f   :  { %355 = vmatpush3.bf16.msra.mxu0 %v392_v20 }
  0x22   :  { %222 = vmatmul.mubr.bf16.vlgmr.msra.gmra.mxu0 %v394_v21 }
  0xcb   :  { %v264_v22 = vpop.f32.mrf.mxu1 }
  0xcd   :  { %v371_v23 = vpop.f32.mrf.mxu1 }
  0xcf   :  { %v267_v24 = vpop.f32.mrf.mxu1 }
  0xd1   :  { %v372_v25 = vpop.f32.mrf.mxu1 }
  0xe2   :  { %v356_v26 = vpop.f32.mrf.mxu0 }
  0xe4   :  { %v357_v27 = vpop.f32.mrf.mxu0 }
  0xe5   :  { %v358_v28 = vadd.f32 %v357_v27, %v356_v26 }
  0xe6   :  { %v359_v30 = vpop.f32.mrf.mxu0 }
  0xe7   :  { %v265_v31 = vadd.f32 %v358_v28, %v264_v22 }
  0xe8   :  { %v360_v33 = vpop.f32.mrf.mxu0 }
  0xe9   :  { %v278_v34 = vmul.f32 %v334_v29, %v265_v31  ;;  %v361_v35 = vadd.f32 %v360_v33, %v359_v30 }
  0xeb   :  { %v287_v37 = vadd.f32 %v335_v32, %v278_v34  ;;  %v268_v38 = vadd.f32 %v361_v35, %v267_v24 }
  0xed   :  { %vm290_vm2 = vcmp.ge.f32.partialorder %v287_v37, 0.0  ;;  %v293_v39 = vmul.f32 %v292_v36, %v287_v37  ;;  %v279_v40 = vmul.f32 %v334_v29, %v268_v38 }
  0xef   :  { %v295_v41 = vsel %vm290_vm2, %v287_v37, %v293_v39  ;;  %v288_v42 = vadd.f32 %v335_v32, %v279_v40 }
  0xf0   :  { %v338_v43 = vpack.c.bf16 %v295_v41, %v295_v41 }
  0xf1   :  { %vm291_vm4 = vcmp.ge.f32.partialorder %v288_v42, 0.0  ;;  %v294_v44 = vmul.f32 %v292_v36, %v288_v42 }
  0xf2   :  { %306 = vst.msk [vmem:[%s512_s5] sm:$0xf] %vm305_vm3, %v338_v43 }
  0xf3   :  { %v296_v45 = vsel %vm291_vm4, %v288_v42, %v294_v44 }
  0xf4   :  { %v339_v46 = vpack.c.bf16 %v296_v45, %v296_v45 }
  0xf6   :  { %307 = vst.msk [vmem:[%s512_s5 + $0x4] sm:$0xf] %vm305_vm3, %v339_v46 }

// kernel: lanenet_forward.154
= control target key start
LH: loop header
LB: loop body
LE: loop exit
PB: predicated region body
PF: predicated region fallthrough
CT: control target
= control target key end

     0   :  { %11 = vsyncpa [#allocation3], 0  ;;  %s273_s0 = inlined_call_operand.vmem [shape: bf16[16,32], index: 0, kind: input, shape index: {}]   ;;  %s274_s1 = inlined_call_operand.vmem [shape: bf16[32,128], index: 1, kind: input, shape index: {}]   ;;  %s275_s2 = inlined_call_operand.vmem [shape: f32[1,128], index: 2, kind: input, shape index: {}]   ;;  %s276_s3 = inlined_call_operand.vmem [shape: f32[1,128], index: 3, kind: input, shape index: {}]   ;;  %s277_s4 = inlined_call_operand.vmem [shape: bf16[16,128], index: 4, kind: input, shape index: {}]   ;;  %s278_s5 = inlined_call_operand.vmem [shape: f32[2], index: 5, kind: input, shape index: {}]   ;;  %s279_s6 = inlined_call_operand.vmem [shape: bf16[16,128], index: 6, kind: output, shape index: {}]  }
   0x1   :  { %s28_s23 = sshll.u32 %s278_s5, 4  ;;  %s29_s23 = int_to_ptr.vmem [resolvable:$true] %s28_s23 }
   0x2   :  { %s197_s24 = scalar_lea.vmem %s29_s23, 16  ;;  %p202_p1 = scmp.lt.s32.totalorder %s29_s23, %s29_s23 }
   0x3   :  { %p198_p0 = scmp.ne.s32.totalorder %s29_s23, %s197_s24  ;;  %p203_p2 = scmp.lt.s32.totalorder %s197_s24, %s197_s24 }
   0x5   :  { %p204_p3 = por %p203_p2, %p202_p1 }
   0x7   :  { %p205_p4 = pnand %p204_p3, %p198_p0 }
   0x9   :  { %208 = shalt.err (!%p205_p4)
}
   0xa   :  { %s211_s25 = smov [#allocation2]  }
   0xb   :  { %31 = dma.vmem_to_smem %s29_s23, 16, %s211_s25, [#allocation3]  }
   0xc   :  { %209 = dma.done.wait [#allocation3], 16  }
   0xd   :  { %210 = vsyncadd [#allocation3], 4294967280 }
   0xe   :  { %35 = sfence }
   0xf   :  { %v194_v0 = vld [vmem:[%s274_s1 + $0x8] sm:$0xff]   ;;  %v212_v1 = vmov 0.0   ;;  %v195_v2 = vld [vmem:[%s274_s1] sm:$0xff]   ;;  %vm213_vm0 = vmmov 0   ;;  %vm60_vm1 = vcmask 261120   ;;  %s123_s7 = sld [smem:[#allocation2]] }
  0x10   :  { %183 = vmatprep.subr.bf16.mxu0 %v212_v1  ;;  %187 = vmatprep.mubr.msk.bf16.mxu0 %vm213_vm0, %v212_v1  ;;  %v196_v3 = vld [vmem:[%s273_s0] sm:$0xff]   ;;  %s166_s13 = sld [smem:[#allocation2 + $0x1]] }
  0x11   :  { %184 = vmatpush3.bf16.msra.mxu0 %v194_v0  ;;  %v164_v4 = vld [vmem:[%s275_s2] ss:$0 sm:$0xff] }
  0x12   :  { %185 = vmatprep.subr.bf16.mxu0 %v212_v1  ;;  %v165_v6 = vld [vmem:[%s276_s3] ss:$0 sm:$0xff] }
  0x13   :  { %v172_v8 = vld [vmem:[%s277_s4] sm:$0xff]  }
  0x14   :  { %v173_v12 = vunpack.c.l.bf16 %v172_v8  ;;  %v174_v20 = vunpack.c.h.bf16 %v172_v8 }
  0x15   :  { %186 = vmatpush3.bf16.msra.mxu0 %v195_v2  ;;  %v126_v9 = vstv %s123_s7 }
  0x16   :  { %v140_v21 = vstv %s166_s13 }
  0x18   :  { %188 = vmatmul.mubr.msk.bf16.vlgmr.msra.gmra.mxu0 %vm60_vm1, %v196_v3 }
  0xd8   :  { %v98_v5 = vpop.f32.mrf.mxu0 }
  0xd9   :  { %v112_v7 = vmul.f32 %v164_v4, %v98_v5 }
  0xda   :  { %v189_v10 = vpop.f32.mrf.mxu0 }
  0xdb   :  { %v121_v11 = vadd.f32 %v165_v6, %v112_v7 }
  0xdc   :  { %v101_v13 = vpop.f32.mrf.mxu0 }
  0xdd   :  { %vm124_vm2 = vcmp.ge.f32.partialorder %v121_v11, 0.0  ;;  %v127_v14 = vmul.f32 %v126_v9, %v121_v11  ;;  %v113_v15 = vmul.f32 %v164_v4, %v101_v13 }
  0xde   :  { %v190_v16 = vpop.f32.mrf.mxu0 }
  0xdf   :  { %v129_v17 = vsel %vm124_vm2, %v121_v11, %v127_v14  ;;  %v122_v18 = vadd.f32 %v165_v6, %v113_v15 }
  0xe0   :  { %v135_v19 = vadd.f32 %v173_v12, %v129_v17 }
  0xe1   :  { %vm125_vm3 = vcmp.ge.f32.partialorder %v122_v18, 0.0  ;;  %v128_v22 = vmul.f32 %v126_v9, %v122_v18 }
  0xe2   :  { %v141_v24 = vmul.f32 %v140_v21, %v135_v19  ;;  %vm138_vm4 = vcmp.ge.f32.partialorder %v135_v19, 0.0 }
  0xe3   :  { %v130_v23 = vsel %vm125_vm3, %v122_v18, %v128_v22 }
  0xe4   :  { %v136_v25 = vadd.f32 %v174_v20, %v130_v23  ;;  %v143_v27 = vsel %vm138_vm4, %v135_v19, %v141_v24 }
  0xe6   :  { %vm139_vm5 = vcmp.ge.f32.partialorder %v136_v25, 0.0  ;;  %v142_v26 = vmul.f32 %v140_v21, %v136_v25 }
  0xe8   :  { %v144_v28 = vsel %vm139_vm5, %v136_v25, %v142_v26 }
  0xe9   :  { %v178_v29 = vpack.c.bf16 %v144_v28, %v143_v27 }
  0xeb   :  { %179 = vst [vmem:[%s279_s6] sm:$0xff] %v178_v29  }
  0xec   :  { %159 = vsyncpa [#allocation3], 1 }

// kernel: lanenet_forward.159
= control target key start
LH: loop header
LB: loop body
LE: loop exit
PB: predicated region body
PF: predicated region fallthrough
CT: control target
= control target key end

     0   :  { %v232_v0 = vmov 0   ;;  %vm113_vm0 = vcmask 261120   ;;  %vm192_vm2 = vcmask 257024   ;;  %s314_s1 = inlined_call_operand.vmem [shape: bf16[160,32], index: 1, kind: input, shape index: {}]   ;;  %s315_s0 = inlined_call_operand.vmem [shape: bf16[16,160], index: 0, kind: input, shape index: {}]   ;;  %s316_s2 = inlined_call_operand.vmem [shape: f32[1,32], index: 2, kind: input, shape index: {}]   ;;  %s317_s3 = inlined_call_operand.vmem [shape: f32[1,32], index: 3, kind: input, shape index: {}]   ;;  %s318_s4 = inlined_call_operand.<no memory space> [shape: f32[1], index: 4, kind: input, shape index: {}]   ;;  %s319_s5 = inlined_call_operand.vmem [shape: bf16[16,32], index: 5, kind: output, shape index: {}]  }
   0x1   :  { %117 = vmatprep.subr.bf16.mxu0 %v232_v0  ;;  %v219_v1 = vld [vmem:[%s314_s1 + $0x38] sm:$0xff]   ;;  %v220_v2 = vld [vmem:[%s314_s1 + $0x30] sm:$0xff]   ;;  %v221_v3 = vld [vmem:[%s314_s1 + $0x28] sm:$0xff]   ;;  %v179_v17 = vstv %s318_s4 }
   0x2   :  { %118 = vmatpush1.bf16.msra.mxu0 %v219_v1  ;;  %v222_v4 = vld [vmem:[%s314_s1 + $0x20] sm:$0xff]   ;;  %v223_v6 = vld [vmem:[%s314_s1 + $0x18] sm:$0xff]   ;;  %v224_v7 = vld [vmem:[%s314_s1 + $0x10] sm:$0xff]  }
   0x3   :  { %119 = vmatprep.subr.bf16.mxu0 %v232_v0  ;;  %v231_v5 = vld [vmem:[%s315_s0 + $0x4] ss:$8 sps:$4 sm:$0xff]   ;;  %v229_v12 = vld [vmem:[%s315_s0] ss:$8 sps:$4 sm:$0xff]  }
   0x4   :  { %211 = vmatprep.mubr.msk.bf16.mxu0 %vm113_vm0, %v231_v5  ;;  %v225_v8 = vld [vmem:[%s314_s1 + $0x8] sm:$0xff]   ;;  %v226_v9 = vld [vmem:[%s314_s1] sm:$0xff]  }
   0x5   :  { %v227_v10 = vld [vmem:[%s314_s1 + $0x48] sm:$0xff]   ;;  %v228_v11 = vld [vmem:[%s314_s1 + $0x40] sm:$0xff]  }
   0x6   :  { %120 = vmatpush1.bf16.msra.mxu0 %v220_v2  ;;  %v212_v13 = vld [vmem:[%s316_s2] ss:$0 sm:$0xff] }
   0x7   :  { %121 = vmatprep.subr.bf16.mxu0 %v232_v0  ;;  %v213_v15 = vld [vmem:[%s317_s3] ss:$0 sm:$0xff] }
   0xa   :  { %122 = vmatpush1.bf16.msra.mxu0 %v221_v3 }
   0xb   :  { %123 = vmatprep.subr.bf16.mxu0 %v232_v0 }
   0xe   :  { %124 = vmatpush1.bf16.msra.mxu0 %v222_v4 }
   0xf   :  { %125 = vmatprep.subr.bf16.mxu0 %v232_v0 }
  0x12   :  { %126 = vmatpush1.bf16.msra.mxu0 %v223_v6 }
  0x13   :  { %127 = vmatprep.subr.bf16.mxu0 %v232_v0 }
  0x16   :  { %128 = vmatpush1.bf16.msra.mxu0 %v224_v7 }
  0x17   :  { %129 = vmatprep.subr.bf16.mxu0 %v232_v0 }
  0x1a   :  { %130 = vmatpush1.bf16.msra.mxu0 %v225_v8 }
  0x1b   :  { %131 = vmatprep.subr.bf16.mxu0 %v232_v0 }
  0x1e   :  { %132 = vmatpush1.bf16.msra.mxu0 %v226_v9 }
  0x1f   :  { %145 = vmatprep.subr.bf16.mxu0 %v232_v0 }
  0x22   :  { %146 = vmatpush2.bf16.msra.mxu0 %v227_v10 }
  0x23   :  { %147 = vmatprep.subr.bf16.mxu0 %v232_v0 }
  0x26   :  { %148 = vmatpush2.bf16.msra.mxu0 %v228_v11 }
  0x29   :  { %150 = vmatmul.mubr.bf16.vlgmr.msra.gmra.mxu0 %v229_v12 }
  0xe9   :  { %v151_v14 = vpop.f32.mrf.mxu0 }
  0xea   :  { %v165_v16 = vmul.f32 %v212_v13, %v151_v14 }
  0xeb   :  { %v153_v18 = vpop.f32.mrf.mxu0 }
  0xec   :  { %v174_v19 = vadd.f32 %v213_v15, %v165_v16 }
  0xed   :  { %v154_v20 = vpop.f32.mrf.mxu0 }
  0xee   :  { %vm177_vm1 = vcmp.ge.f32.partialorder %v174_v19, 0.0  ;;  %v180_v21 = vmul.f32 %v179_v17, %v174_v19  ;;  %v166_v22 = vmul.f32 %v212_v13, %v154_v20 }
  0xef   :  { %v156_v23 = vpop.f32.mrf.mxu0 }
  0xf0   :  { %v182_v24 = vsel %vm177_vm1, %v174_v19, %v180_v21  ;;  %v175_v25 = vadd.f32 %v213_v15, %v166_v22 }
  0xf1   :  { %v216_v26 = vpack.c.bf16 %v182_v24, %v182_v24 }
  0xf2   :  { %vm178_vm3 = vcmp.ge.f32.partialorder %v175_v25, 0.0  ;;  %v181_v27 = vmul.f32 %v179_v17, %v175_v25 }
  0xf3   :  { %193 = vst.msk [vmem:[%s319_s5] sm:$0xf] %vm192_vm2, %v216_v26 }
  0xf4   :  { %v183_v28 = vsel %vm178_vm3, %v175_v25, %v181_v27 }
  0xf5   :  { %v217_v29 = vpack.c.bf16 %v183_v28, %v183_v28 }
  0xf7   :  { %194 = vst.msk [vmem:[%s319_s5 + $0x4] sm:$0xf] %vm192_vm2, %v217_v29 }

// kernel: tile.53
= control target key start
LH: loop header
LB: loop body
LE: loop exit
PB: predicated region body
PF: predicated region fallthrough
CT: control target
= control target key end

     0   :  { %s22_s0 = inlined_call_operand.vmem [shape: f32[32], index: 0, kind: input, shape index: {}]   ;;  %s23_s1 = inlined_call_operand.vmem [shape: f32[4,32], index: 1, kind: output, shape index: {}]  }
   0x1   :  { %v4_v0 = vld [vmem:[%s22_s0] ss:$0 sm:$0xff] }
   0x2   :  { %5 = vst [vmem:[%s23_s1] sm:$0xf] %v4_v0 }

// kernel: tile.58
= control target key start
LH: loop header
LB: loop body
LE: loop exit
PB: predicated region body
PF: predicated region fallthrough
CT: control target
= control target key end

     0   :  { %vm8_vm0 = vcmask 261120   ;;  %s40_s8 = smov 32   ;;  %s41_s9 = smov 64   ;;  %vm14_vm1 = vcmask 1048320   ;;  %vm20_vm2 = vcmask 785920   ;;  %vm26_vm3 = vcmask 523520   ;;  %s58_s0 = inlined_call_operand.vmem [shape: f32[4,32], index: 0, kind: input, shape index: {}]   ;;  %s59_s1 = inlined_call_operand.vmem [shape: f32[1,128], index: 1, kind: output, shape index: {}]  }
   0x1   :  { %v5_v0 = vld [vmem:[%s58_s0] sm:$0xf]  ;;  %s39_s0 = smov 96  }
   0x2   :  { %6 = vst [vmem:[#allocation1] sm:$0xf] %v5_v0 }
   0x9   :  { %v11_v1 = vld [vmem:[#allocation1 + $0x3] sm:$0x1]   ;;  %v23_v2 = vld [vmem:[#allocation1 + $0x1] sm:$0x1]   ;;  %v7_v3 = vld [vmem:[#allocation1] sm:$0x1]  }
   0xa   :  { %12 = vrot.lane.b32.xlu0 %v11_v1, %s39_s0  ;;  %24 = vrot.lane.b32.xlu1 %v23_v2, %s40_s8  ;;  %v17_v4 = vld [vmem:[#allocation1 + $0x2] sm:$0x1]   ;;  %9 = vst.msk [vmem:[#allocation0] sm:$0x1] %vm8_vm0, %v7_v3  }
   0xe   :  { %18 = vrot.lane.b32.xlu0 %v17_v4, %s41_s9 }
  0x7c   :  { %v13_v5 = vpop.permute.xlu0 %12   ;;  %v25_v6 = vpop.permute.xlu1 %24  }
  0x7d   :  { %15 = vst.msk [vmem:[#allocation0] sm:$0x1] %vm14_vm1, %v13_v5  }
  0x80   :  { %v19_v7 = vpop.permute.xlu0 %18  }
  0x81   :  { %21 = vst.msk [vmem:[#allocation0] sm:$0x1] %vm20_vm2, %v19_v7  }
  0x82   :  { %27 = vst.msk [vmem:[#allocation0] sm:$0x1] %vm26_vm3, %v25_v6  }
  0x89   :  { %v32_v8 = vld [vmem:[#allocation0] sm:$0x1] }
  0x8a   :  { %35 = vst [vmem:[%s59_s1] sm:$0x1] %v32_v8 }

// kernel: lanenet_forward.240
= control target key start
LH: loop header
LB: loop body
LE: loop exit
PB: predicated region body
PF: predicated region fallthrough
CT: control target
= control target key end

     0   :  { %v231_v0 = vmov 0.0   ;;  %vm232_vm0 = vmmov 0   ;;  %vm169_vm2 = vcmask 519168   ;;  %s305_s1 = inlined_call_operand.vmem [shape: bf16[128,64], index: 1, kind: input, shape index: {}]   ;;  %s306_s0 = inlined_call_operand.vmem [shape: bf16[16,128], index: 0, kind: input, shape index: {}]   ;;  %s307_s2 = inlined_call_operand.vmem [shape: f32[1,64], index: 2, kind: input, shape index: {}]   ;;  %s308_s3 = inlined_call_operand.vmem [shape: f32[1,64], index: 3, kind: input, shape index: {}]   ;;  %s309_s4 = inlined_call_operand.<no memory space> [shape: f32[1], index: 4, kind: input, shape index: {}]   ;;  %s310_s5 = inlined_call_operand.vmem [shape: bf16[16,64], index: 5, kind: output, shape index: {}]  }
   0x1   :  { %200 = vmatprep.subr.bf16.mxu0 %v231_v0  ;;  %v222_v1 = vld [vmem:[%s305_s1 + $0x38] sm:$0xff]   ;;  %216 = vmatprep.mubr.msk.bf16.mxu0 %vm232_vm0, %v231_v0  ;;  %v223_v2 = vld [vmem:[%s305_s1 + $0x30] sm:$0xff]   ;;  %v224_v3 = vld [vmem:[%s305_s1 + $0x28] sm:$0xff]   ;;  %v156_v14 = vstv %s309_s4 }
   0x2   :  { %201 = vmatpush3.bf16.msra.mxu0 %v222_v1  ;;  %v225_v4 = vld [vmem:[%s305_s1 + $0x20] sm:$0xff]   ;;  %v226_v5 = vld [vmem:[%s305_s1 + $0x18] sm:$0xff]   ;;  %v227_v6 = vld [vmem:[%s305_s1 + $0x10] sm:$0xff]  }
   0x3   :  { %202 = vmatprep.subr.bf16.mxu0 %v231_v0  ;;  %v228_v7 = vld [vmem:[%s305_s1 + $0x8] sm:$0xff]   ;;  %v229_v8 = vld [vmem:[%s305_s1] sm:$0xff]  }
   0x4   :  { %v230_v9 = vld [vmem:[%s306_s0] sm:$0xff]  }
   0x5   :  { %v185_v10 = vld [vmem:[%s307_s2] ss:$0 sm:$0xff] }
   0x6   :  { %203 = vmatpush3.bf16.msra.mxu0 %v223_v2  ;;  %v186_v12 = vld [vmem:[%s308_s3] ss:$0 sm:$0xff] }
   0x7   :  { %204 = vmatprep.subr.bf16.mxu0 %v231_v0 }
   0xa   :  { %205 = vmatpush3.bf16.msra.mxu0 %v224_v3 }
   0xb   :  { %206 = vmatprep.subr.bf16.mxu0 %v231_v0 }
   0xe   :  { %207 = vmatpush3.bf16.msra.mxu0 %v225_v4 }
   0xf   :  { %208 = vmatprep.subr.bf16.mxu0 %v231_v0 }
  0x12   :  { %209 = vmatpush3.bf16.msra.mxu0 %v226_v5 }
  0x13   :  { %210 = vmatprep.subr.bf16.mxu0 %v231_v0 }
  0x16   :  { %211 = vmatpush3.bf16.msra.mxu0 %v227_v6 }
  0x17   :  { %212 = vmatprep.subr.bf16.mxu0 %v231_v0 }
  0x1a   :  { %213 = vmatpush3.bf16.msra.mxu0 %v228_v7 }
  0x1b   :  { %214 = vmatprep.subr.bf16.mxu0 %v231_v0 }
  0x1e   :  { %215 = vmatpush3.bf16.msra.mxu0 %v229_v8 }
  0x21   :  { %217 = vmatmul.mubr.bf16.vlgmr.msra.gmra.mxu0 %v230_v9 }
  0xe1   :  { %v128_v11 = vpop.f32.mrf.mxu0 }
  0xe2   :  { %v142_v13 = vmul.f32 %v185_v10, %v128_v11 }
  0xe3   :  { %v218_v15 = vpop.f32.mrf.mxu0 }
  0xe4   :  { %v151_v16 = vadd.f32 %v186_v12, %v142_v13 }
  0xe5   :  { %v131_v17 = vpop.f32.mrf.mxu0 }
  0xe6   :  { %vm154_vm1 = vcmp.ge.f32.partialorder %v151_v16, 0.0  ;;  %v157_v18 = vmul.f32 %v156_v14, %v151_v16  ;;  %v143_v19 = vmul.f32 %v185_v10, %v131_v17 }
  0xe7   :  { %v219_v20 = vpop.f32.mrf.mxu0 }
  0xe8   :  { %v159_v21 = vsel %vm154_vm1, %v151_v16, %v157_v18  ;;  %v152_v22 = vadd.f32 %v186_v12, %v143_v19 }
  0xe9   :  { %v189_v23 = vpack.c.bf16 %v159_v21, %v159_v21 }
  0xea   :  { %vm155_vm3 = vcmp.ge.f32.partialorder %v152_v22, 0.0  ;;  %v158_v24 = vmul.f32 %v156_v14, %v152_v22 }
  0xeb   :  { %170 = vst.msk [vmem:[%s310_s5] sm:$0xf] %vm169_vm2, %v189_v23 }
  0xec   :  { %v160_v25 = vsel %vm155_vm3, %v152_v22, %v158_v24 }
  0xed   :  { %v190_v26 = vpack.c.bf16 %v160_v25, %v160_v25 }
  0xef   :  { %171 = vst.msk [vmem:[%s310_s5 + $0x4] sm:$0xf] %vm169_vm2, %v190_v26 }

// kernel: lanenet_forward.242
= control target key start
LH: loop header
LB: loop body
LE: loop exit
PB: predicated region body
PF: predicated region fallthrough
CT: control target
= control target key end

     0   :  { %v235_v0 = vmov 0.0   ;;  %vm236_vm0 = vmmov 0   ;;  %s306_s1 = inlined_call_operand.vmem [shape: bf16[128,128], index: 1, kind: input, shape index: {}]   ;;  %s307_s0 = inlined_call_operand.vmem [shape: bf16[16,128], index: 0, kind: input, shape index: {}]   ;;  %s308_s2 = inlined_call_operand.vmem [shape: f32[1,128], index: 2, kind: input, shape index: {}]   ;;  %s309_s3 = inlined_call_operand.vmem [shape: f32[1,128], index: 3, kind: input, shape index: {}]   ;;  %s310_s4 = inlined_call_operand.<no memory space> [shape: f32[1], index: 4, kind: input, shape index: {}]   ;;  %s311_s5 = inlined_call_operand.vmem [shape: bf16[16,128], index: 5, kind: output, shape index: {}]  }
   0x1   :  { %204 = vmatprep.subr.bf16.mxu0 %v235_v0  ;;  %v226_v1 = vld [vmem:[%s306_s1 + $0x38] sm:$0xff]   ;;  %220 = vmatprep.mubr.msk.bf16.mxu0 %vm236_vm0, %v235_v0  ;;  %v227_v2 = vld [vmem:[%s306_s1 + $0x30] sm:$0xff]   ;;  %v228_v3 = vld [vmem:[%s306_s1 + $0x28] sm:$0xff]   ;;  %v156_v16 = vstv %s310_s4 }
   0x2   :  { %205 = vmatpush3.bf16.msra.mxu0 %v226_v1  ;;  %v229_v4 = vld [vmem:[%s306_s1 + $0x20] sm:$0xff]   ;;  %v230_v5 = vld [vmem:[%s306_s1 + $0x18] sm:$0xff]   ;;  %v231_v6 = vld [vmem:[%s306_s1 + $0x10] sm:$0xff]  }
   0x3   :  { %206 = vmatprep.subr.bf16.mxu0 %v235_v0  ;;  %v232_v7 = vld [vmem:[%s306_s1 + $0x8] sm:$0xff]   ;;  %v233_v8 = vld [vmem:[%s306_s1] sm:$0xff]  }
   0x4   :  { %v234_v9 = vld [vmem:[%s307_s0] sm:$0xff]  }
   0x5   :  { %v184_v10 = vld [vmem:[%s308_s2] ss:$0 sm:$0xff] }
   0x6   :  { %207 = vmatpush3.bf16.msra.mxu0 %v227_v2  ;;  %v185_v12 = vld [vmem:[%s309_s3] ss:$0 sm:$0xff] }
   0x7   :  { %208 = vmatprep.subr.bf16.mxu0 %v235_v0 }
   0xa   :  { %209 = vmatpush3.bf16.msra.mxu0 %v228_v3 }
   0xb   :  { %210 = vmatprep.subr.bf16.mxu0 %v235_v0 }
   0xe   :  { %211 = vmatpush3.bf16.msra.mxu0 %v229_v4 }
   0xf   :  { %212 = vmatprep.subr.bf16.mxu0 %v235_v0 }
  0x12   :  { %213 = vmatpush3.bf16.msra.mxu0 %v230_v5 }
  0x13   :  { %214 = vmatprep.subr.bf16.mxu0 %v235_v0 }
  0x16   :  { %215 = vmatpush3.bf16.msra.mxu0 %v231_v6 }
  0x17   :  { %216 = vmatprep.subr.bf16.mxu0 %v235_v0 }
  0x1a   :  { %217 = vmatpush3.bf16.msra.mxu0 %v232_v7 }
  0x1b   :  { %218 = vmatprep.subr.bf16.mxu0 %v235_v0 }
  0x1e   :  { %219 = vmatpush3.bf16.msra.mxu0 %v233_v8 }
  0x21   :  { %221 = vmatmul.mubr.bf16.vlgmr.msra.gmra.mxu0 %v234_v9 }
  0xe1   :  { %v128_v11 = vpop.f32.mrf.mxu0 }
  0xe2   :  { %v142_v13 = vmul.f32 %v184_v10, %v128_v11 }
  0xe3   :  { %v222_v14 = vpop.f32.mrf.mxu0 }
  0xe4   :  { %v151_v15 = vadd.f32 %v185_v12, %v142_v13 }
  0xe5   :  { %v131_v17 = vpop.f32.mrf.mxu0 }
  0xe6   :  { %v143_v18 = vmul.f32 %v184_v10, %v131_v17  ;;  %v157_v20 = vmul.f32 %v156_v16, %v151_v15  ;;  %vm154_vm1 = vcmp.ge.f32.partialorder %v151_v15, 0.0 }
  0xe7   :  { %v223_v19 = vpop.f32.mrf.mxu0 }
  0xe8   :  { %v152_v21 = vadd.f32 %v185_v12, %v143_v18  ;;  %v159_v23 = vsel %vm154_vm1, %v151_v15, %v157_v20 }
  0xea   :  { %vm155_vm2 = vcmp.ge.f32.partialorder %v152_v21, 0.0  ;;  %v158_v22 = vmul.f32 %v156_v16, %v152_v21 }
  0xec   :  { %v160_v24 = vsel %vm155_vm2, %v152_v21, %v158_v22 }
  0xed   :  { %v193_v25 = vpack.c.bf16 %v160_v24, %v159_v23 }
  0xef   :  { %194 = vst [vmem:[%s311_s5] sm:$0xff] %v193_v25  }

// kernel: lanenet_forward.243
= control target key start
LH: loop header
LB: loop body
LE: loop exit
PB: predicated region body
PF: predicated region fallthrough
CT: control target
= control target key end

     0   :  { %11 = vsyncpa [#allocation3], 0  ;;  %s347_s0 = inlined_call_operand.vmem [shape: bf16[32,32], index: 0, kind: input, shape index: {}]   ;;  %s348_s1 = inlined_call_operand.vmem [shape: bf16[32,64], index: 1, kind: input, shape index: {}]   ;;  %s349_s2 = inlined_call_operand.vmem [shape: f32[1,64], index: 2, kind: input, shape index: {}]   ;;  %s350_s3 = inlined_call_operand.vmem [shape: f32[1,64], index: 3, kind: input, shape index: {}]   ;;  %s351_s4 = inlined_call_operand.vmem [shape: bf16[32,64], index: 4, kind: input, shape index: {}]   ;;  %s352_s5 = inlined_call_operand.vmem [shape: f32[2], index: 5, kind: input, shape index: {}]   ;;  %s353_s6 = inlined_call_operand.vmem [shape: bf16[32,64], index: 6, kind: output, shape index: {}]  }
   0x1   :  { %s28_s23 = sshll.u32 %s352_s5, 4  ;;  %s29_s23 = int_to_ptr.vmem [resolvable:$true] %s28_s23 }
   0x2   :  { %s254_s24 = scalar_lea.vmem %s29_s23, 16  ;;  %p259_p1 = scmp.lt.s32.totalorder %s29_s23, %s29_s23 }
   0x3   :  { %p255_p0 = scmp.ne.s32.totalorder %s29_s23, %s254_s24  ;;  %p260_p2 = scmp.lt.s32.totalorder %s254_s24, %s254_s24 }
   0x5   :  { %p261_p3 = por %p260_p2, %p259_p1 }
   0x7   :  { %p262_p4 = pnand %p261_p3, %p255_p0 }
   0x9   :  { %265 = shalt.err (!%p262_p4)
}
   0xa   :  { %s268_s25 = smov [#allocation2]  }
   0xb   :  { %31 = dma.vmem_to_smem %s29_s23, 16, %s268_s25, [#allocation3]  }
   0xc   :  { %266 = dma.done.wait [#allocation3], 16  }
   0xd   :  { %267 = vsyncadd [#allocation3], 4294967280 }
   0xe   :  { %35 = sfence }
   0xf   :  { %v250_v0 = vld [vmem:[%s348_s1 + $0x8] sm:$0xff]   ;;  %v251_v1 = vld [vmem:[%s348_s1] sm:$0xff]   ;;  %vm67_vm0 = vcmask 261120   ;;  %s145_s9 = sld [smem:[#allocation2]]  ;;  %vm201_vm5 = vcmask 519168  }
  0x10   :  { %241 = vmatprep.subr.bf16.mxu0 %v250_v0  ;;  %v252_v2 = vld [vmem:[%s347_s0] sm:$0xff]   ;;  %v253_v3 = vld [vmem:[%s347_s0 + $0x8] sm:$0xff]   ;;  %s219_s1 = sld [smem:[#allocation2 + $0x1]] }
  0x11   :  { %242 = vmatpush3.bf16.msra.mxu0 %v250_v0  ;;  %245 = vmatprep.mubr.msk.bf16.mxu0 %vm67_vm0, %v252_v2  ;;  %v217_v4 = vld [vmem:[%s349_s2] ss:$0 sm:$0xff]  ;;  %v236_v8 = vld [vmem:[%s351_s4 + $0x8] sm:$0xff]  }
  0x12   :  { %243 = vmatprep.subr.bf16.mxu0 %v251_v1  ;;  %v218_v6 = vld [vmem:[%s350_s3] ss:$0 sm:$0xff]  ;;  %v234_v14 = vunpack.c.l.bf16 %v236_v8  ;;  %v235_v26 = vunpack.c.h.bf16 %v236_v8 }
  0x13   :  { %v229_v13 = vld [vmem:[%s351_s4] sm:$0xff]  }
  0x14   :  { %v230_v20 = vunpack.c.l.bf16 %v229_v13  ;;  %v231_v34 = vunpack.c.h.bf16 %v229_v13 }
  0x15   :  { %244 = vmatpush3.bf16.msra.mxu0 %v251_v1  ;;  %v150_v9 = vstv %s145_s9 }
  0x16   :  { %v176_v19 = vstv %s219_s1 }
  0x18   :  { %246 = vmatmul.mubr.msk.bf16.vlgmr.msra.gmra.mxu0 %vm67_vm0, %v253_v3 }
  0xd8   :  { %v247_v5 = vpop.f32.mrf.mxu0 }
  0xd9   :  { %v132_v7 = vmul.f32 %v247_v5, %v217_v4 }
  0xda   :  { %v108_v10 = vpop.f32.mrf.mxu0 }
  0xdb   :  { %v143_v11 = vadd.f32 %v218_v6, %v132_v7  ;;  %v130_v12 = vmul.f32 %v217_v4, %v108_v10 }
  0xdc   :  { %v248_v15 = vpop.f32.mrf.mxu0 }
  0xdd   :  { %vm148_vm1 = vcmp.ge.f32.partialorder %v143_v11, 0.0  ;;  %v153_v16 = vmul.f32 %v150_v9, %v143_v11  ;;  %v141_v17 = vadd.f32 %v218_v6, %v130_v12  ;;  %v133_v18 = vmul.f32 %v248_v15, %v217_v4 }
  0xde   :  { %v111_v21 = vpop.f32.mrf.mxu0 }
  0xdf   :  { %v157_v22 = vsel %vm148_vm1, %v143_v11, %v153_v16  ;;  %vm146_vm2 = vcmp.ge.f32.partialorder %v141_v17, 0.0  ;;  %v151_v23 = vmul.f32 %v150_v9, %v141_v17  ;;  %v144_v24 = vadd.f32 %v218_v6, %v133_v18 }
  0xe0   :  { %v169_v25 = vadd.f32 %v234_v14, %v157_v22  ;;  %v131_v27 = vmul.f32 %v217_v4, %v111_v21 }
  0xe1   :  { %v155_v28 = vsel %vm146_vm2, %v141_v17, %v151_v23  ;;  %vm149_vm3 = vcmp.ge.f32.partialorder %v144_v24, 0.0  ;;  %v154_v29 = vmul.f32 %v150_v9, %v144_v24 }
  0xe2   :  { %vm174_vm4 = vcmp.ge.f32.partialorder %v169_v25, 0.0  ;;  %v179_v30 = vmul.f32 %v176_v19, %v169_v25  ;;  %v167_v31 = vadd.f32 %v230_v20, %v155_v28  ;;  %v142_v32 = vadd.f32 %v218_v6, %v131_v27 }
  0xe3   :  { %v158_v33 = vsel %vm149_vm3, %v144_v24, %v154_v29 }
  0xe4   :  { %v183_v35 = vsel %vm174_vm4, %v169_v25, %v179_v30  ;;  %vm172_vm6 = vcmp.ge.f32.partialorder %v167_v31, 0.0  ;;  %v177_v36 = vmul.f32 %v176_v19, %v167_v31  ;;  %v170_v37 = vadd.f32 %v235_v26, %v158_v33 }
  0xe5   :  { %v226_v38 = vpack.c.bf16 %v183_v35, %v183_v35  ;;  %vm147_vm7 = vcmp.ge.f32.partialorder %v142_v32, 0.0  ;;  %v152_v39 = vmul.f32 %v150_v9, %v142_v32 }
  0xe6   :  { %v181_v40 = vsel %vm172_vm6, %v167_v31, %v177_v36  ;;  %vm175_vm8 = vcmp.ge.f32.partialorder %v170_v37, 0.0  ;;  %v180_v41 = vmul.f32 %v176_v19, %v170_v37 }
  0xe7   :  { %204 = vst.msk [vmem:[%s353_s6 + $0x8] sm:$0xf] %vm201_vm5, %v226_v38  ;;  %v224_v42 = vpack.c.bf16 %v181_v40, %v181_v40  ;;  %v156_v43 = vsel %vm147_vm7, %v142_v32, %v152_v39 }
  0xe8   :  { %v184_v44 = vsel %vm175_vm8, %v170_v37, %v180_v41  ;;  %v168_v45 = vadd.f32 %v231_v34, %v156_v43 }
  0xe9   :  { %202 = vst.msk [vmem:[%s353_s6] sm:$0xf] %vm201_vm5, %v224_v42  ;;  %v227_v46 = vpack.c.bf16 %v184_v44, %v184_v44 }
  0xea   :  { %vm173_vm9 = vcmp.ge.f32.partialorder %v168_v45, 0.0  ;;  %v178_v47 = vmul.f32 %v176_v19, %v168_v45 }
  0xeb   :  { %205 = vst.msk [vmem:[%s353_s6 + $0xc] sm:$0xf] %vm201_vm5, %v227_v46 }
  0xec   :  { %v182_v48 = vsel %vm173_vm9, %v168_v45, %v178_v47 }
  0xed   :  { %v225_v49 = vpack.c.bf16 %v182_v48, %v182_v48 }
  0xef   :  { %203 = vst.msk [vmem:[%s353_s6 + $0x4] sm:$0xf] %vm201_vm5, %v225_v49 }
  0xf0   :  { %210 = vsyncpa [#allocation3], 1 }

// kernel: tile.73
= control target key start
LH: loop header
LB: loop body
LE: loop exit
PB: predicated region body
PF: predicated region fallthrough
CT: control target
= control target key end

     0   :  { %s22_s0 = inlined_call_operand.vmem [shape: f32[16], index: 0, kind: input, shape index: {}]   ;;  %s23_s1 = inlined_call_operand.vmem [shape: f32[4,16], index: 1, kind: output, shape index: {}]  }
   0x1   :  { %v4_v0 = vld [vmem:[%s22_s0] ss:$0 sm:$0xff] }
   0x2   :  { %5 = vst [vmem:[%s23_s1] sm:$0xf] %v4_v0 }

// kernel: tile.78
= control target key start
LH: loop header
LB: loop body
LE: loop exit
PB: predicated region body
PF: predicated region fallthrough
CT: control target
= control target key end

     0   :  { %vm8_vm0 = vcmask 130048   ;;  %s40_s8 = smov 16   ;;  %s41_s9 = smov 32   ;;  %vm14_vm1 = vcmask 523648   ;;  %vm20_vm2 = vcmask 392448   ;;  %vm26_vm3 = vcmask 261248   ;;  %s58_s0 = inlined_call_operand.vmem [shape: f32[4,16], index: 0, kind: input, shape index: {}]   ;;  %s59_s1 = inlined_call_operand.vmem [shape: f32[1,64], index: 1, kind: output, shape index: {}]  }
   0x1   :  { %v5_v0 = vld [vmem:[%s58_s0] sm:$0xf]  ;;  %s39_s0 = smov 48  }
   0x2   :  { %6 = vst [vmem:[#allocation1] sm:$0xf] %v5_v0 }
   0x9   :  { %v11_v1 = vld [vmem:[#allocation1 + $0x3] sm:$0x1]   ;;  %v23_v2 = vld [vmem:[#allocation1 + $0x1] sm:$0x1]   ;;  %v7_v3 = vld [vmem:[#allocation1] sm:$0x1]  }
   0xa   :  { %12 = vrot.lane.b32.xlu0 %v11_v1, %s39_s0  ;;  %24 = vrot.lane.b32.xlu1 %v23_v2, %s40_s8  ;;  %v17_v4 = vld [vmem:[#allocation1 + $0x2] sm:$0x1]   ;;  %9 = vst.msk [vmem:[#allocation0] sm:$0x1] %vm8_vm0, %v7_v3  }
   0xe   :  { %18 = vrot.lane.b32.xlu0 %v17_v4, %s41_s9 }
  0x7c   :  { %v13_v5 = vpop.permute.xlu0 %12   ;;  %v25_v6 = vpop.permute.xlu1 %24  }
  0x7d   :  { %15 = vst.msk [vmem:[#allocation0] sm:$0x1] %vm14_vm1, %v13_v5  }
  0x80   :  { %v19_v7 = vpop.permute.xlu0 %18  }
  0x81   :  { %21 = vst.msk [vmem:[#allocation0] sm:$0x1] %vm20_vm2, %v19_v7  }
  0x82   :  { %27 = vst.msk [vmem:[#allocation0] sm:$0x1] %vm26_vm3, %v25_v6  }
  0x89   :  { %v32_v8 = vld [vmem:[#allocation0] sm:$0x1] }
  0x8a   :  { %35 = vst [vmem:[%s59_s1] sm:$0x1] %v32_v8 }

// kernel: lanenet_forward.260
= control target key start
LH: loop header
LB: loop body
LE: loop exit
PB: predicated region body
PF: predicated region fallthrough
CT: control target
= control target key end

     0   :  { %vm68_vm0 = vcmask 523264   ;;  %vm176_vm2 = vcmask 519168   ;;  %s300_s1 = inlined_call_operand.vmem [shape: bf16[64,64], index: 1, kind: input, shape index: {}]   ;;  %s301_s0 = inlined_call_operand.vmem [shape: bf16[32,64], index: 0, kind: input, shape index: {}]   ;;  %s302_s2 = inlined_call_operand.vmem [shape: f32[1,64], index: 2, kind: input, shape index: {}]   ;;  %s303_s3 = inlined_call_operand.vmem [shape: f32[1,64], index: 3, kind: input, shape index: {}]   ;;  %s304_s4 = inlined_call_operand.<no memory space> [shape: f32[1], index: 4, kind: input, shape index: {}]   ;;  %s305_s5 = inlined_call_operand.vmem [shape: bf16[32,64], index: 5, kind: output, shape index: {}]  }
   0x1   :  { %v221_v0 = vld [vmem:[%s300_s1 + $0x18] sm:$0xff]   ;;  %v222_v1 = vld [vmem:[%s300_s1 + $0x10] sm:$0xff]   ;;  %v223_v2 = vld [vmem:[%s300_s1 + $0x8] sm:$0xff]   ;;  %v151_v10 = vstv %s304_s4 }
   0x2   :  { %209 = vmatprep.subr.bf16.mxu0 %v221_v0  ;;  %v225_v3 = vld [vmem:[%s301_s0] sm:$0xff]   ;;  %v226_v5 = vld [vmem:[%s301_s0 + $0x8] sm:$0xff]  }
   0x3   :  { %210 = vmatpush3.bf16.msra.mxu0 %v221_v0  ;;  %217 = vmatprep.mubr.msk.bf16.mxu0 %vm68_vm0, %v225_v3  ;;  %v224_v4 = vld [vmem:[%s300_s1] sm:$0xff]  }
   0x4   :  { %211 = vmatprep.subr.bf16.mxu0 %v222_v1  ;;  %v193_v6 = vld [vmem:[%s302_s2] ss:$0 sm:$0xff] }
   0x5   :  { %v194_v8 = vld [vmem:[%s303_s3] ss:$0 sm:$0xff] }
   0x7   :  { %212 = vmatpush3.bf16.msra.mxu0 %v222_v1 }
   0x8   :  { %213 = vmatprep.subr.bf16.mxu0 %v223_v2 }
   0xb   :  { %214 = vmatpush3.bf16.msra.mxu0 %v223_v2 }
   0xc   :  { %215 = vmatprep.subr.bf16.mxu0 %v224_v4 }
   0xf   :  { %216 = vmatpush3.bf16.msra.mxu0 %v224_v4 }
  0x12   :  { %218 = vmatmul.mubr.msk.bf16.vlgmr.msra.gmra.mxu0 %vm68_vm0, %v226_v5 }
  0xd2   :  { %v219_v7 = vpop.f32.mrf.mxu0 }
  0xd3   :  { %v133_v9 = vmul.f32 %v219_v7, %v193_v6 }
  0xd4   :  { %v109_v11 = vpop.f32.mrf.mxu0 }
  0xd5   :  { %v144_v12 = vadd.f32 %v194_v8, %v133_v9  ;;  %v131_v13 = vmul.f32 %v193_v6, %v109_v11 }
  0xd6   :  { %v220_v14 = vpop.f32.mrf.mxu0 }
  0xd7   :  { %vm149_vm1 = vcmp.ge.f32.partialorder %v144_v12, 0.0  ;;  %v154_v15 = vmul.f32 %v151_v10, %v144_v12  ;;  %v142_v16 = vadd.f32 %v194_v8, %v131_v13  ;;  %v134_v17 = vmul.f32 %v220_v14, %v193_v6 }
  0xd8   :  { %v112_v18 = vpop.f32.mrf.mxu0 }
  0xd9   :  { %v158_v19 = vsel %vm149_vm1, %v144_v12, %v154_v15  ;;  %vm147_vm3 = vcmp.ge.f32.partialorder %v142_v16, 0.0  ;;  %v152_v20 = vmul.f32 %v151_v10, %v142_v16  ;;  %v145_v21 = vadd.f32 %v194_v8, %v134_v17 }
  0xda   :  { %v201_v22 = vpack.c.bf16 %v158_v19, %v158_v19  ;;  %v132_v23 = vmul.f32 %v193_v6, %v112_v18 }
  0xdb   :  { %v156_v24 = vsel %vm147_vm3, %v142_v16, %v152_v20  ;;  %vm150_vm4 = vcmp.ge.f32.partialorder %v145_v21, 0.0  ;;  %v155_v25 = vmul.f32 %v151_v10, %v145_v21 }
  0xdc   :  { %179 = vst.msk [vmem:[%s305_s5 + $0x8] sm:$0xf] %vm176_vm2, %v201_v22  ;;  %v199_v26 = vpack.c.bf16 %v156_v24, %v156_v24  ;;  %v143_v27 = vadd.f32 %v194_v8, %v132_v23 }
  0xdd   :  { %v159_v28 = vsel %vm150_vm4, %v145_v21, %v155_v25 }
  0xde   :  { %177 = vst.msk [vmem:[%s305_s5] sm:$0xf] %vm176_vm2, %v199_v26  ;;  %v202_v29 = vpack.c.bf16 %v159_v28, %v159_v28  ;;  %vm148_vm5 = vcmp.ge.f32.partialorder %v143_v27, 0.0  ;;  %v153_v30 = vmul.f32 %v151_v10, %v143_v27 }
  0xe0   :  { %180 = vst.msk [vmem:[%s305_s5 + $0xc] sm:$0xf] %vm176_vm2, %v202_v29  ;;  %v157_v31 = vsel %vm148_vm5, %v143_v27, %v153_v30 }
  0xe1   :  { %v200_v32 = vpack.c.bf16 %v157_v31, %v157_v31 }
  0xe3   :  { %178 = vst.msk [vmem:[%s305_s5 + $0x4] sm:$0xf] %vm176_vm2, %v200_v32 }

// kernel: lanenet_forward.261
= control target key start
LH: loop header
LB: loop body
LE: loop exit
PB: predicated region body
PF: predicated region fallthrough
CT: control target
= control target key end

     0   :  { %11 = vsyncpa [#allocation3], 0  ;;  %s942_s0 = inlined_call_operand.vmem [shape: bf16[128,16], index: 0, kind: input, shape index: {}]   ;;  %s943_s1 = inlined_call_operand.vmem [shape: bf16[16,16], index: 1, kind: input, shape index: {}]   ;;  %s944_s2 = inlined_call_operand.vmem [shape: f32[1,16], index: 2, kind: input, shape index: {}]   ;;  %s945_s3 = inlined_call_operand.vmem [shape: f32[1,16], index: 3, kind: input, shape index: {}]   ;;  %s946_s4 = inlined_call_operand.vmem [shape: bf16[128,16], index: 4, kind: input, shape index: {}]   ;;  %s947_s5 = inlined_call_operand.vmem [shape: f32[2], index: 5, kind: input, shape index: {}]   ;;  %s948_s6 = inlined_call_operand.vmem [shape: bf16[128,16], index: 6, kind: output, shape index: {}]  }
   0x1   :  { %s28_s23 = sshll.u32 %s947_s5, 4  ;;  %s29_s23 = int_to_ptr.vmem [resolvable:$true] %s28_s23 }
   0x2   :  { %s633_s24 = scalar_lea.vmem %s29_s23, 16  ;;  %p638_p1 = scmp.lt.s32.totalorder %s29_s23, %s29_s23 }
   0x3   :  { %p634_p0 = scmp.ne.s32.totalorder %s29_s23, %s633_s24  ;;  %p639_p2 = scmp.lt.s32.totalorder %s633_s24, %s633_s24 }
   0x5   :  { %p640_p3 = por %p639_p2, %p638_p1 }
   0x7   :  { %p641_p4 = pnand %p640_p3, %p634_p0 }
   0x9   :  { %644 = shalt.err (!%p641_p4)
}
   0xa   :  { %s647_s25 = smov [#allocation2]  }
   0xb   :  { %31 = dma.vmem_to_smem %s29_s23, 16, %s647_s25, [#allocation3]  }
   0xc   :  { %645 = dma.done.wait [#allocation3], 16  }
   0xd   :  { %646 = vsyncadd [#allocation3], 4294967280 }
   0xe   :  { %35 = sfence }
   0xf   :  { %v624_v0 = vld [vmem:[%s943_s1] sm:$0xff]   ;;  %vm101_vm0 = vcmask 130048   ;;  %v627_v3 = vld [vmem:[%s942_s0 + $0x8] sm:$0xff]   ;;  %v629_v5 = vld [vmem:[%s942_s0 + $0x10] sm:$0xff]   ;;  %s269_s18 = sld [smem:[#allocation2]]  ;;  %vm481_vm1 = vcmask 125952  }
  0x10   :  { %v625_v1 = vld [vmem:[%s942_s0] sm:$0xff]   ;;  %603 = vmatprep.subr.bf16.mxu0 %v624_v0  ;;  %621 = vmatprep.subr.bf16.mxu1 %v624_v0  ;;  %v628_v4 = vld [vmem:[%s942_s0 + $0x28] sm:$0xff]   ;;  %v630_v6 = vld [vmem:[%s942_s0 + $0x30] sm:$0xff]   ;;  %s522_s19 = sld [smem:[#allocation2 + $0x1]] }
  0x11   :  { %v626_v2 = vld [vmem:[%s942_s0 + $0x20] sm:$0xff]   ;;  %604 = vmatpush3.bf16.msra.mxu0 %v624_v0  ;;  %622 = vmatpush3.bf16.msra.mxu1 %v624_v0  ;;  %v631_v7 = vld [vmem:[%s942_s0 + $0x18] sm:$0xff]   ;;  %v724_v9 = vld [vmem:[%s946_s4 + $0x8] sm:$0xff]  }
  0x12   :  { %605 = vmatprep.mubr.msk.bf16.mxu0 %vm101_vm0, %v625_v1  ;;  %613 = vmatprep.mubr.msk.bf16.mxu1 %vm101_vm0, %v626_v2  ;;  %v632_v8 = vld [vmem:[%s942_s0 + $0x38] sm:$0xff]   ;;  %v729_v10 = vld [vmem:[%s946_s4 + $0x28] sm:$0xff]   ;;  %v734_v11 = vld [vmem:[%s946_s4] sm:$0xff]   ;;  %v561_v15 = vunpack.c.l.bf16 %v724_v9  ;;  %v562_v26 = vunpack.c.h.bf16 %v724_v9 }
  0x13   :  { %v739_v12 = vld [vmem:[%s946_s4 + $0x20] sm:$0xff]   ;;  %v577_v16 = vunpack.c.l.bf16 %v729_v10  ;;  %v753_v17 = vld [vmem:[%s946_s4 + $0x18] sm:$0xff]   ;;  %v763_v19 = vld [vmem:[%s946_s4 + $0x10] sm:$0xff]   ;;  %v557_v24 = vunpack.c.l.bf16 %v734_v11  ;;  %v578_v29 = vunpack.c.h.bf16 %v729_v10  ;;  %v558_v30 = vunpack.c.h.bf16 %v734_v11 }
  0x14   :  { %606 = vmatmul.mubr.msk.bf16.vlgmr.msra.gmra.mxu0 %vm101_vm0, %v627_v3  ;;  %614 = vmatmul.mubr.msk.bf16.vlgmr.msra.gmra.mxu1 %vm101_vm0, %v628_v4  ;;  %v744_v13 = vld [vmem:[%s944_s2] ss:$0 sm:$0xff]  ;;  %v758_v18 = vld [vmem:[%s946_s4 + $0x38] sm:$0xff]   ;;  %v573_v25 = vunpack.c.l.bf16 %v739_v12  ;;  %v782_v31 = vld [vmem:[%s946_s4 + $0x30] sm:$0xff]   ;;  %v574_v34 = vunpack.c.h.bf16 %v739_v12  ;;  %v569_v35 = vunpack.c.l.bf16 %v753_v17  ;;  %v565_v37 = vunpack.c.l.bf16 %v763_v19 }
  0x15   :  { %609 = vmatprep.mubr.msk.bf16.mxu0 %vm101_vm0, %v629_v5  ;;  %617 = vmatprep.mubr.msk.bf16.mxu1 %vm101_vm0, %v630_v6  ;;  %v746_v14 = vstv %s269_s18  ;;  %v768_v21 = vld [vmem:[%s945_s3] ss:$0 sm:$0xff]  ;;  %v585_v36 = vunpack.c.l.bf16 %v758_v18  ;;  %v581_v44 = vunpack.c.l.bf16 %v782_v31  ;;  %v570_v45 = vunpack.c.h.bf16 %v753_v17 }
  0x16   :  { %v770_v22 = vstv %s522_s19  ;;  %v586_v46 = vunpack.c.h.bf16 %v758_v18  ;;  %v566_v47 = vunpack.c.h.bf16 %v763_v19 }
  0x1c   :  { %610 = vmatmul.mubr.msk.bf16.gmra.mxu0 %vm101_vm0, %v631_v7  ;;  %618 = vmatmul.mubr.msk.bf16.gmra.mxu1 %vm101_vm0, %v632_v8 }
  0xd4   :  { %v607_v20 = vpop.f32.mrf.mxu0  ;;  %v615_v23 = vpop.f32.mrf.mxu1 }
  0xd5   :  { %v232_v27 = vmul.f32 %v607_v20, %v744_v13  ;;  %v240_v28 = vmul.f32 %v615_v23, %v744_v13 }
  0xd6   :  { %v160_v32 = vpop.f32.mrf.mxu0  ;;  %v192_v33 = vpop.f32.mrf.mxu1 }
  0xd7   :  { %v255_v38 = vadd.f32 %v768_v21, %v232_v27  ;;  %v263_v39 = vadd.f32 %v768_v21, %v240_v28  ;;  %v230_v40 = vmul.f32 %v744_v13, %v160_v32  ;;  %v238_v41 = vmul.f32 %v744_v13, %v192_v33 }
  0xd8   :  { %v608_v42 = vpop.f32.mrf.mxu0  ;;  %v616_v43 = vpop.f32.mrf.mxu1 }
  0xd9   :  { %vm272_vm2 = vcmp.ge.f32.partialorder %v255_v38, 0.0  ;;  %v289_v48 = vmul.f32 %v746_v14, %v255_v38  ;;  %vm280_vm3 = vcmp.ge.f32.partialorder %v263_v39, 0.0  ;;  %v297_v49 = vmul.f32 %v746_v14, %v263_v39 }
  0xda   :  { %v253_v50 = vadd.f32 %v768_v21, %v230_v40  ;;  %v261_v51 = vadd.f32 %v768_v21, %v238_v41  ;;  %v233_v52 = vmul.f32 %v608_v42, %v744_v13  ;;  %v241_v53 = vmul.f32 %v616_v43, %v744_v13  ;;  %v163_v54 = vpop.f32.mrf.mxu0  ;;  %v195_v55 = vpop.f32.mrf.mxu1 }
  0xdb   :  { %v305_v56 = vsel %vm272_vm2, %v255_v38, %v289_v48  ;;  %v313_v57 = vsel %vm280_vm3, %v263_v39, %v297_v49  ;;  %v231_v58 = vmul.f32 %v744_v13, %v163_v54  ;;  %v239_v59 = vmul.f32 %v744_v13, %v195_v55 }
  0xdc   :  { %v353_v60 = vadd.f32 %v561_v15, %v305_v56  ;;  %v361_v61 = vadd.f32 %v577_v16, %v313_v57  ;;  %vm270_vm4 = vcmp.ge.f32.partialorder %v253_v50, 0.0  ;;  %v287_v62 = vmul.f32 %v746_v14, %v253_v50  ;;  %v611_v28 = vpop.f32.mrf.mxu0  ;;  %v619_v32 = vpop.f32.mrf.mxu1 }
  0xdd   :  { %vm278_vm5 = vcmp.ge.f32.partialorder %v261_v51, 0.0  ;;  %v295_v63 = vmul.f32 %v746_v14, %v261_v51  ;;  %v256_v0 = vadd.f32 %v768_v21, %v233_v52  ;;  %v264_v1 = vadd.f32 %v768_v21, %v241_v53 }
  0xde   :  { %vm370_vm6 = vcmp.ge.f32.partialorder %v353_v60, 0.0  ;;  %v387_v2 = vmul.f32 %v770_v22, %v353_v60  ;;  %vm378_vm7 = vcmp.ge.f32.partialorder %v361_v61, 0.0  ;;  %v395_v3 = vmul.f32 %v770_v22, %v361_v61  ;;  %v176_v52 = vpop.f32.mrf.mxu0 }
  0xdf   :  { %v303_v4 = vsel %vm270_vm4, %v253_v50, %v287_v62  ;;  %v311_v5 = vsel %vm278_vm5, %v261_v51, %v295_v63  ;;  %vm273_vm8 = vcmp.ge.f32.partialorder %v256_v0, 0.0  ;;  %v290_v6 = vmul.f32 %v746_v14, %v256_v0 }
  0xe0   :  { %v403_v7 = vsel %vm370_vm6, %v353_v60, %v387_v2  ;;  %v411_v8 = vsel %vm378_vm7, %v361_v61, %v395_v3  ;;  %v351_v15 = vadd.f32 %v557_v24, %v303_v4  ;;  %v359_v16 = vadd.f32 %v573_v25, %v311_v5 }
  0xe1   :  { %v541_v20 = vpack.c.bf16 %v403_v7, %v403_v7  ;;  %v549_v23 = vpack.c.bf16 %v411_v8, %v411_v8  ;;  %v306_v27 = vsel %vm273_vm8, %v256_v0, %v290_v6  ;;  %vm281_vm9 = vcmp.ge.f32.partialorder %v264_v1, 0.0  ;;  %v208_v0 = vpop.f32.mrf.mxu1 }
  0xe2   :  { %vm368_vm10 = vcmp.ge.f32.partialorder %v351_v15, 0.0  ;;  %v385_v33 = vmul.f32 %v770_v22, %v351_v15  ;;  %vm376_vm11 = vcmp.ge.f32.partialorder %v359_v16, 0.0  ;;  %v393_v38 = vmul.f32 %v770_v22, %v359_v16 }
  0xe3   :  { %484 = vst.msk [vmem:[%s948_s6 + $0x8] sm:$0xf] %vm481_vm1, %v541_v20  ;;  %492 = vst.msk [vmem:[%s948_s6 + $0x28] sm:$0xf] %vm481_vm1, %v549_v23  ;;  %v354_v24 = vadd.f32 %v562_v26, %v306_v27  ;;  %v298_v25 = vmul.f32 %v746_v14, %v264_v1  ;;  %v254_v39 = vadd.f32 %v768_v21, %v231_v58  ;;  %v620_v8 = vpop.f32.mrf.mxu1 }
  0xe4   :  { %v262_v40 = vadd.f32 %v768_v21, %v239_v59  ;;  %v401_v41 = vsel %vm368_vm10, %v351_v15, %v385_v33  ;;  %v409_v42 = vsel %vm376_vm11, %v359_v16, %v393_v38  ;;  %v236_v43 = vmul.f32 %v611_v28, %v744_v13 }
  0xe5   :  { %v244_v48 = vmul.f32 %v619_v32, %v744_v13  ;;  %v539_v49 = vpack.c.bf16 %v401_v41, %v401_v41  ;;  %v547_v50 = vpack.c.bf16 %v409_v42, %v409_v42  ;;  %vm371_vm12 = vcmp.ge.f32.partialorder %v354_v24, 0.0 }
  0xe6   :  { %v388_v51 = vmul.f32 %v770_v22, %v354_v24  ;;  %v314_v9 = vsel %vm281_vm9, %v264_v1, %v298_v25  ;;  %vm271_vm13 = vcmp.ge.f32.partialorder %v254_v39, 0.0  ;;  %v288_v26 = vmul.f32 %v746_v14, %v254_v39  ;;  %v612_v1 = vpop.f32.mrf.mxu0 }
  0xe7   :  { %vm279_vm14 = vcmp.ge.f32.partialorder %v262_v40, 0.0  ;;  %482 = vst.msk [vmem:[%s948_s6] sm:$0xf] %vm481_vm1, %v539_v49  ;;  %490 = vst.msk [vmem:[%s948_s6 + $0x20] sm:$0xf] %vm481_vm1, %v547_v50  ;;  %v362_v54 = vadd.f32 %v578_v29, %v314_v9  ;;  %v296_v55 = vmul.f32 %v746_v14, %v262_v40  ;;  %v259_v56 = vadd.f32 %v768_v21, %v236_v43 }
  0xe8   :  { %v404_v53 = vsel %vm371_vm12, %v354_v24, %v388_v51  ;;  %v304_v58 = vsel %vm271_vm13, %v254_v39, %v288_v26  ;;  %v267_v59 = vadd.f32 %v768_v21, %v244_v48  ;;  %v234_v60 = vmul.f32 %v744_v13, %v176_v52  ;;  %v179_v27 = vpop.f32.mrf.mxu0 }
  0xe9   :  { %v542_v57 = vpack.c.bf16 %v404_v53, %v404_v53  ;;  %vm379_vm15 = vcmp.ge.f32.partialorder %v362_v54, 0.0  ;;  %v396_v61 = vmul.f32 %v770_v22, %v362_v54  ;;  %v352_v62 = vadd.f32 %v558_v30, %v304_v58 }
  0xea   :  { %v312_v63 = vsel %vm279_vm14, %v262_v40, %v296_v55  ;;  %vm276_vm0 = vcmp.ge.f32.partialorder %v259_v56, 0.0  ;;  %v293_v29 = vmul.f32 %v746_v14, %v259_v56  ;;  %vm284_vm2 = vcmp.ge.f32.partialorder %v267_v59, 0.0  ;;  %v211_v40 = vpop.f32.mrf.mxu1 }
  0xeb   :  { %485 = vst.msk [vmem:[%s948_s6 + $0xc] sm:$0xf] %vm481_vm1, %v542_v57  ;;  %v360_v10 = vadd.f32 %v574_v34, %v312_v63  ;;  %v412_v2 = vsel %vm379_vm15, %v362_v54, %v396_v61  ;;  %vm369_vm3 = vcmp.ge.f32.partialorder %v352_v62, 0.0  ;;  %v386_v11 = vmul.f32 %v770_v22, %v352_v62 }
  0xec   :  { %v301_v30 = vmul.f32 %v746_v14, %v267_v59  ;;  %v550_v3 = vpack.c.bf16 %v412_v2, %v412_v2  ;;  %v309_v5 = vsel %vm276_vm0, %v259_v56, %v293_v29  ;;  %v257_v7 = vadd.f32 %v768_v21, %v234_v60 }
  0xed   :  { %vm377_vm4 = vcmp.ge.f32.partialorder %v360_v10, 0.0  ;;  %v394_v4 = vmul.f32 %v770_v22, %v360_v10  ;;  %v402_v6 = vsel %vm369_vm3, %v352_v62, %v386_v11  ;;  %v357_v12 = vadd.f32 %v569_v35, %v309_v5 }
  0xee   :  { %v317_v34 = vsel %vm284_vm2, %v267_v59, %v301_v30  ;;  %493 = vst.msk [vmem:[%s948_s6 + $0x2c] sm:$0xf] %vm481_vm1, %v550_v3  ;;  %v540_v15 = vpack.c.bf16 %v402_v6, %v402_v6  ;;  %v242_v23 = vmul.f32 %v744_v13, %v208_v0  ;;  %vm274_vm6 = vcmp.ge.f32.partialorder %v257_v7, 0.0 }
  0xef   :  { %v410_v16 = vsel %vm377_vm4, %v360_v10, %v394_v4  ;;  %v365_v20 = vadd.f32 %v585_v36, %v317_v34  ;;  %vm374_vm5 = vcmp.ge.f32.partialorder %v357_v12, 0.0  ;;  %v391_v35 = vmul.f32 %v770_v22, %v357_v12 }
  0xf0   :  { %v548_v28 = vpack.c.bf16 %v410_v16, %v410_v16  ;;  %483 = vst.msk [vmem:[%s948_s6 + $0x4] sm:$0xf] %vm481_vm1, %v540_v15  ;;  %v291_v33 = vmul.f32 %v746_v14, %v257_v7  ;;  %v265_v36 = vadd.f32 %v768_v21, %v242_v23  ;;  %v237_v24 = vmul.f32 %v612_v1, %v744_v13 }
  0xf1   :  { %vm382_vm7 = vcmp.ge.f32.partialorder %v365_v20, 0.0  ;;  %v399_v32 = vmul.f32 %v770_v22, %v365_v20  ;;  %v407_v38 = vsel %vm374_vm5, %v357_v12, %v391_v35  ;;  %v245_v25 = vmul.f32 %v620_v8, %v744_v13 }
  0xf2   :  { %491 = vst.msk [vmem:[%s948_s6 + $0x24] sm:$0xf] %vm481_vm1, %v548_v28  ;;  %v235_v39 = vmul.f32 %v744_v13, %v179_v27  ;;  %v545_v41 = vpack.c.bf16 %v407_v38, %v407_v38  ;;  %v307_v43 = vsel %vm274_vm6, %v257_v7, %v291_v33  ;;  %vm282_vm8 = vcmp.ge.f32.partialorder %v265_v36, 0.0 }
  0xf3   :  { %v415_v42 = vsel %vm382_vm7, %v365_v20, %v399_v32  ;;  %v355_v49 = vadd.f32 %v565_v37, %v307_v43  ;;  %v299_v50 = vmul.f32 %v746_v14, %v265_v36  ;;  %v260_v51 = vadd.f32 %v768_v21, %v237_v24 }
  0xf4   :  { %v553_v48 = vpack.c.bf16 %v415_v42, %v415_v42  ;;  %488 = vst.msk [vmem:[%s948_s6 + $0x18] sm:$0xf] %vm481_vm1, %v545_v41  ;;  %v268_v52 = vadd.f32 %v768_v21, %v245_v25  ;;  %v258_v9 = vadd.f32 %v768_v21, %v235_v39  ;;  %v243_v26 = vmul.f32 %v744_v13, %v211_v40 }
  0xf5   :  { %v582_v53 = vunpack.c.h.bf16 %v782_v31  ;;  %vm372_vm9 = vcmp.ge.f32.partialorder %v355_v49, 0.0  ;;  %v389_v37 = vmul.f32 %v770_v22, %v355_v49  ;;  %v315_v54 = vsel %vm282_vm8, %v265_v36, %v299_v50 }
  0xf6   :  { %496 = vst.msk [vmem:[%s948_s6 + $0x38] sm:$0xf] %vm481_vm1, %v553_v48  ;;  %vm277_vm10 = vcmp.ge.f32.partialorder %v260_v51, 0.0  ;;  %v363_v55 = vadd.f32 %v581_v44, %v315_v54  ;;  %v294_v56 = vmul.f32 %v746_v14, %v260_v51  ;;  %vm285_vm11 = vcmp.ge.f32.partialorder %v268_v52, 0.0 }
  0xf7   :  { %v302_v13 = vmul.f32 %v746_v14, %v268_v52  ;;  %v405_v57 = vsel %vm372_vm9, %v355_v49, %v389_v37  ;;  %vm275_vm12 = vcmp.ge.f32.partialorder %v258_v9, 0.0  ;;  %v292_v58 = vmul.f32 %v746_v14, %v258_v9 }
  0xf8   :  { %v266_v59 = vadd.f32 %v768_v21, %v243_v26  ;;  %v543_v60 = vpack.c.bf16 %v405_v57, %v405_v57  ;;  %vm380_vm13 = vcmp.ge.f32.partialorder %v363_v55, 0.0  ;;  %v397_v61 = vmul.f32 %v770_v22, %v363_v55 }
  0xf9   :  { %v310_v62 = vsel %vm277_vm10, %v260_v51, %v294_v56  ;;  %v318_v44 = vsel %vm285_vm11, %v268_v52, %v302_v13  ;;  %v308_v63 = vsel %vm275_vm12, %v258_v9, %v292_v58 }
  0xfa   :  { %v358_v31 = vadd.f32 %v570_v45, %v310_v62  ;;  %vm283_vm14 = vcmp.ge.f32.partialorder %v266_v59, 0.0  ;;  %486 = vst.msk [vmem:[%s948_s6 + $0x10] sm:$0xf] %vm481_vm1, %v543_v60  ;;  %v413_v0 = vsel %vm380_vm13, %v363_v55, %v397_v61  ;;  %v366_v21 = vadd.f32 %v586_v46, %v318_v44 }
  0xfb   :  { %v356_v10 = vadd.f32 %v566_v47, %v308_v63  ;;  %v300_v29 = vmul.f32 %v746_v14, %v266_v59  ;;  %v551_v1 = vpack.c.bf16 %v413_v0, %v413_v0 }
  0xfc   :  { %vm375_vm15 = vcmp.ge.f32.partialorder %v358_v31, 0.0  ;;  %v392_v17 = vmul.f32 %v770_v22, %v358_v31  ;;  %vm383_vm0 = vcmp.ge.f32.partialorder %v366_v21, 0.0  ;;  %v400_v45 = vmul.f32 %v770_v22, %v366_v21 }
  0xfd   :  { %vm373_vm2 = vcmp.ge.f32.partialorder %v356_v10, 0.0  ;;  %v390_v2 = vmul.f32 %v770_v22, %v356_v10  ;;  %494 = vst.msk [vmem:[%s948_s6 + $0x30] sm:$0xf] %vm481_vm1, %v551_v1  ;;  %v316_v19 = vsel %vm283_vm14, %v266_v59, %v300_v29 }
  0xfe   :  { %v408_v18 = vsel %vm375_vm15, %v358_v31, %v392_v17  ;;  %v416_v47 = vsel %vm383_vm0, %v366_v21, %v400_v45  ;;  %v364_v11 = vadd.f32 %v582_v53, %v316_v19 }
  0xff   :  { %v546_v46 = vpack.c.bf16 %v408_v18, %v408_v18  ;;  %v406_v14 = vsel %vm373_vm2, %v356_v10, %v390_v2  ;;  %v554_v30 = vpack.c.bf16 %v416_v47, %v416_v47 }
 0x100   :  { %v544_v3 = vpack.c.bf16 %v406_v14, %v406_v14  ;;  %vm381_vm3 = vcmp.ge.f32.partialorder %v364_v11, 0.0  ;;  %v398_v4 = vmul.f32 %v770_v22, %v364_v11 }
 0x101   :  { %489 = vst.msk [vmem:[%s948_s6 + $0x1c] sm:$0xf] %vm481_vm1, %v546_v46  ;;  %497 = vst.msk [vmem:[%s948_s6 + $0x3c] sm:$0xf] %vm481_vm1, %v554_v30 }
 0x102   :  { %487 = vst.msk [vmem:[%s948_s6 + $0x14] sm:$0xf] %vm481_vm1, %v544_v3  ;;  %v414_v5 = vsel %vm381_vm3, %v364_v11, %v398_v4 }
 0x103   :  { %v552_v6 = vpack.c.bf16 %v414_v5, %v414_v5 }
 0x105   :  { %495 = vst.msk [vmem:[%s948_s6 + $0x34] sm:$0xf] %vm481_vm1, %v552_v6 }
 0x106   :  { %502 = vsyncpa [#allocation3], 1 }

// kernel: lanenet_forward.262
= control target key start
LH: loop header
LB: loop body
LE: loop exit
PB: predicated region body
PF: predicated region fallthrough
CT: control target
= control target key end

     0   :  { %vm86_vm0 = vcmask 130048   ;;  %vm368_vm1 = vcmask 27648   ;;  %s670_s1 = inlined_call_operand.vmem [shape: bf16[16,4], index: 1, kind: input, shape index: {}]   ;;  %s671_s0 = inlined_call_operand.vmem [shape: bf16[128,16], index: 0, kind: input, shape index: {}]   ;;  %s672_s2 = inlined_call_operand.vmem [shape: f32[1,4], index: 2, kind: input, shape index: {}]   ;;  %s673_s3 = inlined_call_operand.vmem [shape: f32[1,4], index: 3, kind: input, shape index: {}]   ;;  %s674_s4 = inlined_call_operand.<no memory space> [shape: f32[1], index: 4, kind: input, shape index: {}]   ;;  %s675_s5 = inlined_call_operand.vmem [shape: bf16[128,4], index: 5, kind: output, shape index: {}]  }
   0x1   :  { %v469_v0 = vld [vmem:[%s670_s1] sm:$0xff]   ;;  %v472_v3 = vld [vmem:[%s671_s0 + $0x8] sm:$0xff]   ;;  %v474_v5 = vld [vmem:[%s671_s0 + $0x10] sm:$0xff]   ;;  %v558_v15 = vstv %s674_s4 }
   0x2   :  { %v470_v1 = vld [vmem:[%s671_s0] sm:$0xff]   ;;  %449 = vmatprep.subr.bf16.mxu0 %v469_v0  ;;  %467 = vmatprep.subr.bf16.mxu1 %v469_v0  ;;  %v473_v4 = vld [vmem:[%s671_s0 + $0x28] sm:$0xff]   ;;  %v475_v6 = vld [vmem:[%s671_s0 + $0x30] sm:$0xff]  }
   0x3   :  { %v471_v2 = vld [vmem:[%s671_s0 + $0x20] sm:$0xff]   ;;  %450 = vmatpush3.bf16.msra.mxu0 %v469_v0  ;;  %468 = vmatpush3.bf16.msra.mxu1 %v469_v0  ;;  %v476_v7 = vld [vmem:[%s671_s0 + $0x18] sm:$0xff]  }
   0x4   :  { %451 = vmatprep.mubr.msk.bf16.mxu0 %vm86_vm0, %v470_v1  ;;  %459 = vmatprep.mubr.msk.bf16.mxu1 %vm86_vm0, %v471_v2  ;;  %v477_v8 = vld [vmem:[%s671_s0 + $0x38] sm:$0xff]   ;;  %v546_v9 = vld [vmem:[%s672_s2] ss:$0 sm:$0xff] }
   0x5   :  { %v551_v11 = vld [vmem:[%s673_s3] ss:$0 sm:$0xff] }
   0x6   :  { %452 = vmatmul.mubr.msk.bf16.vlgmr.msra.gmra.mxu0 %vm86_vm0, %v472_v3  ;;  %460 = vmatmul.mubr.msk.bf16.vlgmr.msra.gmra.mxu1 %vm86_vm0, %v473_v4 }
   0x7   :  { %455 = vmatprep.mubr.msk.bf16.mxu0 %vm86_vm0, %v474_v5  ;;  %463 = vmatprep.mubr.msk.bf16.mxu1 %vm86_vm0, %v475_v6 }
   0xe   :  { %456 = vmatmul.mubr.msk.bf16.gmra.mxu0 %vm86_vm0, %v476_v7  ;;  %464 = vmatmul.mubr.msk.bf16.gmra.mxu1 %vm86_vm0, %v477_v8 }
  0xc6   :  { %v453_v10 = vpop.f32.mrf.mxu0  ;;  %v461_v12 = vpop.f32.mrf.mxu1 }
  0xc7   :  { %v217_v13 = vmul.f32 %v453_v10, %v546_v9  ;;  %v225_v14 = vmul.f32 %v461_v12, %v546_v9 }
  0xc8   :  { %v145_v16 = vpop.f32.mrf.mxu0  ;;  %v177_v17 = vpop.f32.mrf.mxu1 }
  0xc9   :  { %v240_v18 = vadd.f32 %v551_v11, %v217_v13  ;;  %v248_v19 = vadd.f32 %v551_v11, %v225_v14  ;;  %v215_v20 = vmul.f32 %v546_v9, %v145_v16  ;;  %v223_v21 = vmul.f32 %v546_v9, %v177_v17 }
  0xca   :  { %v454_v22 = vpop.f32.mrf.mxu0  ;;  %v462_v23 = vpop.f32.mrf.mxu1 }
  0xcb   :  { %vm257_vm2 = vcmp.ge.f32.partialorder %v240_v18, 0.0  ;;  %v274_v24 = vmul.f32 %v558_v15, %v240_v18  ;;  %vm265_vm3 = vcmp.ge.f32.partialorder %v248_v19, 0.0  ;;  %v282_v25 = vmul.f32 %v558_v15, %v248_v19 }
  0xcc   :  { %v238_v26 = vadd.f32 %v551_v11, %v215_v20  ;;  %v246_v27 = vadd.f32 %v551_v11, %v223_v21  ;;  %v218_v28 = vmul.f32 %v454_v22, %v546_v9  ;;  %v226_v29 = vmul.f32 %v462_v23, %v546_v9  ;;  %v148_v30 = vpop.f32.mrf.mxu0  ;;  %v180_v31 = vpop.f32.mrf.mxu1 }
  0xcd   :  { %v290_v32 = vsel %vm257_vm2, %v240_v18, %v274_v24  ;;  %v298_v33 = vsel %vm265_vm3, %v248_v19, %v282_v25  ;;  %v216_v34 = vmul.f32 %v546_v9, %v148_v30  ;;  %v224_v35 = vmul.f32 %v546_v9, %v180_v31 }
  0xce   :  { %v426_v36 = vpack.c.bf16 %v290_v32, %v290_v32  ;;  %v434_v37 = vpack.c.bf16 %v298_v33, %v298_v33  ;;  %vm255_vm4 = vcmp.ge.f32.partialorder %v238_v26, 0.0  ;;  %v272_v38 = vmul.f32 %v558_v15, %v238_v26  ;;  %v457_v39 = vpop.f32.mrf.mxu0  ;;  %v465_v40 = vpop.f32.mrf.mxu1 }
  0xcf   :  { %vm263_vm5 = vcmp.ge.f32.partialorder %v246_v27, 0.0  ;;  %v280_v41 = vmul.f32 %v558_v15, %v246_v27  ;;  %v241_v42 = vadd.f32 %v551_v11, %v218_v28  ;;  %v249_v43 = vadd.f32 %v551_v11, %v226_v29 }
  0xd0   :  { %371 = vst.msk [vmem:[%s675_s5 + $0x8] sm:$0xf] %vm368_vm1, %v426_v36  ;;  %379 = vst.msk [vmem:[%s675_s5 + $0x28] sm:$0xf] %vm368_vm1, %v434_v37  ;;  %v288_v44 = vsel %vm255_vm4, %v238_v26, %v272_v38  ;;  %v239_v45 = vadd.f32 %v551_v11, %v216_v34  ;;  %v247_v46 = vadd.f32 %v551_v11, %v224_v35  ;;  %v161_v48 = vpop.f32.mrf.mxu0  ;;  %v193_v49 = vpop.f32.mrf.mxu1 }
  0xd1   :  { %v221_v47 = vmul.f32 %v457_v39, %v546_v9  ;;  %v424_v50 = vpack.c.bf16 %v288_v44, %v288_v44  ;;  %v296_v51 = vsel %vm263_vm5, %v246_v27, %v280_v41  ;;  %vm258_vm6 = vcmp.ge.f32.partialorder %v241_v42, 0.0 }
  0xd2   :  { %v275_v52 = vmul.f32 %v558_v15, %v241_v42  ;;  %v432_v53 = vpack.c.bf16 %v296_v51, %v296_v51  ;;  %vm266_vm7 = vcmp.ge.f32.partialorder %v249_v43, 0.0  ;;  %v283_v54 = vmul.f32 %v558_v15, %v249_v43  ;;  %v458_v55 = vpop.f32.mrf.mxu0  ;;  %v466_v56 = vpop.f32.mrf.mxu1 }
  0xd3   :  { %vm256_vm8 = vcmp.ge.f32.partialorder %v239_v45, 0.0  ;;  %369 = vst.msk [vmem:[%s675_s5] sm:$0xf] %vm368_vm1, %v424_v50  ;;  %v273_v58 = vmul.f32 %v558_v15, %v239_v45  ;;  %vm264_vm9 = vcmp.ge.f32.partialorder %v247_v46, 0.0  ;;  %v281_v59 = vmul.f32 %v558_v15, %v247_v46 }
  0xd4   :  { %v291_v57 = vsel %vm258_vm6, %v241_v42, %v275_v52  ;;  %377 = vst.msk [vmem:[%s675_s5 + $0x20] sm:$0xf] %vm368_vm1, %v432_v53  ;;  %v299_v61 = vsel %vm266_vm7, %v249_v43, %v283_v54  ;;  %v244_v62 = vadd.f32 %v551_v11, %v221_v47  ;;  %v229_v63 = vmul.f32 %v465_v40, %v546_v9  ;;  %v164_v4 = vpop.f32.mrf.mxu0  ;;  %v196_v5 = vpop.f32.mrf.mxu1 }
  0xd5   :  { %v427_v60 = vpack.c.bf16 %v291_v57, %v291_v57  ;;  %v435_v0 = vpack.c.bf16 %v299_v61, %v299_v61  ;;  %v289_v1 = vsel %vm256_vm8, %v239_v45, %v273_v58  ;;  %v297_v2 = vsel %vm264_vm9, %v247_v46, %v281_v59 }
  0xd6   :  { %v219_v3 = vmul.f32 %v546_v9, %v161_v48  ;;  %v425_v6 = vpack.c.bf16 %v289_v1, %v289_v1  ;;  %v433_v7 = vpack.c.bf16 %v297_v2, %v297_v2  ;;  %vm261_vm10 = vcmp.ge.f32.partialorder %v244_v62, 0.0 }
  0xd7   :  { %372 = vst.msk [vmem:[%s675_s5 + $0xc] sm:$0xf] %vm368_vm1, %v427_v60  ;;  %v278_v8 = vmul.f32 %v558_v15, %v244_v62  ;;  %380 = vst.msk [vmem:[%s675_s5 + $0x2c] sm:$0xf] %vm368_vm1, %v435_v0  ;;  %v252_v10 = vadd.f32 %v551_v11, %v229_v63  ;;  %v227_v13 = vmul.f32 %v546_v9, %v193_v49 }
  0xd8   :  { %v242_v12 = vadd.f32 %v551_v11, %v219_v3  ;;  %v222_v14 = vmul.f32 %v458_v55, %v546_v9  ;;  %370 = vst.msk [vmem:[%s675_s5 + $0x4] sm:$0xf] %vm368_vm1, %v425_v6  ;;  %378 = vst.msk [vmem:[%s675_s5 + $0x24] sm:$0xf] %vm368_vm1, %v433_v7  ;;  %v230_v17 = vmul.f32 %v466_v56, %v546_v9 }
  0xd9   :  { %v294_v16 = vsel %vm261_vm10, %v244_v62, %v278_v8  ;;  %v220_v18 = vmul.f32 %v546_v9, %v164_v4  ;;  %v228_v19 = vmul.f32 %v546_v9, %v196_v5  ;;  %vm269_vm11 = vcmp.ge.f32.partialorder %v252_v10, 0.0 }
  0xda   :  { %v430_v20 = vpack.c.bf16 %v294_v16, %v294_v16  ;;  %v286_v21 = vmul.f32 %v558_v15, %v252_v10  ;;  %vm259_vm12 = vcmp.ge.f32.partialorder %v242_v12, 0.0  ;;  %v276_v22 = vmul.f32 %v558_v15, %v242_v12 }
  0xdb   :  { %v250_v23 = vadd.f32 %v551_v11, %v227_v13  ;;  %v245_v24 = vadd.f32 %v551_v11, %v222_v14  ;;  %v253_v25 = vadd.f32 %v551_v11, %v230_v17  ;;  %v243_v9 = vadd.f32 %v551_v11, %v220_v18 }
  0xdc   :  { %375 = vst.msk [vmem:[%s675_s5 + $0x18] sm:$0xf] %vm368_vm1, %v430_v20  ;;  %v302_v26 = vsel %vm269_vm11, %v252_v10, %v286_v21  ;;  %v251_v27 = vadd.f32 %v551_v11, %v228_v19  ;;  %v292_v29 = vsel %vm259_vm12, %v242_v12, %v276_v22 }
  0xdd   :  { %v438_v28 = vpack.c.bf16 %v302_v26, %v302_v26  ;;  %vm267_vm13 = vcmp.ge.f32.partialorder %v250_v23, 0.0  ;;  %v284_v30 = vmul.f32 %v558_v15, %v250_v23  ;;  %v428_v31 = vpack.c.bf16 %v292_v29, %v292_v29 }
  0xde   :  { %vm262_vm14 = vcmp.ge.f32.partialorder %v245_v24, 0.0  ;;  %v279_v32 = vmul.f32 %v558_v15, %v245_v24  ;;  %vm270_vm15 = vcmp.ge.f32.partialorder %v253_v25, 0.0  ;;  %v287_v34 = vmul.f32 %v558_v15, %v253_v25 }
  0xdf   :  { %383 = vst.msk [vmem:[%s675_s5 + $0x38] sm:$0xf] %vm368_vm1, %v438_v28  ;;  %v300_v33 = vsel %vm267_vm13, %v250_v23, %v284_v30  ;;  %vm260_vm0 = vcmp.ge.f32.partialorder %v243_v9, 0.0  ;;  %v277_v11 = vmul.f32 %v558_v15, %v243_v9  ;;  %373 = vst.msk [vmem:[%s675_s5 + $0x10] sm:$0xf] %vm368_vm1, %v428_v31  ;;  %vm268_vm2 = vcmp.ge.f32.partialorder %v251_v27, 0.0 }
  0xe0   :  { %v436_v35 = vpack.c.bf16 %v300_v33, %v300_v33  ;;  %v295_v36 = vsel %vm262_vm14, %v245_v24, %v279_v32  ;;  %v285_v37 = vmul.f32 %v558_v15, %v251_v27  ;;  %v303_v39 = vsel %vm270_vm15, %v253_v25, %v287_v34 }
  0xe1   :  { %v431_v38 = vpack.c.bf16 %v295_v36, %v295_v36  ;;  %v293_v40 = vsel %vm260_vm0, %v243_v9, %v277_v11  ;;  %v439_v41 = vpack.c.bf16 %v303_v39, %v303_v39 }
  0xe2   :  { %381 = vst.msk [vmem:[%s675_s5 + $0x30] sm:$0xf] %vm368_vm1, %v436_v35  ;;  %v429_v42 = vpack.c.bf16 %v293_v40, %v293_v40  ;;  %v301_v43 = vsel %vm268_vm2, %v251_v27, %v285_v37 }
  0xe3   :  { %376 = vst.msk [vmem:[%s675_s5 + $0x1c] sm:$0xf] %vm368_vm1, %v431_v38  ;;  %v437_v44 = vpack.c.bf16 %v301_v43, %v301_v43  ;;  %384 = vst.msk [vmem:[%s675_s5 + $0x3c] sm:$0xf] %vm368_vm1, %v439_v41 }
  0xe4   :  { %374 = vst.msk [vmem:[%s675_s5 + $0x14] sm:$0xf] %vm368_vm1, %v429_v42 }
  0xe5   :  { %382 = vst.msk [vmem:[%s675_s5 + $0x34] sm:$0xf] %vm368_vm1, %v437_v44 }

// kernel: lanenet_forward.263
= control target key start
LH: loop header
LB: loop body
LE: loop exit
PB: predicated region body
PF: predicated region fallthrough
CT: control target
= control target key end

     0   :  { %vm123_vm0 = vcmask 1041408   ;;  %vm98_vm1 = vcmask 293888   ;;  %vm384_vm2 = vcmask 27648   ;;  %s708_s1 = inlined_call_operand.vmem [shape: bf16[36,4], index: 1, kind: input, shape index: {}]   ;;  %s709_s0 = inlined_call_operand.vmem [shape: bf16[128,36], index: 0, kind: input, shape index: {}]   ;;  %s710_s2 = inlined_call_operand.vmem [shape: f32[1,4], index: 2, kind: input, shape index: {}]   ;;  %s711_s3 = inlined_call_operand.vmem [shape: f32[1,4], index: 3, kind: input, shape index: {}]   ;;  %s712_s4 = inlined_call_operand.<no memory space> [shape: f32[1], index: 4, kind: input, shape index: {}]   ;;  %s713_s5 = inlined_call_operand.vmem [shape: bf16[128,4], index: 5, kind: output, shape index: {}]  }
   0x1   :  { %v499_v0 = vld [vmem:[%s708_s1 + $0x10] ss:$0 sps:$4 sm:$0x33]   ;;  %v500_v1 = vld [vmem:[%s708_s1 + $0x8] sm:$0xff]   ;;  %v501_v3 = vld [vmem:[%s708_s1] sm:$0xff]   ;;  %v596_v18 = vstv %s712_s4 }
   0x2   :  { %497 = vmatprep.subr.msk.bf16.mxu0 %vm123_vm0, %v499_v0  ;;  %498 = vmatprep.subr.msk.bf16.mxu1 %vm123_vm0, %v499_v0  ;;  %v125_v2 = vsel %vm123_vm0, %v499_v0, 0  ;;  %v502_v4 = vld [vmem:[%s709_s0] sm:$0xff]   ;;  %v504_v6 = vld [vmem:[%s709_s0 + $0x8] sm:$0xff]   ;;  %v506_v8 = vld [vmem:[%s709_s0 + $0x10] sm:$0xff]  }
   0x3   :  { %470 = vmatpush3.bf16.msra.mxu0 %v125_v2  ;;  %494 = vmatpush3.bf16.msra.mxu1 %v125_v2  ;;  %v503_v5 = vld [vmem:[%s709_s0 + $0x20] sm:$0xff]   ;;  %v505_v7 = vld [vmem:[%s709_s0 + $0x28] sm:$0xff]   ;;  %v507_v9 = vld [vmem:[%s709_s0 + $0x30] sm:$0xff]  }
   0x4   :  { %471 = vmatprep.subr.bf16.mxu0 %v500_v1  ;;  %492 = vmatprep.subr.bf16.mxu1 %v500_v1  ;;  %v508_v10 = vld [vmem:[%s709_s0 + $0x18] sm:$0xff]   ;;  %v584_v12 = vld [vmem:[%s710_s2] ss:$0 sm:$0xff] }
   0x5   :  { %475 = vmatprep.mubr.msk.bf16.mxu0 %vm98_vm1, %v502_v4  ;;  %483 = vmatprep.mubr.msk.bf16.mxu1 %vm98_vm1, %v503_v5  ;;  %v509_v11 = vld [vmem:[%s709_s0 + $0x38] sm:$0xff]   ;;  %v589_v14 = vld [vmem:[%s711_s3] ss:$0 sm:$0xff] }
   0x7   :  { %472 = vmatpush3.bf16.msra.mxu0 %v500_v1  ;;  %495 = vmatpush3.bf16.msra.mxu1 %v500_v1 }
   0x8   :  { %473 = vmatprep.subr.bf16.mxu0 %v501_v3  ;;  %493 = vmatprep.subr.bf16.mxu1 %v501_v3 }
   0xb   :  { %474 = vmatpush3.bf16.msra.mxu0 %v501_v3  ;;  %496 = vmatpush3.bf16.msra.mxu1 %v501_v3 }
   0xe   :  { %476 = vmatmul.mubr.msk.bf16.vlgmr.msra.gmra.mxu0 %vm98_vm1, %v504_v6  ;;  %484 = vmatmul.mubr.msk.bf16.vlgmr.msra.gmra.mxu1 %vm98_vm1, %v505_v7 }
   0xf   :  { %479 = vmatprep.mubr.msk.bf16.mxu0 %vm98_vm1, %v506_v8  ;;  %487 = vmatprep.mubr.msk.bf16.mxu1 %vm98_vm1, %v507_v9 }
  0x16   :  { %480 = vmatmul.mubr.msk.bf16.gmra.mxu0 %vm98_vm1, %v508_v10  ;;  %488 = vmatmul.mubr.msk.bf16.gmra.mxu1 %vm98_vm1, %v509_v11 }
  0xce   :  { %v477_v13 = vpop.f32.mrf.mxu0  ;;  %v485_v15 = vpop.f32.mrf.mxu1 }
  0xcf   :  { %v233_v16 = vmul.f32 %v477_v13, %v584_v12  ;;  %v241_v17 = vmul.f32 %v485_v15, %v584_v12 }
  0xd0   :  { %v161_v19 = vpop.f32.mrf.mxu0  ;;  %v193_v20 = vpop.f32.mrf.mxu1 }
  0xd1   :  { %v256_v21 = vadd.f32 %v589_v14, %v233_v16  ;;  %v264_v22 = vadd.f32 %v589_v14, %v241_v17  ;;  %v231_v23 = vmul.f32 %v584_v12, %v161_v19  ;;  %v239_v24 = vmul.f32 %v584_v12, %v193_v20 }
  0xd2   :  { %v478_v25 = vpop.f32.mrf.mxu0  ;;  %v486_v26 = vpop.f32.mrf.mxu1 }
  0xd3   :  { %vm273_vm3 = vcmp.ge.f32.partialorder %v256_v21, 0.0  ;;  %v290_v27 = vmul.f32 %v596_v18, %v256_v21  ;;  %vm281_vm4 = vcmp.ge.f32.partialorder %v264_v22, 0.0  ;;  %v298_v28 = vmul.f32 %v596_v18, %v264_v22 }
  0xd4   :  { %v254_v29 = vadd.f32 %v589_v14, %v231_v23  ;;  %v262_v30 = vadd.f32 %v589_v14, %v239_v24  ;;  %v234_v31 = vmul.f32 %v478_v25, %v584_v12  ;;  %v242_v32 = vmul.f32 %v486_v26, %v584_v12  ;;  %v164_v33 = vpop.f32.mrf.mxu0  ;;  %v196_v34 = vpop.f32.mrf.mxu1 }
  0xd5   :  { %v306_v35 = vsel %vm273_vm3, %v256_v21, %v290_v27  ;;  %v314_v36 = vsel %vm281_vm4, %v264_v22, %v298_v28  ;;  %v232_v37 = vmul.f32 %v584_v12, %v164_v33  ;;  %v240_v38 = vmul.f32 %v584_v12, %v196_v34 }
  0xd6   :  { %v444_v39 = vpack.c.bf16 %v306_v35, %v306_v35  ;;  %v452_v40 = vpack.c.bf16 %v314_v36, %v314_v36  ;;  %vm271_vm5 = vcmp.ge.f32.partialorder %v254_v29, 0.0  ;;  %v288_v41 = vmul.f32 %v596_v18, %v254_v29  ;;  %v481_v42 = vpop.f32.mrf.mxu0  ;;  %v489_v43 = vpop.f32.mrf.mxu1 }
  0xd7   :  { %vm279_vm6 = vcmp.ge.f32.partialorder %v262_v30, 0.0  ;;  %v296_v44 = vmul.f32 %v596_v18, %v262_v30  ;;  %v257_v45 = vadd.f32 %v589_v14, %v234_v31  ;;  %v265_v46 = vadd.f32 %v589_v14, %v242_v32 }
  0xd8   :  { %387 = vst.msk [vmem:[%s713_s5 + $0x8] sm:$0xf] %vm384_vm2, %v444_v39  ;;  %395 = vst.msk [vmem:[%s713_s5 + $0x28] sm:$0xf] %vm384_vm2, %v452_v40  ;;  %v304_v47 = vsel %vm271_vm5, %v254_v29, %v288_v41  ;;  %v255_v48 = vadd.f32 %v589_v14, %v232_v37  ;;  %v263_v49 = vadd.f32 %v589_v14, %v240_v38  ;;  %v177_v51 = vpop.f32.mrf.mxu0  ;;  %v209_v52 = vpop.f32.mrf.mxu1 }
  0xd9   :  { %v237_v50 = vmul.f32 %v481_v42, %v584_v12  ;;  %v442_v53 = vpack.c.bf16 %v304_v47, %v304_v47  ;;  %v312_v54 = vsel %vm279_vm6, %v262_v30, %v296_v44  ;;  %vm274_vm7 = vcmp.ge.f32.partialorder %v257_v45, 0.0 }
  0xda   :  { %v291_v55 = vmul.f32 %v596_v18, %v257_v45  ;;  %v450_v56 = vpack.c.bf16 %v312_v54, %v312_v54  ;;  %vm282_vm8 = vcmp.ge.f32.partialorder %v265_v46, 0.0  ;;  %v299_v57 = vmul.f32 %v596_v18, %v265_v46  ;;  %v482_v58 = vpop.f32.mrf.mxu0  ;;  %v490_v59 = vpop.f32.mrf.mxu1 }
  0xdb   :  { %vm272_vm9 = vcmp.ge.f32.partialorder %v255_v48, 0.0  ;;  %385 = vst.msk [vmem:[%s713_s5] sm:$0xf] %vm384_vm2, %v442_v53  ;;  %v289_v61 = vmul.f32 %v596_v18, %v255_v48  ;;  %vm280_vm10 = vcmp.ge.f32.partialorder %v263_v49, 0.0  ;;  %v297_v62 = vmul.f32 %v596_v18, %v263_v49 }
  0xdc   :  { %v307_v60 = vsel %vm274_vm7, %v257_v45, %v291_v55  ;;  %393 = vst.msk [vmem:[%s713_s5 + $0x20] sm:$0xf] %vm384_vm2, %v450_v56  ;;  %v315_v0 = vsel %vm282_vm8, %v265_v46, %v299_v57  ;;  %v260_v1 = vadd.f32 %v589_v14, %v237_v50  ;;  %v245_v2 = vmul.f32 %v489_v43, %v584_v12  ;;  %v180_v7 = vpop.f32.mrf.mxu0  ;;  %v212_v8 = vpop.f32.mrf.mxu1 }
  0xdd   :  { %v445_v63 = vpack.c.bf16 %v307_v60, %v307_v60  ;;  %v453_v3 = vpack.c.bf16 %v315_v0, %v315_v0  ;;  %v305_v4 = vsel %vm272_vm9, %v255_v48, %v289_v61  ;;  %v313_v5 = vsel %vm280_vm10, %v263_v49, %v297_v62 }
  0xde   :  { %v235_v6 = vmul.f32 %v584_v12, %v177_v51  ;;  %v443_v9 = vpack.c.bf16 %v305_v4, %v305_v4  ;;  %v451_v10 = vpack.c.bf16 %v313_v5, %v313_v5  ;;  %vm277_vm11 = vcmp.ge.f32.partialorder %v260_v1, 0.0 }
  0xdf   :  { %388 = vst.msk [vmem:[%s713_s5 + $0xc] sm:$0xf] %vm384_vm2, %v445_v63  ;;  %v294_v11 = vmul.f32 %v596_v18, %v260_v1  ;;  %396 = vst.msk [vmem:[%s713_s5 + $0x2c] sm:$0xf] %vm384_vm2, %v453_v3  ;;  %v268_v13 = vadd.f32 %v589_v14, %v245_v2  ;;  %v243_v16 = vmul.f32 %v584_v12, %v209_v52 }
  0xe0   :  { %v258_v15 = vadd.f32 %v589_v14, %v235_v6  ;;  %v238_v17 = vmul.f32 %v482_v58, %v584_v12  ;;  %386 = vst.msk [vmem:[%s713_s5 + $0x4] sm:$0xf] %vm384_vm2, %v443_v9  ;;  %394 = vst.msk [vmem:[%s713_s5 + $0x24] sm:$0xf] %vm384_vm2, %v451_v10  ;;  %v246_v20 = vmul.f32 %v490_v59, %v584_v12 }
  0xe1   :  { %v310_v19 = vsel %vm277_vm11, %v260_v1, %v294_v11  ;;  %v236_v21 = vmul.f32 %v584_v12, %v180_v7  ;;  %v244_v22 = vmul.f32 %v584_v12, %v212_v8  ;;  %vm285_vm12 = vcmp.ge.f32.partialorder %v268_v13, 0.0 }
  0xe2   :  { %v448_v23 = vpack.c.bf16 %v310_v19, %v310_v19  ;;  %v302_v24 = vmul.f32 %v596_v18, %v268_v13  ;;  %vm275_vm13 = vcmp.ge.f32.partialorder %v258_v15, 0.0  ;;  %v292_v25 = vmul.f32 %v596_v18, %v258_v15 }
  0xe3   :  { %v266_v26 = vadd.f32 %v589_v14, %v243_v16  ;;  %v261_v27 = vadd.f32 %v589_v14, %v238_v17  ;;  %v269_v28 = vadd.f32 %v589_v14, %v246_v20  ;;  %v259_v12 = vadd.f32 %v589_v14, %v236_v21 }
  0xe4   :  { %391 = vst.msk [vmem:[%s713_s5 + $0x18] sm:$0xf] %vm384_vm2, %v448_v23  ;;  %v318_v29 = vsel %vm285_vm12, %v268_v13, %v302_v24  ;;  %v267_v30 = vadd.f32 %v589_v14, %v244_v22  ;;  %v308_v32 = vsel %vm275_vm13, %v258_v15, %v292_v25 }
  0xe5   :  { %v456_v31 = vpack.c.bf16 %v318_v29, %v318_v29  ;;  %vm283_vm14 = vcmp.ge.f32.partialorder %v266_v26, 0.0  ;;  %v300_v33 = vmul.f32 %v596_v18, %v266_v26  ;;  %v446_v34 = vpack.c.bf16 %v308_v32, %v308_v32 }
  0xe6   :  { %vm278_vm15 = vcmp.ge.f32.partialorder %v261_v27, 0.0  ;;  %v295_v35 = vmul.f32 %v596_v18, %v261_v27  ;;  %vm286_vm0 = vcmp.ge.f32.partialorder %v269_v28, 0.0  ;;  %v303_v37 = vmul.f32 %v596_v18, %v269_v28 }
  0xe7   :  { %399 = vst.msk [vmem:[%s713_s5 + $0x38] sm:$0xf] %vm384_vm2, %v456_v31  ;;  %v316_v36 = vsel %vm283_vm14, %v266_v26, %v300_v33  ;;  %vm276_vm1 = vcmp.ge.f32.partialorder %v259_v12, 0.0  ;;  %v293_v14 = vmul.f32 %v596_v18, %v259_v12  ;;  %389 = vst.msk [vmem:[%s713_s5 + $0x10] sm:$0xf] %vm384_vm2, %v446_v34  ;;  %vm284_vm3 = vcmp.ge.f32.partialorder %v267_v30, 0.0 }
  0xe8   :  { %v454_v38 = vpack.c.bf16 %v316_v36, %v316_v36  ;;  %v311_v39 = vsel %vm278_vm15, %v261_v27, %v295_v35  ;;  %v301_v40 = vmul.f32 %v596_v18, %v267_v30  ;;  %v319_v42 = vsel %vm286_vm0, %v269_v28, %v303_v37 }
  0xe9   :  { %v449_v41 = vpack.c.bf16 %v311_v39, %v311_v39  ;;  %v309_v43 = vsel %vm276_vm1, %v259_v12, %v293_v14  ;;  %v457_v44 = vpack.c.bf16 %v319_v42, %v319_v42 }
  0xea   :  { %397 = vst.msk [vmem:[%s713_s5 + $0x30] sm:$0xf] %vm384_vm2, %v454_v38  ;;  %v447_v45 = vpack.c.bf16 %v309_v43, %v309_v43  ;;  %v317_v46 = vsel %vm284_vm3, %v267_v30, %v301_v40 }
  0xeb   :  { %392 = vst.msk [vmem:[%s713_s5 + $0x1c] sm:$0xf] %vm384_vm2, %v449_v41  ;;  %v455_v47 = vpack.c.bf16 %v317_v46, %v317_v46  ;;  %400 = vst.msk [vmem:[%s713_s5 + $0x3c] sm:$0xf] %vm384_vm2, %v457_v44 }
  0xec   :  { %390 = vst.msk [vmem:[%s713_s5 + $0x14] sm:$0xf] %vm384_vm2, %v447_v45 }
  0xed   :  { %398 = vst.msk [vmem:[%s713_s5 + $0x34] sm:$0xf] %vm384_vm2, %v455_v47 }

// kernel: lanenet_forward.264
= control target key start
LH: loop header
LB: loop body
LE: loop exit
PB: predicated region body
PF: predicated region fallthrough
CT: control target
= control target key end

     0   :  { %11 = vsyncpa [#allocation3], 0  ;;  %s936_s0 = inlined_call_operand.vmem [shape: bf16[128,4], index: 0, kind: input, shape index: {}]   ;;  %s937_s1 = inlined_call_operand.vmem [shape: bf16[4,16], index: 1, kind: input, shape index: {}]   ;;  %s938_s2 = inlined_call_operand.vmem [shape: f32[1,16], index: 2, kind: input, shape index: {}]   ;;  %s939_s3 = inlined_call_operand.vmem [shape: f32[1,16], index: 3, kind: input, shape index: {}]   ;;  %s940_s4 = inlined_call_operand.vmem [shape: bf16[128,16], index: 4, kind: input, shape index: {}]   ;;  %s941_s5 = inlined_call_operand.vmem [shape: f32[2], index: 5, kind: input, shape index: {}]   ;;  %s942_s6 = inlined_call_operand.vmem [shape: bf16[128,16], index: 6, kind: output, shape index: {}]  }
   0x1   :  { %s28_s23 = sshll.u32 %s941_s5, 4  ;;  %s29_s23 = int_to_ptr.vmem [resolvable:$true] %s28_s23 }
   0x2   :  { %s630_s24 = scalar_lea.vmem %s29_s23, 16  ;;  %p635_p1 = scmp.lt.s32.totalorder %s29_s23, %s29_s23 }
   0x3   :  { %p631_p0 = scmp.ne.s32.totalorder %s29_s23, %s630_s24  ;;  %p636_p2 = scmp.lt.s32.totalorder %s630_s24, %s630_s24 }
   0x5   :  { %p637_p3 = por %p636_p2, %p635_p1 }
   0x7   :  { %p638_p4 = pnand %p637_p3, %p631_p0 }
   0x9   :  { %641 = shalt.err (!%p638_p4)
}
   0xa   :  { %s644_s25 = smov [#allocation2]  }
   0xb   :  { %31 = dma.vmem_to_smem %s29_s23, 16, %s644_s25, [#allocation3]  }
   0xc   :  { %642 = dma.done.wait [#allocation3], 16  }
   0xd   :  { %643 = vsyncadd [#allocation3], 4294967280 }
   0xe   :  { %35 = sfence }
   0xf   :  { %v53_v0 = vld [vmem:[%s937_s1] sm:$0x3]  ;;  %vm119_vm0 = vcmask 1041408   ;;  %vm94_vm1 = vcmask 31744   ;;  %v624_v4 = vld [vmem:[%s936_s0 + $0x8] sm:$0xff]   ;;  %v626_v6 = vld [vmem:[%s936_s0 + $0x10] sm:$0xff]  }
  0x10   :  { %v622_v1 = vld [vmem:[%s936_s0] sm:$0xff]   ;;  %619 = vmatprep.subr.msk.bf16.mxu0 %vm119_vm0, %v53_v0  ;;  %620 = vmatprep.subr.msk.bf16.mxu1 %vm119_vm0, %v53_v0  ;;  %v121_v2 = vsel %vm119_vm0, %v53_v0, 0  ;;  %v625_v5 = vld [vmem:[%s936_s0 + $0x28] sm:$0xff]   ;;  %v627_v7 = vld [vmem:[%s936_s0 + $0x30] sm:$0xff]   ;;  %s266_s18 = sld [smem:[#allocation2]]  ;;  %vm478_vm2 = vcmask 125952  }
  0x11   :  { %600 = vmatpush3.bf16.msra.mxu0 %v121_v2  ;;  %618 = vmatpush3.bf16.msra.mxu1 %v121_v2  ;;  %v623_v3 = vld [vmem:[%s936_s0 + $0x20] sm:$0xff]   ;;  %v628_v8 = vld [vmem:[%s936_s0 + $0x18] sm:$0xff]   ;;  %s518_s19 = sld [smem:[#allocation2 + $0x1]]  ;;  %v721_v10 = vld [vmem:[%s940_s4 + $0x8] sm:$0xff]  }
  0x12   :  { %601 = vmatprep.mubr.msk.bf16.mxu0 %vm94_vm1, %v622_v1  ;;  %609 = vmatprep.mubr.msk.bf16.mxu1 %vm94_vm1, %v623_v3  ;;  %v629_v9 = vld [vmem:[%s936_s0 + $0x38] sm:$0xff]   ;;  %v726_v11 = vld [vmem:[%s940_s4 + $0x28] sm:$0xff]   ;;  %v731_v12 = vld [vmem:[%s940_s4] sm:$0xff]   ;;  %v557_v16 = vunpack.c.l.bf16 %v721_v10  ;;  %v558_v26 = vunpack.c.h.bf16 %v721_v10 }
  0x13   :  { %v736_v13 = vld [vmem:[%s940_s4 + $0x20] sm:$0xff]   ;;  %v573_v17 = vunpack.c.l.bf16 %v726_v11  ;;  %v750_v18 = vld [vmem:[%s940_s4 + $0x18] sm:$0xff]   ;;  %v760_v20 = vld [vmem:[%s940_s4 + $0x10] sm:$0xff]   ;;  %v553_v24 = vunpack.c.l.bf16 %v731_v12  ;;  %v574_v30 = vunpack.c.h.bf16 %v726_v11  ;;  %v554_v31 = vunpack.c.h.bf16 %v731_v12 }
  0x14   :  { %602 = vmatmul.mubr.msk.bf16.vlgmr.msra.gmra.mxu0 %vm94_vm1, %v624_v4  ;;  %610 = vmatmul.mubr.msk.bf16.vlgmr.msra.gmra.mxu1 %vm94_vm1, %v625_v5  ;;  %v741_v14 = vld [vmem:[%s938_s2] ss:$0 sm:$0xff]  ;;  %v755_v19 = vld [vmem:[%s940_s4 + $0x38] sm:$0xff]   ;;  %v569_v25 = vunpack.c.l.bf16 %v736_v13  ;;  %v775_v27 = vld [vmem:[%s940_s4 + $0x30] sm:$0xff]   ;;  %v570_v32 = vunpack.c.h.bf16 %v736_v13  ;;  %v565_v35 = vunpack.c.l.bf16 %v750_v18  ;;  %v561_v37 = vunpack.c.l.bf16 %v760_v20 }
  0x15   :  { %605 = vmatprep.mubr.msk.bf16.mxu0 %vm94_vm1, %v626_v6  ;;  %613 = vmatprep.mubr.msk.bf16.mxu1 %vm94_vm1, %v627_v7  ;;  %v765_v22 = vld [vmem:[%s939_s3] ss:$0 sm:$0xff]  ;;  %v581_v36 = vunpack.c.l.bf16 %v755_v19  ;;  %v577_v41 = vunpack.c.l.bf16 %v775_v27  ;;  %v566_v42 = vunpack.c.h.bf16 %v750_v18  ;;  %v582_v46 = vunpack.c.h.bf16 %v755_v19 }
  0x16   :  { %v743_v15 = vstv %s266_s18  ;;  %v562_v47 = vunpack.c.h.bf16 %v760_v20 }
  0x17   :  { %v767_v23 = vstv %s518_s19 }
  0x1c   :  { %606 = vmatmul.mubr.msk.bf16.gmra.mxu0 %vm94_vm1, %v628_v8  ;;  %614 = vmatmul.mubr.msk.bf16.gmra.mxu1 %vm94_vm1, %v629_v9 }
  0xd4   :  { %v603_v21 = vpop.f32.mrf.mxu0  ;;  %v611_v29 = vpop.f32.mrf.mxu1 }
  0xd5   :  { %v229_v28 = vmul.f32 %v603_v21, %v741_v14  ;;  %v237_v33 = vmul.f32 %v611_v29, %v741_v14 }
  0xd6   :  { %v157_v34 = vpop.f32.mrf.mxu0  ;;  %v189_v40 = vpop.f32.mrf.mxu1 }
  0xd7   :  { %v252_v38 = vadd.f32 %v765_v22, %v229_v28  ;;  %v227_v39 = vmul.f32 %v741_v14, %v157_v34  ;;  %v260_v43 = vadd.f32 %v765_v22, %v237_v33  ;;  %v235_v44 = vmul.f32 %v741_v14, %v189_v40 }
  0xd8   :  { %v604_v45 = vpop.f32.mrf.mxu0  ;;  %v612_v51 = vpop.f32.mrf.mxu1 }
  0xd9   :  { %vm269_vm3 = vcmp.ge.f32.partialorder %v252_v38, 0.0  ;;  %v286_v48 = vmul.f32 %v743_v15, %v252_v38  ;;  %v250_v49 = vadd.f32 %v765_v22, %v227_v39  ;;  %v230_v50 = vmul.f32 %v604_v45, %v741_v14 }
  0xda   :  { %vm277_vm4 = vcmp.ge.f32.partialorder %v260_v43, 0.0  ;;  %v294_v52 = vmul.f32 %v743_v15, %v260_v43  ;;  %v258_v53 = vadd.f32 %v765_v22, %v235_v44  ;;  %v238_v54 = vmul.f32 %v612_v51, %v741_v14  ;;  %v160_v58 = vpop.f32.mrf.mxu0  ;;  %v192_v62 = vpop.f32.mrf.mxu1 }
  0xdb   :  { %v302_v55 = vsel %vm269_vm3, %v252_v38, %v286_v48  ;;  %vm267_vm5 = vcmp.ge.f32.partialorder %v250_v49, 0.0  ;;  %v284_v56 = vmul.f32 %v743_v15, %v250_v49  ;;  %v253_v57 = vadd.f32 %v765_v22, %v230_v50 }
  0xdc   :  { %v350_v59 = vadd.f32 %v557_v16, %v302_v55  ;;  %v310_v60 = vsel %vm277_vm4, %v260_v43, %v294_v52  ;;  %vm275_vm6 = vcmp.ge.f32.partialorder %v258_v53, 0.0  ;;  %v292_v61 = vmul.f32 %v743_v15, %v258_v53  ;;  %v607_v8 = vpop.f32.mrf.mxu0 }
  0xdd   :  { %v358_v63 = vadd.f32 %v573_v17, %v310_v60  ;;  %v300_v0 = vsel %vm267_vm5, %v250_v49, %v284_v56  ;;  %vm270_vm7 = vcmp.ge.f32.partialorder %v253_v57, 0.0  ;;  %v287_v1 = vmul.f32 %v743_v15, %v253_v57  ;;  %v615_v17 = vpop.f32.mrf.mxu1 }
  0xde   :  { %vm367_vm8 = vcmp.ge.f32.partialorder %v350_v59, 0.0  ;;  %v384_v2 = vmul.f32 %v767_v23, %v350_v59  ;;  %v348_v3 = vadd.f32 %v553_v24, %v300_v0  ;;  %v308_v4 = vsel %vm275_vm6, %v258_v53, %v292_v61  ;;  %v173_v40 = vpop.f32.mrf.mxu0 }
  0xdf   :  { %vm375_vm9 = vcmp.ge.f32.partialorder %v358_v63, 0.0  ;;  %v392_v5 = vmul.f32 %v767_v23, %v358_v63  ;;  %v356_v6 = vadd.f32 %v569_v25, %v308_v4  ;;  %v303_v7 = vsel %vm270_vm7, %v253_v57, %v287_v1  ;;  %v205_v49 = vpop.f32.mrf.mxu1 }
  0xe0   :  { %v400_v9 = vsel %vm367_vm8, %v350_v59, %v384_v2  ;;  %vm365_vm10 = vcmp.ge.f32.partialorder %v348_v3, 0.0  ;;  %v382_v10 = vmul.f32 %v767_v23, %v348_v3  ;;  %v351_v16 = vadd.f32 %v558_v26, %v303_v7 }
  0xe1   :  { %v537_v21 = vpack.c.bf16 %v400_v9, %v400_v9  ;;  %v408_v28 = vsel %vm375_vm9, %v358_v63, %v392_v5  ;;  %vm373_vm11 = vcmp.ge.f32.partialorder %v356_v6, 0.0  ;;  %v390_v29 = vmul.f32 %v767_v23, %v356_v6 }
  0xe2   :  { %v545_v33 = vpack.c.bf16 %v408_v28, %v408_v28  ;;  %v398_v24 = vsel %vm365_vm10, %v348_v3, %v382_v10  ;;  %vm368_vm12 = vcmp.ge.f32.partialorder %v351_v16, 0.0  ;;  %v385_v34 = vmul.f32 %v767_v23, %v351_v16 }
  0xe3   :  { %481 = vst.msk [vmem:[%s942_s6 + $0x8] sm:$0xf] %vm478_vm2, %v537_v21  ;;  %v535_v25 = vpack.c.bf16 %v398_v24, %v398_v24  ;;  %v406_v38 = vsel %vm373_vm11, %v356_v6, %v390_v29  ;;  %v261_v26 = vadd.f32 %v765_v22, %v238_v54  ;;  %v228_v39 = vmul.f32 %v741_v14, %v160_v58  ;;  %v608_v6 = vpop.f32.mrf.mxu0 }
  0xe4   :  { %489 = vst.msk [vmem:[%s942_s6 + $0x28] sm:$0xf] %vm478_vm2, %v545_v33  ;;  %v543_v43 = vpack.c.bf16 %v406_v38, %v406_v38  ;;  %v401_v44 = vsel %vm368_vm12, %v351_v16, %v385_v34  ;;  %v236_v45 = vmul.f32 %v741_v14, %v192_v62  ;;  %v233_v48 = vmul.f32 %v607_v8, %v741_v14 }
  0xe5   :  { %479 = vst.msk [vmem:[%s942_s6] sm:$0xf] %vm478_vm2, %v535_v25  ;;  %v538_v50 = vpack.c.bf16 %v401_v44, %v401_v44  ;;  %vm278_vm13 = vcmp.ge.f32.partialorder %v261_v26, 0.0  ;;  %v295_v51 = vmul.f32 %v743_v15, %v261_v26  ;;  %v251_v52 = vadd.f32 %v765_v22, %v228_v39  ;;  %v176_v29 = vpop.f32.mrf.mxu0 }
  0xe6   :  { %487 = vst.msk [vmem:[%s942_s6 + $0x20] sm:$0xf] %vm478_vm2, %v543_v43  ;;  %v259_v53 = vadd.f32 %v765_v22, %v236_v45  ;;  %v256_v54 = vadd.f32 %v765_v22, %v233_v48  ;;  %v241_v55 = vmul.f32 %v615_v17, %v741_v14  ;;  %v231_v56 = vmul.f32 %v741_v14, %v173_v40  ;;  %v616_v17 = vpop.f32.mrf.mxu1 }
  0xe7   :  { %482 = vst.msk [vmem:[%s942_s6 + $0xc] sm:$0xf] %vm478_vm2, %v538_v50  ;;  %v311_v57 = vsel %vm278_vm13, %v261_v26, %v295_v51  ;;  %vm268_vm14 = vcmp.ge.f32.partialorder %v251_v52, 0.0  ;;  %v285_v58 = vmul.f32 %v743_v15, %v251_v52  ;;  %v239_v59 = vmul.f32 %v741_v14, %v205_v49 }
  0xe8   :  { %v359_v60 = vadd.f32 %v574_v30, %v311_v57  ;;  %vm276_vm15 = vcmp.ge.f32.partialorder %v259_v53, 0.0  ;;  %v293_v61 = vmul.f32 %v743_v15, %v259_v53  ;;  %vm273_vm0 = vcmp.ge.f32.partialorder %v256_v54, 0.0  ;;  %v208_v45 = vpop.f32.mrf.mxu1 }
  0xe9   :  { %v301_v62 = vsel %vm268_vm14, %v251_v52, %v285_v58  ;;  %v290_v63 = vmul.f32 %v743_v15, %v256_v54  ;;  %v264_v0 = vadd.f32 %v765_v22, %v241_v55  ;;  %v254_v1 = vadd.f32 %v765_v22, %v231_v56 }
  0xea   :  { %vm376_vm1 = vcmp.ge.f32.partialorder %v359_v60, 0.0  ;;  %v393_v2 = vmul.f32 %v767_v23, %v359_v60  ;;  %v349_v3 = vadd.f32 %v554_v31, %v301_v62  ;;  %v309_v4 = vsel %vm276_vm15, %v259_v53, %v293_v61 }
  0xeb   :  { %v357_v11 = vadd.f32 %v570_v32, %v309_v4  ;;  %v306_v30 = vsel %vm273_vm0, %v256_v54, %v290_v63  ;;  %vm281_vm3 = vcmp.ge.f32.partialorder %v264_v0, 0.0  ;;  %v298_v5 = vmul.f32 %v743_v15, %v264_v0 }
  0xec   :  { %v409_v7 = vsel %vm376_vm1, %v359_v60, %v393_v2  ;;  %vm366_vm4 = vcmp.ge.f32.partialorder %v349_v3, 0.0  ;;  %v383_v8 = vmul.f32 %v767_v23, %v349_v3  ;;  %v354_v9 = vadd.f32 %v565_v35, %v306_v30 }
  0xed   :  { %v546_v10 = vpack.c.bf16 %v409_v7, %v409_v7  ;;  %vm374_vm5 = vcmp.ge.f32.partialorder %v357_v11, 0.0  ;;  %v391_v12 = vmul.f32 %v767_v23, %v357_v11  ;;  %v314_v31 = vsel %vm281_vm3, %v264_v0, %v298_v5 }
  0xee   :  { %v399_v16 = vsel %vm366_vm4, %v349_v3, %v383_v8  ;;  %vm371_vm6 = vcmp.ge.f32.partialorder %v354_v9, 0.0  ;;  %v388_v13 = vmul.f32 %v767_v23, %v354_v9  ;;  %v362_v32 = vadd.f32 %v581_v36, %v314_v31 }
  0xef   :  { %490 = vst.msk [vmem:[%s942_s6 + $0x2c] sm:$0xf] %vm478_vm2, %v546_v10  ;;  %v536_v21 = vpack.c.bf16 %v399_v16, %v399_v16  ;;  %v407_v35 = vsel %vm374_vm5, %v357_v11, %v391_v12  ;;  %vm271_vm7 = vcmp.ge.f32.partialorder %v254_v1, 0.0  ;;  %v288_v28 = vmul.f32 %v743_v15, %v254_v1 }
  0xf0   :  { %v544_v33 = vpack.c.bf16 %v407_v35, %v407_v35  ;;  %v404_v24 = vsel %vm371_vm6, %v354_v9, %v388_v13  ;;  %vm379_vm8 = vcmp.ge.f32.partialorder %v362_v32, 0.0  ;;  %v396_v34 = vmul.f32 %v767_v23, %v362_v32 }
  0xf1   :  { %480 = vst.msk [vmem:[%s942_s6 + $0x4] sm:$0xf] %vm478_vm2, %v536_v21  ;;  %v541_v36 = vpack.c.bf16 %v404_v24, %v404_v24  ;;  %v304_v25 = vsel %vm271_vm7, %v254_v1, %v288_v28  ;;  %v262_v38 = vadd.f32 %v765_v22, %v239_v59  ;;  %v234_v26 = vmul.f32 %v608_v6, %v741_v14 }
  0xf2   :  { %488 = vst.msk [vmem:[%s942_s6 + $0x24] sm:$0xf] %vm478_vm2, %v544_v33  ;;  %v412_v39 = vsel %vm379_vm8, %v362_v32, %v396_v34  ;;  %v352_v40 = vadd.f32 %v561_v37, %v304_v25  ;;  %v242_v43 = vmul.f32 %v616_v17, %v741_v14  ;;  %v232_v44 = vmul.f32 %v741_v14, %v176_v29 }
  0xf3   :  { %485 = vst.msk [vmem:[%s942_s6 + $0x18] sm:$0xf] %vm478_vm2, %v541_v36  ;;  %v549_v48 = vpack.c.bf16 %v412_v39, %v412_v39  ;;  %vm279_vm9 = vcmp.ge.f32.partialorder %v262_v38, 0.0  ;;  %v296_v49 = vmul.f32 %v743_v15, %v262_v38  ;;  %v257_v50 = vadd.f32 %v765_v22, %v234_v26 }
  0xf4   :  { %vm369_vm10 = vcmp.ge.f32.partialorder %v352_v40, 0.0  ;;  %v386_v51 = vmul.f32 %v767_v23, %v352_v40  ;;  %v265_v37 = vadd.f32 %v765_v22, %v242_v43  ;;  %v255_v52 = vadd.f32 %v765_v22, %v232_v44 }
  0xf5   :  { %493 = vst.msk [vmem:[%s942_s6 + $0x38] sm:$0xf] %vm478_vm2, %v549_v48  ;;  %v312_v53 = vsel %vm279_vm9, %v262_v38, %v296_v49  ;;  %vm274_vm11 = vcmp.ge.f32.partialorder %v257_v50, 0.0  ;;  %v291_v54 = vmul.f32 %v743_v15, %v257_v50  ;;  %v240_v55 = vmul.f32 %v741_v14, %v208_v45 }
  0xf6   :  { %v402_v56 = vsel %vm369_vm10, %v352_v40, %v386_v51  ;;  %v360_v57 = vadd.f32 %v577_v41, %v312_v53  ;;  %vm282_vm12 = vcmp.ge.f32.partialorder %v265_v37, 0.0  ;;  %v299_v58 = vmul.f32 %v743_v15, %v265_v37 }
  0xf7   :  { %v539_v59 = vpack.c.bf16 %v402_v56, %v402_v56  ;;  %v307_v60 = vsel %vm274_vm11, %v257_v50, %v291_v54  ;;  %vm272_vm13 = vcmp.ge.f32.partialorder %v255_v52, 0.0  ;;  %v289_v61 = vmul.f32 %v743_v15, %v255_v52 }
  0xf8   :  { %vm377_vm14 = vcmp.ge.f32.partialorder %v360_v57, 0.0  ;;  %v394_v62 = vmul.f32 %v767_v23, %v360_v57  ;;  %v355_v63 = vadd.f32 %v566_v42, %v307_v60  ;;  %v315_v0 = vsel %vm282_vm12, %v265_v37, %v299_v58 }
  0xf9   :  { %483 = vst.msk [vmem:[%s942_s6 + $0x10] sm:$0xf] %vm478_vm2, %v539_v59  ;;  %v363_v14 = vadd.f32 %v582_v46, %v315_v0  ;;  %v305_v41 = vsel %vm272_vm13, %v255_v52, %v289_v61  ;;  %v263_v1 = vadd.f32 %v765_v22, %v240_v55  ;;  %v578_v2 = vunpack.c.h.bf16 %v775_v27 }
  0xfa   :  { %v410_v3 = vsel %vm377_vm14, %v360_v57, %v394_v62  ;;  %vm372_vm15 = vcmp.ge.f32.partialorder %v355_v63, 0.0  ;;  %v389_v4 = vmul.f32 %v767_v23, %v355_v63  ;;  %v353_v18 = vadd.f32 %v562_v47, %v305_v41 }
  0xfb   :  { %v547_v42 = vpack.c.bf16 %v410_v3, %v410_v3  ;;  %vm380_vm0 = vcmp.ge.f32.partialorder %v363_v14, 0.0  ;;  %v397_v11 = vmul.f32 %v767_v23, %v363_v14  ;;  %vm280_vm1 = vcmp.ge.f32.partialorder %v263_v1, 0.0 }
  0xfc   :  { %v405_v30 = vsel %vm372_vm15, %v355_v63, %v389_v4  ;;  %vm370_vm3 = vcmp.ge.f32.partialorder %v353_v18, 0.0  ;;  %v387_v19 = vmul.f32 %v767_v23, %v353_v18  ;;  %v297_v22 = vmul.f32 %v743_v15, %v263_v1 }
  0xfd   :  { %491 = vst.msk [vmem:[%s942_s6 + $0x30] sm:$0xf] %vm478_vm2, %v547_v42  ;;  %v542_v27 = vpack.c.bf16 %v405_v30, %v405_v30  ;;  %v413_v46 = vsel %vm380_vm0, %v363_v14, %v397_v11 }
  0xfe   :  { %v550_v20 = vpack.c.bf16 %v413_v46, %v413_v46  ;;  %v403_v47 = vsel %vm370_vm3, %v353_v18, %v387_v19  ;;  %v313_v5 = vsel %vm280_vm1, %v263_v1, %v297_v22 }
  0xff   :  { %486 = vst.msk [vmem:[%s942_s6 + $0x1c] sm:$0xf] %vm478_vm2, %v542_v27  ;;  %v540_v6 = vpack.c.bf16 %v403_v47, %v403_v47  ;;  %v361_v7 = vadd.f32 %v578_v2, %v313_v5 }
 0x100   :  { %494 = vst.msk [vmem:[%s942_s6 + $0x3c] sm:$0xf] %vm478_vm2, %v550_v20 }
 0x101   :  { %484 = vst.msk [vmem:[%s942_s6 + $0x14] sm:$0xf] %vm478_vm2, %v540_v6  ;;  %vm378_vm4 = vcmp.ge.f32.partialorder %v361_v7, 0.0  ;;  %v395_v15 = vmul.f32 %v767_v23, %v361_v7 }
 0x103   :  { %v411_v8 = vsel %vm378_vm4, %v361_v7, %v395_v15 }
 0x104   :  { %v548_v9 = vpack.c.bf16 %v411_v8, %v411_v8 }
 0x106   :  { %492 = vst.msk [vmem:[%s942_s6 + $0x34] sm:$0xf] %vm478_vm2, %v548_v9 }
 0x107   :  { %499 = vsyncpa [#allocation3], 1 }

// kernel: lanenet_forward.265
= control target key start
LH: loop header
LB: loop body
LE: loop exit
PB: predicated region body
PF: predicated region fallthrough
CT: control target
= control target key end

     0   :  { %vm110_vm0 = vcmask 523264   ;;  %vm392_vm1 = vcmask 93184   ;;  %s724_s1 = inlined_call_operand.vmem [shape: bf16[64,12], index: 1, kind: input, shape index: {}]   ;;  %s725_s0 = inlined_call_operand.vmem [shape: bf16[128,64], index: 0, kind: input, shape index: {}]   ;;  %s726_s2 = inlined_call_operand.vmem [shape: f32[1,12], index: 2, kind: input, shape index: {}]   ;;  %s727_s3 = inlined_call_operand.vmem [shape: f32[1,12], index: 3, kind: input, shape index: {}]   ;;  %s728_s4 = inlined_call_operand.<no memory space> [shape: f32[1], index: 4, kind: input, shape index: {}]   ;;  %s729_s5 = inlined_call_operand.vmem [shape: bf16[128,12], index: 5, kind: output, shape index: {}]  }
   0x1   :  { %v511_v0 = vld [vmem:[%s724_s1 + $0x18] sm:$0xff]   ;;  %v512_v1 = vld [vmem:[%s724_s1 + $0x10] sm:$0xff]   ;;  %v513_v2 = vld [vmem:[%s724_s1 + $0x8] sm:$0xff]   ;;  %v612_v18 = vstv %s728_s4 }
   0x2   :  { %479 = vmatprep.subr.bf16.mxu0 %v511_v0  ;;  %503 = vmatprep.subr.bf16.mxu1 %v511_v0  ;;  %v515_v3 = vld [vmem:[%s725_s0] sm:$0xff]   ;;  %v517_v6 = vld [vmem:[%s725_s0 + $0x8] sm:$0xff]   ;;  %v519_v8 = vld [vmem:[%s725_s0 + $0x10] sm:$0xff]  }
   0x3   :  { %480 = vmatpush3.bf16.msra.mxu0 %v511_v0  ;;  %507 = vmatpush3.bf16.msra.mxu1 %v511_v0  ;;  %v516_v4 = vld [vmem:[%s725_s0 + $0x20] sm:$0xff]   ;;  %v518_v7 = vld [vmem:[%s725_s0 + $0x28] sm:$0xff]   ;;  %v520_v9 = vld [vmem:[%s725_s0 + $0x30] sm:$0xff]  }
   0x4   :  { %481 = vmatprep.subr.bf16.mxu0 %v512_v1  ;;  %504 = vmatprep.subr.bf16.mxu1 %v512_v1  ;;  %v514_v5 = vld [vmem:[%s724_s1] sm:$0xff]   ;;  %v521_v10 = vld [vmem:[%s725_s0 + $0x18] sm:$0xff]  }
   0x5   :  { %487 = vmatprep.mubr.msk.bf16.mxu0 %vm110_vm0, %v515_v3  ;;  %495 = vmatprep.mubr.msk.bf16.mxu1 %vm110_vm0, %v516_v4  ;;  %v522_v11 = vld [vmem:[%s725_s0 + $0x38] sm:$0xff]   ;;  %v600_v12 = vld [vmem:[%s726_s2] ss:$0 sm:$0xff] }
   0x6   :  { %v605_v14 = vld [vmem:[%s727_s3] ss:$0 sm:$0xff] }
   0x7   :  { %482 = vmatpush3.bf16.msra.mxu0 %v512_v1  ;;  %508 = vmatpush3.bf16.msra.mxu1 %v512_v1 }
   0x8   :  { %483 = vmatprep.subr.bf16.mxu0 %v513_v2  ;;  %505 = vmatprep.subr.bf16.mxu1 %v513_v2 }
   0xb   :  { %484 = vmatpush3.bf16.msra.mxu0 %v513_v2  ;;  %509 = vmatpush3.bf16.msra.mxu1 %v513_v2 }
   0xc   :  { %485 = vmatprep.subr.bf16.mxu0 %v514_v5  ;;  %506 = vmatprep.subr.bf16.mxu1 %v514_v5 }
   0xf   :  { %486 = vmatpush3.bf16.msra.mxu0 %v514_v5  ;;  %510 = vmatpush3.bf16.msra.mxu1 %v514_v5 }
  0x12   :  { %488 = vmatmul.mubr.msk.bf16.vlgmr.msra.gmra.mxu0 %vm110_vm0, %v517_v6  ;;  %496 = vmatmul.mubr.msk.bf16.vlgmr.msra.gmra.mxu1 %vm110_vm0, %v518_v7 }
  0x13   :  { %491 = vmatprep.mubr.msk.bf16.mxu0 %vm110_vm0, %v519_v8  ;;  %499 = vmatprep.mubr.msk.bf16.mxu1 %vm110_vm0, %v520_v9 }
  0x1a   :  { %492 = vmatmul.mubr.msk.bf16.gmra.mxu0 %vm110_vm0, %v521_v10  ;;  %500 = vmatmul.mubr.msk.bf16.gmra.mxu1 %vm110_vm0, %v522_v11 }
  0xd2   :  { %v489_v13 = vpop.f32.mrf.mxu0  ;;  %v497_v15 = vpop.f32.mrf.mxu1 }
  0xd3   :  { %v241_v16 = vmul.f32 %v489_v13, %v600_v12  ;;  %v249_v17 = vmul.f32 %v497_v15, %v600_v12 }
  0xd4   :  { %v169_v19 = vpop.f32.mrf.mxu0  ;;  %v201_v20 = vpop.f32.mrf.mxu1 }
  0xd5   :  { %v264_v21 = vadd.f32 %v605_v14, %v241_v16  ;;  %v272_v22 = vadd.f32 %v605_v14, %v249_v17  ;;  %v239_v23 = vmul.f32 %v600_v12, %v169_v19  ;;  %v247_v24 = vmul.f32 %v600_v12, %v201_v20 }
  0xd6   :  { %v490_v25 = vpop.f32.mrf.mxu0  ;;  %v498_v26 = vpop.f32.mrf.mxu1 }
  0xd7   :  { %vm281_vm2 = vcmp.ge.f32.partialorder %v264_v21, 0.0  ;;  %v298_v27 = vmul.f32 %v612_v18, %v264_v21  ;;  %vm289_vm3 = vcmp.ge.f32.partialorder %v272_v22, 0.0  ;;  %v306_v28 = vmul.f32 %v612_v18, %v272_v22 }
  0xd8   :  { %v262_v29 = vadd.f32 %v605_v14, %v239_v23  ;;  %v270_v30 = vadd.f32 %v605_v14, %v247_v24  ;;  %v242_v31 = vmul.f32 %v490_v25, %v600_v12  ;;  %v250_v32 = vmul.f32 %v498_v26, %v600_v12  ;;  %v172_v33 = vpop.f32.mrf.mxu0  ;;  %v204_v34 = vpop.f32.mrf.mxu1 }
  0xd9   :  { %v314_v35 = vsel %vm281_vm2, %v264_v21, %v298_v27  ;;  %v322_v36 = vsel %vm289_vm3, %v272_v22, %v306_v28  ;;  %v240_v37 = vmul.f32 %v600_v12, %v172_v33  ;;  %v248_v38 = vmul.f32 %v600_v12, %v204_v34 }
  0xda   :  { %v453_v39 = vpack.c.bf16 %v314_v35, %v314_v35  ;;  %v461_v40 = vpack.c.bf16 %v322_v36, %v322_v36  ;;  %vm279_vm4 = vcmp.ge.f32.partialorder %v262_v29, 0.0  ;;  %v296_v41 = vmul.f32 %v612_v18, %v262_v29  ;;  %v493_v42 = vpop.f32.mrf.mxu0  ;;  %v501_v43 = vpop.f32.mrf.mxu1 }
  0xdb   :  { %vm287_vm5 = vcmp.ge.f32.partialorder %v270_v30, 0.0  ;;  %v304_v44 = vmul.f32 %v612_v18, %v270_v30  ;;  %v265_v45 = vadd.f32 %v605_v14, %v242_v31  ;;  %v273_v46 = vadd.f32 %v605_v14, %v250_v32 }
  0xdc   :  { %395 = vst.msk [vmem:[%s729_s5 + $0x8] sm:$0xf] %vm392_vm1, %v453_v39  ;;  %403 = vst.msk [vmem:[%s729_s5 + $0x28] sm:$0xf] %vm392_vm1, %v461_v40  ;;  %v312_v47 = vsel %vm279_vm4, %v262_v29, %v296_v41  ;;  %v263_v48 = vadd.f32 %v605_v14, %v240_v37  ;;  %v271_v49 = vadd.f32 %v605_v14, %v248_v38  ;;  %v185_v51 = vpop.f32.mrf.mxu0  ;;  %v217_v52 = vpop.f32.mrf.mxu1 }
  0xdd   :  { %v245_v50 = vmul.f32 %v493_v42, %v600_v12  ;;  %v451_v53 = vpack.c.bf16 %v312_v47, %v312_v47  ;;  %v320_v54 = vsel %vm287_vm5, %v270_v30, %v304_v44  ;;  %vm282_vm6 = vcmp.ge.f32.partialorder %v265_v45, 0.0 }
  0xde   :  { %v299_v55 = vmul.f32 %v612_v18, %v265_v45  ;;  %v459_v56 = vpack.c.bf16 %v320_v54, %v320_v54  ;;  %vm290_vm7 = vcmp.ge.f32.partialorder %v273_v46, 0.0  ;;  %v307_v57 = vmul.f32 %v612_v18, %v273_v46  ;;  %v494_v58 = vpop.f32.mrf.mxu0  ;;  %v502_v59 = vpop.f32.mrf.mxu1 }
  0xdf   :  { %vm280_vm8 = vcmp.ge.f32.partialorder %v263_v48, 0.0  ;;  %393 = vst.msk [vmem:[%s729_s5] sm:$0xf] %vm392_vm1, %v451_v53  ;;  %v297_v61 = vmul.f32 %v612_v18, %v263_v48  ;;  %vm288_vm9 = vcmp.ge.f32.partialorder %v271_v49, 0.0  ;;  %v305_v62 = vmul.f32 %v612_v18, %v271_v49 }
  0xe0   :  { %v315_v60 = vsel %vm282_vm6, %v265_v45, %v299_v55  ;;  %401 = vst.msk [vmem:[%s729_s5 + $0x20] sm:$0xf] %vm392_vm1, %v459_v56  ;;  %v323_v0 = vsel %vm290_vm7, %v273_v46, %v307_v57  ;;  %v268_v1 = vadd.f32 %v605_v14, %v245_v50  ;;  %v253_v2 = vmul.f32 %v501_v43, %v600_v12  ;;  %v188_v7 = vpop.f32.mrf.mxu0  ;;  %v220_v8 = vpop.f32.mrf.mxu1 }
  0xe1   :  { %v454_v63 = vpack.c.bf16 %v315_v60, %v315_v60  ;;  %v462_v3 = vpack.c.bf16 %v323_v0, %v323_v0  ;;  %v313_v4 = vsel %vm280_vm8, %v263_v48, %v297_v61  ;;  %v321_v5 = vsel %vm288_vm9, %v271_v49, %v305_v62 }
  0xe2   :  { %v243_v6 = vmul.f32 %v600_v12, %v185_v51  ;;  %v452_v9 = vpack.c.bf16 %v313_v4, %v313_v4  ;;  %v460_v10 = vpack.c.bf16 %v321_v5, %v321_v5  ;;  %vm285_vm10 = vcmp.ge.f32.partialorder %v268_v1, 0.0 }
  0xe3   :  { %396 = vst.msk [vmem:[%s729_s5 + $0xc] sm:$0xf] %vm392_vm1, %v454_v63  ;;  %v302_v11 = vmul.f32 %v612_v18, %v268_v1  ;;  %404 = vst.msk [vmem:[%s729_s5 + $0x2c] sm:$0xf] %vm392_vm1, %v462_v3  ;;  %v276_v13 = vadd.f32 %v605_v14, %v253_v2  ;;  %v251_v16 = vmul.f32 %v600_v12, %v217_v52 }
  0xe4   :  { %v266_v15 = vadd.f32 %v605_v14, %v243_v6  ;;  %v246_v17 = vmul.f32 %v494_v58, %v600_v12  ;;  %394 = vst.msk [vmem:[%s729_s5 + $0x4] sm:$0xf] %vm392_vm1, %v452_v9  ;;  %402 = vst.msk [vmem:[%s729_s5 + $0x24] sm:$0xf] %vm392_vm1, %v460_v10  ;;  %v254_v20 = vmul.f32 %v502_v59, %v600_v12 }
  0xe5   :  { %v318_v19 = vsel %vm285_vm10, %v268_v1, %v302_v11  ;;  %v244_v21 = vmul.f32 %v600_v12, %v188_v7  ;;  %v252_v22 = vmul.f32 %v600_v12, %v220_v8  ;;  %vm293_vm11 = vcmp.ge.f32.partialorder %v276_v13, 0.0 }
  0xe6   :  { %v457_v23 = vpack.c.bf16 %v318_v19, %v318_v19  ;;  %v310_v24 = vmul.f32 %v612_v18, %v276_v13  ;;  %vm283_vm12 = vcmp.ge.f32.partialorder %v266_v15, 0.0  ;;  %v300_v25 = vmul.f32 %v612_v18, %v266_v15 }
  0xe7   :  { %v274_v26 = vadd.f32 %v605_v14, %v251_v16  ;;  %v269_v27 = vadd.f32 %v605_v14, %v246_v17  ;;  %v277_v28 = vadd.f32 %v605_v14, %v254_v20  ;;  %v267_v12 = vadd.f32 %v605_v14, %v244_v21 }
  0xe8   :  { %399 = vst.msk [vmem:[%s729_s5 + $0x18] sm:$0xf] %vm392_vm1, %v457_v23  ;;  %v326_v29 = vsel %vm293_vm11, %v276_v13, %v310_v24  ;;  %v275_v30 = vadd.f32 %v605_v14, %v252_v22  ;;  %v316_v32 = vsel %vm283_vm12, %v266_v15, %v300_v25 }
  0xe9   :  { %v465_v31 = vpack.c.bf16 %v326_v29, %v326_v29  ;;  %vm291_vm13 = vcmp.ge.f32.partialorder %v274_v26, 0.0  ;;  %v308_v33 = vmul.f32 %v612_v18, %v274_v26  ;;  %v455_v34 = vpack.c.bf16 %v316_v32, %v316_v32 }
  0xea   :  { %vm286_vm14 = vcmp.ge.f32.partialorder %v269_v27, 0.0  ;;  %v303_v35 = vmul.f32 %v612_v18, %v269_v27  ;;  %vm294_vm15 = vcmp.ge.f32.partialorder %v277_v28, 0.0  ;;  %v311_v37 = vmul.f32 %v612_v18, %v277_v28 }
  0xeb   :  { %407 = vst.msk [vmem:[%s729_s5 + $0x38] sm:$0xf] %vm392_vm1, %v465_v31  ;;  %v324_v36 = vsel %vm291_vm13, %v274_v26, %v308_v33  ;;  %vm284_vm0 = vcmp.ge.f32.partialorder %v267_v12, 0.0  ;;  %v301_v14 = vmul.f32 %v612_v18, %v267_v12  ;;  %397 = vst.msk [vmem:[%s729_s5 + $0x10] sm:$0xf] %vm392_vm1, %v455_v34  ;;  %vm292_vm2 = vcmp.ge.f32.partialorder %v275_v30, 0.0 }
  0xec   :  { %v463_v38 = vpack.c.bf16 %v324_v36, %v324_v36  ;;  %v319_v39 = vsel %vm286_vm14, %v269_v27, %v303_v35  ;;  %v309_v40 = vmul.f32 %v612_v18, %v275_v30  ;;  %v327_v42 = vsel %vm294_vm15, %v277_v28, %v311_v37 }
  0xed   :  { %v458_v41 = vpack.c.bf16 %v319_v39, %v319_v39  ;;  %v317_v43 = vsel %vm284_vm0, %v267_v12, %v301_v14  ;;  %v466_v44 = vpack.c.bf16 %v327_v42, %v327_v42 }
  0xee   :  { %405 = vst.msk [vmem:[%s729_s5 + $0x30] sm:$0xf] %vm392_vm1, %v463_v38  ;;  %v456_v45 = vpack.c.bf16 %v317_v43, %v317_v43  ;;  %v325_v46 = vsel %vm292_vm2, %v275_v30, %v309_v40 }
  0xef   :  { %400 = vst.msk [vmem:[%s729_s5 + $0x1c] sm:$0xf] %vm392_vm1, %v458_v41  ;;  %v464_v47 = vpack.c.bf16 %v325_v46, %v325_v46  ;;  %408 = vst.msk [vmem:[%s729_s5 + $0x3c] sm:$0xf] %vm392_vm1, %v466_v44 }
  0xf0   :  { %398 = vst.msk [vmem:[%s729_s5 + $0x14] sm:$0xf] %vm392_vm1, %v456_v45 }
  0xf1   :  { %406 = vst.msk [vmem:[%s729_s5 + $0x34] sm:$0xf] %vm392_vm1, %v464_v47 }

// kernel: lanenet_forward.257
= control target key start
LH: loop header
LB: loop body
LE: loop exit
PB: predicated region body
PF: predicated region fallthrough
CT: control target
= control target key end

     0   :  { %vm110_vm0 = vcmask 523264   ;;  %vm392_vm1 = vcmask 60416   ;;  %s724_s1 = inlined_call_operand.vmem [shape: bf16[64,8], index: 1, kind: input, shape index: {}]   ;;  %s725_s0 = inlined_call_operand.vmem [shape: bf16[128,64], index: 0, kind: input, shape index: {}]   ;;  %s726_s2 = inlined_call_operand.vmem [shape: f32[1,8], index: 2, kind: input, shape index: {}]   ;;  %s727_s3 = inlined_call_operand.vmem [shape: f32[1,8], index: 3, kind: input, shape index: {}]   ;;  %s728_s4 = inlined_call_operand.<no memory space> [shape: f32[1], index: 4, kind: input, shape index: {}]   ;;  %s729_s5 = inlined_call_operand.vmem [shape: bf16[128,8], index: 5, kind: output, shape index: {}]  }
   0x1   :  { %v511_v0 = vld [vmem:[%s724_s1 + $0x18] sm:$0xff]   ;;  %v512_v1 = vld [vmem:[%s724_s1 + $0x10] sm:$0xff]   ;;  %v513_v2 = vld [vmem:[%s724_s1 + $0x8] sm:$0xff]   ;;  %v612_v18 = vstv %s728_s4 }
   0x2   :  { %479 = vmatprep.subr.bf16.mxu0 %v511_v0  ;;  %503 = vmatprep.subr.bf16.mxu1 %v511_v0  ;;  %v515_v3 = vld [vmem:[%s725_s0] sm:$0xff]   ;;  %v517_v6 = vld [vmem:[%s725_s0 + $0x8] sm:$0xff]   ;;  %v519_v8 = vld [vmem:[%s725_s0 + $0x10] sm:$0xff]  }
   0x3   :  { %480 = vmatpush3.bf16.msra.mxu0 %v511_v0  ;;  %507 = vmatpush3.bf16.msra.mxu1 %v511_v0  ;;  %v516_v4 = vld [vmem:[%s725_s0 + $0x20] sm:$0xff]   ;;  %v518_v7 = vld [vmem:[%s725_s0 + $0x28] sm:$0xff]   ;;  %v520_v9 = vld [vmem:[%s725_s0 + $0x30] sm:$0xff]  }
   0x4   :  { %481 = vmatprep.subr.bf16.mxu0 %v512_v1  ;;  %504 = vmatprep.subr.bf16.mxu1 %v512_v1  ;;  %v514_v5 = vld [vmem:[%s724_s1] sm:$0xff]   ;;  %v521_v10 = vld [vmem:[%s725_s0 + $0x18] sm:$0xff]  }
   0x5   :  { %487 = vmatprep.mubr.msk.bf16.mxu0 %vm110_vm0, %v515_v3  ;;  %495 = vmatprep.mubr.msk.bf16.mxu1 %vm110_vm0, %v516_v4  ;;  %v522_v11 = vld [vmem:[%s725_s0 + $0x38] sm:$0xff]   ;;  %v600_v12 = vld [vmem:[%s726_s2] ss:$0 sm:$0xff] }
   0x6   :  { %v605_v14 = vld [vmem:[%s727_s3] ss:$0 sm:$0xff] }
   0x7   :  { %482 = vmatpush3.bf16.msra.mxu0 %v512_v1  ;;  %508 = vmatpush3.bf16.msra.mxu1 %v512_v1 }
   0x8   :  { %483 = vmatprep.subr.bf16.mxu0 %v513_v2  ;;  %505 = vmatprep.subr.bf16.mxu1 %v513_v2 }
   0xb   :  { %484 = vmatpush3.bf16.msra.mxu0 %v513_v2  ;;  %509 = vmatpush3.bf16.msra.mxu1 %v513_v2 }
   0xc   :  { %485 = vmatprep.subr.bf16.mxu0 %v514_v5  ;;  %506 = vmatprep.subr.bf16.mxu1 %v514_v5 }
   0xf   :  { %486 = vmatpush3.bf16.msra.mxu0 %v514_v5  ;;  %510 = vmatpush3.bf16.msra.mxu1 %v514_v5 }
  0x12   :  { %488 = vmatmul.mubr.msk.bf16.vlgmr.msra.gmra.mxu0 %vm110_vm0, %v517_v6  ;;  %496 = vmatmul.mubr.msk.bf16.vlgmr.msra.gmra.mxu1 %vm110_vm0, %v518_v7 }
  0x13   :  { %491 = vmatprep.mubr.msk.bf16.mxu0 %vm110_vm0, %v519_v8  ;;  %499 = vmatprep.mubr.msk.bf16.mxu1 %vm110_vm0, %v520_v9 }
  0x1a   :  { %492 = vmatmul.mubr.msk.bf16.gmra.mxu0 %vm110_vm0, %v521_v10  ;;  %500 = vmatmul.mubr.msk.bf16.gmra.mxu1 %vm110_vm0, %v522_v11 }
  0xd2   :  { %v489_v13 = vpop.f32.mrf.mxu0  ;;  %v497_v15 = vpop.f32.mrf.mxu1 }
  0xd3   :  { %v241_v16 = vmul.f32 %v489_v13, %v600_v12  ;;  %v249_v17 = vmul.f32 %v497_v15, %v600_v12 }
  0xd4   :  { %v169_v19 = vpop.f32.mrf.mxu0  ;;  %v201_v20 = vpop.f32.mrf.mxu1 }
  0xd5   :  { %v264_v21 = vadd.f32 %v605_v14, %v241_v16  ;;  %v272_v22 = vadd.f32 %v605_v14, %v249_v17  ;;  %v239_v23 = vmul.f32 %v600_v12, %v169_v19  ;;  %v247_v24 = vmul.f32 %v600_v12, %v201_v20 }
  0xd6   :  { %v490_v25 = vpop.f32.mrf.mxu0  ;;  %v498_v26 = vpop.f32.mrf.mxu1 }
  0xd7   :  { %vm281_vm2 = vcmp.ge.f32.partialorder %v264_v21, 0.0  ;;  %v298_v27 = vmul.f32 %v612_v18, %v264_v21  ;;  %vm289_vm3 = vcmp.ge.f32.partialorder %v272_v22, 0.0  ;;  %v306_v28 = vmul.f32 %v612_v18, %v272_v22 }
  0xd8   :  { %v262_v29 = vadd.f32 %v605_v14, %v239_v23  ;;  %v270_v30 = vadd.f32 %v605_v14, %v247_v24  ;;  %v242_v31 = vmul.f32 %v490_v25, %v600_v12  ;;  %v250_v32 = vmul.f32 %v498_v26, %v600_v12  ;;  %v172_v33 = vpop.f32.mrf.mxu0  ;;  %v204_v34 = vpop.f32.mrf.mxu1 }
  0xd9   :  { %v314_v35 = vsel %vm281_vm2, %v264_v21, %v298_v27  ;;  %v322_v36 = vsel %vm289_vm3, %v272_v22, %v306_v28  ;;  %v240_v37 = vmul.f32 %v600_v12, %v172_v33  ;;  %v248_v38 = vmul.f32 %v600_v12, %v204_v34 }
  0xda   :  { %v453_v39 = vpack.c.bf16 %v314_v35, %v314_v35  ;;  %v461_v40 = vpack.c.bf16 %v322_v36, %v322_v36  ;;  %vm279_vm4 = vcmp.ge.f32.partialorder %v262_v29, 0.0  ;;  %v296_v41 = vmul.f32 %v612_v18, %v262_v29  ;;  %v493_v42 = vpop.f32.mrf.mxu0  ;;  %v501_v43 = vpop.f32.mrf.mxu1 }
  0xdb   :  { %vm287_vm5 = vcmp.ge.f32.partialorder %v270_v30, 0.0  ;;  %v304_v44 = vmul.f32 %v612_v18, %v270_v30  ;;  %v265_v45 = vadd.f32 %v605_v14, %v242_v31  ;;  %v273_v46 = vadd.f32 %v605_v14, %v250_v32 }
  0xdc   :  { %395 = vst.msk [vmem:[%s729_s5 + $0x8] sm:$0xf] %vm392_vm1, %v453_v39  ;;  %403 = vst.msk [vmem:[%s729_s5 + $0x28] sm:$0xf] %vm392_vm1, %v461_v40  ;;  %v312_v47 = vsel %vm279_vm4, %v262_v29, %v296_v41  ;;  %v263_v48 = vadd.f32 %v605_v14, %v240_v37  ;;  %v271_v49 = vadd.f32 %v605_v14, %v248_v38  ;;  %v185_v51 = vpop.f32.mrf.mxu0  ;;  %v217_v52 = vpop.f32.mrf.mxu1 }
  0xdd   :  { %v245_v50 = vmul.f32 %v493_v42, %v600_v12  ;;  %v451_v53 = vpack.c.bf16 %v312_v47, %v312_v47  ;;  %v320_v54 = vsel %vm287_vm5, %v270_v30, %v304_v44  ;;  %vm282_vm6 = vcmp.ge.f32.partialorder %v265_v45, 0.0 }
  0xde   :  { %v299_v55 = vmul.f32 %v612_v18, %v265_v45  ;;  %v459_v56 = vpack.c.bf16 %v320_v54, %v320_v54  ;;  %vm290_vm7 = vcmp.ge.f32.partialorder %v273_v46, 0.0  ;;  %v307_v57 = vmul.f32 %v612_v18, %v273_v46  ;;  %v494_v58 = vpop.f32.mrf.mxu0  ;;  %v502_v59 = vpop.f32.mrf.mxu1 }
  0xdf   :  { %vm280_vm8 = vcmp.ge.f32.partialorder %v263_v48, 0.0  ;;  %393 = vst.msk [vmem:[%s729_s5] sm:$0xf] %vm392_vm1, %v451_v53  ;;  %v297_v61 = vmul.f32 %v612_v18, %v263_v48  ;;  %vm288_vm9 = vcmp.ge.f32.partialorder %v271_v49, 0.0  ;;  %v305_v62 = vmul.f32 %v612_v18, %v271_v49 }
  0xe0   :  { %v315_v60 = vsel %vm282_vm6, %v265_v45, %v299_v55  ;;  %401 = vst.msk [vmem:[%s729_s5 + $0x20] sm:$0xf] %vm392_vm1, %v459_v56  ;;  %v323_v0 = vsel %vm290_vm7, %v273_v46, %v307_v57  ;;  %v268_v1 = vadd.f32 %v605_v14, %v245_v50  ;;  %v253_v2 = vmul.f32 %v501_v43, %v600_v12  ;;  %v188_v7 = vpop.f32.mrf.mxu0  ;;  %v220_v8 = vpop.f32.mrf.mxu1 }
  0xe1   :  { %v454_v63 = vpack.c.bf16 %v315_v60, %v315_v60  ;;  %v462_v3 = vpack.c.bf16 %v323_v0, %v323_v0  ;;  %v313_v4 = vsel %vm280_vm8, %v263_v48, %v297_v61  ;;  %v321_v5 = vsel %vm288_vm9, %v271_v49, %v305_v62 }
  0xe2   :  { %v243_v6 = vmul.f32 %v600_v12, %v185_v51  ;;  %v452_v9 = vpack.c.bf16 %v313_v4, %v313_v4  ;;  %v460_v10 = vpack.c.bf16 %v321_v5, %v321_v5  ;;  %vm285_vm10 = vcmp.ge.f32.partialorder %v268_v1, 0.0 }
  0xe3   :  { %396 = vst.msk [vmem:[%s729_s5 + $0xc] sm:$0xf] %vm392_vm1, %v454_v63  ;;  %v302_v11 = vmul.f32 %v612_v18, %v268_v1  ;;  %404 = vst.msk [vmem:[%s729_s5 + $0x2c] sm:$0xf] %vm392_vm1, %v462_v3  ;;  %v276_v13 = vadd.f32 %v605_v14, %v253_v2  ;;  %v251_v16 = vmul.f32 %v600_v12, %v217_v52 }
  0xe4   :  { %v266_v15 = vadd.f32 %v605_v14, %v243_v6  ;;  %v246_v17 = vmul.f32 %v494_v58, %v600_v12  ;;  %394 = vst.msk [vmem:[%s729_s5 + $0x4] sm:$0xf] %vm392_vm1, %v452_v9  ;;  %402 = vst.msk [vmem:[%s729_s5 + $0x24] sm:$0xf] %vm392_vm1, %v460_v10  ;;  %v254_v20 = vmul.f32 %v502_v59, %v600_v12 }
  0xe5   :  { %v318_v19 = vsel %vm285_vm10, %v268_v1, %v302_v11  ;;  %v244_v21 = vmul.f32 %v600_v12, %v188_v7  ;;  %v252_v22 = vmul.f32 %v600_v12, %v220_v8  ;;  %vm293_vm11 = vcmp.ge.f32.partialorder %v276_v13, 0.0 }
  0xe6   :  { %v457_v23 = vpack.c.bf16 %v318_v19, %v318_v19  ;;  %v310_v24 = vmul.f32 %v612_v18, %v276_v13  ;;  %vm283_vm12 = vcmp.ge.f32.partialorder %v266_v15, 0.0  ;;  %v300_v25 = vmul.f32 %v612_v18, %v266_v15 }
  0xe7   :  { %v274_v26 = vadd.f32 %v605_v14, %v251_v16  ;;  %v269_v27 = vadd.f32 %v605_v14, %v246_v17  ;;  %v277_v28 = vadd.f32 %v605_v14, %v254_v20  ;;  %v267_v12 = vadd.f32 %v605_v14, %v244_v21 }
  0xe8   :  { %399 = vst.msk [vmem:[%s729_s5 + $0x18] sm:$0xf] %vm392_vm1, %v457_v23  ;;  %v326_v29 = vsel %vm293_vm11, %v276_v13, %v310_v24  ;;  %v275_v30 = vadd.f32 %v605_v14, %v252_v22  ;;  %v316_v32 = vsel %vm283_vm12, %v266_v15, %v300_v25 }
  0xe9   :  { %v465_v31 = vpack.c.bf16 %v326_v29, %v326_v29  ;;  %vm291_vm13 = vcmp.ge.f32.partialorder %v274_v26, 0.0  ;;  %v308_v33 = vmul.f32 %v612_v18, %v274_v26  ;;  %v455_v34 = vpack.c.bf16 %v316_v32, %v316_v32 }
  0xea   :  { %vm286_vm14 = vcmp.ge.f32.partialorder %v269_v27, 0.0  ;;  %v303_v35 = vmul.f32 %v612_v18, %v269_v27  ;;  %vm294_vm15 = vcmp.ge.f32.partialorder %v277_v28, 0.0  ;;  %v311_v37 = vmul.f32 %v612_v18, %v277_v28 }
  0xeb   :  { %407 = vst.msk [vmem:[%s729_s5 + $0x38] sm:$0xf] %vm392_vm1, %v465_v31  ;;  %v324_v36 = vsel %vm291_vm13, %v274_v26, %v308_v33  ;;  %vm284_vm0 = vcmp.ge.f32.partialorder %v267_v12, 0.0  ;;  %v301_v14 = vmul.f32 %v612_v18, %v267_v12  ;;  %397 = vst.msk [vmem:[%s729_s5 + $0x10] sm:$0xf] %vm392_vm1, %v455_v34  ;;  %vm292_vm2 = vcmp.ge.f32.partialorder %v275_v30, 0.0 }
  0xec   :  { %v463_v38 = vpack.c.bf16 %v324_v36, %v324_v36  ;;  %v319_v39 = vsel %vm286_vm14, %v269_v27, %v303_v35  ;;  %v309_v40 = vmul.f32 %v612_v18, %v275_v30  ;;  %v327_v42 = vsel %vm294_vm15, %v277_v28, %v311_v37 }
  0xed   :  { %v458_v41 = vpack.c.bf16 %v319_v39, %v319_v39  ;;  %v317_v43 = vsel %vm284_vm0, %v267_v12, %v301_v14  ;;  %v466_v44 = vpack.c.bf16 %v327_v42, %v327_v42 }
  0xee   :  { %405 = vst.msk [vmem:[%s729_s5 + $0x30] sm:$0xf] %vm392_vm1, %v463_v38  ;;  %v456_v45 = vpack.c.bf16 %v317_v43, %v317_v43  ;;  %v325_v46 = vsel %vm292_vm2, %v275_v30, %v309_v40 }
  0xef   :  { %400 = vst.msk [vmem:[%s729_s5 + $0x1c] sm:$0xf] %vm392_vm1, %v458_v41  ;;  %v464_v47 = vpack.c.bf16 %v325_v46, %v325_v46  ;;  %408 = vst.msk [vmem:[%s729_s5 + $0x3c] sm:$0xf] %vm392_vm1, %v466_v44 }
  0xf0   :  { %398 = vst.msk [vmem:[%s729_s5 + $0x14] sm:$0xf] %vm392_vm1, %v456_v45 }
  0xf1   :  { %406 = vst.msk [vmem:[%s729_s5 + $0x34] sm:$0xf] %vm392_vm1, %v464_v47 }

</bundles_post_ra>
